<compile_context>
chip_gen: v5e
topology: v5e:2x2
jax: 0.10.0
libtpu: 0.0.40
codegen_flags: <defaults>
</compile_context>

<pallas_src>
import functools

import jax
import jax.numpy as jnp
from jax.experimental import pallas as pl
from jax.experimental.pallas import tpu as pltpu

# MXU-native operand dtype (bf16 on v5e/v6e/v7x); accumulation is always f32.
_COMPUTE_DTYPE = jnp.bfloat16


def _round_up(x, m):
    return (x + m - 1) // m * m


# --------------------------- fused Pallas kernel -----------------------------

def _basic_block_kernel(x_ref, w1_ref, w2_ref, bias_ref, o_ref, h_ref, *,
                        Wp, Hp, OFF, R_OUT, ROW_CHUNK, use_tanh):
    """One image per grid step.

    x_ref   : (Re, Cp) bf16  flattened, spatially+channel padded input; real
              (H+2)*(W+2) rows start at row OFF, everything else is zero.
    w*_ref  : (9, Cp, Cp) bf16 conv weights, tap-major (t = dy*3+dx), channel
              padded, BN scale already folded into the output columns.
    bias_ref: (2, Cp) f32   rows = [bias1, bias2] (folded BN biases).
    o_ref   : (R_OUT, Cp) f32 output in the flattened padded-grid layout.
    h_ref   : (Re, Cp) bf16 VMEM scratch holding the stage-1 activation, laid
              out exactly like x_ref so stage 2 reuses the same tap slices.
    """
    Cp = x_ref.shape[-1]
    Re = x_ref.shape[0]

    # Zero ONLY the halo bands of the scratch (they provide conv2's zero padding
    # and keep every tap slice in-bounds).  ~2*(Wp+1) rows instead of the full
    # Re-row tile; interior rows are fully overwritten below.
    h_ref[0:OFF, :] = jnp.zeros((OFF, Cp), h_ref.dtype)
    tail = Re - (OFF + R_OUT)
    if tail > 0:
        h_ref[OFF + R_OUT:Re, :] = jnp.zeros((tail, Cp), h_ref.dtype)

    def conv_chunk(src_ref, w_ref, r0, rows, init):
        # 9 taps: each a static, lane-dense row slice feeding one
        # (rows, Cp) @ (Cp, Cp) bf16 MXU matmul with f32 accumulation.
        acc = init
        t = 0
        for dy in range(3):
            for dx in range(3):
                off = OFF + r0 + (dy - 1) * Wp + (dx - 1)
                acc = acc + jnp.dot(src_ref[off:off + rows, :], w_ref[t],
                                    preferred_element_type=jnp.float32)
                t += 1
        return acc

    def interior_mask(r0, rows):
        # Interior-pixel predicate over flattened padded-grid rows, computed
        # in-kernel (no mask operand).  floor((r + 0.5) / Wp) avoids integer
        # div/mod on the VPU; the 0.5 margins make float rounding irrelevant.
        rf = jax.lax.broadcasted_iota(jnp.int32, (rows, 1), 0).astype(jnp.float32)
        rf = rf + (r0 + 0.5)
        qh = jnp.floor(rf * (1.0 / Wp))
        qw = rf - qh * Wp                       # = column index + 0.5
        inside = (qh > 0.5) & (qh < Hp - 1.5) & (qw > 1.0) & (qw < Wp - 1.0)
        return inside.astype(jnp.float32)       # (rows, 1), broadcast over lanes

    chunks = [(r0, min(ROW_CHUNK, R_OUT - r0)) for r0 in range(0, R_OUT, ROW_CHUNK)]

    b1 = bias_ref[0:1, :]                       # (1, Cp) f32
    b2 = bias_ref[1:2, :]

    # Stage 1: conv1 (BN1 folded) + ReLU, zeroed outside the interior so stage 2
    # sees correct zero padding.  Intermediate stays resident in VMEM (bf16).
    for r0, rows in chunks:
        acc = conv_chunk(x_ref, w1_ref, r0, rows, b1)
        h = jnp.maximum(acc, 0.0) * interior_mask(r0, rows)
        h_ref[OFF + r0:OFF + r0 + rows, :] = h.astype(h_ref.dtype)

    # Stage 2: conv2 (BN2 folded) + residual identity + final activation.
    for r0, rows in chunks:
        ident = x_ref[OFF + r0:OFF + r0 + rows, :].astype(jnp.float32)
        acc = conv_chunk(h_ref, w2_ref, r0, rows, ident + b2)
        out = jnp.tanh(acc) if use_tanh else jnp.maximum(acc, 0.0)
        o_ref[r0:r0 + rows, :] = out.astype(o_ref.dtype)


# --------------------------- wrapper ------------------------------------------

def fold_bn(gamma, beta, running_mean, running_var, eps=1e-5):
    scale = gamma / jnp.sqrt(running_var + eps)
    bias = beta - running_mean * scale
    return scale, bias


def basic_block_forward(x_nhwc, params, tanh=False):
    """BasicBlock forward (stride=1, downsample=None).  x_nhwc: (N, H, W, C) f32."""
    N, H, W, C = x_nhwc.shape
    Hp, Wp = H + 2, W + 2
    Cp = _round_up(C, 128)                     # lane-dense channel padding
    R_OUT = _round_up(Hp * Wp, 8)              # rows of the flattened padded grid
    OFF = _round_up(Wp + 1, 8)                 # leading zero rows (>= max tap offset)
    Re = _round_up(OFF + Wp + 1 + R_OUT, 8)    # extended rows: every tap slice in-bounds

    # ---- wrapper-side layout plumbing (plain XLA on small tensors) ----
    xp = jnp.pad(x_nhwc.astype(jnp.float32),
                 ((0, 0), (1, 1), (1, 1), (0, Cp - C)))            # (N, Hp, Wp, Cp)
    xe = jnp.pad(xp.reshape(N, Hp * Wp, Cp),
                 ((0, 0), (OFF, Re - OFF - Hp * Wp), (0, 0)))      # (N, Re, Cp)
    xe = xe.astype(_COMPUTE_DTYPE)                                 # bf16 MXU operand

    s1, b1 = fold_bn(params["bn1_gamma"], params["bn1_beta"],
                     params["bn1_mean"], params["bn1_var"])
    s2, b2 = fold_bn(params["bn2_gamma"], params["bn2_beta"],
                     params["bn2_mean"], params["bn2_var"])

    def prep_w(w, scale):                      # (3,3,C,C) HWIO -> (9,Cp,Cp), BN folded
        wf = w * scale[None, None, None, :]    # fold per-output-channel BN scale
        wp = jnp.zeros((3, 3, Cp, Cp), jnp.float32).at[:, :, :C, :C].set(wf)
        return wp.reshape(9, Cp, Cp).astype(_COMPUTE_DTYPE)

    w1 = prep_w(params["w1"], s1)
    w2 = prep_w(params["w2"], s2)

    bias = jnp.zeros((2, Cp), jnp.float32).at[0, :C].set(b1).at[1, :C].set(b2)

    kernel = functools.partial(_basic_block_kernel, Wp=Wp, Hp=Hp, OFF=OFF,
                               R_OUT=R_OUT, ROW_CHUNK=128, use_tanh=tanh)
    out = pl.pallas_call(
        kernel,
        out_shape=jax.ShapeDtypeStruct((N, R_OUT, Cp), jnp.float32),
        grid=(N,),
        in_specs=[
            pl.BlockSpec((None, Re, Cp), lambda n: (n, 0, 0)),     # x (per image, bf16)
            pl.BlockSpec((9, Cp, Cp), lambda n: (0, 0, 0)),        # w1 (resident, bf16)
            pl.BlockSpec((9, Cp, Cp), lambda n: (0, 0, 0)),        # w2 (resident, bf16)
            pl.BlockSpec((2, Cp), lambda n: (0, 0)),               # folded BN biases
        ],
        out_specs=pl.BlockSpec((None, R_OUT, Cp), lambda n: (n, 0, 0)),
        scratch_shapes=[pltpu.VMEM((Re, Cp), _COMPUTE_DTYPE)],     # stage-1 activation
        compiler_params=pltpu.CompilerParams(
            dimension_semantics=("parallel",)),
    )(xe, w1, w2, bias)

    # un-flatten / un-pad back to NHWC in the wrapper (free layout plumbing)
    out = out[:, :Hp * Wp, :].reshape(N, Hp, Wp, Cp)
    return out[:, 1:Hp - 1, 1:Wp - 1, :C]


# --------------------------- pure-JAX reference ------------------------------

def _ref_forward(x_nhwc, params, tanh=False):
    def conv(x, w):
        return jax.lax.conv_general_dilated(
            x, w, window_strides=(1, 1), padding=((1, 1), (1, 1)),
            dimension_numbers=("NHWC", "HWIO", "NHWC"))

    s1, b1 = fold_bn(params["bn1_gamma"], params["bn1_beta"],
                     params["bn1_mean"], params["bn1_var"])
    s2, b2 = fold_bn(params["bn2_gamma"], params["bn2_beta"],
                     params["bn2_mean"], params["bn2_var"])
    out = jnp.maximum(conv(x_nhwc, params["w1"]) * s1 + b1, 0.0)
    out = conv(out, params["w2"]) * s2 + b2 + x_nhwc
    return jnp.tanh(out) if tanh else jnp.maximum(out, 0.0)


# --------------------------- main --------------------------------------------

if __name__ == "__main__":
    # Small shapes: batch=2, inplanes=planes=4, spatial=16x16 (stride=1, no downsample).
    N, C, Hs, Ws = 2, 4, 16, 16
    key = jax.random.PRNGKey(0)
    k = jax.random.split(key, 8)

    params = {
        "w1": jax.random.normal(k[0], (3, 3, C, C), jnp.float32) * 0.1,
        "w2": jax.random.normal(k[1], (3, 3, C, C), jnp.float32) * 0.1,
        "bn1_gamma": jax.random.normal(k[2], (C,), jnp.float32) * 0.1 + 1.0,
        "bn1_beta": jax.random.normal(k[3], (C,), jnp.float32) * 0.1,
        "bn1_mean": jnp.zeros((C,), jnp.float32),
        "bn1_var": jnp.ones((C,), jnp.float32),
        "bn2_gamma": jax.random.normal(k[4], (C,), jnp.float32) * 0.1 + 1.0,
        "bn2_beta": jax.random.normal(k[5], (C,), jnp.float32) * 0.1,
        "bn2_mean": jnp.zeros((C,), jnp.float32),
        "bn2_var": jnp.ones((C,), jnp.float32),
    }

    # PyTorch input would be NCHW (2, 4, 16, 16); transpose to NHWC for the kernel.
    x_nchw = jax.random.normal(k[6], (N, C, Hs, Ws), jnp.float32)
    x_nhwc = jnp.transpose(x_nchw, (0, 2, 3, 1))

    for use_tanh in (False, True):          # exercise both final activations
        out = jax.block_until_ready(basic_block_forward(x_nhwc, params, tanh=use_tanh))
        ref = _ref_forward(x_nhwc, params, tanh=use_tanh)
        assert out.shape == (N, Hs, Ws, C)
        max_err = float(jnp.max(jnp.abs(out - ref)))
        # bf16 MXU operands: tolerance loosened vs exact-f32 parity (per review).
        assert jnp.allclose(out, ref, atol=5e-2, rtol=5e-2), (
            f"mismatch vs JAX reference (tanh={use_tanh}), max abs err={max_err}")

    print("KERNEL_OK")
</pallas_src>

<mosaic_0001>
module attributes {stable_mosaic.version = 11 : i64} {
  func.func @_basic_block_kernel(%arg0: i32, %arg1: memref<1x376x128xbf16, #tpu.memory_space<vmem>>, %arg2: memref<9x128x128xbf16, #tpu.memory_space<vmem>>, %arg3: memref<9x128x128xbf16, #tpu.memory_space<vmem>>, %arg4: memref<2x128xf32, #tpu.memory_space<vmem>>, %arg5: memref<1x328x128xf32, #tpu.memory_space<vmem>>, %arg6: memref<376x128xbf16, #tpu.memory_space<vmem>>) attributes {dimension_semantics = [#tpu.dimension_semantics<parallel>], iteration_bounds = array<i64: 2>, scalar_prefetch = 0 : i64, scratch_operands = 1 : i64, tpu.core_type = #tpu.core_type<tc>, window_params = [{transform_indices = @transform_0, window_bounds = array<i64: 1, 376, 128>}, {pipeline_mode = #tpu.pipeline_mode<synchronous>, transform_indices = @transform_1, window_bounds = array<i64: 9, 128, 128>}, {pipeline_mode = #tpu.pipeline_mode<synchronous>, transform_indices = @transform_2, window_bounds = array<i64: 9, 128, 128>}, {pipeline_mode = #tpu.pipeline_mode<synchronous>, transform_indices = @transform_3, window_bounds = array<i64: 2, 128>}, {transform_indices = @transform_4, window_bounds = array<i64: 1, 328, 128>}]} {
    %cst = arith.constant 0.000000e+00 : bf16
    %0 = vector.broadcast %cst : bf16 to vector<24x128xbf16>
    %c0 = arith.constant 0 : index
    %c0_0 = arith.constant 0 : index
    %1 = vector.load %arg6[%c0, %c0_0] : memref<376x128xbf16, #tpu.memory_space<vmem>>, vector<24x128xbf16>
    tpu.vector_store %arg6[%c0, %c0_0], %0 {strides = array<i32>} : memref<376x128xbf16, #tpu.memory_space<vmem>>, vector<24x128xbf16>,
    %cst_1 = arith.constant 0.000000e+00 : bf16
    %2 = vector.broadcast %cst_1 : bf16 to vector<24x128xbf16>
    %c352 = arith.constant 352 : index
    %c0_2 = arith.constant 0 : index
    %3 = vector.load %arg6[%c352, %c0_2] : memref<376x128xbf16, #tpu.memory_space<vmem>>, vector<24x128xbf16>
    tpu.vector_store %arg6[%c352, %c0_2], %2 {strides = array<i32>} : memref<376x128xbf16, #tpu.memory_space<vmem>>, vector<24x128xbf16>,
    %c0_3 = arith.constant 0 : index
    %c0_4 = arith.constant 0 : index
    %4 = vector.load %arg4[%c0_3, %c0_4] : memref<2x128xf32, #tpu.memory_space<vmem>>, vector<1x128xf32>
    %c1 = arith.constant 1 : index
    %c0_5 = arith.constant 0 : index
    %5 = vector.load %arg4[%c1, %c0_5] : memref<2x128xf32, #tpu.memory_space<vmem>>, vector<1x128xf32>
    %c0_6 = arith.constant 0 : index
    %c5 = arith.constant 5 : index
    %c0_7 = arith.constant 0 : index
    %6 = vector.load %arg1[%c0_6, %c5, %c0_7] : memref<1x376x128xbf16, #tpu.memory_space<vmem>>, vector<1x128x128xbf16>
    %7 = vector.shape_cast %6 : vector<1x128x128xbf16> to vector<128x128xbf16>
    %c0_8 = arith.constant 0 : index
    %c0_9 = arith.constant 0 : index
    %c0_10 = arith.constant 0 : index
    %8 = vector.load %arg2[%c0_8, %c0_9, %c0_10] : memref<9x128x128xbf16, #tpu.memory_space<vmem>>, vector<1x128x128xbf16>
    %9 = vector.shape_cast %8 : vector<1x128x128xbf16> to vector<128x128xbf16>
    %cst_11 = arith.constant dense<0.000000e+00> : vector<128x128xf32>
    %10 = tpu.matmul %7, %9, %cst_11 {dimension_numbers = #tpu.dot_dimension_numbers<[1], [0], [0], [1], [0, 0, 1, 1], [], []>} : vector<128x128xbf16>, vector<128x128xbf16>, vector<128x128xf32> -> vector<128x128xf32>
    %11 = vector.broadcast %4 : vector<1x128xf32> to vector<128x128xf32>
    %12 = arith.addf %11, %10 : vector<128x128xf32>
    %c0_12 = arith.constant 0 : index
    %c6 = arith.constant 6 : index
    %c0_13 = arith.constant 0 : index
    %13 = vector.load %arg1[%c0_12, %c6, %c0_13] : memref<1x376x128xbf16, #tpu.memory_space<vmem>>, vector<1x128x128xbf16>
    %14 = vector.shape_cast %13 : vector<1x128x128xbf16> to vector<128x128xbf16>
    %c1_14 = arith.constant 1 : index
    %c0_15 = arith.constant 0 : index
    %c0_16 = arith.constant 0 : index
    %15 = vector.load %arg2[%c1_14, %c0_15, %c0_16] : memref<9x128x128xbf16, #tpu.memory_space<vmem>>, vector<1x128x128xbf16>
    %16 = vector.shape_cast %15 : vector<1x128x128xbf16> to vector<128x128xbf16>
    %cst_17 = arith.constant dense<0.000000e+00> : vector<128x128xf32>
    %17 = tpu.matmul %14, %16, %cst_17 {dimension_numbers = #tpu.dot_dimension_numbers<[1], [0], [0], [1], [0, 0, 1, 1], [], []>} : vector<128x128xbf16>, vector<128x128xbf16>, vector<128x128xf32> -> vector<128x128xf32>
    %18 = arith.addf %12, %17 : vector<128x128xf32>
    %c0_18 = arith.constant 0 : index
    %c7 = arith.constant 7 : index
    %c0_19 = arith.constant 0 : index
    %19 = vector.load %arg1[%c0_18, %c7, %c0_19] : memref<1x376x128xbf16, #tpu.memory_space<vmem>>, vector<1x128x128xbf16>
    %20 = vector.shape_cast %19 : vector<1x128x128xbf16> to vector<128x128xbf16>
    %c2 = arith.constant 2 : index
    %c0_20 = arith.constant 0 : index
    %c0_21 = arith.constant 0 : index
    %21 = vector.load %arg2[%c2, %c0_20, %c0_21] : memref<9x128x128xbf16, #tpu.memory_space<vmem>>, vector<1x128x128xbf16>
    %22 = vector.shape_cast %21 : vector<1x128x128xbf16> to vector<128x128xbf16>
    %cst_22 = arith.constant dense<0.000000e+00> : vector<128x128xf32>
    %23 = tpu.matmul %20, %22, %cst_22 {dimension_numbers = #tpu.dot_dimension_numbers<[1], [0], [0], [1], [0, 0, 1, 1], [], []>} : vector<128x128xbf16>, vector<128x128xbf16>, vector<128x128xf32> -> vector<128x128xf32>
    %24 = arith.addf %18, %23 : vector<128x128xf32>
    %c0_23 = arith.constant 0 : index
    %c23 = arith.constant 23 : index
    %c0_24 = arith.constant 0 : index
    %25 = vector.load %arg1[%c0_23, %c23, %c0_24] : memref<1x376x128xbf16, #tpu.memory_space<vmem>>, vector<1x128x128xbf16>
    %26 = vector.shape_cast %25 : vector<1x128x128xbf16> to vector<128x128xbf16>
    %c3 = arith.constant 3 : index
    %c0_25 = arith.constant 0 : index
    %c0_26 = arith.constant 0 : index
    %27 = vector.load %arg2[%c3, %c0_25, %c0_26] : memref<9x128x128xbf16, #tpu.memory_space<vmem>>, vector<1x128x128xbf16>
    %28 = vector.shape_cast %27 : vector<1x128x128xbf16> to vector<128x128xbf16>
    %cst_27 = arith.constant dense<0.000000e+00> : vector<128x128xf32>
    %29 = tpu.matmul %26, %28, %cst_27 {dimension_numbers = #tpu.dot_dimension_numbers<[1], [0], [0], [1], [0, 0, 1, 1], [], []>} : vector<128x128xbf16>, vector<128x128xbf16>, vector<128x128xf32> -> vector<128x128xf32>
    %30 = arith.addf %24, %29 : vector<128x128xf32>
    %c0_28 = arith.constant 0 : index
    %c24 = arith.constant 24 : index
    %c0_29 = arith.constant 0 : index
    %31 = vector.load %arg1[%c0_28, %c24, %c0_29] : memref<1x376x128xbf16, #tpu.memory_space<vmem>>, vector<1x128x128xbf16>
    %32 = vector.shape_cast %31 : vector<1x128x128xbf16> to vector<128x128xbf16>
    %c4 = arith.constant 4 : index
    %c0_30 = arith.constant 0 : index
    %c0_31 = arith.constant 0 : index
    %33 = vector.load %arg2[%c4, %c0_30, %c0_31] : memref<9x128x128xbf16, #tpu.memory_space<vmem>>, vector<1x128x128xbf16>
    %34 = vector.shape_cast %33 : vector<1x128x128xbf16> to vector<128x128xbf16>
    %cst_32 = arith.constant dense<0.000000e+00> : vector<128x128xf32>
    %35 = tpu.matmul %32, %34, %cst_32 {dimension_numbers = #tpu.dot_dimension_numbers<[1], [0], [0], [1], [0, 0, 1, 1], [], []>} : vector<128x128xbf16>, vector<128x128xbf16>, vector<128x128xf32> -> vector<128x128xf32>
    %36 = arith.addf %30, %35 : vector<128x128xf32>
    %c0_33 = arith.constant 0 : index
    %c25 = arith.constant 25 : index
    %c0_34 = arith.constant 0 : index
    %37 = vector.load %arg1[%c0_33, %c25, %c0_34] : memref<1x376x128xbf16, #tpu.memory_space<vmem>>, vector<1x128x128xbf16>
    %38 = vector.shape_cast %37 : vector<1x128x128xbf16> to vector<128x128xbf16>
    %c5_35 = arith.constant 5 : index
    %c0_36 = arith.constant 0 : index
    %c0_37 = arith.constant 0 : index
    %39 = vector.load %arg2[%c5_35, %c0_36, %c0_37] : memref<9x128x128xbf16, #tpu.memory_space<vmem>>, vector<1x128x128xbf16>
    %40 = vector.shape_cast %39 : vector<1x128x128xbf16> to vector<128x128xbf16>
    %cst_38 = arith.constant dense<0.000000e+00> : vector<128x128xf32>
    %41 = tpu.matmul %38, %40, %cst_38 {dimension_numbers = #tpu.dot_dimension_numbers<[1], [0], [0], [1], [0, 0, 1, 1], [], []>} : vector<128x128xbf16>, vector<128x128xbf16>, vector<128x128xf32> -> vector<128x128xf32>
    %42 = arith.addf %36, %41 : vector<128x128xf32>
    %c0_39 = arith.constant 0 : index
    %c41 = arith.constant 41 : index
    %c0_40 = arith.constant 0 : index
    %43 = vector.load %arg1[%c0_39, %c41, %c0_40] : memref<1x376x128xbf16, #tpu.memory_space<vmem>>, vector<1x128x128xbf16>
    %44 = vector.shape_cast %43 : vector<1x128x128xbf16> to vector<128x128xbf16>
    %c6_41 = arith.constant 6 : index
    %c0_42 = arith.constant 0 : index
    %c0_43 = arith.constant 0 : index
    %45 = vector.load %arg2[%c6_41, %c0_42, %c0_43] : memref<9x128x128xbf16, #tpu.memory_space<vmem>>, vector<1x128x128xbf16>
    %46 = vector.shape_cast %45 : vector<1x128x128xbf16> to vector<128x128xbf16>
    %cst_44 = arith.constant dense<0.000000e+00> : vector<128x128xf32>
    %47 = tpu.matmul %44, %46, %cst_44 {dimension_numbers = #tpu.dot_dimension_numbers<[1], [0], [0], [1], [0, 0, 1, 1], [], []>} : vector<128x128xbf16>, vector<128x128xbf16>, vector<128x128xf32> -> vector<128x128xf32>
    %48 = arith.addf %42, %47 : vector<128x128xf32>
    %c0_45 = arith.constant 0 : index
    %c42 = arith.constant 42 : index
    %c0_46 = arith.constant 0 : index
    %49 = vector.load %arg1[%c0_45, %c42, %c0_46] : memref<1x376x128xbf16, #tpu.memory_space<vmem>>, vector<1x128x128xbf16>
    %50 = vector.shape_cast %49 : vector<1x128x128xbf16> to vector<128x128xbf16>
    %c7_47 = arith.constant 7 : index
    %c0_48 = arith.constant 0 : index
    %c0_49 = arith.constant 0 : index
    %51 = vector.load %arg2[%c7_47, %c0_48, %c0_49] : memref<9x128x128xbf16, #tpu.memory_space<vmem>>, vector<1x128x128xbf16>
    %52 = vector.shape_cast %51 : vector<1x128x128xbf16> to vector<128x128xbf16>
    %cst_50 = arith.constant dense<0.000000e+00> : vector<128x128xf32>
    %53 = tpu.matmul %50, %52, %cst_50 {dimension_numbers = #tpu.dot_dimension_numbers<[1], [0], [0], [1], [0, 0, 1, 1], [], []>} : vector<128x128xbf16>, vector<128x128xbf16>, vector<128x128xf32> -> vector<128x128xf32>
    %54 = arith.addf %48, %53 : vector<128x128xf32>
    %c0_51 = arith.constant 0 : index
    %c43 = arith.constant 43 : index
    %c0_52 = arith.constant 0 : index
    %55 = vector.load %arg1[%c0_51, %c43, %c0_52] : memref<1x376x128xbf16, #tpu.memory_space<vmem>>, vector<1x128x128xbf16>
    %56 = vector.shape_cast %55 : vector<1x128x128xbf16> to vector<128x128xbf16>
    %c8 = arith.constant 8 : index
    %c0_53 = arith.constant 0 : index
    %c0_54 = arith.constant 0 : index
    %57 = vector.load %arg2[%c8, %c0_53, %c0_54] : memref<9x128x128xbf16, #tpu.memory_space<vmem>>, vector<1x128x128xbf16>
    %58 = vector.shape_cast %57 : vector<1x128x128xbf16> to vector<128x128xbf16>
    %cst_55 = arith.constant dense<0.000000e+00> : vector<128x128xf32>
    %59 = tpu.matmul %56, %58, %cst_55 {dimension_numbers = #tpu.dot_dimension_numbers<[1], [0], [0], [1], [0, 0, 1, 1], [], []>} : vector<128x128xbf16>, vector<128x128xbf16>, vector<128x128xf32> -> vector<128x128xf32>
    %60 = arith.addf %54, %59 : vector<128x128xf32>
    %cst_56 = arith.constant 0.000000e+00 : f32
    %61 = vector.broadcast %cst_56 : f32 to vector<128x128xf32>
    %62 = arith.maximumf %60, %61 : vector<128x128xf32>
    %63 = tpu.iota {dimensions = array<i32: 0>} : vector<128x1xi32>
    %64 = arith.sitofp %63 : vector<128x1xi32> to vector<128x1xf32>
    %cst_57 = arith.constant 5.000000e-01 : f32
    %65 = vector.broadcast %cst_57 : f32 to vector<128x1xf32>
    %66 = arith.addf %64, %65 : vector<128x1xf32>
    %cst_58 = arith.constant 0.055555556 : f32
    %67 = vector.broadcast %cst_58 : f32 to vector<128x1xf32>
    %68 = arith.mulf %66, %67 : vector<128x1xf32>
    %69 = math.floor %68 : vector<128x1xf32>
    %cst_59 = arith.constant 1.800000e+01 : f32
    %70 = vector.broadcast %cst_59 : f32 to vector<128x1xf32>
    %71 = arith.mulf %69, %70 : vector<128x1xf32>
    %72 = arith.subf %66, %71 : vector<128x1xf32>
    %cst_60 = arith.constant 5.000000e-01 : f32
    %73 = vector.broadcast %cst_60 : f32 to vector<128x1xf32>
    %74 = arith.cmpf ogt, %69, %73 : vector<128x1xf32>
    %cst_61 = arith.constant 1.650000e+01 : f32
    %75 = vector.broadcast %cst_61 : f32 to vector<128x1xf32>
    %76 = arith.cmpf olt, %69, %75 : vector<128x1xf32>
    %77 = arith.andi %74, %76 : vector<128x1xi1>
    %cst_62 = arith.constant 1.000000e+00 : f32
    %78 = vector.broadcast %cst_62 : f32 to vector<128x1xf32>
    %79 = arith.cmpf ogt, %72, %78 : vector<128x1xf32>
    %80 = arith.andi %77, %79 : vector<128x1xi1>
    %cst_63 = arith.constant 1.700000e+01 : f32
    %81 = vector.broadcast %cst_63 : f32 to vector<128x1xf32>
    %82 = arith.cmpf olt, %72, %81 : vector<128x1xf32>
    %83 = arith.andi %80, %82 : vector<128x1xi1>
    %84 = arith.extui %83 : vector<128x1xi1> to vector<128x1xi32>
    %85 = arith.sitofp %84 : vector<128x1xi32> to vector<128x1xf32>
    %86 = vector.broadcast %85 : vector<128x1xf32> to vector<128x128xf32>
    %87 = arith.mulf %62, %86 : vector<128x128xf32>
    %88 = arith.truncf %87 : vector<128x128xf32> to vector<128x128xbf16>
    %c24_64 = arith.constant 24 : index
    %c0_65 = arith.constant 0 : index
    %89 = vector.load %arg6[%c24_64, %c0_65] : memref<376x128xbf16, #tpu.memory_space<vmem>>, vector<128x128xbf16>
    tpu.vector_store %arg6[%c24_64, %c0_65], %88 {strides = array<i32>} : memref<376x128xbf16, #tpu.memory_space<vmem>>, vector<128x128xbf16>,
    %c0_66 = arith.constant 0 : index
    %c133 = arith.constant 133 : index
    %c0_67 = arith.constant 0 : index
    %90 = vector.load %arg1[%c0_66, %c133, %c0_67] : memref<1x376x128xbf16, #tpu.memory_space<vmem>>, vector<1x128x128xbf16>
    %91 = vector.shape_cast %90 : vector<1x128x128xbf16> to vector<128x128xbf16>
    %c0_68 = arith.constant 0 : index
    %c0_69 = arith.constant 0 : index
    %c0_70 = arith.constant 0 : index
    %92 = vector.load %arg2[%c0_68, %c0_69, %c0_70] : memref<9x128x128xbf16, #tpu.memory_space<vmem>>, vector<1x128x128xbf16>
    %93 = vector.shape_cast %92 : vector<1x128x128xbf16> to vector<128x128xbf16>
    %cst_71 = arith.constant dense<0.000000e+00> : vector<128x128xf32>
    %94 = tpu.matmul %91, %93, %cst_71 {dimension_numbers = #tpu.dot_dimension_numbers<[1], [0], [0], [1], [0, 0, 1, 1], [], []>} : vector<128x128xbf16>, vector<128x128xbf16>, vector<128x128xf32> -> vector<128x128xf32>
    %95 = vector.broadcast %4 : vector<1x128xf32> to vector<128x128xf32>
    %96 = arith.addf %95, %94 : vector<128x128xf32>
    %c0_72 = arith.constant 0 : index
    %c134 = arith.constant 134 : index
    %c0_73 = arith.constant 0 : index
    %97 = vector.load %arg1[%c0_72, %c134, %c0_73] : memref<1x376x128xbf16, #tpu.memory_space<vmem>>, vector<1x128x128xbf16>
    %98 = vector.shape_cast %97 : vector<1x128x128xbf16> to vector<128x128xbf16>
    %c1_74 = arith.constant 1 : index
    %c0_75 = arith.constant 0 : index
    %c0_76 = arith.constant 0 : index
    %99 = vector.load %arg2[%c1_74, %c0_75, %c0_76] : memref<9x128x128xbf16, #tpu.memory_space<vmem>>, vector<1x128x128xbf16>
    %100 = vector.shape_cast %99 : vector<1x128x128xbf16> to vector<128x128xbf16>
    %cst_77 = arith.constant dense<0.000000e+00> : vector<128x128xf32>
    %101 = tpu.matmul %98, %100, %cst_77 {dimension_numbers = #tpu.dot_dimension_numbers<[1], [0], [0], [1], [0, 0, 1, 1], [], []>} : vector<128x128xbf16>, vector<128x128xbf16>, vector<128x128xf32> -> vector<128x128xf32>
    %102 = arith.addf %96, %101 : vector<128x128xf32>
    %c0_78 = arith.constant 0 : index
    %c135 = arith.constant 135 : index
    %c0_79 = arith.constant 0 : index
    %103 = vector.load %arg1[%c0_78, %c135, %c0_79] : memref<1x376x128xbf16, #tpu.memory_space<vmem>>, vector<1x128x128xbf16>
    %104 = vector.shape_cast %103 : vector<1x128x128xbf16> to vector<128x128xbf16>
    %c2_80 = arith.constant 2 : index
    %c0_81 = arith.constant 0 : index
    %c0_82 = arith.constant 0 : index
    %105 = vector.load %arg2[%c2_80, %c0_81, %c0_82] : memref<9x128x128xbf16, #tpu.memory_space<vmem>>, vector<1x128x128xbf16>
    %106 = vector.shape_cast %105 : vector<1x128x128xbf16> to vector<128x128xbf16>
    %cst_83 = arith.constant dense<0.000000e+00> : vector<128x128xf32>
    %107 = tpu.matmul %104, %106, %cst_83 {dimension_numbers = #tpu.dot_dimension_numbers<[1], [0], [0], [1], [0, 0, 1, 1], [], []>} : vector<128x128xbf16>, vector<128x128xbf16>, vector<128x128xf32> -> vector<128x128xf32>
    %108 = arith.addf %102, %107 : vector<128x128xf32>
    %c0_84 = arith.constant 0 : index
    %c151 = arith.constant 151 : index
    %c0_85 = arith.constant 0 : index
    %109 = vector.load %arg1[%c0_84, %c151, %c0_85] : memref<1x376x128xbf16, #tpu.memory_space<vmem>>, vector<1x128x128xbf16>
    %110 = vector.shape_cast %109 : vector<1x128x128xbf16> to vector<128x128xbf16>
    %c3_86 = arith.constant 3 : index
    %c0_87 = arith.constant 0 : index
    %c0_88 = arith.constant 0 : index
    %111 = vector.load %arg2[%c3_86, %c0_87, %c0_88] : memref<9x128x128xbf16, #tpu.memory_space<vmem>>, vector<1x128x128xbf16>
    %112 = vector.shape_cast %111 : vector<1x128x128xbf16> to vector<128x128xbf16>
    %cst_89 = arith.constant dense<0.000000e+00> : vector<128x128xf32>
    %113 = tpu.matmul %110, %112, %cst_89 {dimension_numbers = #tpu.dot_dimension_numbers<[1], [0], [0], [1], [0, 0, 1, 1], [], []>} : vector<128x128xbf16>, vector<128x128xbf16>, vector<128x128xf32> -> vector<128x128xf32>
    %114 = arith.addf %108, %113 : vector<128x128xf32>
    %c0_90 = arith.constant 0 : index
    %c152 = arith.constant 152 : index
    %c0_91 = arith.constant 0 : index
    %115 = vector.load %arg1[%c0_90, %c152, %c0_91] : memref<1x376x128xbf16, #tpu.memory_space<vmem>>, vector<1x128x128xbf16>
    %116 = vector.shape_cast %115 : vector<1x128x128xbf16> to vector<128x128xbf16>
    %c4_92 = arith.constant 4 : index
    %c0_93 = arith.constant 0 : index
    %c0_94 = arith.constant 0 : index
    %117 = vector.load %arg2[%c4_92, %c0_93, %c0_94] : memref<9x128x128xbf16, #tpu.memory_space<vmem>>, vector<1x128x128xbf16>
    %118 = vector.shape_cast %117 : vector<1x128x128xbf16> to vector<128x128xbf16>
    %cst_95 = arith.constant dense<0.000000e+00> : vector<128x128xf32>
    %119 = tpu.matmul %116, %118, %cst_95 {dimension_numbers = #tpu.dot_dimension_numbers<[1], [0], [0], [1], [0, 0, 1, 1], [], []>} : vector<128x128xbf16>, vector<128x128xbf16>, vector<128x128xf32> -> vector<128x128xf32>
    %120 = arith.addf %114, %119 : vector<128x128xf32>
    %c0_96 = arith.constant 0 : index
    %c153 = arith.constant 153 : index
    %c0_97 = arith.constant 0 : index
    %121 = vector.load %arg1[%c0_96, %c153, %c0_97] : memref<1x376x128xbf16, #tpu.memory_space<vmem>>, vector<1x128x128xbf16>
    %122 = vector.shape_cast %121 : vector<1x128x128xbf16> to vector<128x128xbf16>
    %c5_98 = arith.constant 5 : index
    %c0_99 = arith.constant 0 : index
    %c0_100 = arith.constant 0 : index
    %123 = vector.load %arg2[%c5_98, %c0_99, %c0_100] : memref<9x128x128xbf16, #tpu.memory_space<vmem>>, vector<1x128x128xbf16>
    %124 = vector.shape_cast %123 : vector<1x128x128xbf16> to vector<128x128xbf16>
    %cst_101 = arith.constant dense<0.000000e+00> : vector<128x128xf32>
    %125 = tpu.matmul %122, %124, %cst_101 {dimension_numbers = #tpu.dot_dimension_numbers<[1], [0], [0], [1], [0, 0, 1, 1], [], []>} : vector<128x128xbf16>, vector<128x128xbf16>, vector<128x128xf32> -> vector<128x128xf32>
    %126 = arith.addf %120, %125 : vector<128x128xf32>
    %c0_102 = arith.constant 0 : index
    %c169 = arith.constant 169 : index
    %c0_103 = arith.constant 0 : index
    %127 = vector.load %arg1[%c0_102, %c169, %c0_103] : memref<1x376x128xbf16, #tpu.memory_space<vmem>>, vector<1x128x128xbf16>
    %128 = vector.shape_cast %127 : vector<1x128x128xbf16> to vector<128x128xbf16>
    %c6_104 = arith.constant 6 : index
    %c0_105 = arith.constant 0 : index
    %c0_106 = arith.constant 0 : index
    %129 = vector.load %arg2[%c6_104, %c0_105, %c0_106] : memref<9x128x128xbf16, #tpu.memory_space<vmem>>, vector<1x128x128xbf16>
    %130 = vector.shape_cast %129 : vector<1x128x128xbf16> to vector<128x128xbf16>
    %cst_107 = arith.constant dense<0.000000e+00> : vector<128x128xf32>
    %131 = tpu.matmul %128, %130, %cst_107 {dimension_numbers = #tpu.dot_dimension_numbers<[1], [0], [0], [1], [0, 0, 1, 1], [], []>} : vector<128x128xbf16>, vector<128x128xbf16>, vector<128x128xf32> -> vector<128x128xf32>
    %132 = arith.addf %126, %131 : vector<128x128xf32>
    %c0_108 = arith.constant 0 : index
    %c170 = arith.constant 170 : index
    %c0_109 = arith.constant 0 : index
    %133 = vector.load %arg1[%c0_108, %c170, %c0_109] : memref<1x376x128xbf16, #tpu.memory_space<vmem>>, vector<1x128x128xbf16>
    %134 = vector.shape_cast %133 : vector<1x128x128xbf16> to vector<128x128xbf16>
    %c7_110 = arith.constant 7 : index
    %c0_111 = arith.constant 0 : index
    %c0_112 = arith.constant 0 : index
    %135 = vector.load %arg2[%c7_110, %c0_111, %c0_112] : memref<9x128x128xbf16, #tpu.memory_space<vmem>>, vector<1x128x128xbf16>
    %136 = vector.shape_cast %135 : vector<1x128x128xbf16> to vector<128x128xbf16>
    %cst_113 = arith.constant dense<0.000000e+00> : vector<128x128xf32>
    %137 = tpu.matmul %134, %136, %cst_113 {dimension_numbers = #tpu.dot_dimension_numbers<[1], [0], [0], [1], [0, 0, 1, 1], [], []>} : vector<128x128xbf16>, vector<128x128xbf16>, vector<128x128xf32> -> vector<128x128xf32>
    %138 = arith.addf %132, %137 : vector<128x128xf32>
    %c0_114 = arith.constant 0 : index
    %c171 = arith.constant 171 : index
    %c0_115 = arith.constant 0 : index
    %139 = vector.load %arg1[%c0_114, %c171, %c0_115] : memref<1x376x128xbf16, #tpu.memory_space<vmem>>, vector<1x128x128xbf16>
    %140 = vector.shape_cast %139 : vector<1x128x128xbf16> to vector<128x128xbf16>
    %c8_116 = arith.constant 8 : index
    %c0_117 = arith.constant 0 : index
    %c0_118 = arith.constant 0 : index
    %141 = vector.load %arg2[%c8_116, %c0_117, %c0_118] : memref<9x128x128xbf16, #tpu.memory_space<vmem>>, vector<1x128x128xbf16>
    %142 = vector.shape_cast %141 : vector<1x128x128xbf16> to vector<128x128xbf16>
    %cst_119 = arith.constant dense<0.000000e+00> : vector<128x128xf32>
    %143 = tpu.matmul %140, %142, %cst_119 {dimension_numbers = #tpu.dot_dimension_numbers<[1], [0], [0], [1], [0, 0, 1, 1], [], []>} : vector<128x128xbf16>, vector<128x128xbf16>, vector<128x128xf32> -> vector<128x128xf32>
    %144 = arith.addf %138, %143 : vector<128x128xf32>
    %cst_120 = arith.constant 0.000000e+00 : f32
    %145 = vector.broadcast %cst_120 : f32 to vector<128x128xf32>
    %146 = arith.maximumf %144, %145 : vector<128x128xf32>
    %147 = tpu.iota {dimensions = array<i32: 0>} : vector<128x1xi32>
    %148 = arith.sitofp %147 : vector<128x1xi32> to vector<128x1xf32>
    %cst_121 = arith.constant 1.285000e+02 : f32
    %149 = vector.broadcast %cst_121 : f32 to vector<128x1xf32>
    %150 = arith.addf %148, %149 : vector<128x1xf32>
    %cst_122 = arith.constant 0.055555556 : f32
    %151 = vector.broadcast %cst_122 : f32 to vector<128x1xf32>
    %152 = arith.mulf %150, %151 : vector<128x1xf32>
    %153 = math.floor %152 : vector<128x1xf32>
    %cst_123 = arith.constant 1.800000e+01 : f32
    %154 = vector.broadcast %cst_123 : f32 to vector<128x1xf32>
    %155 = arith.mulf %153, %154 : vector<128x1xf32>
    %156 = arith.subf %150, %155 : vector<128x1xf32>
    %cst_124 = arith.constant 5.000000e-01 : f32
    %157 = vector.broadcast %cst_124 : f32 to vector<128x1xf32>
    %158 = arith.cmpf ogt, %153, %157 : vector<128x1xf32>
    %cst_125 = arith.constant 1.650000e+01 : f32
    %159 = vector.broadcast %cst_125 : f32 to vector<128x1xf32>
    %160 = arith.cmpf olt, %153, %159 : vector<128x1xf32>
    %161 = arith.andi %158, %160 : vector<128x1xi1>
    %cst_126 = arith.constant 1.000000e+00 : f32
    %162 = vector.broadcast %cst_126 : f32 to vector<128x1xf32>
    %163 = arith.cmpf ogt, %156, %162 : vector<128x1xf32>
    %164 = arith.andi %161, %163 : vector<128x1xi1>
    %cst_127 = arith.constant 1.700000e+01 : f32
    %165 = vector.broadcast %cst_127 : f32 to vector<128x1xf32>
    %166 = arith.cmpf olt, %156, %165 : vector<128x1xf32>
    %167 = arith.andi %164, %166 : vector<128x1xi1>
    %168 = arith.extui %167 : vector<128x1xi1> to vector<128x1xi32>
    %169 = arith.sitofp %168 : vector<128x1xi32> to vector<128x1xf32>
    %170 = vector.broadcast %169 : vector<128x1xf32> to vector<128x128xf32>
    %171 = arith.mulf %146, %170 : vector<128x128xf32>
    %172 = arith.truncf %171 : vector<128x128xf32> to vector<128x128xbf16>
    %c152_128 = arith.constant 152 : index
    %c0_129 = arith.constant 0 : index
    %173 = vector.load %arg6[%c152_128, %c0_129] : memref<376x128xbf16, #tpu.memory_space<vmem>>, vector<128x128xbf16>
    tpu.vector_store %arg6[%c152_128, %c0_129], %172 {strides = array<i32>} : memref<376x128xbf16, #tpu.memory_space<vmem>>, vector<128x128xbf16>,
    %c0_130 = arith.constant 0 : index
    %c261 = arith.constant 261 : index
    %c0_131 = arith.constant 0 : index
    %174 = vector.load %arg1[%c0_130, %c261, %c0_131] : memref<1x376x128xbf16, #tpu.memory_space<vmem>>, vector<1x72x128xbf16>
    %175 = vector.shape_cast %174 : vector<1x72x128xbf16> to vector<72x128xbf16>
    %c0_132 = arith.constant 0 : index
    %c0_133 = arith.constant 0 : index
    %c0_134 = arith.constant 0 : index
    %176 = vector.load %arg2[%c0_132, %c0_133, %c0_134] : memref<9x128x128xbf16, #tpu.memory_space<vmem>>, vector<1x128x128xbf16>
    %177 = vector.shape_cast %176 : vector<1x128x128xbf16> to vector<128x128xbf16>
    %cst_135 = arith.constant dense<0.000000e+00> : vector<72x128xf32>
    %178 = tpu.matmul %175, %177, %cst_135 {dimension_numbers = #tpu.dot_dimension_numbers<[1], [0], [0], [1], [0, 0, 1, 1], [], []>} : vector<72x128xbf16>, vector<128x128xbf16>, vector<72x128xf32> -> vector<72x128xf32>
    %179 = vector.broadcast %4 : vector<1x128xf32> to vector<72x128xf32>
    %180 = arith.addf %179, %178 : vector<72x128xf32>
    %c0_136 = arith.constant 0 : index
    %c262 = arith.constant 262 : index
    %c0_137 = arith.constant 0 : index
    %181 = vector.load %arg1[%c0_136, %c262, %c0_137] : memref<1x376x128xbf16, #tpu.memory_space<vmem>>, vector<1x72x128xbf16>
    %182 = vector.shape_cast %181 : vector<1x72x128xbf16> to vector<72x128xbf16>
    %c1_138 = arith.constant 1 : index
    %c0_139 = arith.constant 0 : index
    %c0_140 = arith.constant 0 : index
    %183 = vector.load %arg2[%c1_138, %c0_139, %c0_140] : memref<9x128x128xbf16, #tpu.memory_space<vmem>>, vector<1x128x128xbf16>
    %184 = vector.shape_cast %183 : vector<1x128x128xbf16> to vector<128x128xbf16>
    %cst_141 = arith.constant dense<0.000000e+00> : vector<72x128xf32>
    %185 = tpu.matmul %182, %184, %cst_141 {dimension_numbers = #tpu.dot_dimension_numbers<[1], [0], [0], [1], [0, 0, 1, 1], [], []>} : vector<72x128xbf16>, vector<128x128xbf16>, vector<72x128xf32> -> vector<72x128xf32>
    %186 = arith.addf %180, %185 : vector<72x128xf32>
    %c0_142 = arith.constant 0 : index
    %c263 = arith.constant 263 : index
    %c0_143 = arith.constant 0 : index
    %187 = vector.load %arg1[%c0_142, %c263, %c0_143] : memref<1x376x128xbf16, #tpu.memory_space<vmem>>, vector<1x72x128xbf16>
    %188 = vector.shape_cast %187 : vector<1x72x128xbf16> to vector<72x128xbf16>
    %c2_144 = arith.constant 2 : index
    %c0_145 = arith.constant 0 : index
    %c0_146 = arith.constant 0 : index
    %189 = vector.load %arg2[%c2_144, %c0_145, %c0_146] : memref<9x128x128xbf16, #tpu.memory_space<vmem>>, vector<1x128x128xbf16>
    %190 = vector.shape_cast %189 : vector<1x128x128xbf16> to vector<128x128xbf16>
    %cst_147 = arith.constant dense<0.000000e+00> : vector<72x128xf32>
    %191 = tpu.matmul %188, %190, %cst_147 {dimension_numbers = #tpu.dot_dimension_numbers<[1], [0], [0], [1], [0, 0, 1, 1], [], []>} : vector<72x128xbf16>, vector<128x128xbf16>, vector<72x128xf32> -> vector<72x128xf32>
    %192 = arith.addf %186, %191 : vector<72x128xf32>
    %c0_148 = arith.constant 0 : index
    %c279 = arith.constant 279 : index
    %c0_149 = arith.constant 0 : index
    %193 = vector.load %arg1[%c0_148, %c279, %c0_149] : memref<1x376x128xbf16, #tpu.memory_space<vmem>>, vector<1x72x128xbf16>
    %194 = vector.shape_cast %193 : vector<1x72x128xbf16> to vector<72x128xbf16>
    %c3_150 = arith.constant 3 : index
    %c0_151 = arith.constant 0 : index
    %c0_152 = arith.constant 0 : index
    %195 = vector.load %arg2[%c3_150, %c0_151, %c0_152] : memref<9x128x128xbf16, #tpu.memory_space<vmem>>, vector<1x128x128xbf16>
    %196 = vector.shape_cast %195 : vector<1x128x128xbf16> to vector<128x128xbf16>
    %cst_153 = arith.constant dense<0.000000e+00> : vector<72x128xf32>
    %197 = tpu.matmul %194, %196, %cst_153 {dimension_numbers = #tpu.dot_dimension_numbers<[1], [0], [0], [1], [0, 0, 1, 1], [], []>} : vector<72x128xbf16>, vector<128x128xbf16>, vector<72x128xf32> -> vector<72x128xf32>
    %198 = arith.addf %192, %197 : vector<72x128xf32>
    %c0_154 = arith.constant 0 : index
    %c280 = arith.constant 280 : index
    %c0_155 = arith.constant 0 : index
    %199 = vector.load %arg1[%c0_154, %c280, %c0_155] : memref<1x376x128xbf16, #tpu.memory_space<vmem>>, vector<1x72x128xbf16>
    %200 = vector.shape_cast %199 : vector<1x72x128xbf16> to vector<72x128xbf16>
    %c4_156 = arith.constant 4 : index
    %c0_157 = arith.constant 0 : index
    %c0_158 = arith.constant 0 : index
    %201 = vector.load %arg2[%c4_156, %c0_157, %c0_158] : memref<9x128x128xbf16, #tpu.memory_space<vmem>>, vector<1x128x128xbf16>
    %202 = vector.shape_cast %201 : vector<1x128x128xbf16> to vector<128x128xbf16>
    %cst_159 = arith.constant dense<0.000000e+00> : vector<72x128xf32>
    %203 = tpu.matmul %200, %202, %cst_159 {dimension_numbers = #tpu.dot_dimension_numbers<[1], [0], [0], [1], [0, 0, 1, 1], [], []>} : vector<72x128xbf16>, vector<128x128xbf16>, vector<72x128xf32> -> vector<72x128xf32>
    %204 = arith.addf %198, %203 : vector<72x128xf32>
    %c0_160 = arith.constant 0 : index
    %c281 = arith.constant 281 : index
    %c0_161 = arith.constant 0 : index
    %205 = vector.load %arg1[%c0_160, %c281, %c0_161] : memref<1x376x128xbf16, #tpu.memory_space<vmem>>, vector<1x72x128xbf16>
    %206 = vector.shape_cast %205 : vector<1x72x128xbf16> to vector<72x128xbf16>
    %c5_162 = arith.constant 5 : index
    %c0_163 = arith.constant 0 : index
    %c0_164 = arith.constant 0 : index
    %207 = vector.load %arg2[%c5_162, %c0_163, %c0_164] : memref<9x128x128xbf16, #tpu.memory_space<vmem>>, vector<1x128x128xbf16>
    %208 = vector.shape_cast %207 : vector<1x128x128xbf16> to vector<128x128xbf16>
    %cst_165 = arith.constant dense<0.000000e+00> : vector<72x128xf32>
    %209 = tpu.matmul %206, %208, %cst_165 {dimension_numbers = #tpu.dot_dimension_numbers<[1], [0], [0], [1], [0, 0, 1, 1], [], []>} : vector<72x128xbf16>, vector<128x128xbf16>, vector<72x128xf32> -> vector<72x128xf32>
    %210 = arith.addf %204, %209 : vector<72x128xf32>
    %c0_166 = arith.constant 0 : index
    %c297 = arith.constant 297 : index
    %c0_167 = arith.constant 0 : index
    %211 = vector.load %arg1[%c0_166, %c297, %c0_167] : memref<1x376x128xbf16, #tpu.memory_space<vmem>>, vector<1x72x128xbf16>
    %212 = vector.shape_cast %211 : vector<1x72x128xbf16> to vector<72x128xbf16>
    %c6_168 = arith.constant 6 : index
    %c0_169 = arith.constant 0 : index
    %c0_170 = arith.constant 0 : index
    %213 = vector.load %arg2[%c6_168, %c0_169, %c0_170] : memref<9x128x128xbf16, #tpu.memory_space<vmem>>, vector<1x128x128xbf16>
    %214 = vector.shape_cast %213 : vector<1x128x128xbf16> to vector<128x128xbf16>
    %cst_171 = arith.constant dense<0.000000e+00> : vector<72x128xf32>
    %215 = tpu.matmul %212, %214, %cst_171 {dimension_numbers = #tpu.dot_dimension_numbers<[1], [0], [0], [1], [0, 0, 1, 1], [], []>} : vector<72x128xbf16>, vector<128x128xbf16>, vector<72x128xf32> -> vector<72x128xf32>
    %216 = arith.addf %210, %215 : vector<72x128xf32>
    %c0_172 = arith.constant 0 : index
    %c298 = arith.constant 298 : index
    %c0_173 = arith.constant 0 : index
    %217 = vector.load %arg1[%c0_172, %c298, %c0_173] : memref<1x376x128xbf16, #tpu.memory_space<vmem>>, vector<1x72x128xbf16>
    %218 = vector.shape_cast %217 : vector<1x72x128xbf16> to vector<72x128xbf16>
    %c7_174 = arith.constant 7 : index
    %c0_175 = arith.constant 0 : index
    %c0_176 = arith.constant 0 : index
    %219 = vector.load %arg2[%c7_174, %c0_175, %c0_176] : memref<9x128x128xbf16, #tpu.memory_space<vmem>>, vector<1x128x128xbf16>
    %220 = vector.shape_cast %219 : vector<1x128x128xbf16> to vector<128x128xbf16>
    %cst_177 = arith.constant dense<0.000000e+00> : vector<72x128xf32>
    %221 = tpu.matmul %218, %220, %cst_177 {dimension_numbers = #tpu.dot_dimension_numbers<[1], [0], [0], [1], [0, 0, 1, 1], [], []>} : vector<72x128xbf16>, vector<128x128xbf16>, vector<72x128xf32> -> vector<72x128xf32>
    %222 = arith.addf %216, %221 : vector<72x128xf32>
    %c0_178 = arith.constant 0 : index
    %c299 = arith.constant 299 : index
    %c0_179 = arith.constant 0 : index
    %223 = vector.load %arg1[%c0_178, %c299, %c0_179] : memref<1x376x128xbf16, #tpu.memory_space<vmem>>, vector<1x72x128xbf16>
    %224 = vector.shape_cast %223 : vector<1x72x128xbf16> to vector<72x128xbf16>
    %c8_180 = arith.constant 8 : index
    %c0_181 = arith.constant 0 : index
    %c0_182 = arith.constant 0 : index
    %225 = vector.load %arg2[%c8_180, %c0_181, %c0_182] : memref<9x128x128xbf16, #tpu.memory_space<vmem>>, vector<1x128x128xbf16>
    %226 = vector.shape_cast %225 : vector<1x128x128xbf16> to vector<128x128xbf16>
    %cst_183 = arith.constant dense<0.000000e+00> : vector<72x128xf32>
    %227 = tpu.matmul %224, %226, %cst_183 {dimension_numbers = #tpu.dot_dimension_numbers<[1], [0], [0], [1], [0, 0, 1, 1], [], []>} : vector<72x128xbf16>, vector<128x128xbf16>, vector<72x128xf32> -> vector<72x128xf32>
    %228 = arith.addf %222, %227 : vector<72x128xf32>
    %cst_184 = arith.constant 0.000000e+00 : f32
    %229 = vector.broadcast %cst_184 : f32 to vector<72x128xf32>
    %230 = arith.maximumf %228, %229 : vector<72x128xf32>
    %231 = tpu.iota {dimensions = array<i32: 0>} : vector<72x1xi32>
    %232 = arith.sitofp %231 : vector<72x1xi32> to vector<72x1xf32>
    %cst_185 = arith.constant 2.565000e+02 : f32
    %233 = vector.broadcast %cst_185 : f32 to vector<72x1xf32>
    %234 = arith.addf %232, %233 : vector<72x1xf32>
    %cst_186 = arith.constant 0.055555556 : f32
    %235 = vector.broadcast %cst_186 : f32 to vector<72x1xf32>
    %236 = arith.mulf %234, %235 : vector<72x1xf32>
    %237 = math.floor %236 : vector<72x1xf32>
    %cst_187 = arith.constant 1.800000e+01 : f32
    %238 = vector.broadcast %cst_187 : f32 to vector<72x1xf32>
    %239 = arith.mulf %237, %238 : vector<72x1xf32>
    %240 = arith.subf %234, %239 : vector<72x1xf32>
    %cst_188 = arith.constant 5.000000e-01 : f32
    %241 = vector.broadcast %cst_188 : f32 to vector<72x1xf32>
    %242 = arith.cmpf ogt, %237, %241 : vector<72x1xf32>
    %cst_189 = arith.constant 1.650000e+01 : f32
    %243 = vector.broadcast %cst_189 : f32 to vector<72x1xf32>
    %244 = arith.cmpf olt, %237, %243 : vector<72x1xf32>
    %245 = arith.andi %242, %244 : vector<72x1xi1>
    %cst_190 = arith.constant 1.000000e+00 : f32
    %246 = vector.broadcast %cst_190 : f32 to vector<72x1xf32>
    %247 = arith.cmpf ogt, %240, %246 : vector<72x1xf32>
    %248 = arith.andi %245, %247 : vector<72x1xi1>
    %cst_191 = arith.constant 1.700000e+01 : f32
    %249 = vector.broadcast %cst_191 : f32 to vector<72x1xf32>
    %250 = arith.cmpf olt, %240, %249 : vector<72x1xf32>
    %251 = arith.andi %248, %250 : vector<72x1xi1>
    %252 = arith.extui %251 : vector<72x1xi1> to vector<72x1xi32>
    %253 = arith.sitofp %252 : vector<72x1xi32> to vector<72x1xf32>
    %254 = vector.broadcast %253 : vector<72x1xf32> to vector<72x128xf32>
    %255 = arith.mulf %230, %254 : vector<72x128xf32>
    %256 = arith.truncf %255 : vector<72x128xf32> to vector<72x128xbf16>
    %c280_192 = arith.constant 280 : index
    %c0_193 = arith.constant 0 : index
    %257 = vector.load %arg6[%c280_192, %c0_193] : memref<376x128xbf16, #tpu.memory_space<vmem>>, vector<72x128xbf16>
    tpu.vector_store %arg6[%c280_192, %c0_193], %256 {strides = array<i32>} : memref<376x128xbf16, #tpu.memory_space<vmem>>, vector<72x128xbf16>,
    %c0_194 = arith.constant 0 : index
    %c24_195 = arith.constant 24 : index
    %c0_196 = arith.constant 0 : index
    %258 = vector.load %arg1[%c0_194, %c24_195, %c0_196] : memref<1x376x128xbf16, #tpu.memory_space<vmem>>, vector<1x128x128xbf16>
    %259 = vector.shape_cast %258 : vector<1x128x128xbf16> to vector<128x128xbf16>
    %260 = arith.extf %259 : vector<128x128xbf16> to vector<128x128xf32>
    %261 = vector.broadcast %5 : vector<1x128xf32> to vector<128x128xf32>
    %262 = arith.addf %260, %261 : vector<128x128xf32>
    %c5_197 = arith.constant 5 : index
    %c0_198 = arith.constant 0 : index
    %263 = vector.load %arg6[%c5_197, %c0_198] : memref<376x128xbf16, #tpu.memory_space<vmem>>, vector<128x128xbf16>
    %c0_199 = arith.constant 0 : index
    %c0_200 = arith.constant 0 : index
    %c0_201 = arith.constant 0 : index
    %264 = vector.load %arg3[%c0_199, %c0_200, %c0_201] : memref<9x128x128xbf16, #tpu.memory_space<vmem>>, vector<1x128x128xbf16>
    %265 = vector.shape_cast %264 : vector<1x128x128xbf16> to vector<128x128xbf16>
    %cst_202 = arith.constant dense<0.000000e+00> : vector<128x128xf32>
    %266 = tpu.matmul %263, %265, %cst_202 {dimension_numbers = #tpu.dot_dimension_numbers<[1], [0], [0], [1], [0, 0, 1, 1], [], []>} : vector<128x128xbf16>, vector<128x128xbf16>, vector<128x128xf32> -> vector<128x128xf32>
    %267 = arith.addf %262, %266 : vector<128x128xf32>
    %c6_203 = arith.constant 6 : index
    %c0_204 = arith.constant 0 : index
    %268 = vector.load %arg6[%c6_203, %c0_204] : memref<376x128xbf16, #tpu.memory_space<vmem>>, vector<128x128xbf16>
    %c1_205 = arith.constant 1 : index
    %c0_206 = arith.constant 0 : index
    %c0_207 = arith.constant 0 : index
    %269 = vector.load %arg3[%c1_205, %c0_206, %c0_207] : memref<9x128x128xbf16, #tpu.memory_space<vmem>>, vector<1x128x128xbf16>
    %270 = vector.shape_cast %269 : vector<1x128x128xbf16> to vector<128x128xbf16>
    %cst_208 = arith.constant dense<0.000000e+00> : vector<128x128xf32>
    %271 = tpu.matmul %268, %270, %cst_208 {dimension_numbers = #tpu.dot_dimension_numbers<[1], [0], [0], [1], [0, 0, 1, 1], [], []>} : vector<128x128xbf16>, vector<128x128xbf16>, vector<128x128xf32> -> vector<128x128xf32>
    %272 = arith.addf %267, %271 : vector<128x128xf32>
    %c7_209 = arith.constant 7 : index
    %c0_210 = arith.constant 0 : index
    %273 = vector.load %arg6[%c7_209, %c0_210] : memref<376x128xbf16, #tpu.memory_space<vmem>>, vector<128x128xbf16>
    %c2_211 = arith.constant 2 : index
    %c0_212 = arith.constant 0 : index
    %c0_213 = arith.constant 0 : index
    %274 = vector.load %arg3[%c2_211, %c0_212, %c0_213] : memref<9x128x128xbf16, #tpu.memory_space<vmem>>, vector<1x128x128xbf16>
    %275 = vector.shape_cast %274 : vector<1x128x128xbf16> to vector<128x128xbf16>
    %cst_214 = arith.constant dense<0.000000e+00> : vector<128x128xf32>
    %276 = tpu.matmul %273, %275, %cst_214 {dimension_numbers = #tpu.dot_dimension_numbers<[1], [0], [0], [1], [0, 0, 1, 1], [], []>} : vector<128x128xbf16>, vector<128x128xbf16>, vector<128x128xf32> -> vector<128x128xf32>
    %277 = arith.addf %272, %276 : vector<128x128xf32>
    %c23_215 = arith.constant 23 : index
    %c0_216 = arith.constant 0 : index
    %278 = vector.load %arg6[%c23_215, %c0_216] : memref<376x128xbf16, #tpu.memory_space<vmem>>, vector<128x128xbf16>
    %c3_217 = arith.constant 3 : index
    %c0_218 = arith.constant 0 : index
    %c0_219 = arith.constant 0 : index
    %279 = vector.load %arg3[%c3_217, %c0_218, %c0_219] : memref<9x128x128xbf16, #tpu.memory_space<vmem>>, vector<1x128x128xbf16>
    %280 = vector.shape_cast %279 : vector<1x128x128xbf16> to vector<128x128xbf16>
    %cst_220 = arith.constant dense<0.000000e+00> : vector<128x128xf32>
    %281 = tpu.matmul %278, %280, %cst_220 {dimension_numbers = #tpu.dot_dimension_numbers<[1], [0], [0], [1], [0, 0, 1, 1], [], []>} : vector<128x128xbf16>, vector<128x128xbf16>, vector<128x128xf32> -> vector<128x128xf32>
    %282 = arith.addf %277, %281 : vector<128x128xf32>
    %c24_221 = arith.constant 24 : index
    %c0_222 = arith.constant 0 : index
    %283 = vector.load %arg6[%c24_221, %c0_222] : memref<376x128xbf16, #tpu.memory_space<vmem>>, vector<128x128xbf16>
    %c4_223 = arith.constant 4 : index
    %c0_224 = arith.constant 0 : index
    %c0_225 = arith.constant 0 : index
    %284 = vector.load %arg3[%c4_223, %c0_224, %c0_225] : memref<9x128x128xbf16, #tpu.memory_space<vmem>>, vector<1x128x128xbf16>
    %285 = vector.shape_cast %284 : vector<1x128x128xbf16> to vector<128x128xbf16>
    %cst_226 = arith.constant dense<0.000000e+00> : vector<128x128xf32>
    %286 = tpu.matmul %283, %285, %cst_226 {dimension_numbers = #tpu.dot_dimension_numbers<[1], [0], [0], [1], [0, 0, 1, 1], [], []>} : vector<128x128xbf16>, vector<128x128xbf16>, vector<128x128xf32> -> vector<128x128xf32>
    %287 = arith.addf %282, %286 : vector<128x128xf32>
    %c25_227 = arith.constant 25 : index
    %c0_228 = arith.constant 0 : index
    %288 = vector.load %arg6[%c25_227, %c0_228] : memref<376x128xbf16, #tpu.memory_space<vmem>>, vector<128x128xbf16>
    %c5_229 = arith.constant 5 : index
    %c0_230 = arith.constant 0 : index
    %c0_231 = arith.constant 0 : index
    %289 = vector.load %arg3[%c5_229, %c0_230, %c0_231] : memref<9x128x128xbf16, #tpu.memory_space<vmem>>, vector<1x128x128xbf16>
    %290 = vector.shape_cast %289 : vector<1x128x128xbf16> to vector<128x128xbf16>
    %cst_232 = arith.constant dense<0.000000e+00> : vector<128x128xf32>
    %291 = tpu.matmul %288, %290, %cst_232 {dimension_numbers = #tpu.dot_dimension_numbers<[1], [0], [0], [1], [0, 0, 1, 1], [], []>} : vector<128x128xbf16>, vector<128x128xbf16>, vector<128x128xf32> -> vector<128x128xf32>
    %292 = arith.addf %287, %291 : vector<128x128xf32>
    %c41_233 = arith.constant 41 : index
    %c0_234 = arith.constant 0 : index
    %293 = vector.load %arg6[%c41_233, %c0_234] : memref<376x128xbf16, #tpu.memory_space<vmem>>, vector<128x128xbf16>
    %c6_235 = arith.constant 6 : index
    %c0_236 = arith.constant 0 : index
    %c0_237 = arith.constant 0 : index
    %294 = vector.load %arg3[%c6_235, %c0_236, %c0_237] : memref<9x128x128xbf16, #tpu.memory_space<vmem>>, vector<1x128x128xbf16>
    %295 = vector.shape_cast %294 : vector<1x128x128xbf16> to vector<128x128xbf16>
    %cst_238 = arith.constant dense<0.000000e+00> : vector<128x128xf32>
    %296 = tpu.matmul %293, %295, %cst_238 {dimension_numbers = #tpu.dot_dimension_numbers<[1], [0], [0], [1], [0, 0, 1, 1], [], []>} : vector<128x128xbf16>, vector<128x128xbf16>, vector<128x128xf32> -> vector<128x128xf32>
    %297 = arith.addf %292, %296 : vector<128x128xf32>
    %c42_239 = arith.constant 42 : index
    %c0_240 = arith.constant 0 : index
    %298 = vector.load %arg6[%c42_239, %c0_240] : memref<376x128xbf16, #tpu.memory_space<vmem>>, vector<128x128xbf16>
    %c7_241 = arith.constant 7 : index
    %c0_242 = arith.constant 0 : index
    %c0_243 = arith.constant 0 : index
    %299 = vector.load %arg3[%c7_241, %c0_242, %c0_243] : memref<9x128x128xbf16, #tpu.memory_space<vmem>>, vector<1x128x128xbf16>
    %300 = vector.shape_cast %299 : vector<1x128x128xbf16> to vector<128x128xbf16>
    %cst_244 = arith.constant dense<0.000000e+00> : vector<128x128xf32>
    %301 = tpu.matmul %298, %300, %cst_244 {dimension_numbers = #tpu.dot_dimension_numbers<[1], [0], [0], [1], [0, 0, 1, 1], [], []>} : vector<128x128xbf16>, vector<128x128xbf16>, vector<128x128xf32> -> vector<128x128xf32>
    %302 = arith.addf %297, %301 : vector<128x128xf32>
    %c43_245 = arith.constant 43 : index
    %c0_246 = arith.constant 0 : index
    %303 = vector.load %arg6[%c43_245, %c0_246] : memref<376x128xbf16, #tpu.memory_space<vmem>>, vector<128x128xbf16>
    %c8_247 = arith.constant 8 : index
    %c0_248 = arith.constant 0 : index
    %c0_249 = arith.constant 0 : index
    %304 = vector.load %arg3[%c8_247, %c0_248, %c0_249] : memref<9x128x128xbf16, #tpu.memory_space<vmem>>, vector<1x128x128xbf16>
    %305 = vector.shape_cast %304 : vector<1x128x128xbf16> to vector<128x128xbf16>
    %cst_250 = arith.constant dense<0.000000e+00> : vector<128x128xf32>
    %306 = tpu.matmul %303, %305, %cst_250 {dimension_numbers = #tpu.dot_dimension_numbers<[1], [0], [0], [1], [0, 0, 1, 1], [], []>} : vector<128x128xbf16>, vector<128x128xbf16>, vector<128x128xf32> -> vector<128x128xf32>
    %307 = arith.addf %302, %306 : vector<128x128xf32>
    %cst_251 = arith.constant 0.000000e+00 : f32
    %308 = vector.broadcast %cst_251 : f32 to vector<128x128xf32>
    %309 = arith.maximumf %307, %308 : vector<128x128xf32>
    %c0_252 = arith.constant 0 : index
    %c0_253 = arith.constant 0 : index
    %c0_254 = arith.constant 0 : index
    %310 = vector.load %arg5[%c0_252, %c0_253, %c0_254] : memref<1x328x128xf32, #tpu.memory_space<vmem>>, vector<1x128x128xf32>
    %311 = vector.shape_cast %310 : vector<1x128x128xf32> to vector<128x128xf32>
    %312 = vector.shape_cast %309 : vector<128x128xf32> to vector<1x128x128xf32>
    tpu.vector_store %arg5[%c0_252, %c0_253, %c0_254], %312 {strides = array<i32>} : memref<1x328x128xf32, #tpu.memory_space<vmem>>, vector<1x128x128xf32>,
    %c0_255 = arith.constant 0 : index
    %c152_256 = arith.constant 152 : index
    %c0_257 = arith.constant 0 : index
    %313 = vector.load %arg1[%c0_255, %c152_256, %c0_257] : memref<1x376x128xbf16, #tpu.memory_space<vmem>>, vector<1x128x128xbf16>
    %314 = vector.shape_cast %313 : vector<1x128x128xbf16> to vector<128x128xbf16>
    %315 = arith.extf %314 : vector<128x128xbf16> to vector<128x128xf32>
    %316 = vector.broadcast %5 : vector<1x128xf32> to vector<128x128xf32>
    %317 = arith.addf %315, %316 : vector<128x128xf32>
    %c133_258 = arith.constant 133 : index
    %c0_259 = arith.constant 0 : index
    %318 = vector.load %arg6[%c133_258, %c0_259] : memref<376x128xbf16, #tpu.memory_space<vmem>>, vector<128x128xbf16>
    %c0_260 = arith.constant 0 : index
    %c0_261 = arith.constant 0 : index
    %c0_262 = arith.constant 0 : index
    %319 = vector.load %arg3[%c0_260, %c0_261, %c0_262] : memref<9x128x128xbf16, #tpu.memory_space<vmem>>, vector<1x128x128xbf16>
    %320 = vector.shape_cast %319 : vector<1x128x128xbf16> to vector<128x128xbf16>
    %cst_263 = arith.constant dense<0.000000e+00> : vector<128x128xf32>
    %321 = tpu.matmul %318, %320, %cst_263 {dimension_numbers = #tpu.dot_dimension_numbers<[1], [0], [0], [1], [0, 0, 1, 1], [], []>} : vector<128x128xbf16>, vector<128x128xbf16>, vector<128x128xf32> -> vector<128x128xf32>
    %322 = arith.addf %317, %321 : vector<128x128xf32>
    %c134_264 = arith.constant 134 : index
    %c0_265 = arith.constant 0 : index
    %323 = vector.load %arg6[%c134_264, %c0_265] : memref<376x128xbf16, #tpu.memory_space<vmem>>, vector<128x128xbf16>
    %c1_266 = arith.constant 1 : index
    %c0_267 = arith.constant 0 : index
    %c0_268 = arith.constant 0 : index
    %324 = vector.load %arg3[%c1_266, %c0_267, %c0_268] : memref<9x128x128xbf16, #tpu.memory_space<vmem>>, vector<1x128x128xbf16>
    %325 = vector.shape_cast %324 : vector<1x128x128xbf16> to vector<128x128xbf16>
    %cst_269 = arith.constant dense<0.000000e+00> : vector<128x128xf32>
    %326 = tpu.matmul %323, %325, %cst_269 {dimension_numbers = #tpu.dot_dimension_numbers<[1], [0], [0], [1], [0, 0, 1, 1], [], []>} : vector<128x128xbf16>, vector<128x128xbf16>, vector<128x128xf32> -> vector<128x128xf32>
    %327 = arith.addf %322, %326 : vector<128x128xf32>
    %c135_270 = arith.constant 135 : index
    %c0_271 = arith.constant 0 : index
    %328 = vector.load %arg6[%c135_270, %c0_271] : memref<376x128xbf16, #tpu.memory_space<vmem>>, vector<128x128xbf16>
    %c2_272 = arith.constant 2 : index
    %c0_273 = arith.constant 0 : index
    %c0_274 = arith.constant 0 : index
    %329 = vector.load %arg3[%c2_272, %c0_273, %c0_274] : memref<9x128x128xbf16, #tpu.memory_space<vmem>>, vector<1x128x128xbf16>
    %330 = vector.shape_cast %329 : vector<1x128x128xbf16> to vector<128x128xbf16>
    %cst_275 = arith.constant dense<0.000000e+00> : vector<128x128xf32>
    %331 = tpu.matmul %328, %330, %cst_275 {dimension_numbers = #tpu.dot_dimension_numbers<[1], [0], [0], [1], [0, 0, 1, 1], [], []>} : vector<128x128xbf16>, vector<128x128xbf16>, vector<128x128xf32> -> vector<128x128xf32>
    %332 = arith.addf %327, %331 : vector<128x128xf32>
    %c151_276 = arith.constant 151 : index
    %c0_277 = arith.constant 0 : index
    %333 = vector.load %arg6[%c151_276, %c0_277] : memref<376x128xbf16, #tpu.memory_space<vmem>>, vector<128x128xbf16>
    %c3_278 = arith.constant 3 : index
    %c0_279 = arith.constant 0 : index
    %c0_280 = arith.constant 0 : index
    %334 = vector.load %arg3[%c3_278, %c0_279, %c0_280] : memref<9x128x128xbf16, #tpu.memory_space<vmem>>, vector<1x128x128xbf16>
    %335 = vector.shape_cast %334 : vector<1x128x128xbf16> to vector<128x128xbf16>
    %cst_281 = arith.constant dense<0.000000e+00> : vector<128x128xf32>
    %336 = tpu.matmul %333, %335, %cst_281 {dimension_numbers = #tpu.dot_dimension_numbers<[1], [0], [0], [1], [0, 0, 1, 1], [], []>} : vector<128x128xbf16>, vector<128x128xbf16>, vector<128x128xf32> -> vector<128x128xf32>
    %337 = arith.addf %332, %336 : vector<128x128xf32>
    %c152_282 = arith.constant 152 : index
    %c0_283 = arith.constant 0 : index
    %338 = vector.load %arg6[%c152_282, %c0_283] : memref<376x128xbf16, #tpu.memory_space<vmem>>, vector<128x128xbf16>
    %c4_284 = arith.constant 4 : index
    %c0_285 = arith.constant 0 : index
    %c0_286 = arith.constant 0 : index
    %339 = vector.load %arg3[%c4_284, %c0_285, %c0_286] : memref<9x128x128xbf16, #tpu.memory_space<vmem>>, vector<1x128x128xbf16>
    %340 = vector.shape_cast %339 : vector<1x128x128xbf16> to vector<128x128xbf16>
    %cst_287 = arith.constant dense<0.000000e+00> : vector<128x128xf32>
    %341 = tpu.matmul %338, %340, %cst_287 {dimension_numbers = #tpu.dot_dimension_numbers<[1], [0], [0], [1], [0, 0, 1, 1], [], []>} : vector<128x128xbf16>, vector<128x128xbf16>, vector<128x128xf32> -> vector<128x128xf32>
    %342 = arith.addf %337, %341 : vector<128x128xf32>
    %c153_288 = arith.constant 153 : index
    %c0_289 = arith.constant 0 : index
    %343 = vector.load %arg6[%c153_288, %c0_289] : memref<376x128xbf16, #tpu.memory_space<vmem>>, vector<128x128xbf16>
    %c5_290 = arith.constant 5 : index
    %c0_291 = arith.constant 0 : index
    %c0_292 = arith.constant 0 : index
    %344 = vector.load %arg3[%c5_290, %c0_291, %c0_292] : memref<9x128x128xbf16, #tpu.memory_space<vmem>>, vector<1x128x128xbf16>
    %345 = vector.shape_cast %344 : vector<1x128x128xbf16> to vector<128x128xbf16>
    %cst_293 = arith.constant dense<0.000000e+00> : vector<128x128xf32>
    %346 = tpu.matmul %343, %345, %cst_293 {dimension_numbers = #tpu.dot_dimension_numbers<[1], [0], [0], [1], [0, 0, 1, 1], [], []>} : vector<128x128xbf16>, vector<128x128xbf16>, vector<128x128xf32> -> vector<128x128xf32>
    %347 = arith.addf %342, %346 : vector<128x128xf32>
    %c169_294 = arith.constant 169 : index
    %c0_295 = arith.constant 0 : index
    %348 = vector.load %arg6[%c169_294, %c0_295] : memref<376x128xbf16, #tpu.memory_space<vmem>>, vector<128x128xbf16>
    %c6_296 = arith.constant 6 : index
    %c0_297 = arith.constant 0 : index
    %c0_298 = arith.constant 0 : index
    %349 = vector.load %arg3[%c6_296, %c0_297, %c0_298] : memref<9x128x128xbf16, #tpu.memory_space<vmem>>, vector<1x128x128xbf16>
    %350 = vector.shape_cast %349 : vector<1x128x128xbf16> to vector<128x128xbf16>
    %cst_299 = arith.constant dense<0.000000e+00> : vector<128x128xf32>
    %351 = tpu.matmul %348, %350, %cst_299 {dimension_numbers = #tpu.dot_dimension_numbers<[1], [0], [0], [1], [0, 0, 1, 1], [], []>} : vector<128x128xbf16>, vector<128x128xbf16>, vector<128x128xf32> -> vector<128x128xf32>
    %352 = arith.addf %347, %351 : vector<128x128xf32>
    %c170_300 = arith.constant 170 : index
    %c0_301 = arith.constant 0 : index
    %353 = vector.load %arg6[%c170_300, %c0_301] : memref<376x128xbf16, #tpu.memory_space<vmem>>, vector<128x128xbf16>
    %c7_302 = arith.constant 7 : index
    %c0_303 = arith.constant 0 : index
    %c0_304 = arith.constant 0 : index
    %354 = vector.load %arg3[%c7_302, %c0_303, %c0_304] : memref<9x128x128xbf16, #tpu.memory_space<vmem>>, vector<1x128x128xbf16>
    %355 = vector.shape_cast %354 : vector<1x128x128xbf16> to vector<128x128xbf16>
    %cst_305 = arith.constant dense<0.000000e+00> : vector<128x128xf32>
    %356 = tpu.matmul %353, %355, %cst_305 {dimension_numbers = #tpu.dot_dimension_numbers<[1], [0], [0], [1], [0, 0, 1, 1], [], []>} : vector<128x128xbf16>, vector<128x128xbf16>, vector<128x128xf32> -> vector<128x128xf32>
    %357 = arith.addf %352, %356 : vector<128x128xf32>
    %c171_306 = arith.constant 171 : index
    %c0_307 = arith.constant 0 : index
    %358 = vector.load %arg6[%c171_306, %c0_307] : memref<376x128xbf16, #tpu.memory_space<vmem>>, vector<128x128xbf16>
    %c8_308 = arith.constant 8 : index
    %c0_309 = arith.constant 0 : index
    %c0_310 = arith.constant 0 : index
    %359 = vector.load %arg3[%c8_308, %c0_309, %c0_310] : memref<9x128x128xbf16, #tpu.memory_space<vmem>>, vector<1x128x128xbf16>
    %360 = vector.shape_cast %359 : vector<1x128x128xbf16> to vector<128x128xbf16>
    %cst_311 = arith.constant dense<0.000000e+00> : vector<128x128xf32>
    %361 = tpu.matmul %358, %360, %cst_311 {dimension_numbers = #tpu.dot_dimension_numbers<[1], [0], [0], [1], [0, 0, 1, 1], [], []>} : vector<128x128xbf16>, vector<128x128xbf16>, vector<128x128xf32> -> vector<128x128xf32>
    %362 = arith.addf %357, %361 : vector<128x128xf32>
    %cst_312 = arith.constant 0.000000e+00 : f32
    %363 = vector.broadcast %cst_312 : f32 to vector<128x128xf32>
    %364 = arith.maximumf %362, %363 : vector<128x128xf32>
    %c0_313 = arith.constant 0 : index
    %c128 = arith.constant 128 : index
    %c0_314 = arith.constant 0 : index
    %365 = vector.load %arg5[%c0_313, %c128, %c0_314] : memref<1x328x128xf32, #tpu.memory_space<vmem>>, vector<1x128x128xf32>
    %366 = vector.shape_cast %365 : vector<1x128x128xf32> to vector<128x128xf32>
    %367 = vector.shape_cast %364 : vector<128x128xf32> to vector<1x128x128xf32>
    tpu.vector_store %arg5[%c0_313, %c128, %c0_314], %367 {strides = array<i32>} : memref<1x328x128xf32, #tpu.memory_space<vmem>>, vector<1x128x128xf32>,
    %c0_315 = arith.constant 0 : index
    %c280_316 = arith.constant 280 : index
    %c0_317 = arith.constant 0 : index
    %368 = vector.load %arg1[%c0_315, %c280_316, %c0_317] : memref<1x376x128xbf16, #tpu.memory_space<vmem>>, vector<1x72x128xbf16>
    %369 = vector.shape_cast %368 : vector<1x72x128xbf16> to vector<72x128xbf16>
    %370 = arith.extf %369 : vector<72x128xbf16> to vector<72x128xf32>
    %371 = vector.broadcast %5 : vector<1x128xf32> to vector<72x128xf32>
    %372 = arith.addf %370, %371 : vector<72x128xf32>
    %c261_318 = arith.constant 261 : index
    %c0_319 = arith.constant 0 : index
    %373 = vector.load %arg6[%c261_318, %c0_319] : memref<376x128xbf16, #tpu.memory_space<vmem>>, vector<72x128xbf16>
    %c0_320 = arith.constant 0 : index
    %c0_321 = arith.constant 0 : index
    %c0_322 = arith.constant 0 : index
    %374 = vector.load %arg3[%c0_320, %c0_321, %c0_322] : memref<9x128x128xbf16, #tpu.memory_space<vmem>>, vector<1x128x128xbf16>
    %375 = vector.shape_cast %374 : vector<1x128x128xbf16> to vector<128x128xbf16>
    %cst_323 = arith.constant dense<0.000000e+00> : vector<72x128xf32>
    %376 = tpu.matmul %373, %375, %cst_323 {dimension_numbers = #tpu.dot_dimension_numbers<[1], [0], [0], [1], [0, 0, 1, 1], [], []>} : vector<72x128xbf16>, vector<128x128xbf16>, vector<72x128xf32> -> vector<72x128xf32>
    %377 = arith.addf %372, %376 : vector<72x128xf32>
    %c262_324 = arith.constant 262 : index
    %c0_325 = arith.constant 0 : index
    %378 = vector.load %arg6[%c262_324, %c0_325] : memref<376x128xbf16, #tpu.memory_space<vmem>>, vector<72x128xbf16>
    %c1_326 = arith.constant 1 : index
    %c0_327 = arith.constant 0 : index
    %c0_328 = arith.constant 0 : index
    %379 = vector.load %arg3[%c1_326, %c0_327, %c0_328] : memref<9x128x128xbf16, #tpu.memory_space<vmem>>, vector<1x128x128xbf16>
    %380 = vector.shape_cast %379 : vector<1x128x128xbf16> to vector<128x128xbf16>
    %cst_329 = arith.constant dense<0.000000e+00> : vector<72x128xf32>
    %381 = tpu.matmul %378, %380, %cst_329 {dimension_numbers = #tpu.dot_dimension_numbers<[1], [0], [0], [1], [0, 0, 1, 1], [], []>} : vector<72x128xbf16>, vector<128x128xbf16>, vector<72x128xf32> -> vector<72x128xf32>
    %382 = arith.addf %377, %381 : vector<72x128xf32>
    %c263_330 = arith.constant 263 : index
    %c0_331 = arith.constant 0 : index
    %383 = vector.load %arg6[%c263_330, %c0_331] : memref<376x128xbf16, #tpu.memory_space<vmem>>, vector<72x128xbf16>
    %c2_332 = arith.constant 2 : index
    %c0_333 = arith.constant 0 : index
    %c0_334 = arith.constant 0 : index
    %384 = vector.load %arg3[%c2_332, %c0_333, %c0_334] : memref<9x128x128xbf16, #tpu.memory_space<vmem>>, vector<1x128x128xbf16>
    %385 = vector.shape_cast %384 : vector<1x128x128xbf16> to vector<128x128xbf16>
    %cst_335 = arith.constant dense<0.000000e+00> : vector<72x128xf32>
    %386 = tpu.matmul %383, %385, %cst_335 {dimension_numbers = #tpu.dot_dimension_numbers<[1], [0], [0], [1], [0, 0, 1, 1], [], []>} : vector<72x128xbf16>, vector<128x128xbf16>, vector<72x128xf32> -> vector<72x128xf32>
    %387 = arith.addf %382, %386 : vector<72x128xf32>
    %c279_336 = arith.constant 279 : index
    %c0_337 = arith.constant 0 : index
    %388 = vector.load %arg6[%c279_336, %c0_337] : memref<376x128xbf16, #tpu.memory_space<vmem>>, vector<72x128xbf16>
    %c3_338 = arith.constant 3 : index
    %c0_339 = arith.constant 0 : index
    %c0_340 = arith.constant 0 : index
    %389 = vector.load %arg3[%c3_338, %c0_339, %c0_340] : memref<9x128x128xbf16, #tpu.memory_space<vmem>>, vector<1x128x128xbf16>
    %390 = vector.shape_cast %389 : vector<1x128x128xbf16> to vector<128x128xbf16>
    %cst_341 = arith.constant dense<0.000000e+00> : vector<72x128xf32>
    %391 = tpu.matmul %388, %390, %cst_341 {dimension_numbers = #tpu.dot_dimension_numbers<[1], [0], [0], [1], [0, 0, 1, 1], [], []>} : vector<72x128xbf16>, vector<128x128xbf16>, vector<72x128xf32> -> vector<72x128xf32>
    %392 = arith.addf %387, %391 : vector<72x128xf32>
    %c280_342 = arith.constant 280 : index
    %c0_343 = arith.constant 0 : index
    %393 = vector.load %arg6[%c280_342, %c0_343] : memref<376x128xbf16, #tpu.memory_space<vmem>>, vector<72x128xbf16>
    %c4_344 = arith.constant 4 : index
    %c0_345 = arith.constant 0 : index
    %c0_346 = arith.constant 0 : index
    %394 = vector.load %arg3[%c4_344, %c0_345, %c0_346] : memref<9x128x128xbf16, #tpu.memory_space<vmem>>, vector<1x128x128xbf16>
    %395 = vector.shape_cast %394 : vector<1x128x128xbf16> to vector<128x128xbf16>
    %cst_347 = arith.constant dense<0.000000e+00> : vector<72x128xf32>
    %396 = tpu.matmul %393, %395, %cst_347 {dimension_numbers = #tpu.dot_dimension_numbers<[1], [0], [0], [1], [0, 0, 1, 1], [], []>} : vector<72x128xbf16>, vector<128x128xbf16>, vector<72x128xf32> -> vector<72x128xf32>
    %397 = arith.addf %392, %396 : vector<72x128xf32>
    %c281_348 = arith.constant 281 : index
    %c0_349 = arith.constant 0 : index
    %398 = vector.load %arg6[%c281_348, %c0_349] : memref<376x128xbf16, #tpu.memory_space<vmem>>, vector<72x128xbf16>
    %c5_350 = arith.constant 5 : index
    %c0_351 = arith.constant 0 : index
    %c0_352 = arith.constant 0 : index
    %399 = vector.load %arg3[%c5_350, %c0_351, %c0_352] : memref<9x128x128xbf16, #tpu.memory_space<vmem>>, vector<1x128x128xbf16>
    %400 = vector.shape_cast %399 : vector<1x128x128xbf16> to vector<128x128xbf16>
    %cst_353 = arith.constant dense<0.000000e+00> : vector<72x128xf32>
    %401 = tpu.matmul %398, %400, %cst_353 {dimension_numbers = #tpu.dot_dimension_numbers<[1], [0], [0], [1], [0, 0, 1, 1], [], []>} : vector<72x128xbf16>, vector<128x128xbf16>, vector<72x128xf32> -> vector<72x128xf32>
    %402 = arith.addf %397, %401 : vector<72x128xf32>
    %c297_354 = arith.constant 297 : index
    %c0_355 = arith.constant 0 : index
    %403 = vector.load %arg6[%c297_354, %c0_355] : memref<376x128xbf16, #tpu.memory_space<vmem>>, vector<72x128xbf16>
    %c6_356 = arith.constant 6 : index
    %c0_357 = arith.constant 0 : index
    %c0_358 = arith.constant 0 : index
    %404 = vector.load %arg3[%c6_356, %c0_357, %c0_358] : memref<9x128x128xbf16, #tpu.memory_space<vmem>>, vector<1x128x128xbf16>
    %405 = vector.shape_cast %404 : vector<1x128x128xbf16> to vector<128x128xbf16>
    %cst_359 = arith.constant dense<0.000000e+00> : vector<72x128xf32>
    %406 = tpu.matmul %403, %405, %cst_359 {dimension_numbers = #tpu.dot_dimension_numbers<[1], [0], [0], [1], [0, 0, 1, 1], [], []>} : vector<72x128xbf16>, vector<128x128xbf16>, vector<72x128xf32> -> vector<72x128xf32>
    %407 = arith.addf %402, %406 : vector<72x128xf32>
    %c298_360 = arith.constant 298 : index
    %c0_361 = arith.constant 0 : index
    %408 = vector.load %arg6[%c298_360, %c0_361] : memref<376x128xbf16, #tpu.memory_space<vmem>>, vector<72x128xbf16>
    %c7_362 = arith.constant 7 : index
    %c0_363 = arith.constant 0 : index
    %c0_364 = arith.constant 0 : index
    %409 = vector.load %arg3[%c7_362, %c0_363, %c0_364] : memref<9x128x128xbf16, #tpu.memory_space<vmem>>, vector<1x128x128xbf16>
    %410 = vector.shape_cast %409 : vector<1x128x128xbf16> to vector<128x128xbf16>
    %cst_365 = arith.constant dense<0.000000e+00> : vector<72x128xf32>
    %411 = tpu.matmul %408, %410, %cst_365 {dimension_numbers = #tpu.dot_dimension_numbers<[1], [0], [0], [1], [0, 0, 1, 1], [], []>} : vector<72x128xbf16>, vector<128x128xbf16>, vector<72x128xf32> -> vector<72x128xf32>
    %412 = arith.addf %407, %411 : vector<72x128xf32>
    %c299_366 = arith.constant 299 : index
    %c0_367 = arith.constant 0 : index
    %413 = vector.load %arg6[%c299_366, %c0_367] : memref<376x128xbf16, #tpu.memory_space<vmem>>, vector<72x128xbf16>
    %c8_368 = arith.constant 8 : index
    %c0_369 = arith.constant 0 : index
    %c0_370 = arith.constant 0 : index
    %414 = vector.load %arg3[%c8_368, %c0_369, %c0_370] : memref<9x128x128xbf16, #tpu.memory_space<vmem>>, vector<1x128x128xbf16>
    %415 = vector.shape_cast %414 : vector<1x128x128xbf16> to vector<128x128xbf16>
    %cst_371 = arith.constant dense<0.000000e+00> : vector<72x128xf32>
    %416 = tpu.matmul %413, %415, %cst_371 {dimension_numbers = #tpu.dot_dimension_numbers<[1], [0], [0], [1], [0, 0, 1, 1], [], []>} : vector<72x128xbf16>, vector<128x128xbf16>, vector<72x128xf32> -> vector<72x128xf32>
    %417 = arith.addf %412, %416 : vector<72x128xf32>
    %cst_372 = arith.constant 0.000000e+00 : f32
    %418 = vector.broadcast %cst_372 : f32 to vector<72x128xf32>
    %419 = arith.maximumf %417, %418 : vector<72x128xf32>
    %c0_373 = arith.constant 0 : index
    %c256 = arith.constant 256 : index
    %c0_374 = arith.constant 0 : index
    %420 = vector.load %arg5[%c0_373, %c256, %c0_374] : memref<1x328x128xf32, #tpu.memory_space<vmem>>, vector<1x72x128xf32>
    %421 = vector.shape_cast %420 : vector<1x72x128xf32> to vector<72x128xf32>
    %422 = vector.shape_cast %419 : vector<72x128xf32> to vector<1x72x128xf32>
    tpu.vector_store %arg5[%c0_373, %c256, %c0_374], %422 {strides = array<i32>} : memref<1x328x128xf32, #tpu.memory_space<vmem>>, vector<1x72x128xf32>,
    return
  }
  func.func @transform_0(%arg0: i32) -> (i32, i32, i32) {
    %c0_i32 = arith.constant 0 : i32
    %c0_i32_0 = arith.constant 0 : i32
    %c0_i32_1 = arith.constant 0 : i32
    return %arg0, %c0_i32, %c0_i32_0 : i32, i32, i32
  }
  func.func @transform_1(%arg0: i32) -> (i32, i32, i32) {
    %c0_i32 = arith.constant 0 : i32
    %c0_i32_0 = arith.constant 0 : i32
    %c0_i32_1 = arith.constant 0 : i32
    %c0_i32_2 = arith.constant 0 : i32
    return %c0_i32, %c0_i32_0, %c0_i32_1 : i32, i32, i32
  }
  func.func @transform_2(%arg0: i32) -> (i32, i32, i32) {
    %c0_i32 = arith.constant 0 : i32
    %c0_i32_0 = arith.constant 0 : i32
    %c0_i32_1 = arith.constant 0 : i32
    %c0_i32_2 = arith.constant 0 : i32
    return %c0_i32, %c0_i32_0, %c0_i32_1 : i32, i32, i32
  }
  func.func @transform_3(%arg0: i32) -> (i32, i32) {
    %c0_i32 = arith.constant 0 : i32
    %c0_i32_0 = arith.constant 0 : i32
    %c0_i32_1 = arith.constant 0 : i32
    return %c0_i32, %c0_i32_0 : i32, i32
  }
  func.func @transform_4(%arg0: i32) -> (i32, i32, i32) {
    %c0_i32 = arith.constant 0 : i32
    %c0_i32_0 = arith.constant 0 : i32
    %c0_i32_1 = arith.constant 0 : i32
    return %arg0, %c0_i32, %c0_i32_0 : i32, i32, i32
  }
}

</mosaic_0001>

<bundles_post_ra>
// kernel: tpu_custom_call.1
= control target key start
LH: loop header
LB: loop body
LE: loop exit
PB: predicated region body
PF: predicated region fallthrough
CT: control target
= control target key end

     0   :  { %9 = vsyncpa [#allocation4], 0  ;;  %s21306_s0 = inlined_call_operand.hbm [shape: bf16[2,376,128], index: 0, kind: input, shape index: {}]   ;;  %s21307_s1 = inlined_call_operand.hbm [shape: bf16[9,128,128], index: 1, kind: input, shape index: {}]   ;;  %s21308_s2 = inlined_call_operand.hbm [shape: bf16[9,128,128], index: 2, kind: input, shape index: {}]   ;;  %s21309_s3 = inlined_call_operand.vmem [shape: f32[2,128], index: 3, kind: input, shape index: {}]   ;;  %s21310_s4 = inlined_call_operand.hbm [shape: f32[2,328,128], index: 4, kind: output, shape index: {}]  }
   0x1   :  { %11 = vsyncpa [#allocation4 + $0x1], 0 }
   0x2   :  { %12 = vsyncpa [#allocation7], 0 }
   0x3   :  { %13 = vsyncpa [#allocation5], 0 }
   0x4   :  { %15 = vsyncpa [#allocation5 + $0x1], 0  ;;  %s15520_s15 = smov 0   ;;  %s15522_s16 = smov 0  }
   0x5   :  { %s15524_s17 = smov 0   ;;  %s15526_s18 = smov 0  }
   0x6 LB: > { %s15541_s19 = sadd.s32 4294967295, %s15485_s18   ;;  %s11840_s20 = sadd.s32 4294967294, %s15485_s18   ;;  %s15485_s18 = sphi %s15526_s18, %s21904_s18   ;;  %s15481_s17 = sphi %s15524_s17, %s21903_s17   ;;  %s15477_s16 = sphi %s15522_s16, %s21902_s16   ;;  %s15473_s15 = sphi %s15520_s15, %s21901_s15  }
   0x7   : > { %p41_p0 = scmp.ne.s32.totalorder %s15477_s16, %s15473_s15  ;;  %p42_p1 = scmp.eq.s32.totalorder %s15541_s19, 0 }
   0x8   : > { %p128_p2 = scmp.eq.s32.totalorder %s15541_s19, 1  ;;  %p134_p3 = scmp.eq.s32.totalorder %s11840_s20, 1 }
   0x9   : > { %p15550_p4 = por %p42_p1, %p41_p0  ;;  %p11841_p5 = scmp.ge.s32.totalorder %s15485_s18, 1 }
   0xa   : > { %p15555_p6 = por %p134_p3, %p41_p0  ;;  %p141_p7 = scmp.lt.s32.totalorder %s15485_s18, 3 }
   0xb   : > { %s152_s25 = sshll.u32 %s21307_s1, 4  ;;  %s15487_s27 = smov [#allocation6]   ;;  %s153_s25 = int_to_ptr.hbm [resolvable:$true] %s152_s25 }
   0xc   : > { %p15563_p8 = pnand %p11841_p5, %p141_p7  ;;  %s154_s28 = sshll.u32 %s15487_s27, 4  ;;  %s155_s28 = int_to_ptr.vmem [resolvable:$true] %s154_s28 }
   0xd   : > { %s166_s5 = sshll.u32 %s21308_s2, 4  ;;  %s21311_s6 = smov 64   ;;  %s167_s5 = int_to_ptr.hbm [resolvable:$true] %s166_s5 }
   0xe   : > { %p15216_p9 = pneg %p15563_p8  ;;  %s21312_s7 = smov 4  }
   0xf   : > { %s15490_s8 = smov [#allocation8]   ;;  %s15582_s10 = sadd.s32 1, %s15485_s18  }
  0x10   : > { %p15217_p10 = pnand %p15216_p9, %p42_p1  ;;  %s168_s9 = sshll.u32 %s15490_s8, 4  ;;  %s169_s9 = int_to_ptr.vmem [resolvable:$true] %s168_s9 }
  0x11   : > { %s28_s11 = sadd.s32 1, %s15481_s17  ;;  %s25_s12 = ssub.s32 %s15485_s18, %s15582_s10 }
  0x12   : > { %15219 = dma.hbm_to_vmem [thread:$0]  (!%p15217_p10), %s153_s25, 9216, %s155_s28, [#allocation7], %s21311_s6, %s21311_s6, %s21312_s7  }
  0x13   : > { %15222 = dma.hbm_to_vmem [thread:$0]  (!%p15217_p10), %s167_s5, 9216, %s169_s9, [#allocation7], %s21311_s6, %s21311_s6, %s21312_s7  }
  0x14   : > { %p35_p12 = scmp.ne.s32.totalorder %s15481_s17, %s15477_s16  ;;  %p26_p13 = scmp.eq.s32.totalorder %s25_s12, 0 }
  0x15   : > { %p36_p0 = scmp.eq.s32.totalorder %s15485_s18, 0  ;;  %p15233_p5 = scmp.lt.s32.totalorder %s15485_s18, 2 }
  0x16   : > { %p15592_p3 = por %p128_p2, %p35_p12  ;;  %s185_s20 = sand.u32 1, %s15481_s17  }
  0x17   : > { %s15598_s14 = scalar_select %p26_p13, %s15481_s17, %s28_s11  }
  0x18   : > { %p37_p7 = por %p36_p0, %p35_p12  ;;  %s15199_s23 = smul.u32 188, %s185_s20 }
  0x19   : > { %s15200_s24 = smul.u32 188, %s15485_s18  ;;  %s186_s9 = scalar_lea.sflag [#allocation4], %s185_s20 }
  0x1a   : > { %p15602_p9 = pnand %p15233_p5, %p37_p7  ;;  %s189_s30 = scalar_lea.vmem [#allocation3], %s15199_s23 }
  0x1b   : > { %s194_s29 = scalar_lea.hbm %s21306_s0, %s15200_s24  ;;  %s197_s5 = sshll.u32 %s189_s30, 4  ;;  %s198_s5 = int_to_ptr.vmem [resolvable:$true] %s197_s5 }
  0x1c   : > { %s195_s8 = sshll.u32 %s194_s29, 4  ;;  %p15382_p10 = pneg %p15602_p9  ;;  %s196_s8 = int_to_ptr.hbm [resolvable:$true] %s195_s8 }
  0x1d   : > { %s15378_s11 = sshra.s32 %s196_s8, 4  ;;  %s15385_s27 = scalar_lea.hbm %s21306_s0, 376  ;;  %s15379_s11 = int_to_ptr.hbm [resolvable:$true] %s15378_s11 }
  0x1e   : > { %s15380_s12 = scalar_lea.hbm %s15379_s11, 188  ;;  %p15386_p0 = scmp.lt.s32.totalorder %s15379_s11, %s21306_s0 }
  0x1f   : > { %p15381_p2 = scmp.ne.s32.totalorder %s15379_s11, %s15380_s12  ;;  %p15387_p5 = scmp.lt.s32.totalorder %s15385_s27, %s15380_s12 }
  0x21   : > { %p15383_p12 = pnand %p15382_p10, %p15381_p2  ;;  %p15388_p7 = por %p15387_p5, %p15386_p0 }
  0x23   : > { %p15384_p13 = pneg %p15383_p12 }
  0x25   : > { %p15389_p11 = pnand %p15388_p7, %p15384_p13 }
  0x27   : > { %15392 = shalt.err (!%p15389_p11)
}
  0x28   : > { %s21457_s20 = smov 4   ;;  %s21458_s23 = smov 64  }
  0x29   : > { %15226 = dma.hbm_to_vmem [thread:$0]  (!%p15602_p9), %s196_s8, 3008, %s198_s5, %s186_s9, %s21458_s23, %s21458_s23, %s21457_s20  }
  0x2a   : > { %209 = sbr.rel (%p15563_p8) target bundleno = 1729 (0x6c1), region = 36 }
  0x2f   : > { %s15625_s6 = sand.u32 1, %s15477_s16  }
  0x30   : > { %s15201_s7 = smul.u32 188, %s15625_s6  ;;  %s212_s29 = scalar_lea.sflag [#allocation4], %s15625_s6 }
  0x32   : > { %s15629_s30 = scalar_lea.vmem [#allocation3], %s15201_s7 }
  0x33   : > { %15453 = dma.done.wait (%p15550_p4), %s212_s29, 3008  }
  0x34   : > { %15455 = vsyncadd (%p15550_p4), %s212_s29, 4294964288 }
  0x35   : > { %15457 = dma.done.wait (%p42_p1), [#allocation7], 18432  }
  0x36   : > { %15459 = vsyncadd (%p42_p1), [#allocation7], 4294948864  ;;  %v14075_v0 = vld [vmem:[#allocation6 + $0x38] sm:$0xff]  ;;  %v14074_v3 = vld [vmem:[#allocation6 + $0x30] sm:$0xff]  ;;  %vm336_vm0 = vsmask.f32 5376 }
  0x37   : > { %v14083_v1 = vld [vmem:[#allocation6 + $0x78] sm:$0xff]  ;;  %473 = vmatpush.bf16.msra.mxu0 %v14075_v0  ;;  %15191 = vmatpush.bf16.msra.mxu2 %v14075_v0  ;;  %v14082_v4 = vld [vmem:[#allocation6 + $0x70] sm:$0xff]  ;;  %v14073_v6 = vld [vmem:[#allocation6 + $0x28] sm:$0xff]  ;;  %vm560_vm1 = vcmask 1044480   ;;  %vm720_vm2 = vsmask.f32 4352 }
  0x38   : > { %v14099_v2 = vld [vmem:[#allocation6 + $0xf8] sm:$0xff]  ;;  %634 = vmatpush.bf16.msra.mxu1 %v14083_v1  ;;  %v14098_v5 = vld [vmem:[#allocation6 + $0xf0] sm:$0xff]  ;;  %v14081_v7 = vld [vmem:[#allocation6 + $0x68] sm:$0xff]  ;;  %vm1388_vm3 = vsmask.f32 7424  ;;  %vm1865_vm4 = vcmask 1046528  }
  0x39   : > { %1100 = vmatpush.bf16.msra.mxu3 %v14099_v2  ;;  %v14097_v8 = vld [vmem:[#allocation6 + $0xe8] sm:$0xff]  ;;  %v14072_v11 = vld [vmem:[#allocation6 + $0x20] sm:$0xff]  ;;  %v15646_v18 = vld [vmem:[%s15629_s30 + $0x30] sm:$0xff]  ;;  %vm2025_vm5 = vsmask.f32 6400  ;;  %s15202_s24 = smul.u32 328, %s15625_s6 }
  0x3a   : > { %v260_v9 = vld [vmem:[%s15629_s30] sm:$0xc]  ;;  %v261_v10 = vld [vmem:[%s15629_s30 + $0x4] sm:$0xf]  ;;  %v15642_v16 = vld [vmem:[%s15629_s30 + $0x8] sm:$0xff]  ;;  %v391_v31 = vshrl.u32 %v15646_v18, 16 }
  0x3b   : > { %474 = vmatpush.bf16.msra.mxu0 %v14074_v3  ;;  %15192 = vmatpush.bf16.msra.mxu2 %v14074_v3  ;;  %v310_v12 = vunpack.c.l.b16 %v260_v9  ;;  %v311_v13 = vunpack.c.l.b16 %v261_v10  ;;  %v14080_v14 = vld [vmem:[#allocation6 + $0x60] sm:$0xff]  ;;  %v887_v17 = vld [vmem:[%s15629_s30 + $0x8] sm:$0x8]  ;;  %v15652_v20 = vld [vmem:[%s15629_s30 + $0xc] sm:$0xf]  ;;  %v346_v26 = vshrl.u32 %v15642_v16, 16 }
  0x3c   : > { %635 = vmatpush.bf16.msra.mxu1 %v14082_v4  ;;  %v14096_v15 = vld [vmem:[#allocation6 + $0xe0] sm:$0xff]  ;;  %v14071_v21 = vld [vmem:[#allocation6 + $0x18] sm:$0xff]  ;;  %v938_v27 = vunpack.c.l.b16 %v887_v17  ;;  %v349_v28 = vshll.u32 %v15642_v16, 16  ;;  %v939_v30 = vunpack.c.l.b16 %v15652_v20  ;;  %v394_v32 = vshll.u32 %v15646_v18, 16  ;;  %v14070_v35 = vld [vmem:[#allocation6 + $0x10] sm:$0xff]  ;;  %s20233_s20 = scalar_lea.vmem [#allocation9], %s15202_s24 }
  0x3d   : > { %1101 = vmatpush.bf16.msra.mxu3 %v14098_v5  ;;  %v15649_v19 = vld [vmem:[%s15629_s30 + $0x38] sm:$0xff]  ;;  %v327_v22 = vpack.c.b16 %v311_v13, %v310_v12  ;;  %v539_v23 = vld [vmem:[%s15629_s30] sm:$0x8]  ;;  %v15658_v29 = vld [vmem:[%s15629_s30 + $0x10] sm:$0xff]   ;;  %v348_v44 = vrot.slane %v346_v26, 2  ;;  %v393_v49 = vrot.slane %v391_v31, 2 }
  0x3e   : > { %v14079_v24 = vld [vmem:[#allocation6 + $0x58] sm:$0xff]  ;;  %v400_v33 = vshrl.u32 %v15649_v19, 16  ;;  %v558_v34 = vunpack.c.l.b16 %v539_v23  ;;  %v403_v38 = vshll.u32 %v15649_v19, 16  ;;  %v955_v39 = vpack.c.b16 %v939_v30, %v938_v27  ;;  %v14078_v40 = vld [vmem:[#allocation6 + $0x50] sm:$0xff]  ;;  %v14069_v47 = vld [vmem:[#allocation6 + $0x8] sm:$0xff]  ;;  %s11745_s8 = sshll.u32 %s20233_s20, 4  ;;  %s11746_s8 = int_to_ptr.vmem [resolvable:$true] %s11745_s8 }
  0x3f   : > { %475 = vmatpush.bf16.msra.mxu0 %v14073_v6  ;;  %15193 = vmatpush.bf16.msra.mxu2 %v14073_v6  ;;  %v14095_v25 = vld [vmem:[#allocation6 + $0xd8] sm:$0xff]  ;;  %v338_v36 = vshrl.u32 %v327_v22, 16  ;;  %v341_v37 = vshll.u32 %v327_v22, 16  ;;  %v14094_v41 = vld [vmem:[#allocation6 + $0xd0] sm:$0xff]  ;;  %v973_v42 = vshrl.u32 %v15658_v29, 16  ;;  %v976_v43 = vshll.u32 %v15658_v29, 16 }
  0x40   : > { %636 = vmatpush.bf16.msra.mxu1 %v14081_v7  ;;  %v965_v45 = vshrl.u32 %v955_v39, 16  ;;  %v968_v46 = vshll.u32 %v955_v39, 16  ;;  %v351_v48 = vrot.slane %v349_v28, 3  ;;  %v396_v50 = vrot.slane %v394_v32, 3  ;;  %v14077_v52 = vld [vmem:[#allocation6 + $0x48] sm:$0xff]  ;;  %v14068_v0 = vld [vmem:[#allocation6] sm:$0xff] }
  0x41   : > { %1102 = vmatpush.bf16.msra.mxu3 %v14097_v8  ;;  %v15677_v51 = vpack.c.b16 %v311_v13, %v558_v34  ;;  %v14093_v53 = vld [vmem:[#allocation6 + $0xc8] sm:$0xff]  ;;  %v340_v54 = vrot.slane %v338_v36, 2  ;;  %v343_v55 = vrot.slane %v341_v37, 3  ;;  %v402_v56 = vrot.slane %v400_v33, 2  ;;  %v14076_v5 = vld [vmem:[#allocation6 + $0x40] sm:$0xff]  ;;  %v14123_v12 = vld [vmem:[#allocation6 + $0x178] sm:$0xff] }
  0x42   : > { %v405_v57 = vrot.slane %v403_v38, 3  ;;  %v967_v58 = vrot.slane %v965_v45, 3  ;;  %v970_v59 = vrot.slane %v968_v46, 4  ;;  %v975_v60 = vrot.slane %v973_v42, 3  ;;  %v276_v62 = vld [vmem:[%s15629_s30 + $0x40] sm:$0x7] }
  0x43   : > { %476 = vmatpush.bf16.msra.mxu0 %v14072_v11  ;;  %15194 = vmatpush.bf16.msra.mxu2 %v14072_v11  ;;  %v978_v61 = vrot.slane %v976_v43, 4  ;;  %v15684_v63 = vor.u32 %v351_v48, %v348_v44  ;;  %v344_v1 = vor.u32 %v343_v55, %v340_v54  ;;  %v15686_v2 = vor.u32 %v396_v50, %v393_v49  ;;  %v14092_v6 = vld [vmem:[#allocation6 + $0xc0] sm:$0xff]  ;;  %v14107_v11 = vld [vmem:[#allocation6 + $0x138] sm:$0xff]  ;;  %v14122_v34 = vld [vmem:[#allocation6 + $0x170] sm:$0xff]  ;;  %s15428_s24 = scalar_lea.hbm %s21310_s4, 656 }
  0x44   : > { %637 = vmatpush.bf16.msra.mxu1 %v14080_v14  ;;  %v15688_v3 = vor.u32 %v405_v57, %v402_v56  ;;  %v326_v4 = vunpack.c.l.b16 %v276_v62  ;;  %v561_v7 = vrot.slane %v15677_v51, 3  ;;  %v562_v8 = vrot.slane %v15642_v16, 3  ;;  %v14091_v23 = vld [vmem:[#allocation6 + $0xb8] sm:$0xff]  ;;  %v14145_v43 = vld [vmem:[#allocation6 + $0x1f0] sm:$0xff]  ;;  %v14105_v44 = vld [vmem:[#allocation6 + $0x128] sm:$0xff] }
  0x45   : > { %1103 = vmatpush.bf16.msra.mxu3 %v14096_v15  ;;  %v971_v9 = vor.u32 %v970_v59, %v967_v58  ;;  %v15692_v10 = vor.u32 %v978_v61, %v975_v60  ;;  %v353_v13 = vsel %vm336_vm0, %v344_v1, %v15684_v63  ;;  %v15700_v15 = vld [vmem:[%s15629_s30 + $0x10] sm:$0xff]  ;;  %v14910_v27 = vld [vmem:[%s15629_s30 + $0x18] sm:$0xff]   ;;  %v14121_v45 = vld [vmem:[#allocation6 + $0x168] sm:$0xff]  ;;  %v749_v20 = vrot.slane %v391_v31, 3 }
  0x46   : > { %v407_v14 = vsel %vm336_vm0, %v15686_v2, %v15688_v3  ;;  %v15702_v17 = vpack.c.b16 %v326_v4, %v326_v4  ;;  %v358_v36 = vshll.u32 %v15700_v15, 16  ;;  %v985_v42 = vshll.u32 %v14910_v27, 16  ;;  %v14089_v50 = vld [vmem:[#allocation6 + $0xa8] sm:$0xff]  ;;  %v14104_v55 = vld [vmem:[#allocation6 + $0x120] sm:$0xff] }
  0x47   : > { %477 = vmatpush.bf16.msra.mxu0 %v14071_v21  ;;  %15195 = vmatpush.bf16.msra.mxu2 %v14071_v21  ;;  %v563_v21 = vsel %vm560_vm1, %v561_v7, %v562_v8  ;;  %v980_v22 = vsel %vm720_vm2, %v971_v9, %v15692_v10  ;;  %v14144_v54 = vld [vmem:[#allocation6 + $0x1e8] sm:$0xff]  ;;  %v14088_v58 = vld [vmem:[#allocation6 + $0xa0] sm:$0xff]  ;;  %v564_v59 = vrot.slane %v15700_v15, 3  ;;  %v14086_v7 = vld [vmem:[#allocation6 + $0x90] sm:$0xff]  ;;  %v722_v9 = vshrl.u32 %v15677_v51, 16 }
  0x48   : > { %638 = vmatpush.bf16.msra.mxu1 %v14079_v24  ;;  %v14146_v24 = vld [vmem:[#allocation6 + $0x1f8] sm:$0xff]  ;;  %v409_v37 = vshrl.u32 %v15702_v17, 16  ;;  %v412_v39 = vshll.u32 %v15702_v17, 16 }
  0x49   : > { %1104 = vmatpush.bf16.msra.mxu3 %v14095_v25  ;;  %v14106_v25 = vld [vmem:[#allocation6 + $0x130] sm:$0xff]  ;;  %v565_v1 = vsel %vm560_vm1, %v562_v8, %v564_v59  ;;  %v14103_v8 = vld [vmem:[#allocation6 + $0x118] sm:$0xff] }
  0x4a   : > { %v411_v48 = vrot.slane %v409_v37, 2  ;;  %v414_v49 = vrot.slane %v412_v39, 3 }
  0x4b   : > { %478 = vmatpush.bf16.msra.mxu0 %v14070_v35  ;;  %15196 = vmatpush.bf16.msra.mxu2 %v14070_v35  ;;  %v355_v35 = vshrl.u32 %v15700_v15, 16  ;;  %v14913_v15 = vld [vmem:[%s15629_s30 + $0x30] sm:$0xff]  }
  0x4c   : > { %639 = vmatpush.bf16.msra.mxu1 %v14078_v40  ;;  %v14090_v40 = vld [vmem:[#allocation6 + $0xb0] sm:$0xff]  ;;  %v415_v57 = vor.u32 %v414_v49, %v411_v48  ;;  %v15747_v48 = vld [vmem:[%s15629_s30 + $0x20] sm:$0xff] }
  0x4d   : > { %1105 = vmatpush.bf16.msra.mxu3 %v14094_v41  ;;  %v982_v41 = vshrl.u32 %v14910_v27, 16  ;;  %v357_v46 = vrot.slane %v355_v35, 2  ;;  %v729_v27 = vrot.slane %v346_v26, 3  ;;  %v14137_v49 = vld [vmem:[#allocation6 + $0x1b0] sm:$0xff] }
  0x4e   : > { %v416_v62 = vsel %vm336_vm0, %v15688_v3, %v415_v57 }
  0x4f   : > { %479 = vmatpush.bf16.msra.mxu0 %v14069_v47  ;;  %15197 = vmatpush.bf16.msra.mxu2 %v14069_v47  ;;  %v360_v47 = vrot.slane %v358_v36, 3 }
  0x50   : > { %640 = vmatpush.bf16.msra.mxu1 %v14077_v52  ;;  %v984_v52 = vrot.slane %v982_v41, 3  ;;  %v14084_v41 = vld [vmem:[#allocation6 + $0x80] sm:$0xff] }
  0x51   : > { %1106 = vmatpush.bf16.msra.mxu3 %v14093_v53  ;;  %v987_v53 = vrot.slane %v985_v42, 4  ;;  %v361_v56 = vor.u32 %v360_v47, %v357_v46  ;;  %v14138_v46 = vld [vmem:[#allocation6 + $0x1b8] sm:$0xff] }
  0x53   : > { %480 = vmatpush.bf16.msra.mxu0 %v14068_v0  ;;  %15198 = vmatpush.bf16.msra.mxu2 %v14068_v0  ;;  %v988_v60 = vor.u32 %v987_v53, %v984_v52  ;;  %v362_v61 = vsel %vm336_vm0, %v15684_v63, %v361_v56  ;;  %v15724_v0 = vld [vmem:[%s15629_s30 + $0x18] sm:$0xff]  ;;  %v373_v52 = vshrl.u32 %v15747_v48, 16  ;;  %v376_v53 = vshll.u32 %v15747_v48, 16 }
  0x54   : > { %641 = vmatpush.bf16.msra.mxu1 %v14076_v5  ;;  %v14087_v5 = vld [vmem:[#allocation6 + $0x98] sm:$0xff]  ;;  %v364_v63 = vshrl.u32 %v15724_v0, 16  ;;  %v367_v3 = vshll.u32 %v15724_v0, 16  ;;  %v566_v42 = vrot.slane %v15724_v0, 3  ;;  %v14117_v0 = vld [vmem:[#allocation6 + $0x148] sm:$0xff] }
  0x55   : > { %1107 = vmatpush.bf16.msra.mxu3 %v14092_v6  ;;  %v989_v4 = vsel %vm720_vm2, %v15692_v10, %v988_v60  ;;  %v14911_v6 = vld [vmem:[%s15629_s30 + $0x20] sm:$0xff]  }
  0x56   : > { %481 = vmatmul.bf16.vlgmr.msra.gmra.mxu0 %v353_v13  ;;  %511 = vmatmul.bf16.vlgmr.msra.gmra.mxu2 %v407_v14  ;;  %v991_v13 = vshrl.u32 %v14911_v6, 16  ;;  %v994_v10 = vshll.u32 %v14911_v6, 16  ;;  %v14143_v14 = vld [vmem:[#allocation6 + $0x1e0] sm:$0xff]  ;;  %v567_v16 = vsel %vm560_vm1, %v564_v59, %v566_v42  ;;  %v14142_v59 = vld [vmem:[#allocation6 + $0x1d8] sm:$0xff] }
  0x57   : > { %1246 = vmatpush.bf16.msrb.mxu0 %v14107_v11  ;;  %642 = vmatmul.bf16.vlgmr.msra.gmra.mxu1 %v563_v21  ;;  %v725_v11 = vshll.u32 %v15677_v51, 16  ;;  %v14102_v21 = vld [vmem:[#allocation6 + $0x110] sm:$0xff] }
  0x58   : > { %1513 = vmatpush.bf16.msrb.mxu1 %v14123_v12  ;;  %1108 = vmatmul.bf16.vlgmr.msra.gmra.mxu3 %v980_v22  ;;  %v14120_v12 = vld [vmem:[#allocation6 + $0x160] sm:$0xff]  ;;  %v366_v22 = vrot.slane %v364_v63, 2  ;;  %v993_v37 = vrot.slane %v991_v13, 3  ;;  %v996_v39 = vrot.slane %v994_v10, 4 }
  0x59   : > { %822 = vmatpush.bf16.msrb.mxu2 %v14091_v23  ;;  %1939 = vmatpush.bf16.msrb.mxu3 %v14146_v24  ;;  %v369_v23 = vrot.slane %v367_v3, 3  ;;  %v14085_v24 = vld [vmem:[#allocation6 + $0x88] sm:$0xff]  ;;  %v727_v51 = vrot.slane %v725_v11, 4 }
  0x5b   : > { %1247 = vmatpush.bf16.msrb.mxu0 %v14106_v25  ;;  %v724_v25 = vrot.slane %v722_v9, 3 }
  0x5c   : > { %1514 = vmatpush.bf16.msrb.mxu1 %v14122_v34  ;;  %v730_v34 = vrot.slane %v349_v28, 4 }
  0x5d   : > { %823 = vmatpush.bf16.msrb.mxu2 %v14090_v40  ;;  %1940 = vmatpush.bf16.msrb.mxu3 %v14145_v43  ;;  %v370_v40 = vor.u32 %v369_v23, %v366_v22  ;;  %v728_v43 = vor.u32 %v727_v51, %v724_v25  ;;  %v14100_v22 = vld [vmem:[#allocation6 + $0x100] sm:$0xff]  ;;  %v1012_v25 = vshll.u32 %v14913_v15, 16  ;;  %v14141_v51 = vld [vmem:[#allocation6 + $0x1d0] sm:$0xff] }
  0x5e   : > { %v14135_v23 = vld [vmem:[#allocation6 + $0x1a0] sm:$0xff] }
  0x5f   : > { %1248 = vmatpush.bf16.msrb.mxu0 %v14105_v44  ;;  %v731_v44 = vor.u32 %v730_v34, %v729_v27  ;;  %v371_v47 = vsel %vm336_vm0, %v361_v56, %v370_v40 }
  0x60   : > { %1515 = vmatpush.bf16.msrb.mxu1 %v14121_v45  ;;  %v997_v45 = vor.u32 %v996_v39, %v993_v37  ;;  %v737_v37 = vrot.slane %v364_v63, 3  ;;  %v738_v39 = vrot.slane %v367_v3, 4  ;;  %v14914_v63 = vld [vmem:[%s15629_s30 + $0x38] sm:$0xff]  }
  0x61   : > { %824 = vmatpush.bf16.msrb.mxu2 %v14089_v50  ;;  %1941 = vmatpush.bf16.msrb.mxu3 %v14144_v54  ;;  %v732_v26 = vsel %vm720_vm2, %v728_v43, %v731_v44  ;;  %v14912_v50 = vld [vmem:[%s15629_s30 + $0x28] sm:$0xff]   ;;  %v14119_v54 = vld [vmem:[#allocation6 + $0x158] sm:$0xff] }
  0x62   : > { %v998_v28 = vsel %vm720_vm2, %v988_v60, %v997_v45  ;;  %v1000_v56 = vshrl.u32 %v14912_v50, 16  ;;  %v1003_v57 = vshll.u32 %v14912_v50, 16  ;;  %v375_v60 = vrot.slane %v373_v52, 2  ;;  %v14154_v3 = vld [vmem:[#allocation6 + $0x238] sm:$0xff] }
  0x63   : > { %1249 = vmatpush.bf16.msrb.mxu0 %v14104_v55  ;;  %v14101_v55 = vld [vmem:[#allocation6 + $0x108] sm:$0xff]  ;;  %v1021_v50 = vshll.u32 %v14914_v63, 16 }
  0x64   : > { %1516 = vmatpush.bf16.msrb.mxu1 %v14120_v12  ;;  %v15766_v12 = vld [vmem:[%s15629_s30 + $0x28] sm:$0xff] }
  0x65   : > { %825 = vmatpush.bf16.msrb.mxu2 %v14088_v58  ;;  %1942 = vmatpush.bf16.msrb.mxu3 %v14143_v14  ;;  %v14136_v58 = vld [vmem:[#allocation6 + $0x1a8] sm:$0xff]  ;;  %v385_v14 = vshll.u32 %v15766_v12, 16  ;;  %v570_v43 = vrot.slane %v15766_v12, 3 }
  0x66   : > { %486 = vmatmul.bf16.gmra.mxu0 %v362_v61  ;;  %516 = vmatmul.bf16.gmra.mxu2 %v416_v62  ;;  %v378_v61 = vrot.slane %v376_v53, 3  ;;  %v733_v62 = vrot.slane %v355_v35, 3 }
  0x67   : > { %647 = vmatmul.bf16.gmra.mxu1 %v565_v1  ;;  %1250 = vmatpush.bf16.msrb.mxu0 %v14103_v8  ;;  %v734_v1 = vrot.slane %v358_v36, 4  ;;  %v382_v36 = vshrl.u32 %v15766_v12, 16  ;;  %v387_v34 = vrot.slane %v385_v14, 3 }
  0x68   : > { %1113 = vmatmul.bf16.gmra.mxu3 %v989_v4  ;;  %1517 = vmatpush.bf16.msrb.mxu1 %v14119_v54  ;;  %v1002_v4 = vrot.slane %v1000_v56, 3  ;;  %v379_v6 = vor.u32 %v378_v61, %v375_v60  ;;  %v14140_v54 = vld [vmem:[#allocation6 + $0x1c8] sm:$0xff]  ;;  %v742_v56 = vrot.slane %v376_v53, 4  ;;  %v14153_v53 = vld [vmem:[#allocation6 + $0x230] sm:$0xff] }
  0x69   : > { %826 = vmatpush.bf16.msrb.mxu2 %v14087_v5  ;;  %1943 = vmatpush.bf16.msrb.mxu3 %v14142_v59  ;;  %v1005_v5 = vrot.slane %v1003_v57, 4  ;;  %v735_v9 = vor.u32 %v734_v1, %v733_v62  ;;  %v384_v27 = vrot.slane %v382_v36, 2  ;;  %v572_v59 = vrot.slane %v15646_v18, 3 }
  0x6a   : > { %v380_v8 = vsel %vm336_vm0, %v370_v40, %v379_v6 }
  0x6b   : > { %1251 = vmatpush.bf16.msrb.mxu0 %v14102_v21  ;;  %v1006_v11 = vor.u32 %v1005_v5, %v1002_v4  ;;  %v736_v10 = vsel %vm720_vm2, %v731_v44, %v735_v9  ;;  %v14118_v21 = vld [vmem:[#allocation6 + $0x150] sm:$0xff]  ;;  %v739_v44 = vor.u32 %v738_v39, %v737_v37  ;;  %v573_v1 = vsel %vm560_vm1, %v570_v43, %v572_v59 }
  0x6c   : > { %1518 = vmatpush.bf16.msrb.mxu1 %v14118_v21  ;;  %v574_v21 = vrot.slane %v15649_v19, 3 }
  0x6d   : > { %827 = vmatpush.bf16.msrb.mxu2 %v14086_v7  ;;  %v568_v7 = vrot.slane %v15747_v48, 3  ;;  %v1007_v35 = vsel %vm720_vm2, %v997_v45, %v1006_v11  ;;  %1944 = vmatpush.bf16.msrb.mxu3 %v14141_v51  ;;  %v14116_v48 = vld [vmem:[#allocation6 + $0x140] sm:$0xff] }
  0x6e   : > { %v575_v51 = vsel %vm560_vm1, %v572_v59, %v574_v21 }
  0x6f   : > { %1252 = vmatpush.bf16.msrb.mxu0 %v14101_v55  ;;  %v569_v13 = vsel %vm560_vm1, %v566_v42, %v568_v7  ;;  %v388_v42 = vor.u32 %v387_v34, %v384_v27  ;;  %v741_v55 = vrot.slane %v373_v52, 3  ;;  %v15799_v52 = vld [vmem:[%s15629_s30 + $0x40] sm:$0xff]   ;;  %v14169_v27 = vld [vmem:[#allocation6 + $0x38] sm:$0xff] }
  0x70   : > { %1519 = vmatpush.bf16.msrb.mxu1 %v14117_v0 }
  0x71   : > { %828 = vmatpush.bf16.msrb.mxu2 %v14085_v24  ;;  %v1009_v24 = vshrl.u32 %v14913_v15, 16  ;;  %1945 = vmatpush.bf16.msrb.mxu3 %v14140_v54  ;;  %v743_v60 = vor.u32 %v742_v56, %v741_v55  ;;  %v398_v62 = vsel %vm336_vm0, %v388_v42, %v15686_v2  ;;  %v1030_v2 = vshll.u32 %v15799_v52, 16  ;;  %v903_v15 = vld [vmem:[%s15629_s30 + $0x48] sm:$0xf] }
  0x73   : > { %1253 = vmatpush.bf16.msrb.mxu0 %v14100_v22  ;;  %v1011_v40 = vrot.slane %v1009_v24, 3  ;;  %v744_v4 = vsel %vm720_vm2, %v739_v44, %v743_v60  ;;  %v15810_v24 = vunpack.c.l.b16 %v903_v15  ;;  %v14110_v15 = vld [vmem:[%s15629_s30 + $0x1c] sm:$0xff] }
  0x74   : > { %1520 = vmatpush.bf16.msrb.mxu1 %v14116_v48  ;;  %v15135_v48 = vld [vmem:[%s15629_s30 + $0x1c] sm:$0xff]  }
  0x75   : > { %829 = vmatpush.bf16.msrb.mxu2 %v14084_v41  ;;  %v1014_v41 = vrot.slane %v1012_v25, 4 }
  0x76   : > { %491 = vmatmul.bf16.gmra.mxu0 %v371_v47  ;;  %v571_v47 = vsel %vm560_vm1, %v568_v7, %v570_v43  ;;  %v1027_v7 = vshrl.u32 %v15799_v52, 16  ;;  %v576_v43 = vrot.slane %v15702_v17, 3  ;;  %v14109_v17 = vld [vmem:[%s15629_s30 + $0x14] sm:$0xff] }
  0x77   : > { %652 = vmatmul.bf16.gmra.mxu1 %v567_v16  ;;  %v1015_v45 = vor.u32 %v1014_v41, %v1011_v40  ;;  %v740_v16 = vsel %vm720_vm2, %v735_v9, %v739_v44  ;;  %2127 = vmatpush.bf16.msra.mxu0 %v14154_v3  ;;  %v14139_v9 = vld [vmem:[#allocation6 + $0x1c0] sm:$0xff]  ;;  %v14132_v41 = vld [vmem:[#allocation6 + $0x188] sm:$0xff]  ;;  %v1397_v56 = vshll.u32 %v14109_v17, 16 }
  0x78   : > { %830 = vmatmul.bf16.vlgmr.msrb.gmra.mxu2 %v732_v26  ;;  %1118 = vmatmul.bf16.gmra.mxu3 %v998_v28  ;;  %v14134_v28 = vld [vmem:[#allocation6 + $0x198] sm:$0xff]  ;;  %v577_v31 = vsel %vm560_vm1, %v574_v21, %v576_v43  ;;  %v14151_v3 = vld [vmem:[#allocation6 + $0x220] sm:$0xff] }
  0x79   : > { %1779 = vmatpush.bf16.msra.mxu2 %v14138_v46  ;;  %v389_v46 = vsel %vm336_vm0, %v379_v6, %v388_v42  ;;  %v1016_v26 = vsel %vm720_vm2, %v1006_v11, %v1015_v45  ;;  %v14133_v6 = vld [vmem:[#allocation6 + $0x190] sm:$0xff]  ;;  %1946 = vmatpush.bf16.msrb.mxu3 %v14139_v9  ;;  %v745_v11 = vrot.slane %v382_v36, 3  ;;  %v14185_v42 = vld [vmem:[#allocation6 + $0xb8] sm:$0xff] }
  0x7a   : > { %2725 = vmatpush.bf16.msra.mxu1 %v14169_v27  ;;  %v14150_v21 = vld [vmem:[#allocation6 + $0x218] sm:$0xff]  ;;  %v1401_v27 = vshrl.u32 %v14109_v17, 16 }
  0x7b   : > { %2128 = vmatpush.bf16.msra.mxu0 %v14153_v53 }
  0x7d   : > { %1780 = vmatpush.bf16.msra.mxu2 %v14137_v49  ;;  %v1018_v49 = vshrl.u32 %v14914_v63, 16  ;;  %3069 = vmatpush.bf16.msra.mxu3 %v14185_v42  ;;  %v15465_v63 = vld [vmem:[%s15629_s30 + $0x14] sm:$0xe] }
  0x7f   : > { %v1020_v57 = vrot.slane %v1018_v49, 3  ;;  %v753_v49 = vrot.slane %v400_v33, 3 }
  0x81   : > { %1781 = vmatpush.bf16.msra.mxu2 %v14136_v58  ;;  %v1023_v58 = vrot.slane %v1021_v50, 4  ;;  %v754_v50 = vrot.slane %v403_v38, 4  ;;  %v1399_v38 = vrot.slane %v1397_v56, 1  ;;  %v1409_v56 = vshrl.u32 %v14110_v15, 16 }
  0x83   : > { %v1024_v61 = vor.u32 %v1023_v58, %v1020_v57  ;;  %v699_v57 = vld [vmem:[%s15629_s30 + $0x40] sm:$0xf]  ;;  %v755_v33 = vor.u32 %v754_v50, %v753_v49 }
  0x84   : > { %v15841_v58 = vld [vmem:[%s15629_s30 + $0x1c] sm:$0xff] }
  0x85   : > { %1782 = vmatpush.bf16.msra.mxu2 %v14135_v23  ;;  %v1025_v5 = vsel %vm720_vm2, %v1015_v45, %v1024_v61  ;;  %v14166_v49 = vld [vmem:[#allocation6 + $0x20] sm:$0xff] }
  0x86   : > { %496 = vmatmul.bf16.gmra.mxu0 %v380_v8  ;;  %v746_v8 = vrot.slane %v385_v14, 4  ;;  %v963_v14 = vpack.c.b16 %v15810_v24, %v15810_v24 }
  0x87   : > { %657 = vmatmul.bf16.gmra.mxu1 %v569_v13  ;;  %v1029_v13 = vrot.slane %v1027_v7, 3 }
  0x88   : > { %835 = vmatmul.bf16.gmra.mxu2 %v736_v10  ;;  %1123 = vmatmul.bf16.gmra.mxu3 %v1007_v35  ;;  %v1032_v10 = vrot.slane %v1030_v2, 4  ;;  %v14605_v35 = vunpack.c.l.b16 %v15658_v29  ;;  %v747_v22 = vor.u32 %v746_v8, %v745_v11  ;;  %v14152_v29 = vld [vmem:[#allocation6 + $0x228] sm:$0xff]  ;;  %v1036_v34 = vshrl.u32 %v963_v14, 16 }
  0x89   : > { %1783 = vmatpush.bf16.msra.mxu2 %v14134_v28  ;;  %v1039_v37 = vshll.u32 %v963_v14, 16  ;;  %2129 = vmatpush.bf16.msra.mxu0 %v14152_v29  ;;  %v14168_v28 = vld [vmem:[#allocation6 + $0x30] sm:$0xff] }
  0x8a   : > { %v1033_v23 = vor.u32 %v1032_v10, %v1029_v13  ;;  %v1182_v25 = vpack.c.b16 %v14605_v35, %v939_v30  ;;  %v748_v36 = vsel %vm720_vm2, %v743_v60, %v747_v22  ;;  %v750_v30 = vrot.slane %v394_v32, 4  ;;  %v14108_v32 = vld [vmem:[%s15629_s30 + $0xc] sm:$0xff]  ;;  %2726 = vmatpush.bf16.msra.mxu1 %v14168_v28  ;;  %v14131_v60 = vld [vmem:[#allocation6 + $0x180] sm:$0xff] }
  0x8b   : > { %v1038_v39 = vrot.slane %v1036_v34, 3  ;;  %v1041_v40 = vrot.slane %v1039_v37, 4  ;;  %v1392_v0 = vshll.u32 %v14108_v32, 16  ;;  %v1390_v54 = vshrl.u32 %v14108_v32, 16  ;;  %v15866_v37 = vld [vmem:[%s15629_s30 + $0x24] sm:$0xff] }
  0x8c   : > { %v1034_v12 = vsel %vm720_vm2, %v1024_v61, %v1033_v23  ;;  %v751_v44 = vor.u32 %v750_v30, %v749_v20  ;;  %v14184_v61 = vld [vmem:[#allocation6 + $0xb0] sm:$0xff]  ;;  %v1405_v34 = vshll.u32 %v14110_v15, 16  ;;  %v14177_v30 = vld [vmem:[#allocation6 + $0x78] sm:$0xff] }
  0x8d   : > { %1784 = vmatpush.bf16.msra.mxu2 %v14133_v6  ;;  %v1042_v45 = vor.u32 %v1041_v40, %v1038_v39  ;;  %2130 = vmatpush.bf16.msra.mxu0 %v14151_v3  ;;  %v1394_v55 = vrot.slane %v1392_v0, 1  ;;  %v14183_v39 = vld [vmem:[#allocation6 + $0xa8] sm:$0xff]  ;;  %v14149_v28 = vld [vmem:[#allocation6 + $0x210] sm:$0xff] }
  0x8e   : > { %v752_v18 = vsel %vm720_vm2, %v747_v22, %v751_v44  ;;  %3070 = vmatpush.bf16.msra.mxu3 %v14184_v61  ;;  %v756_v9 = vsel %vm720_vm2, %v751_v44, %v755_v33  ;;  %v14167_v22 = vld [vmem:[#allocation6 + $0x28] sm:$0xff]  ;;  %v1407_v42 = vrot.slane %v1405_v34, 1  ;;  %v1869_v44 = vrot.slane %v15866_v37, 1 }
  0x8f   : > { %v1395_v19 = vor.u32 %v1394_v55, %v1390_v54  ;;  %2727 = vmatpush.bf16.msra.mxu1 %v14167_v22  ;;  %v15883_v0 = vld [vmem:[%s15629_s30 + $0x24] sm:$0xff] }
  0x91   : > { %1785 = vmatpush.bf16.msra.mxu2 %v14132_v41  ;;  %v1400_v11 = vsel %vm1388_vm3, %v1395_v19, %v1399_v38  ;;  %2131 = vmatpush.bf16.msra.mxu0 %v14150_v21  ;;  %v1403_v41 = vor.u32 %v1401_v27, %v1399_v38  ;;  %v1663_v19 = vshll.u32 %v15841_v58, 16  ;;  %v15895_v38 = vld [vmem:[%s15629_s30 + $0x2c] sm:$0xff] }
  0x92   : > { %3071 = vmatpush.bf16.msra.mxu3 %v14183_v39 }
  0x93   : > { %2728 = vmatpush.bf16.msra.mxu1 %v14166_v49 }
  0x95   : > { %1786 = vmatpush.bf16.msra.mxu2 %v14131_v60  ;;  %2132 = vmatpush.bf16.msra.mxu0 %v14149_v28 }
  0x96   : > { %501 = vmatmul.bf16.gmra.mxu0 %v389_v46  ;;  %v15133_v46 = vld [vmem:[%s15629_s30 + $0x14] sm:$0xff]  }
  0x97   : > { %662 = vmatmul.bf16.gmra.mxu1 %v571_v47  ;;  %v1043_v47 = vsel %vm720_vm2, %v1033_v23, %v1042_v45 }
  0x98   : > { %840 = vmatmul.bf16.gmra.mxu2 %v740_v16  ;;  %1128 = vmatmul.bf16.gmra.mxu3 %v1016_v26  ;;  %v15830_v16 = vld [vmem:[%s15629_s30 + $0x14] sm:$0xff]  }
  0x99   : > { %v15464_v26 = vld [vmem:[%s15629_s30 + $0x14] sm:$0xf0]  ;;  %2883 = vmatpush.bf16.msrb.mxu2 %v14177_v30  ;;  %v1658_v3 = vshll.u32 %v15830_v16, 16 }
  0x9a   : > { %v15843_v59 = vor.u32 %v15465_v63, %v15464_v26  ;;  %v1408_v26 = vsel %vm1388_vm3, %v1403_v41, %v1407_v42 }
  0xa6   : > { %506 = vmatmul.bf16.gmra.mxu0 %v398_v62  ;;  %v718_v62 = vunpack.c.l.b16 %v699_v57  ;;  %v1413_v57 = vshll.u32 %v15883_v0, 16 }
  0xa7   : > { %667 = vmatmul.bf16.gmra.mxu1 %v573_v1  ;;  %v15848_v1 = vld [vmem:[%s21309_s3] ss:$0 sm:$0xff] }
  0xa8   : > { %845 = vmatmul.bf16.gmra.mxu2 %v744_v4  ;;  %1133 = vmatmul.bf16.gmra.mxu3 %v1025_v5  ;;  %v1866_v4 = vrot.slane %v15843_v59, 1  ;;  %v1867_v5 = vrot.slane %v15841_v58, 1  ;;  %v719_v6 = vpack.c.b16 %v718_v62, %v718_v62  ;;  %v1656_v62 = vshrl.u32 %v15830_v16, 16 }
  0xaa   : > { %v1868_v8 = vsel %vm1865_vm4, %v1866_v4, %v1867_v5  ;;  %v758_v10 = vshrl.u32 %v719_v6, 16  ;;  %v761_v35 = vshll.u32 %v719_v6, 16  ;;  %v1870_v63 = vsel %vm1865_vm4, %v1867_v5, %v1869_v44  ;;  %v14176_v5 = vld [vmem:[#allocation6 + $0x70] sm:$0xff] }
  0xab   : > { %v1415_v6 = vrot.slane %v1413_v57, 1  ;;  %2884 = vmatpush.bf16.msrb.mxu2 %v14176_v5 }
  0xac   : > { %v763_v29 = vrot.slane %v761_v35, 4 }
  0xb6   : > { %1254 = vmatmul.bf16.vlgmr.msrb.gmra.mxu0 %v1182_v25 }
  0xb7   : > { %672 = vmatmul.bf16.gmra.mxu1 %v575_v51 }
  0xb8   : > { %850 = vmatmul.bf16.gmra.mxu2 %v748_v36  ;;  %1138 = vmatmul.bf16.gmra.mxu3 %v1034_v12  ;;  %v760_v36 = vrot.slane %v758_v10, 3 }
  0xba   : > { %v764_v40 = vor.u32 %v763_v29, %v760_v36  ;;  %v14165_v29 = vld [vmem:[#allocation6 + $0x18] sm:$0xff] }
  0xbb   : > { %2729 = vmatpush.bf16.msra.mxu1 %v14165_v29  ;;  %v15962_v29 = vld [vmem:[%s15629_s30 + $0x3c] sm:$0xff] }
  0xc6   : > { %1259 = vmatmul.bf16.gmra.mxu0 %v15133_v46  ;;  %v15137_v46 = vld [vmem:[%s15629_s30 + $0x24] sm:$0xff]  }
  0xc7   : > { %677 = vmatmul.bf16.gmra.mxu1 %v577_v31 }
  0xc8   : > { %855 = vmatmul.bf16.gmra.mxu2 %v752_v18  ;;  %1143 = vmatmul.bf16.gmra.mxu3 %v1043_v47  ;;  %v765_v47 = vsel %vm720_vm2, %v755_v33, %v764_v40  ;;  %v1660_v33 = vrot.slane %v1658_v3, 1  ;;  %v1417_v40 = vshrl.u32 %v15883_v0, 16 }
  0xd3   : > { %v482_v53 = vpop.f32.mrf.mxu0 }
  0xd4   : > { %v523_v7 = vadd.f32 %v15848_v1, %v482_v53  ;;  %v643_v2 = vpop.f32.mrf.mxu1  ;;  %v1411_v53 = vor.u32 %v1409_v56, %v1407_v42 }
  0xd6   : > { %v15857_v13 = vadd.f32 %v643_v2, %v523_v7  ;;  %1264 = vmatmul.bf16.gmra.mxu0 %v15135_v48  ;;  %v14182_v48 = vld [vmem:[#allocation6 + $0xa0] sm:$0xff]  ;;  %v1661_v7 = vor.u32 %v1660_v33, %v1656_v62  ;;  %v1665_v2 = vrot.slane %v1663_v19, 1  ;;  %v1416_v21 = vsel %vm1388_vm3, %v1411_v53, %v1415_v6 }
  0xd7   : > { %1521 = vmatmul.bf16.vlgmr.msrb.gmra.mxu1 %v1400_v11  ;;  %3072 = vmatpush.bf16.msra.mxu3 %v14182_v48 }
  0xd8   : > { %860 = vmatmul.bf16.gmra.mxu2 %v756_v9  ;;  %1947 = vmatmul.bf16.vlgmr.msrb.gmra.mxu3 %v1868_v8  ;;  %v1871_v9 = vrot.slane %v15895_v38, 1  ;;  %v15139_v8 = vld [vmem:[%s15629_s30 + $0x2c] sm:$0xff]   ;;  %v1666_v22 = vsel %vm1388_vm3, %v1661_v7, %v1665_v2  ;;  %v14147_v7 = vld [vmem:[#allocation6 + $0x200] sm:$0xff] }
  0xd9   : > { %v15860_v23 = vpop.f32.mrf.mxu2 }
  0xdb   : > { %v15862_v25 = vpop.f32.mrf.mxu3  ;;  %v484_v51 = vpop.f32.mrf.mxu0 }
  0xdc   : > { %v524_v12 = vadd.f32 %v15848_v1, %v484_v51  ;;  %v645_v14 = vpop.f32.mrf.mxu1  ;;  %v1872_v51 = vsel %vm1865_vm4, %v1869_v44, %v1871_v9 }
  0xde   : > { %v15868_v20 = vadd.f32 %v645_v14, %v524_v12  ;;  %v15914_v12 = vld [vmem:[%s15629_s30 + $0x2c] sm:$0xff]  ;;  %v14148_v14 = vld [vmem:[#allocation6 + $0x208] sm:$0xff] }
  0xdf   : > { %2133 = vmatpush.bf16.msra.mxu0 %v14148_v14  ;;  %v1421_v44 = vshll.u32 %v15914_v12, 16  ;;  %v1679_v14 = vshll.u32 %v15895_v38, 16 }
  0xe1   : > { %v15870_v43 = vpop.f32.mrf.mxu2  ;;  %v1423_v0 = vrot.slane %v1421_v44, 1  ;;  %v1875_v44 = vrot.slane %v15962_v29, 1 }
  0xe3   : > { %v15873_v45 = vpop.f32.mrf.mxu3  ;;  %v487_v31 = vpop.f32.mrf.mxu0  ;;  %2134 = vmatpush.bf16.msra.mxu0 %v14147_v7 }
  0xe4   : > { %v525_v18 = vadd.f32 %v15848_v1, %v487_v31  ;;  %v648_v32 = vpop.f32.mrf.mxu1  ;;  %v1671_v31 = vshll.u32 %v15866_v37, 16 }
  0xe6   : > { %v15880_v17 = vadd.f32 %v648_v32, %v525_v18  ;;  %1269 = vmatmul.bf16.gmra.mxu0 %v15137_v46  ;;  %v1667_v46 = vshrl.u32 %v15841_v58, 16  ;;  %v15925_v18 = vld [vmem:[%s15629_s30 + $0x34] sm:$0xff]  ;;  %v1673_v28 = vrot.slane %v1671_v31, 1 }
  0xe7   : > { %1526 = vmatmul.bf16.gmra.mxu1 %v1408_v26  ;;  %v14181_v26 = vld [vmem:[#allocation6 + $0x98] sm:$0xff]  ;;  %v1873_v49 = vrot.slane %v15925_v18, 1  ;;  %v1691_v58 = vshrl.u32 %v15925_v18, 16 }
  0xe8   : > { %865 = vmatmul.bf16.gmra.mxu2 %v765_v47  ;;  %1952 = vmatmul.bf16.gmra.mxu3 %v1870_v63  ;;  %v14175_v47 = vld [vmem:[#allocation6 + $0x68] sm:$0xff]  ;;  %v1419_v63 = vor.u32 %v1417_v40, %v1415_v6  ;;  %v1669_v3 = vor.u32 %v1667_v46, %v1665_v2  ;;  %v14164_v2 = vld [vmem:[#allocation6 + $0x10] sm:$0xff] }
  0xe9   : > { %v15886_v50 = vpop.f32.mrf.mxu2  ;;  %2885 = vmatpush.bf16.msrb.mxu2 %v14175_v47  ;;  %3073 = vmatpush.bf16.msra.mxu3 %v14181_v26  ;;  %v1874_v48 = vsel %vm1865_vm4, %v1871_v9, %v1873_v49 }
  0xea   : > { %v1424_v33 = vsel %vm1388_vm3, %v1419_v63, %v1423_v0  ;;  %v1674_v5 = vsel %vm1388_vm3, %v1669_v3, %v1673_v28  ;;  %2730 = vmatpush.bf16.msra.mxu1 %v14164_v2 }
  0xeb   : > { %v15888_v54 = vpop.f32.mrf.mxu3  ;;  %v489_v55 = vpop.f32.mrf.mxu0 }
  0xec   : > { %v526_v60 = vadd.f32 %v15848_v1, %v489_v55  ;;  %v650_v61 = vpop.f32.mrf.mxu1 }
  0xee   : > { %v15897_v4 = vadd.f32 %v650_v61, %v526_v60 }
  0xf1   : > { %v15901_v16 = vpop.f32.mrf.mxu2 }
  0xf3   : > { %v15904_v11 = vpop.f32.mrf.mxu3  ;;  %v492_v10 = vpop.f32.mrf.mxu0 }
  0xf4   : > { %v527_v35 = vadd.f32 %v15848_v1, %v492_v10  ;;  %v653_v15 = vpop.f32.mrf.mxu1 }
  0xf6   : > { %v15911_v36 = vadd.f32 %v653_v15, %v527_v35  ;;  %1274 = vmatmul.bf16.gmra.mxu0 %v15139_v8  ;;  %v1425_v15 = vshrl.u32 %v15914_v12, 16 }
  0xf7   : > { %1531 = vmatmul.bf16.gmra.mxu1 %v1416_v21 }
  0xf8   : > { %1787 = vmatmul.bf16.vlgmr.msra.gmra.mxu2 %v1666_v22  ;;  %1957 = vmatmul.bf16.gmra.mxu3 %v1872_v51  ;;  %v1675_v51 = vshrl.u32 %v15866_v37, 16  ;;  %v1427_v12 = vor.u32 %v1425_v15, %v1423_v0  ;;  %v1683_v15 = vshrl.u32 %v15895_v38, 16 }
  0xfb   : > { %v831_v27 = vpop.f32.mrf.mxu2  ;;  %v15917_v30 = vpop.f32.mrf.mxu3 }
  0xfc   : > { %v871_v34 = vadd.f32 %v831_v27, %v15857_v13  ;;  %v494_v39 = vpop.f32.mrf.mxu0  ;;  %v655_v42 = vpop.f32.mrf.mxu1 }
  0xfd   : > { %v528_v41 = vadd.f32 %v15848_v1, %v494_v39  ;;  %v14180_v39 = vld [vmem:[#allocation6 + $0x90] sm:$0xff] }
  0xfe   : > { %v15928_v32 = vadd.f32 %v15862_v25, %v871_v34  ;;  %v15141_v25 = vld [vmem:[%s15629_s30 + $0x34] sm:$0xff]   ;;  %3074 = vmatpush.bf16.msra.mxu3 %v14180_v39 }
  0xff   : > { %v15930_v13 = vadd.f32 %v655_v42, %v528_v41  ;;  %v14174_v34 = vld [vmem:[#allocation6 + $0x60] sm:$0xff]  ;;  %v1677_v41 = vor.u32 %v1675_v51, %v1673_v28  ;;  %v1681_v42 = vrot.slane %v1679_v14, 1 }
 0x100   : > { %2886 = vmatpush.bf16.msrb.mxu2 %v14174_v34 }
 0x103   : > { %v833_v55 = vpop.f32.mrf.mxu2  ;;  %v15939_v57 = vpop.f32.mrf.mxu3 }
 0x104   : > { %v872_v56 = vadd.f32 %v833_v55, %v15868_v20  ;;  %v497_v60 = vpop.f32.mrf.mxu0  ;;  %v658_v62 = vpop.f32.mrf.mxu1  ;;  %v15951_v20 = vld [vmem:[%s15629_s30 + $0x34] sm:$0xff] }
 0x105   : > { %v529_v61 = vadd.f32 %v15848_v1, %v497_v60  ;;  %v1429_v22 = vshll.u32 %v15951_v20, 16  ;;  %v1433_v2 = vshrl.u32 %v15951_v20, 16  ;;  %v14630_v20 = vunpack.c.h.b16 %v15799_v52 }
 0x106   : > { %1279 = vmatmul.bf16.gmra.mxu0 %v15141_v25  ;;  %v15948_v6 = vadd.f32 %v15873_v45, %v872_v56  ;;  %v1682_v25 = vsel %vm1388_vm3, %v1677_v41, %v1681_v42  ;;  %v1876_v56 = vsel %vm1865_vm4, %v1873_v49, %v1875_v44  ;;  %v1685_v41 = vor.u32 %v1683_v15, %v1681_v42 }
 0x107   : > { %v15945_v53 = vadd.f32 %v658_v62, %v529_v61  ;;  %1536 = vmatmul.bf16.gmra.mxu1 %v1424_v33  ;;  %v1431_v40 = vrot.slane %v1429_v22, 1  ;;  %v15985_v61 = vld [vmem:[%s15629_s30 + $0x3c] sm:$0xff]  ;;  %v14193_v62 = vld [vmem:[#allocation6 + $0xf8] sm:$0xff] }
 0x108   : > { %1792 = vmatmul.bf16.gmra.mxu2 %v1674_v5  ;;  %1962 = vmatmul.bf16.gmra.mxu3 %v1874_v48  ;;  %v14179_v22 = vld [vmem:[#allocation6 + $0x88] sm:$0xff] }
 0x109   : > { %v1432_v28 = vsel %vm1388_vm3, %v1427_v12, %v1431_v40  ;;  %3346 = vmatpush.bf16.msrb.mxu0 %v14193_v62  ;;  %3075 = vmatpush.bf16.msra.mxu3 %v14179_v22  ;;  %v1435_v39 = vor.u32 %v1433_v2, %v1431_v40  ;;  %v16030_v62 = vld [vmem:[%s15629_s30 + $0x44] sm:$0xff] }
 0x10b   : > { %v836_v8 = vpop.f32.mrf.mxu2  ;;  %v15954_v9 = vpop.f32.mrf.mxu3 }
 0x10c   : > { %v873_v10 = vadd.f32 %v836_v8, %v15880_v17  ;;  %v499_v35 = vpop.f32.mrf.mxu0  ;;  %v660_v21 = vpop.f32.mrf.mxu1 }
 0x10d   : > { %v530_v45 = vadd.f32 %v15848_v1, %v499_v35  ;;  %v1437_v35 = vshll.u32 %v15985_v61, 16 }
 0x10e   : > { %v15965_v27 = vadd.f32 %v15888_v54, %v873_v10  ;;  %v15142_v54 = vld [vmem:[%s15629_s30 + $0x3c] sm:$0xff]  }
 0x10f   : > { %v15967_v17 = vadd.f32 %v660_v21, %v530_v45  ;;  %v15999_v45 = vld [vmem:[%s15629_s30 + $0x44] sm:$0xff]  ;;  %v14173_v21 = vld [vmem:[#allocation6 + $0x58] sm:$0xff]  ;;  %v1439_v12 = vrot.slane %v1437_v35, 1 }
 0x110   : > { %2887 = vmatpush.bf16.msrb.mxu2 %v14173_v21 }
 0x113   : > { %v838_v47 = vpop.f32.mrf.mxu2  ;;  %v15976_v63 = vpop.f32.mrf.mxu3 }
 0x114   : > { %v874_v26 = vadd.f32 %v838_v47, %v15897_v4  ;;  %v502_v3 = vpop.f32.mrf.mxu0  ;;  %v663_v55 = vpop.f32.mrf.mxu1  ;;  %v14163_v4 = vld [vmem:[#allocation6 + $0x8] sm:$0xff] }
 0x115   : > { %v531_v0 = vadd.f32 %v15848_v1, %v502_v3  ;;  %2731 = vmatpush.bf16.msra.mxu1 %v14163_v4  ;;  %v2030_v4 = vshll.u32 %v15843_v59, 16 }
 0x116   : > { %1284 = vmatmul.bf16.gmra.mxu0 %v15142_v54  ;;  %v15988_v33 = vadd.f32 %v15904_v11, %v874_v26  ;;  %v1687_v11 = vshll.u32 %v15925_v18, 16  ;;  %v1877_v54 = vrot.slane %v15999_v45, 1 }
 0x117   : > { %v15982_v60 = vadd.f32 %v663_v55, %v531_v0  ;;  %1541 = vmatmul.bf16.gmra.mxu1 %v1432_v28  ;;  %v1440_v28 = vsel %vm1388_vm3, %v1435_v39, %v1439_v12  ;;  %v2032_v21 = vrot.slane %v2030_v4, 2  ;;  %v16045_v39 = vld [vmem:[%s15629_s30 + $0x4c] sm:$0xff] }
 0x118   : > { %1797 = vmatmul.bf16.gmra.mxu2 %v1682_v25  ;;  %1967 = vmatmul.bf16.gmra.mxu3 %v1876_v56  ;;  %v1689_v47 = vrot.slane %v1687_v11, 1  ;;  %v1878_v25 = vsel %vm1865_vm4, %v1875_v44, %v1877_v54  ;;  %v2035_v44 = vrot.slane %v1663_v19, 2  ;;  %v1445_v19 = vshll.u32 %v16030_v62, 16 }
 0x11a   : > { %v1690_v42 = vsel %vm1388_vm3, %v1685_v41, %v1689_v47  ;;  %v14178_v41 = vld [vmem:[#allocation6 + $0x80] sm:$0xff] }
 0x11b   : > { %v841_v5 = vpop.f32.mrf.mxu2  ;;  %v15991_v49 = vpop.f32.mrf.mxu3  ;;  %3076 = vmatpush.bf16.msra.mxu3 %v14178_v41 }
 0x11c   : > { %v875_v48 = vadd.f32 %v841_v5, %v15911_v36  ;;  %v504_v7 = vpop.f32.mrf.mxu0  ;;  %v665_v10 = vpop.f32.mrf.mxu1  ;;  %v14162_v5 = vld [vmem:[#allocation6] sm:$0xff] }
 0x11d   : > { %v532_v8 = vadd.f32 %v15848_v1, %v504_v7  ;;  %v2034_v7 = vrot.slane %v1667_v46, 1  ;;  %2732 = vmatpush.bf16.msra.mxu1 %v14162_v5  ;;  %v1695_v46 = vshll.u32 %v15962_v29, 16 }
 0x11e   : > { %v16002_v36 = vadd.f32 %v15917_v30, %v875_v48  ;;  %v1189_v30 = vpack.c.b16 %v15810_v24, %v14630_v20  ;;  %v14192_v48 = vld [vmem:[#allocation6 + $0xf0] sm:$0xff] }
 0x11f   : > { %v16004_v34 = vadd.f32 %v665_v10, %v532_v8  ;;  %3347 = vmatpush.bf16.msrb.mxu0 %v14192_v48  ;;  %v1441_v10 = vshrl.u32 %v15985_v61, 16 }
 0x123   : > { %v843_v26 = vpop.f32.mrf.mxu2  ;;  %v16014_v0 = vpop.f32.mrf.mxu3 }
 0x124   : > { %v876_v3 = vadd.f32 %v843_v26, %v15930_v13  ;;  %v507_v52 = vpop.f32.mrf.mxu0  ;;  %v668_v55 = vpop.f32.mrf.mxu1  ;;  %v2027_v13 = vshrl.u32 %v15843_v59, 16 }
 0x125   : > { %v533_v40 = vadd.f32 %v15848_v1, %v507_v52  ;;  %v16052_v52 = vor.u32 %v2035_v44, %v2034_v7 }
 0x126   : > { %1289 = vmatmul.bf16.gmra.mxu0 %v1189_v30  ;;  %v16025_v24 = vadd.f32 %v15939_v57, %v876_v3  ;;  %v2029_v35 = vrot.slane %v2027_v13, 1  ;;  %v1443_v30 = vor.u32 %v1441_v10, %v1439_v12  ;;  %v535_v12 = vadd.f32 %v15848_v1, %v15860_v23 }
 0x127   : > { %v16022_v56 = vadd.f32 %v668_v55, %v533_v40  ;;  %1546 = vmatmul.bf16.gmra.mxu1 %v1440_v28  ;;  %v1447_v40 = vrot.slane %v1445_v19, 1  ;;  %v1693_v55 = vor.u32 %v1691_v58, %v1689_v47  ;;  %v1697_v28 = vrot.slane %v1695_v46, 1 }
 0x128   : > { %1802 = vmatmul.bf16.gmra.mxu2 %v1690_v42  ;;  %1972 = vmatmul.bf16.gmra.mxu3 %v1878_v25  ;;  %v2033_v3 = vor.u32 %v2032_v21, %v2029_v35  ;;  %v1327_v42 = vld [vmem:[%s15629_s30 + $0x4c] sm:$0x1]  ;;  %v14201_v35 = vld [vmem:[#allocation6 + $0x138] sm:$0xff] }
 0x129   : > { %v1378_v48 = vunpack.c.l.b16 %v1327_v42  ;;  %3491 = vmatpush.bf16.msrb.mxu1 %v14201_v35 }
 0x12a   : > { %v2037_v47 = vsel %vm2025_vm5, %v2033_v3, %v16052_v52 }
 0x12b   : > { %v846_v57 = vpop.f32.mrf.mxu2  ;;  %v16037_v8 = vpop.f32.mrf.mxu3  ;;  %v1387_v10 = vpack.c.b16 %v1378_v48, %v1378_v48  ;;  %v14171_v48 = vld [vmem:[#allocation6 + $0x48] sm:$0xff] }
 0x12c   : > { %v877_v2 = vadd.f32 %v846_v57, %v15945_v53  ;;  %v509_v59 = vpop.f32.mrf.mxu0  ;;  %v670_v20 = vpop.f32.mrf.mxu1  ;;  %v14172_v53 = vld [vmem:[#allocation6 + $0x50] sm:$0xff]  ;;  %v1448_v57 = vsel %vm1388_vm3, %v1443_v30, %v1447_v40 }
 0x12d   : > { %v534_v22 = vadd.f32 %v15848_v1, %v509_v59  ;;  %2888 = vmatpush.bf16.msrb.mxu2 %v14172_v53  ;;  %v1453_v3 = vshll.u32 %v1387_v10, 16 }
 0x12e   : > { %v16048_v26 = vadd.f32 %v15954_v9, %v877_v2  ;;  %v1879_v9 = vrot.slane %v16045_v39, 1  ;;  %v1698_v2 = vsel %vm1388_vm3, %v1693_v55, %v1697_v28  ;;  %v2039_v55 = vrot.slane %v1671_v31, 2 }
 0x12f   : > { %v16050_v61 = vadd.f32 %v670_v20, %v534_v22  ;;  %v536_v20 = vadd.f32 %v15848_v1, %v15870_v43 }
 0x130   : > { %v1880_v23 = vsel %vm1865_vm4, %v1877_v54, %v1879_v9  ;;  %v1449_v54 = vshrl.u32 %v16030_v62, 16  ;;  %v1699_v62 = vshrl.u32 %v15962_v29, 16 }
 0x131   : > { %2889 = vmatpush.bf16.msrb.mxu2 %v14171_v48 }
 0x132   : > { %v1451_v31 = vor.u32 %v1449_v54, %v1447_v40  ;;  %v537_v40 = vadd.f32 %v15848_v1, %v15886_v50 }
 0x133   : > { %v848_v25 = vpop.f32.mrf.mxu2  ;;  %v16063_v4 = vpop.f32.mrf.mxu3 }
 0x134   : > { %v878_v13 = vadd.f32 %v848_v25, %v15967_v17  ;;  %v1255_v5 = vpop.f32.mrf.mxu0  ;;  %v673_v44 = vpop.f32.mrf.mxu1  ;;  %v1594_v17 = vld [vmem:[%s15629_s30 + $0x54] sm:$0x1]  ;;  %v1703_v25 = vshll.u32 %v15999_v45, 16 }
 0x135   : > { %v16068_v7 = vadd.f32 %v1255_v5, %v15928_v32  ;;  %v16072_v59 = vadd.f32 %v673_v44, %v535_v12  ;;  %v14191_v32 = vld [vmem:[#allocation6 + $0xe8] sm:$0xff]  ;;  %v1645_v21 = vunpack.c.l.b16 %v1594_v17 }
 0x136   : > { %2135 = vmatmul.bf16.vlgmr.msra.gmra.mxu0 %v2037_v47  ;;  %v16081_v22 = vadd.f32 %v15976_v63, %v878_v13  ;;  %v2038_v63 = vrot.slane %v1675_v51, 1  ;;  %v2513_v12 = vld [vmem:[%s15629_s30 + $0x40] sm:$0xc]  ;;  %v14232_v51 = vld [vmem:[#allocation6 + $0x1b8] sm:$0xff]  ;;  %v1705_v17 = vrot.slane %v1703_v25, 1 }
 0x137   : > { %1551 = vmatmul.bf16.gmra.mxu1 %v1448_v57  ;;  %3348 = vmatpush.bf16.msrb.mxu0 %v14191_v32  ;;  %v16102_v5 = vpack.c.b16 %v1645_v21, %v1645_v21  ;;  %v2790_v47 = vld [vmem:[%s15629_s30 + $0x40] sm:$0x8] }
 0x138   : > { %1807 = vmatmul.bf16.gmra.mxu2 %v1698_v2  ;;  %1977 = vmatmul.bf16.gmra.mxu3 %v1880_v23  ;;  %v16108_v44 = vor.u32 %v2039_v55, %v2038_v63  ;;  %v1455_v2 = vrot.slane %v1453_v3, 1  ;;  %v1701_v23 = vor.u32 %v1699_v62, %v1697_v28  ;;  %v2808_v10 = vunpack.c.l.b16 %v2790_v47  ;;  %v16124_v28 = vld [vmem:[%s15629_s30 + $0x48] sm:$0xff] }
 0x139   : > { %4021 = vmatpush.bf16.msrb.mxu3 %v14232_v51  ;;  %v1881_v32 = vrot.slane %v16102_v5, 1  ;;  %v14190_v51 = vld [vmem:[#allocation6 + $0xe0] sm:$0xff] }
 0x13a   : > { %v1456_v3 = vsel %vm1388_vm3, %v1451_v31, %v1455_v2  ;;  %v1706_v50 = vsel %vm1388_vm3, %v1701_v23, %v1705_v17  ;;  %v14200_v31 = vld [vmem:[#allocation6 + $0x130] sm:$0xff]  ;;  %v1711_v2 = vshll.u32 %v16045_v39, 16  ;;  %v2043_v23 = vrot.slane %v1679_v14, 2 }
 0x13b   : > { %v851_v19 = vpop.f32.mrf.mxu2  ;;  %v16087_v41 = vpop.f32.mrf.mxu3  ;;  %v1882_v55 = vsel %vm1865_vm4, %v1879_v9, %v1881_v32  ;;  %v538_v9 = vadd.f32 %v15848_v1, %v15901_v16  ;;  %3349 = vmatpush.bf16.msrb.mxu0 %v14190_v51  ;;  %3492 = vmatpush.bf16.msrb.mxu1 %v14200_v31 }
 0x13c   : > { %v879_v53 = vadd.f32 %v851_v19, %v15982_v60  ;;  %v1257_v30 = vpop.f32.mrf.mxu0  ;;  %v675_v43 = vpop.f32.mrf.mxu1  ;;  %v2514_v60 = vld [vmem:[%s15629_s30 + $0x44] sm:$0xf]  ;;  %v2041_v19 = vsel %vm2025_vm5, %v16052_v52, %v16108_v44 }
 0x13d   : > { %v16094_v42 = vadd.f32 %v1257_v30, %v15948_v6  ;;  %v16100_v13 = vadd.f32 %v675_v43, %v536_v20  ;;  %v2563_v6 = vunpack.c.l.b16 %v2513_v12  ;;  %v2564_v57 = vunpack.c.l.b16 %v2514_v60 }
 0x13e   : > { %v16106_v37 = vadd.f32 %v15991_v49, %v879_v53  ;;  %v2601_v60 = vshll.u32 %v16124_v28, 16 }
 0x13f   : > { %v2580_v54 = vpack.c.b16 %v2564_v57, %v2563_v6  ;;  %v16131_v63 = vpack.c.b16 %v2564_v57, %v2808_v10  ;;  %v1707_v57 = vshrl.u32 %v15999_v45, 16 }
 0x140   : > { %v2977_v14 = vrot.slane %v2601_v60, 4 }
 0x141   : > { %v2590_v52 = vshrl.u32 %v2580_v54, 16  ;;  %v2593_v43 = vshll.u32 %v2580_v54, 16  ;;  %v2969_v47 = vshrl.u32 %v16131_v63, 16  ;;  %v2972_v48 = vshll.u32 %v16131_v63, 16 }
 0x143   : > { %v853_v49 = vpop.f32.mrf.mxu2  ;;  %v16118_v21 = vpop.f32.mrf.mxu3  ;;  %v2595_v1 = vrot.slane %v2593_v43, 3  ;;  %v2971_v54 = vrot.slane %v2969_v47, 3 }
 0x144   : > { %v880_v35 = vadd.f32 %v853_v49, %v16004_v34  ;;  %v1260_v20 = vpop.f32.mrf.mxu0  ;;  %v678_v53 = vpop.f32.mrf.mxu1 }
 0x145   : > { %v16127_v30 = vadd.f32 %v1260_v20, %v15965_v27  ;;  %v16133_v34 = vadd.f32 %v678_v53, %v537_v40  ;;  %v2598_v27 = vshrl.u32 %v16124_v28, 16  ;;  %v2592_v40 = vrot.slane %v2590_v52, 2 }
 0x146   : > { %2140 = vmatmul.bf16.gmra.mxu0 %v2041_v19  ;;  %v16140_v12 = vadd.f32 %v16014_v0, %v880_v35  ;;  %v2042_v0 = vrot.slane %v1683_v15, 1  ;;  %v2603_v19 = vrot.slane %v2601_v60, 3  ;;  %v2974_v15 = vrot.slane %v2972_v48, 4 }
 0x147   : > { %1556 = vmatmul.bf16.gmra.mxu1 %v1456_v3  ;;  %v2600_v16 = vrot.slane %v2598_v27, 2  ;;  %v2976_v38 = vrot.slane %v2598_v27, 3  ;;  %v14170_v3 = vld [vmem:[#allocation6 + $0x40] sm:$0xff]  ;;  %v1713_v52 = vrot.slane %v1711_v2, 1  ;;  %v2596_v43 = vor.u32 %v2595_v1, %v2592_v40  ;;  %v14189_v1 = vld [vmem:[#allocation6 + $0xd8] sm:$0xff] }
 0x148   : > { %1812 = vmatmul.bf16.gmra.mxu2 %v1706_v50  ;;  %1982 = vmatmul.bf16.gmra.mxu3 %v1882_v55  ;;  %v14231_v50 = vld [vmem:[#allocation6 + $0x1b0] sm:$0xff]  ;;  %v2044_v55 = vor.u32 %v2043_v23, %v2042_v0  ;;  %v2975_v48 = vor.u32 %v2974_v15, %v2971_v54  ;;  %v2046_v15 = vrot.slane %v1691_v58, 1 }
 0x149   : > { %2890 = vmatpush.bf16.msrb.mxu2 %v14170_v3  ;;  %4022 = vmatpush.bf16.msrb.mxu3 %v14231_v50  ;;  %v2604_v47 = vor.u32 %v2603_v19, %v2600_v16  ;;  %v2978_v27 = vor.u32 %v2977_v14, %v2976_v38  ;;  %v14199_v16 = vld [vmem:[#allocation6 + $0x128] sm:$0xff]  ;;  %v2047_v38 = vrot.slane %v1687_v11, 2  ;;  %v1719_v50 = vshll.u32 %v16102_v5, 16 }
 0x14a   : > { %3350 = vmatpush.bf16.msrb.mxu0 %v14189_v1  ;;  %3493 = vmatpush.bf16.msrb.mxu1 %v14199_v16 }
 0x14b   : > { %v856_v6 = vpop.f32.mrf.mxu2  ;;  %v16154_v32 = vpop.f32.mrf.mxu3  ;;  %v2605_v23 = vsel %vm336_vm0, %v2596_v43, %v2604_v47  ;;  %v2048_v18 = vor.u32 %v2047_v38, %v2046_v15  ;;  %v2051_v38 = vrot.slane %v1695_v46, 2  ;;  %v2810_v46 = vrot.slane %v16131_v63, 3  ;;  %v16259_v63 = vld [vmem:[%s15629_s30 + $0x60] sm:$0xff] }
 0x14c   : > { %v881_v10 = vadd.f32 %v856_v6, %v16022_v56  ;;  %v1262_v49 = vpop.f32.mrf.mxu0  ;;  %v680_v35 = vpop.f32.mrf.mxu1 }
 0x14d   : > { %v16157_v20 = vadd.f32 %v1262_v49, %v15988_v33  ;;  %v16159_v53 = vadd.f32 %v680_v35, %v538_v9  ;;  %v1709_v33 = vor.u32 %v1707_v57, %v1705_v17  ;;  %v2045_v9 = vsel %vm2025_vm5, %v16108_v44, %v2044_v55 }
 0x14e   : > { %v16162_v56 = vadd.f32 %v16037_v8, %v881_v10  ;;  %v16179_v10 = vld [vmem:[%s15629_s30 + $0x50] sm:$0xff] }
 0x14f   : > { %v1714_v0 = vsel %vm1388_vm3, %v1709_v33, %v1713_v52  ;;  %v2610_v44 = vshll.u32 %v16179_v10, 16 }
 0x151   : > { %v2612_v43 = vrot.slane %v2610_v44, 3 }
 0x153   : > { %v858_v60 = vpop.f32.mrf.mxu2  ;;  %v16169_v31 = vpop.f32.mrf.mxu3 }
 0x154   : > { %v882_v51 = vadd.f32 %v858_v60, %v16050_v61  ;;  %v1265_v8 = vpop.f32.mrf.mxu0  ;;  %v1522_v17 = vpop.f32.mrf.mxu1  ;;  %v2979_v61 = vsel %vm720_vm2, %v2975_v48, %v2978_v27  ;;  %v2981_v60 = vrot.slane %v2610_v44, 4 }
 0x155   : > { %v16174_v6 = vadd.f32 %v1265_v8, %v16002_v36  ;;  %v16182_v49 = vadd.f32 %v1522_v17, %v16068_v7  ;;  %v2607_v36 = vshrl.u32 %v16179_v10, 16  ;;  %v14230_v8 = vld [vmem:[#allocation6 + $0x1a8] sm:$0xff] }
 0x156   : > { %v16186_v40 = vadd.f32 %v16063_v4, %v882_v51  ;;  %2145 = vmatmul.bf16.gmra.mxu0 %v2045_v9  ;;  %v1715_v4 = vshrl.u32 %v16045_v39, 16  ;;  %v14217_v51 = vld [vmem:[#allocation6 + $0x178] sm:$0xff]  ;;  %4023 = vmatpush.bf16.msrb.mxu3 %v14230_v8  ;;  %v14229_v8 = vld [vmem:[#allocation6 + $0x1a0] sm:$0xff] }
 0x157   : > { %2733 = vmatmul.bf16.vlgmr.msra.gmra.mxu1 %v2605_v23  ;;  %v2609_v33 = vrot.slane %v2607_v36, 2  ;;  %v2980_v48 = vrot.slane %v2607_v36, 3  ;;  %3756 = vmatpush.bf16.msra.mxu2 %v14217_v51  ;;  %v14216_v51 = vld [vmem:[#allocation6 + $0x170] sm:$0xff] }
 0x158   : > { %1817 = vmatmul.bf16.gmra.mxu2 %v1714_v0  ;;  %3077 = vmatmul.bf16.vlgmr.msra.gmra.mxu3 %v2979_v61  ;;  %v1717_v11 = vor.u32 %v1715_v4, %v1713_v52  ;;  %v2049_v61 = vsel %vm2025_vm5, %v2044_v55, %v2048_v18  ;;  %v16220_v52 = vld [vmem:[%s15629_s30 + $0x58] sm:$0xff] }
 0x159   : > { %v2613_v5 = vor.u32 %v2612_v43, %v2609_v33  ;;  %v2982_v9 = vor.u32 %v2981_v60, %v2980_v48  ;;  %v2619_v55 = vshll.u32 %v16220_v52, 16 }
 0x15a   : > { %4024 = vmatpush.bf16.msrb.mxu3 %v14229_v8 }
 0x15b   : > { %v861_v35 = vpop.f32.mrf.mxu2  ;;  %v16191_v19 = vpop.f32.mrf.mxu3  ;;  %v2614_v1 = vsel %vm336_vm0, %v2604_v47, %v2613_v5  ;;  %v14198_v47 = vld [vmem:[#allocation6 + $0x120] sm:$0xff]  ;;  %v2621_v43 = vrot.slane %v2619_v55, 3  ;;  %3757 = vmatpush.bf16.msra.mxu2 %v14216_v51 }
 0x15c   : > { %v883_v7 = vadd.f32 %v861_v35, %v16072_v59  ;;  %v1267_v54 = vpop.f32.mrf.mxu0  ;;  %v1524_v3 = vpop.f32.mrf.mxu1  ;;  %3494 = vmatpush.bf16.msrb.mxu1 %v14198_v47  ;;  %v2055_v47 = vrot.slane %v1703_v25, 2  ;;  %v2813_v25 = vrot.slane %v16179_v10, 3 }
 0x15d   : > { %v16199_v14 = vadd.f32 %v1267_v54, %v16025_v24  ;;  %v16203_v59 = vadd.f32 %v1524_v3, %v16094_v42  ;;  %v1721_v24 = vrot.slane %v1719_v50, 1 }
 0x15e   : > { %v16206_v58 = vadd.f32 %v16087_v41, %v883_v7  ;;  %v14188_v7 = vld [vmem:[#allocation6 + $0xd0] sm:$0xff] }
 0x15f   : > { %v1722_v44 = vsel %vm1388_vm3, %v1717_v11, %v1721_v24  ;;  %3351 = vmatpush.bf16.msrb.mxu0 %v14188_v7 }
 0x163   : > { %v863_v17 = vpop.f32.mrf.mxu2  ;;  %v16211_v0 = vpop.f32.mrf.mxu3 }
 0x164   : > { %v884_v42 = vadd.f32 %v863_v17, %v16100_v13  ;;  %v1270_v23 = vpop.f32.mrf.mxu0  ;;  %v1527_v36 = vpop.f32.mrf.mxu1  ;;  %v2983_v13 = vsel %vm720_vm2, %v2978_v27, %v2982_v9 }
 0x165   : > { %v16215_v41 = vadd.f32 %v1270_v23, %v16048_v26  ;;  %v16223_v16 = vadd.f32 %v1527_v36, %v16127_v30  ;;  %v2616_v26 = vshrl.u32 %v16220_v52, 16 }
 0x166   : > { %v16227_v35 = vadd.f32 %v16118_v21, %v884_v42  ;;  %2150 = vmatmul.bf16.gmra.mxu0 %v2049_v61  ;;  %v2050_v21 = vrot.slane %v1699_v62, 1 }
 0x167   : > { %2738 = vmatmul.bf16.gmra.mxu1 %v2614_v1  ;;  %v2618_v33 = vrot.slane %v2616_v26, 2  ;;  %v2984_v60 = vrot.slane %v2616_v26, 3  ;;  %v14197_v26 = vld [vmem:[#allocation6 + $0x118] sm:$0xff] }
 0x168   : > { %1822 = vmatmul.bf16.gmra.mxu2 %v1722_v44  ;;  %3082 = vmatmul.bf16.gmra.mxu3 %v2983_v13  ;;  %v2052_v62 = vor.u32 %v2051_v38, %v2050_v21 }
 0x169   : > { %v2622_v29 = vor.u32 %v2621_v43, %v2618_v33  ;;  %3495 = vmatpush.bf16.msrb.mxu1 %v14197_v26  ;;  %v14215_v33 = vld [vmem:[#allocation6 + $0x168] sm:$0xff]  ;;  %v14228_v43 = vld [vmem:[#allocation6 + $0x198] sm:$0xff] }
 0x16a   : > { %v2053_v61 = vsel %vm2025_vm5, %v2048_v18, %v2052_v62  ;;  %v2628_v18 = vshll.u32 %v16259_v63, 16  ;;  %3758 = vmatpush.bf16.msra.mxu2 %v14215_v33  ;;  %4025 = vmatpush.bf16.msrb.mxu3 %v14228_v43 }
 0x16b   : > { %v866_v54 = vpop.f32.mrf.mxu2  ;;  %v16232_v15 = vpop.f32.mrf.mxu3  ;;  %v2623_v44 = vsel %vm336_vm0, %v2613_v5, %v2622_v29  ;;  %v14187_v5 = vld [vmem:[#allocation6 + $0xc8] sm:$0xff] }
 0x16c   : > { %v885_v30 = vadd.f32 %v866_v54, %v16133_v34  ;;  %v1272_v27 = vpop.f32.mrf.mxu0  ;;  %v1529_v50 = vpop.f32.mrf.mxu1  ;;  %v2985_v34 = vrot.slane %v2619_v55, 4  ;;  %3352 = vmatpush.bf16.msrb.mxu0 %v14187_v5  ;;  %v2630_v21 = vrot.slane %v2628_v18, 3 }
 0x16d   : > { %v16239_v3 = vadd.f32 %v1272_v27, %v16081_v22  ;;  %v16242_v48 = vadd.f32 %v1529_v50, %v16157_v20  ;;  %v2811_v22 = vrot.slane %v16124_v28, 3 }
 0x16e   : > { %v16245_v11 = vadd.f32 %v16154_v32, %v885_v30  ;;  %v2986_v24 = vor.u32 %v2985_v34, %v2984_v60 }
 0x16f   : > { %v2812_v1 = vsel %vm560_vm1, %v2810_v46, %v2811_v22 }
 0x173   : > { %v868_v17 = vpop.f32.mrf.mxu2  ;;  %v16250_v42 = vpop.f32.mrf.mxu3 }
 0x174   : > { %v886_v20 = vadd.f32 %v868_v17, %v16159_v53  ;;  %v1275_v23 = vpop.f32.mrf.mxu0  ;;  %v1532_v36 = vpop.f32.mrf.mxu1  ;;  %v2987_v53 = vsel %vm720_vm2, %v2982_v9, %v2986_v24 }
 0x175   : > { %v16254_v32 = vadd.f32 %v1275_v23, %v16106_v37  ;;  %v16262_v28 = vadd.f32 %v1532_v36, %v16174_v6  ;;  %v2625_v37 = vshrl.u32 %v16259_v63, 16  ;;  %v2814_v23 = vsel %vm560_vm1, %v2811_v22, %v2813_v25  ;;  %v14196_v22 = vld [vmem:[#allocation6 + $0x110] sm:$0xff] }
 0x176   : > { %v16266_v13 = vadd.f32 %v16169_v31, %v886_v20  ;;  %2155 = vmatmul.bf16.gmra.mxu0 %v2053_v61  ;;  %v2054_v31 = vrot.slane %v1707_v57, 1  ;;  %v16299_v61 = vld [vmem:[%s15629_s30 + $0x68] sm:$0xff]  ;;  %3496 = vmatpush.bf16.msrb.mxu1 %v14196_v22 }
 0x177   : > { %2743 = vmatmul.bf16.gmra.mxu1 %v2623_v44  ;;  %v2627_v27 = vrot.slane %v2625_v37, 2  ;;  %v2988_v50 = vrot.slane %v2625_v37, 3  ;;  %v2059_v37 = vrot.slane %v1711_v2, 2 }
 0x178   : > { %2891 = vmatmul.bf16.vlgmr.msrb.gmra.mxu2 %v2812_v1  ;;  %3087 = vmatmul.bf16.gmra.mxu3 %v2987_v53  ;;  %v2056_v57 = vor.u32 %v2055_v47, %v2054_v31  ;;  %v2058_v53 = vrot.slane %v1715_v4, 1  ;;  %v14214_v47 = vld [vmem:[#allocation6 + $0x160] sm:$0xff] }
 0x179   : > { %v2631_v45 = vor.u32 %v2630_v21, %v2627_v27  ;;  %3759 = vmatpush.bf16.msra.mxu2 %v14214_v47 }
 0x17a   : > { %v2057_v46 = vsel %vm2025_vm5, %v2052_v62, %v2056_v57  ;;  %v2637_v62 = vshll.u32 %v16299_v61, 16  ;;  %v16330_v27 = vor.u32 %v2059_v37, %v2058_v53  ;;  %v3134_v53 = vld [vmem:[%s15629_s30 + $0x48] sm:$0x8]  ;;  %v16373_v37 = vld [vmem:[%s15629_s30 + $0x4c] sm:$0xf] }
 0x17b   : > { %v1788_v55 = vpop.f32.mrf.mxu2  ;;  %v16271_v7 = vpop.f32.mrf.mxu3  ;;  %v2632_v20 = vsel %vm336_vm0, %v2622_v29, %v2631_v45  ;;  %v14186_v29 = vld [vmem:[#allocation6 + $0xc0] sm:$0xff] }
 0x17c   : > { %v1828_v6 = vadd.f32 %v1788_v55, %v16182_v49  ;;  %v1277_v9 = vpop.f32.mrf.mxu0  ;;  %v1534_v30 = vpop.f32.mrf.mxu1  ;;  %v2989_v49 = vrot.slane %v2628_v18, 4  ;;  %3353 = vmatpush.bf16.msrb.mxu0 %v14186_v29  ;;  %v2004_v18 = vld [vmem:[%s15629_s30 + $0x54] sm:$0x3]  ;;  %v2993_v31 = vrot.slane %v2637_v62, 4 }
 0x17d   : > { %v16278_v54 = vadd.f32 %v1277_v9, %v16140_v12  ;;  %v16281_v38 = vadd.f32 %v1534_v30, %v16199_v14  ;;  %v14227_v30 = vld [vmem:[#allocation6 + $0x190] sm:$0xff]  ;;  %v2023_v39 = vunpack.c.l.b16 %v2004_v18 }
 0x17e   : > { %v16284_v60 = vadd.f32 %v16191_v19, %v1828_v6  ;;  %v16287_v12 = vor.u32 %v2989_v49, %v2988_v50  ;;  %v2639_v6 = vrot.slane %v2637_v62, 3  ;;  %4026 = vmatpush.bf16.msrb.mxu3 %v14227_v30 }
 0x17f   : > { %v2024_v49 = vpack.c.b16 %v2023_v39, %v2023_v39 }
 0x183   : > { %v1790_v34 = vpop.f32.mrf.mxu2  ;;  %v16290_v51 = vpop.f32.mrf.mxu3 }
 0x184   : > { %v1829_v14 = vadd.f32 %v1790_v34, %v16203_v59  ;;  %v1280_v8 = vpop.f32.mrf.mxu0  ;;  %v1537_v17 = vpop.f32.mrf.mxu1  ;;  %v2991_v59 = vsel %vm720_vm2, %v2986_v24, %v16287_v12  ;;  %v2061_v34 = vsel %vm2025_vm5, %v2056_v57, %v16330_v27 }
 0x185   : > { %v16294_v19 = vadd.f32 %v1280_v8, %v16162_v56  ;;  %v16302_v10 = vadd.f32 %v1537_v17, %v16215_v41  ;;  %v2634_v56 = vshrl.u32 %v16299_v61, 16  ;;  %v2208_v41 = vlaneseq }
 0x186   : > { %v16307_v36 = vadd.f32 %v16211_v0, %v1829_v14  ;;  %2160 = vmatmul.bf16.gmra.mxu0 %v2057_v46  ;;  %v16345_v14 = vld [vmem:[%s15629_s30 + $0x70] sm:$0xff] }
 0x187   : > { %2748 = vmatmul.bf16.gmra.mxu1 %v2632_v20  ;;  %v2636_v55 = vrot.slane %v2634_v56, 2  ;;  %v16328_v2 = vshrl.u32 %v2208_v41, 7 }
 0x188   : > { %2896 = vmatmul.bf16.gmra.mxu2 %v2814_v23  ;;  %3092 = vmatmul.bf16.gmra.mxu3 %v2991_v59  ;;  %v2063_v59 = vshrl.u32 %v2024_v49, 16 }
 0x189   : > { %v16338_v33 = vcvt.s32.f32 %v16328_v2 }
 0x18a   : > { %v2065_v29 = vrot.slane %v2063_v59, 1 }
 0x18b   : > { %v1793_v44 = vpop.f32.mrf.mxu2  ;;  %v16312_v1 = vpop.f32.mrf.mxu3 }
 0x18c   : > { %v1830_v24 = vadd.f32 %v1793_v44, %v16223_v16  ;;  %v1282_v0 = vpop.f32.mrf.mxu0  ;;  %v1539_v26 = vpop.f32.mrf.mxu1  ;;  %v2992_v16 = vrot.slane %v2634_v56, 3  ;;  %v2643_v56 = vshrl.u32 %v16345_v14, 16 }
 0x18d   : > { %v16320_v5 = vadd.f32 %v1282_v0, %v16186_v40  ;;  %v16323_v9 = vadd.f32 %v1539_v26, %v16239_v3  ;;  %v16332_v40 = vor.u32 %v2639_v6, %v2636_v55  ;;  %v2815_v3 = vrot.slane %v16220_v52, 3  ;;  %v14195_v6 = vld [vmem:[#allocation6 + $0x108] sm:$0xff] }
 0x18e   : > { %v16326_v4 = vadd.f32 %v16232_v15, %v1830_v24  ;;  %v16335_v21 = vor.u32 %v2993_v31, %v2992_v16  ;;  %v2645_v0 = vrot.slane %v2643_v56, 2  ;;  %v14240_v16 = vld [vmem:[#allocation6 + $0x1f8] sm:$0xff]  ;;  %v2210_v31 = vadd.s32 8, %v16328_v2  ;;  %3497 = vmatpush.bf16.msrb.mxu1 %v14195_v6 }
 0x18f   : > { %v2641_v17 = vsel %vm336_vm0, %v2631_v45, %v16332_v40  ;;  %v2816_v20 = vsel %vm560_vm1, %v2813_v25, %v2815_v3  ;;  %v2066_v45 = vshll.u32 %v2024_v49, 16  ;;  %v3185_v49 = vunpack.c.l.b16 %v16373_v37  ;;  %4179 = vmatpush.bf16.msra.mxu0 %v14240_v16 }
 0x190   : > { %v2995_v57 = vsel %vm720_vm2, %v16287_v12, %v16335_v21 }
 0x191   : > { %v2068_v24 = vrot.slane %v2066_v45, 2 }
 0x193   : > { %v1795_v50 = vpop.f32.mrf.mxu2  ;;  %v16340_v15 = vpop.f32.mrf.mxu3 }
 0x194   : > { %v1285_v43 = vpop.f32.mrf.mxu0  ;;  %v1542_v46 = vpop.f32.mrf.mxu1  ;;  %v1831_v25 = vadd.f32 %v1795_v50, %v16242_v48  ;;  %v2996_v48 = vrot.slane %v2643_v56, 3  ;;  %v3184_v50 = vunpack.c.l.b16 %v3134_v53 }
 0x195   : > { %v16348_v8 = vadd.f32 %v1285_v43, %v16206_v58  ;;  %v16356_v23 = vadd.f32 %v1542_v46, %v16254_v32  ;;  %v16362_v58 = vadd.f32 0.5, %v16338_v33  ;;  %v2646_v32 = vshll.u32 %v16345_v14, 16 }
 0x196   : > { %2165 = vmatmul.bf16.gmra.mxu0 %v2061_v34  ;;  %v16383_v30 = vadd.f32 %v16250_v42, %v1831_v25  ;;  %v2069_v43 = vor.u32 %v2068_v24, %v2065_v29  ;;  %v2211_v34 = vadd.s32 16, %v16328_v2  ;;  %v2817_v46 = vrot.slane %v16259_v63, 3 }
 0x197   : > { %2753 = vmatmul.bf16.gmra.mxu1 %v2641_v17  ;;  %v2257_v12 = vmul.f32 0.055555556, %v16362_v58  ;;  %v2648_v55 = vrot.slane %v2646_v32, 3  ;;  %v2997_v47 = vrot.slane %v2646_v32, 4  ;;  %v16395_v42 = vcvt.s32.f32 %v2210_v31  ;;  %v14213_v17 = vld [vmem:[#allocation6 + $0x158] sm:$0xff] }
 0x198   : > { %2901 = vmatmul.bf16.gmra.mxu2 %v2816_v20  ;;  %3097 = vmatmul.bf16.gmra.mxu3 %v2995_v57  ;;  %v16400_v57 = vld [vmem:[%s15629_s30 + $0x78] sm:$0xff]  ;;  %v3201_v56 = vpack.c.b16 %v3185_v49, %v3184_v50  ;;  %v15491_v32 = vmov 0   ;;  %v2070_v29 = vsel %vm2025_vm5, %v16330_v27, %v2069_v43  ;;  %v2818_v53 = vsel %vm560_vm1, %v2815_v3, %v2817_v46 }
 0x199   : > { %21459 = vst [vmem:[#allocation13_spill] sm:$0xff] %v16395_v42  ;;  %v16397_v20 = vor.u32 %v2997_v47, %v2996_v48  ;;  %3760 = vmatpush.bf16.msra.mxu2 %v14213_v17  ;;  %v16426_v27 = vadd.f32 0.5, %v16395_v42 }
 0x19a   : > { %252 = vst [vmem:[#allocation2] sm:$0xf] %v15491_v32  ;;  %v3211_v3 = vshrl.u32 %v3201_v56, 16  ;;  %v3214_v48 = vshll.u32 %v3201_v56, 16 }
 0x19b   : > { %v1798_v62 = vpop.f32.mrf.mxu2  ;;  %v16369_v44 = vpop.f32.mrf.mxu3  ;;  %253 = vst [vmem:[#allocation2 + $0x4] sm:$0xf] %v15491_v32 }
 0x19c   : > { %v1832_v22 = vadd.f32 %v1798_v62, %v16262_v28  ;;  %v1287_v41 = vpop.f32.mrf.mxu0  ;;  %v1544_v26 = vpop.f32.mrf.mxu1  ;;  %254 = vst [vmem:[#allocation2 + $0x8] sm:$0xf] %v15491_v32  ;;  %v3216_v17 = vrot.slane %v3214_v48, 4  ;;  %v14954_v48 = vld [vmem:[%s15629_s30 + $0x58] sm:$0xff]  }
 0x19d   : > { %v16376_v18 = vadd.f32 %v1287_v41, %v16227_v35  ;;  %v16380_v28 = vadd.f32 %v1544_v26, %v16278_v54  ;;  %v16388_v35 = vfloor.f32 %v2257_v12  ;;  %v16392_v54 = vor.u32 %v2648_v55, %v2645_v0  ;;  %v16410_v12 = vld [vmem:[%s15629_s30 + $0x50] sm:$0xff]   ;;  %255 = vst [vmem:[#allocation2 + $0xb0] sm:$0xf] %v15491_v32 }
 0x19e   : > { %v16386_v39 = vadd.f32 %v16271_v7, %v1832_v22  ;;  %v14226_v7 = vld [vmem:[#allocation6 + $0x188] sm:$0xff]  ;;  %v16412_v22 = vcvt.s32.f32 %v2211_v34  ;;  %v2652_v55 = vshrl.u32 %v16400_v57, 16  ;;  %v3219_v6 = vshrl.u32 %v16410_v12, 16  ;;  %256 = vst [vmem:[#allocation2 + $0xb4] sm:$0xf] %v15491_v32 }
 0x19f   : > { %v2289_v45 = vmul.f32 18.0, %v16388_v35  ;;  %4027 = vmatpush.bf16.msrb.mxu3 %v14226_v7  ;;  %v2650_v0 = vsel %vm336_vm0, %v16332_v40, %v16392_v54  ;;  %v2655_v40 = vshll.u32 %v16400_v57, 16  ;;  %v3222_v16 = vshll.u32 %v16410_v12, 16  ;;  %257 = vst [vmem:[#allocation2 + $0xb8] sm:$0xf] %v15491_v32 }
 0x1a0   : > { %21460 = vst [vmem:[#allocation14_spill] sm:$0xff] %v16412_v22  ;;  %vm2321_vm6 = vcmp.gt.f32.partialorder %v16388_v35, 0.5  ;;  %vm2337_vm7 = vcmp.lt.f32.partialorder %v16388_v35, 16.5  ;;  %v2654_v31 = vrot.slane %v2652_v55, 2  ;;  %v3000_v50 = vrot.slane %v2652_v55, 3  ;;  %v14239_v55 = vld [vmem:[#allocation6 + $0x1f0] sm:$0xff] }
 0x1a1   : > { %v2305_v52 = vsub.f32 %v16362_v58, %v2289_v45  ;;  %v2258_v58 = vmul.f32 0.055555556, %v16426_v27  ;;  %v2657_v47 = vrot.slane %v2655_v40, 3  ;;  %v3213_v34 = vrot.slane %v3211_v3, 3  ;;  %vm2353_vm9 = vmand %vm2321_vm6, %vm2337_vm7  ;;  %4180 = vmatpush.bf16.msra.mxu0 %v14239_v55 }
 0x1a2   : > { %v3221_v7 = vrot.slane %v3219_v6, 3  ;;  %v3224_v32 = vrot.slane %v3222_v16, 4  ;;  %v2819_v35 = vrot.slane %v16299_v61, 3 }
 0x1a3   : > { %v1800_v59 = vpop.f32.mrf.mxu2  ;;  %v16405_v25 = vpop.f32.mrf.mxu3  ;;  %vm2369_vm8 = vcmp.gt.f32.partialorder %v2305_v52, 1.0  ;;  %vm2401_vm11 = vcmp.lt.f32.partialorder %v2305_v52, 17.0 }
 0x1a4   : > { %v1290_v62 = vpop.f32.mrf.mxu0  ;;  %v1547_v24 = vpop.f32.mrf.mxu1  ;;  %vm16467_vm10 = vmand %vm2353_vm9, %vm2369_vm8  ;;  %v16476_v16 = vor.u32 %v3224_v32, %v3221_v7 }
 0x1a5   : > { %v16415_v41 = vadd.f32 %v1290_v62, %v16245_v11  ;;  %v16429_v26 = vadd.f32 %v1547_v24, %v16294_v19  ;;  %v2999_v11 = vsel %vm720_vm2, %v16335_v21, %v16397_v20  ;;  %v1833_v19 = vadd.f32 %v1800_v59, %v16281_v38  ;;  %vm16485_vm12 = vmand %vm16467_vm10, %vm2401_vm11 }
 0x1a6   : > { %2170 = vmatmul.bf16.gmra.mxu0 %v2070_v29  ;;  %v16441_v21 = vadd.f32 0.5, %v16412_v22  ;;  %v3001_v38 = vrot.slane %v2655_v40, 4  ;;  %v2529_v29 = vld [vmem:[%s15629_s30 + $0x80] sm:$0x7] }
 0x1a7   : > { %2758 = vmatmul.bf16.gmra.mxu1 %v2650_v0  ;;  %v16454_v24 = vadd.f32 %v16290_v51, %v1833_v19  ;;  %v2579_v6 = vunpack.c.l.b16 %v2529_v29  ;;  %v2948_v19 = vld [vmem:[%s15629_s30 + $0x80] sm:$0xf] }
 0x1a8   : > { %2906 = vmatmul.bf16.gmra.mxu2 %v2818_v53  ;;  %3102 = vmatmul.bf16.gmra.mxu3 %v2999_v11  ;;  %v2259_v62 = vmul.f32 0.055555556, %v16441_v21  ;;  %v2274_v11 = vfloor.f32 %v2258_v58  ;;  %v16473_v51 = vor.u32 %v3001_v38, %v3000_v50  ;;  %v2966_v50 = vunpack.c.l.b16 %v2948_v19 }
 0x1aa   : > { %v16478_v58 = vfloor.f32 %v2259_v62  ;;  %v3003_v52 = vsel %vm720_vm2, %v16397_v20, %v16473_v51  ;;  %v21322_v20 = vmov 0.0   ;;  %vm2322_vm13 = vcmp.gt.f32.partialorder %v2274_v11, 0.5 }
 0x1ab   : > { %v1803_v43 = vpop.f32.mrf.mxu2  ;;  %v16447_v45 = vpop.f32.mrf.mxu3  ;;  %v12225_v55 = vsel %vm16485_vm12, 1.0, %v21322_v20  ;;  %vm2338_vm14 = vcmp.lt.f32.partialorder %v2274_v11, 16.5 }
 0x1ac   : > { %v1834_v59 = vadd.f32 %v1803_v43, %v16302_v10  ;;  %v1292_v56 = vpop.f32.mrf.mxu0  ;;  %v1549_v53 = vpop.f32.mrf.mxu1  ;;  %v14194_v10 = vld [vmem:[#allocation6 + $0x100] sm:$0xff]  ;;  %v2290_v43 = vmul.f32 18.0, %v2274_v11  ;;  %v2291_v62 = vmul.f32 18.0, %v16478_v58  ;;  %vm2354_vm15 = vmand %vm2322_vm13, %vm2338_vm14  ;;  %vm2323_vm7 = vcmp.gt.f32.partialorder %v16478_v58, 0.5 }
 0x1ad   : > { %v16457_v0 = vadd.f32 %v1292_v56, %v16266_v13  ;;  %v16460_v40 = vadd.f32 %v1549_v53, %v16320_v5  ;;  %v16471_v13 = vor.u32 %v2657_v47, %v2654_v31  ;;  %3498 = vmatpush.bf16.msrb.mxu1 %v14194_v10  ;;  %v3217_v5 = vor.u32 %v3216_v17, %v3213_v34  ;;  %v14225_v56 = vld [vmem:[#allocation6 + $0x180] sm:$0xff] }
 0x1ae   : > { %v16464_v3 = vadd.f32 %v16312_v1, %v1834_v59  ;;  %v2212_v1 = vadd.s32 24, %v16328_v2  ;;  %v14212_v59 = vld [vmem:[#allocation6 + $0x150] sm:$0xff]  ;;  %v2213_v53 = vadd.s32 32, %v16328_v2  ;;  %v2820_v47 = vsel %vm560_vm1, %v2817_v46, %v2819_v35  ;;  %4028 = vmatpush.bf16.msrb.mxu3 %v14225_v56 }
 0x1af   : > { %v2659_v34 = vsel %vm336_vm0, %v16392_v54, %v16471_v13  ;;  %v16500_v17 = vpack.c.b16 %v2579_v6, %v2579_v6  ;;  %3761 = vmatpush.bf16.msra.mxu2 %v14212_v59  ;;  %v3226_v32 = vsel %vm720_vm2, %v3217_v5, %v16476_v16  ;;  %v2967_v5 = vpack.c.b16 %v2966_v50, %v2966_v50 }
 0x1b0   : > { %v16508_v54 = vcvt.s32.f32 %v2212_v1  ;;  %v16516_v6 = vcvt.s32.f32 %v2213_v53  ;;  %v3231_v53 = vshll.u32 %v14954_v48, 16  ;;  %vm2339_vm8 = vcmp.lt.f32.partialorder %v16478_v58, 16.5 }
 0x1b1   : > { %v2664_v59 = vshll.u32 %v16500_v17, 16  ;;  %vm2355_vm12 = vmand %vm2323_vm7, %vm2339_vm8  ;;  %v2821_v58 = vrot.slane %v16345_v14, 3  ;;  %v2215_v11 = vadd.s32 48, %v16328_v2 }
 0x1b2   : > { %21465 = vst [vmem:[#allocation15_spill] sm:$0xff] %v16508_v54  ;;  %v16533_v50 = vadd.f32 0.5, %v16516_v6 }
 0x1b3   : > { %v1805_v38 = vpop.f32.mrf.mxu2  ;;  %v16503_v63 = vpop.f32.mrf.mxu3  ;;  %21466 = vst [vmem:[#allocation16_spill] sm:$0xff] %v16516_v6  ;;  %v17205_v6 = vld [vmem:[%s15629_s30 + $0x6c] sm:$0xff] }
 0x1b4   : > { %v1835_v7 = vadd.f32 %v1805_v38, %v16323_v9  ;;  %v2136_v46 = vpop.f32.mrf.mxu0  ;;  %v1552_v29 = vpop.f32.mrf.mxu1  ;;  %v2306_v9 = vsub.f32 %v16426_v27, %v2290_v43  ;;  %v2307_v27 = vsub.f32 %v16441_v21, %v2291_v62  ;;  %v3228_v43 = vshrl.u32 %v14954_v48, 16 }
 0x1b5   : > { %v2176_v10 = vadd.f32 %v2136_v46, %v16284_v60  ;;  %v16519_v19 = vadd.f32 %v1552_v29, %v16348_v8  ;;  %v2661_v60 = vshrl.u32 %v16500_v17, 16  ;;  %v16528_v8 = vadd.f32 0.5, %v16508_v54 }
 0x1b6   : > { %3354 = vmatmul.bf16.vlgmr.msrb.gmra.mxu0 %v3226_v32  ;;  %v16524_v56 = vadd.f32 %v16340_v15, %v1835_v7  ;;  %vm2370_vm6 = vcmp.gt.f32.partialorder %v2306_v9, 1.0  ;;  %v3005_v15 = vshrl.u32 %v2967_v5, 16  ;;  %v3008_v21 = vshll.u32 %v2967_v5, 16  ;;  %v14238_v5 = vld [vmem:[#allocation6 + $0x1e8] sm:$0xff] }
 0x1b7   : > { %v2192_v1 = vmax.f32 %v2176_v10, 0.0  ;;  %2763 = vmatmul.bf16.gmra.mxu1 %v2659_v34  ;;  %vm2402_vm9 = vcmp.lt.f32.partialorder %v2306_v9, 17.0  ;;  %v2663_v34 = vrot.slane %v2661_v60, 2  ;;  %v2666_v7 = vrot.slane %v2664_v59, 3  ;;  %vm16539_vm10 = vmand %vm2354_vm15, %vm2370_vm6  ;;  %4181 = vmatpush.bf16.msra.mxu0 %v14238_v5 }
 0x1b8   : > { %2911 = vmatmul.bf16.gmra.mxu2 %v2820_v47  ;;  %3107 = vmatmul.bf16.gmra.mxu3 %v3003_v52  ;;  %vm2371_vm11 = vcmp.gt.f32.partialorder %v2307_v27, 1.0  ;;  %v3230_v32 = vrot.slane %v3228_v43, 3  ;;  %v3233_v62 = vrot.slane %v3231_v53, 4  ;;  %v2260_v29 = vmul.f32 0.055555556, %v16528_v8  ;;  %vm16556_vm13 = vmand %vm16539_vm10, %vm2402_vm9 }
 0x1b9   : > { %v2465_v31 = vmul.f32 %v12225_v55, %v2192_v1  ;;  %v2261_v48 = vmul.f32 0.055555556, %v16533_v50  ;;  %v14248_v1 = vld [vmem:[#allocation6 + $0x238] sm:$0xff]  ;;  %v3007_v59 = vrot.slane %v3005_v15, 3  ;;  %v3010_v43 = vrot.slane %v3008_v21, 4  ;;  %vm2387_vm14 = vmand %vm2355_vm12, %vm2371_vm11 }
 0x1ba   : > { %v2667_v53 = vor.u32 %v2666_v7, %v2663_v34  ;;  %4365 = vmatpush.bf16.msra.mxu1 %v14248_v1  ;;  %vm2403_vm15 = vcmp.lt.f32.partialorder %v2307_v27, 17.0  ;;  %v2276_v9 = vfloor.f32 %v2260_v29  ;;  %v2214_v15 = vadd.s32 40, %v16328_v2  ;;  %v14211_v34 = vld [vmem:[#allocation6 + $0x148] sm:$0xff]  ;;  %v14267_v7 = vld [vmem:[#allocation6 + $0x78] sm:$0xff] }
 0x1bb   : > { %v2481_v47 = vpack.c.bf16 %v2465_v31, %v2465_v31  ;;  %v1808_v38 = vpop.f32.mrf.mxu2  ;;  %v16537_v46 = vpop.f32.mrf.mxu3  ;;  %v16562_v31 = vld [vmem:[%s15629_s30 + $0x54] sm:$0xff]   ;;  %v3011_v5 = vor.u32 %v3010_v43, %v3007_v59  ;;  %v12226_v27 = vsel %vm16556_vm13, 1.0, %v21322_v20  ;;  %vm16579_vm6 = vmand %vm2387_vm14, %vm2403_vm15  ;;  %3762 = vmatpush.bf16.msra.mxu2 %v14211_v34  ;;  %4990 = vmatpush.bf16.msra.mxu3 %v14267_v7 }
 0x1bc   : > { %v2138_v52 = vpop.f32.mrf.mxu0  ;;  %v1836_v10 = vadd.f32 %v1808_v38, %v16356_v23  ;;  %v1554_v55 = vpop.f32.mrf.mxu1  ;;  %v2277_v38 = vfloor.f32 %v2261_v48  ;;  %v2292_v1 = vmul.f32 18.0, %v2276_v9  ;;  %v16596_v59 = vcvt.s32.f32 %v2214_v15 }
 0x1bd   : > { %2497 = vst [vmem:[#allocation2 + $0xc] sm:$0xf] %v2481_v47  ;;  %v16551_v60 = vadd.f32 %v1554_v55, %v16376_v18  ;;  %v16565_v47 = vld [vmem:[%s15629_s30 + $0x54] sm:$0xf0]  ;;  %v16568_v18 = vor.u32 %v3233_v62, %v3230_v32  ;;  %v2177_v21 = vadd.f32 %v2138_v52, %v16307_v36  ;;  %v2668_v36 = vsel %vm336_vm0, %v16471_v13, %v2667_v53 }
 0x1be   : > { %v16574_v55 = vadd.f32 %v16369_v44, %v1836_v10  ;;  %v2822_v44 = vsel %vm560_vm1, %v2819_v35, %v2821_v58  ;;  %21473 = vst [vmem:[#allocation17_spill] sm:$0xff] %v16596_v59  ;;  %v2293_v23 = vmul.f32 18.0, %v2277_v38  ;;  %v14955_v35 = vld [vmem:[%s15629_s30 + $0x60] sm:$0xff]   ;;  %v16600_v53 = vcvt.s32.f32 %v2215_v11 }
 0x1bf   : > { %v3235_v48 = vsel %vm720_vm2, %v16476_v16, %v16568_v18  ;;  %v2193_v13 = vmax.f32 %v2177_v21, 0.0  ;;  %v12227_v34 = vsel %vm16579_vm6, 1.0, %v21322_v20  ;;  %v3012_v16 = vsel %vm720_vm2, %v16473_v51, %v3011_v5 }
 0x1c0   : > { %21474 = vst [vmem:[#allocation18_spill] sm:$0xff] %v16600_v53  ;;  %vm2324_vm7 = vcmp.gt.f32.partialorder %v2276_v9, 0.5  ;;  %vm2340_vm8 = vcmp.lt.f32.partialorder %v2276_v9, 16.5  ;;  %v3237_v21 = vshrl.u32 %v14955_v35, 16  ;;  %v3240_v7 = vshll.u32 %v14955_v35, 16  ;;  %v14237_v9 = vld [vmem:[#allocation6 + $0x1e0] sm:$0xff] }
 0x1c1   : > { %v16615_v11 = vadd.f32 0.5, %v16596_v59  ;;  %v2309_v51 = vsub.f32 %v16533_v50, %v2293_v23  ;;  %v16619_v5 = vadd.f32 0.5, %v16600_v53  ;;  %vm2325_vm9 = vcmp.gt.f32.partialorder %v2277_v38, 0.5  ;;  %vm16629_vm11 = vmand %vm2324_vm7, %vm2340_vm8  ;;  %4182 = vmatpush.bf16.msra.mxu0 %v14237_v9 }
 0x1c2   : > { %vm2341_vm10 = vcmp.lt.f32.partialorder %v2277_v38, 16.5  ;;  %v3239_v50 = vrot.slane %v3237_v21, 3  ;;  %v3898_v35 = vshrl.u32 %v16562_v31, 16  ;;  %v14668_v38 = vunpack.c.l.b16 %v16410_v12 }
 0x1c3   : > { %v1810_v32 = vpop.f32.mrf.mxu2  ;;  %v16591_v29 = vpop.f32.mrf.mxu3  ;;  %vm2357_vm13 = vmand %vm2325_vm9, %vm2341_vm10  ;;  %vm2373_vm14 = vcmp.gt.f32.partialorder %v2309_v51, 1.0  ;;  %vm2405_vm8 = vcmp.lt.f32.partialorder %v2309_v51, 17.0  ;;  %v2217_v12 = vadd.s32 64, %v16328_v2 }
 0x1c4   : > { %v1837_v52 = vadd.f32 %v1810_v32, %v16380_v28  ;;  %v2141_v10 = vpop.f32.mrf.mxu0  ;;  %v1557_v43 = vpop.f32.mrf.mxu1  ;;  %v2466_v32 = vmul.f32 %v12226_v27, %v2193_v13  ;;  %vm16652_vm7 = vmand %vm2357_vm13, %vm2373_vm14 }
 0x1c5   : > { %v2178_v61 = vadd.f32 %v2141_v10, %v16326_v4  ;;  %v16603_v28 = vadd.f32 %v1557_v43, %v16415_v41  ;;  %v2308_v41 = vsub.f32 %v16528_v8, %v2292_v1  ;;  %v2262_v1 = vmul.f32 0.055555556, %v16615_v11  ;;  %vm16678_vm10 = vmand %vm16652_vm7, %vm2405_vm8 }
 0x1c6   : > { %3359 = vmatmul.bf16.gmra.mxu0 %v3235_v48  ;;  %v16611_v4 = vadd.f32 %v16405_v25, %v1837_v52  ;;  %v16622_v25 = vld [vmem:[%s15629_s30 + $0x5c] sm:$0xff]  ;;  %v3242_v48 = vrot.slane %v3240_v7, 4 }
 0x1c7   : > { %v2194_v15 = vmax.f32 %v2178_v61, 0.0  ;;  %2768 = vmatmul.bf16.gmra.mxu1 %v2668_v36  ;;  %v3900_v36 = vshll.u32 %v16562_v31, 16  ;;  %vm2372_vm12 = vcmp.gt.f32.partialorder %v2308_v41, 1.0  ;;  %v2263_v61 = vmul.f32 0.055555556, %v16619_v5 }
 0x1c8   : > { %2916 = vmatmul.bf16.gmra.mxu2 %v2822_v44  ;;  %3112 = vmatmul.bf16.gmra.mxu3 %v3012_v16  ;;  %v21318_v16 = vshll.u32 %v16622_v25, 16  ;;  %vm16646_vm15 = vmand %vm16629_vm11, %vm2372_vm12  ;;  %vm2404_vm6 = vcmp.lt.f32.partialorder %v2308_v41, 17.0  ;;  %v2823_v31 = vrot.slane %v16400_v57, 3  ;;  %v16657_v7 = vor.u32 %v3242_v48, %v3239_v50 }
 0x1c9   : > { %v2467_v62 = vmul.f32 %v12227_v34, %v2194_v15  ;;  %v3902_v34 = vrot.slane %v3900_v36, 1  ;;  %v14247_v15 = vld [vmem:[#allocation6 + $0x230] sm:$0xff]  ;;  %v2279_v36 = vfloor.f32 %v2263_v61  ;;  %vm16667_vm9 = vmand %vm16646_vm15, %vm2404_vm6  ;;  %v3427_v41 = vpack.c.b16 %v14668_v38, %v3185_v49 }
 0x1ca   : > { %4366 = vmatpush.bf16.msra.mxu1 %v14247_v15  ;;  %v16673_v48 = vrot.slane %v21318_v16, 1  ;;  %v2824_v51 = vsel %vm560_vm1, %v2821_v58, %v2823_v31  ;;  %v3244_v37 = vsel %vm720_vm2, %v16568_v18, %v16657_v7  ;;  %v14956_v15 = vld [vmem:[%s15629_s30 + $0x68] sm:$0xff]   ;;  %v12228_v14 = vsel %vm16667_vm9, 1.0, %v21322_v20 }
 0x1cb   : > { %v14634_v8 = vpack.c.bf16 %v2467_v62, %v2466_v32  ;;  %v1813_v44 = vpop.f32.mrf.mxu2  ;;  %v16625_v52 = vpop.f32.mrf.mxu3  ;;  %v2278_v32 = vfloor.f32 %v2262_v1  ;;  %v3903_v50 = vor.u32 %v3902_v34, %v3898_v35  ;;  %v12229_v58 = vsel %vm16678_vm10, 1.0, %v21322_v20 }
 0x1cc   : > { %v2143_v10 = vpop.f32.mrf.mxu0  ;;  %v1838_v13 = vadd.f32 %v1813_v44, %v16429_v26  ;;  %v1559_v43 = vpop.f32.mrf.mxu1  ;;  %v14266_v44 = vld [vmem:[#allocation6 + $0x70] sm:$0xff]  ;;  %v16701_v26 = vcvt.s32.f32 %v2217_v12  ;;  %vm2327_vm13 = vcmp.gt.f32.partialorder %v2279_v36, 0.5  ;;  %vm2343_vm14 = vcmp.lt.f32.partialorder %v2279_v36, 16.5 }
 0x1cd   : > { %14946 = vst [vmem:[#allocation2 + $0x10] sm:$0xff] %v14634_v8   ;;  %v16639_v23 = vadd.f32 %v1559_v43, %v16457_v0  ;;  %v2216_v0 = vadd.s32 56, %v16328_v2  ;;  %v2179_v62 = vadd.f32 %v2143_v10, %v16383_v30  ;;  %v14210_v8 = vld [vmem:[#allocation6 + $0x140] sm:$0xff]  ;;  %4991 = vmatpush.bf16.msra.mxu3 %v14266_v44  ;;  %v2294_v49 = vmul.f32 18.0, %v2278_v32  ;;  %vm2359_vm7 = vmand %vm2327_vm13, %vm2343_vm14 }
 0x1ce   : > { %v16662_v27 = vadd.f32 %v16447_v45, %v1838_v13  ;;  %3763 = vmatpush.bf16.msra.mxu2 %v14210_v8  ;;  %21486 = vst [vmem:[#allocation20_spill] sm:$0xff] %v16701_v26  ;;  %v3908_v18 = vsel %vm1388_vm3, %v3903_v50, %v16673_v48  ;;  %vm2326_vm11 = vcmp.gt.f32.partialorder %v2278_v32, 0.5  ;;  %vm2342_vm12 = vcmp.lt.f32.partialorder %v2278_v32, 16.5  ;;  %v14246_v32 = vld [vmem:[#allocation6 + $0x228] sm:$0xff] }
 0x1cf   : > { %v16684_v10 = vcvt.s32.f32 %v2216_v0  ;;  %v2195_v9 = vmax.f32 %v2179_v62, 0.0  ;;  %v2310_v21 = vsub.f32 %v16615_v11, %v2294_v49  ;;  %v3246_v62 = vshrl.u32 %v14956_v15, 16  ;;  %vm2358_vm15 = vmand %vm2326_vm11, %vm2342_vm12  ;;  %4367 = vmatpush.bf16.msra.mxu1 %v14246_v32 }
 0x1d0   : > { %v3249_v8 = vshll.u32 %v14956_v15, 16  ;;  %v16720_v50 = vadd.f32 0.5, %v16701_v26 }
 0x1d1   : > { %21485 = vst [vmem:[#allocation19_spill] sm:$0xff] %v16684_v10  ;;  %v2468_v44 = vmul.f32 %v12228_v14, %v2195_v9  ;;  %vm2374_vm6 = vcmp.gt.f32.partialorder %v2310_v21, 1.0  ;;  %v14236_v9 = vld [vmem:[#allocation6 + $0x1d8] sm:$0xff]  ;;  %vm2406_vm10 = vcmp.lt.f32.partialorder %v2310_v21, 17.0 }
 0x1d2   : > { %v2265_v49 = vmul.f32 0.055555556, %v16720_v50  ;;  %vm16737_vm9 = vmand %vm2358_vm15, %vm2374_vm6  ;;  %4183 = vmatpush.bf16.msra.mxu0 %v14236_v9  ;;  %v16795_v9 = vld [vmem:[%s15629_s30 + $0x4c] sm:$0xff] }
 0x1d3   : > { %v1815_v30 = vpop.f32.mrf.mxu2  ;;  %v16687_v13 = vpop.f32.mrf.mxu3  ;;  %vm16765_vm13 = vmand %vm16737_vm9, %vm2406_vm10 }
 0x1d4   : > { %v1839_v1 = vadd.f32 %v1815_v30, %v16460_v40  ;;  %v2146_v61 = vpop.f32.mrf.mxu0  ;;  %v16698_v34 = vpop.f32.mrf.mxu1  ;;  %v2295_v40 = vmul.f32 18.0, %v2279_v36  ;;  %v16723_v30 = vld [vmem:[%s15629_s30 + $0x64] sm:$0xff]  ;;  %v12230_v57 = vsel %vm16765_vm13, 1.0, %v21322_v20 }
 0x1d5   : > { %v2180_v35 = vadd.f32 %v2146_v61, %v16386_v39  ;;  %v16712_v39 = vadd.f32 0.5, %v16684_v10  ;;  %v3248_v61 = vrot.slane %v3246_v62, 3  ;;  %v16754_v62 = vfloor.f32 %v2265_v49  ;;  %v15145_v49 = vld [vmem:[%s15629_s30 + $0x54] sm:$0xff]  }
 0x1d6   : > { %3364 = vmatmul.bf16.gmra.mxu0 %v3244_v37  ;;  %v16715_v0 = vadd.f32 %v16503_v63, %v1839_v1  ;;  %v2311_v43 = vsub.f32 %v16619_v5, %v2295_v40  ;;  %v3251_v5 = vrot.slane %v3249_v8, 4  ;;  %v21315_v40 = vshll.u32 %v16723_v30, 16  ;;  %v14259_v8 = vld [vmem:[#allocation6 + $0x38] sm:$0xff] }
 0x1d7   : > { %v2196_v38 = vmax.f32 %v2180_v35, 0.0  ;;  %3499 = vmatmul.bf16.vlgmr.msrb.gmra.mxu1 %v3427_v41  ;;  %v2264_v41 = vmul.f32 0.055555556, %v16712_v39  ;;  %v21319_v35 = vshrl.u32 %v16622_v25, 16  ;;  %4866 = vmatpush.bf16.msrb.mxu2 %v14259_v8  ;;  %v14957_v8 = vld [vmem:[%s15629_s30 + $0x70] sm:$0xff]  }
 0x1d8   : > { %2921 = vmatmul.bf16.gmra.mxu2 %v2824_v51  ;;  %4029 = vmatmul.bf16.vlgmr.msrb.gmra.mxu3 %v3908_v18  ;;  %vm2375_vm8 = vcmp.gt.f32.partialorder %v2311_v43, 1.0  ;;  %vm2407_vm12 = vcmp.lt.f32.partialorder %v2311_v43, 17.0  ;;  %v16751_v18 = vor.u32 %v3251_v5, %v3248_v61  ;;  %v16774_v43 = vrot.slane %v21315_v40, 1 }
 0x1d9   : > { %v2469_v12 = vmul.f32 %v12229_v58, %v2196_v38  ;;  %v16741_v14 = vfloor.f32 %v2264_v41  ;;  %vm16746_vm11 = vmand %vm2359_vm7, %vm2375_vm8  ;;  %v2825_v58 = vrot.slane %v16500_v17, 3  ;;  %vm2329_vm7 = vcmp.gt.f32.partialorder %v16754_v62, 0.5 }
 0x1da   : > { %vm16778_vm14 = vmand %vm16746_vm11, %vm2407_vm12  ;;  %vm2345_vm8 = vcmp.lt.f32.partialorder %v16754_v62, 16.5 }
 0x1db   : > { %v14639_v63 = vpack.c.bf16 %v2469_v12, %v2468_v44  ;;  %v1818_v45 = vpop.f32.mrf.mxu2  ;;  %v16726_v11 = vpop.f32.mrf.mxu3  ;;  %v14265_v44 = vld [vmem:[#allocation6 + $0x68] sm:$0xff]  ;;  %v16757_v12 = vadd.s32 80, %v16328_v2  ;;  %v2296_v21 = vmul.f32 18.0, %v16741_v14  ;;  %v2826_v5 = vsel %vm560_vm1, %v2823_v31, %v2825_v58  ;;  %vm2361_vm11 = vmand %vm2329_vm7, %vm2345_vm8 }
 0x1dc   : > { %v2148_v1 = vpop.f32.mrf.mxu0  ;;  %v1840_v51 = vadd.f32 %v1818_v45, %v16519_v19  ;;  %v16731_v37 = vpop.f32.mrf.mxu1  ;;  %v16744_v19 = vadd.s32 72, %v16328_v2  ;;  %4992 = vmatpush.bf16.msra.mxu3 %v14265_v44  ;;  %v12231_v31 = vsel %vm16778_vm14, 1.0, %v21322_v20  ;;  %vm2328_vm15 = vcmp.gt.f32.partialorder %v16741_v14, 0.5 }
 0x1dd   : > { %14947 = vst [vmem:[#allocation2 + $0x18] sm:$0xff] %v14639_v63   ;;  %v2181_v38 = vadd.f32 %v2148_v1, %v16454_v24  ;;  %v3911_v24 = vor.u32 %v21319_v35, %v16673_v48  ;;  %v21313_v44 = vcvt.s32.f32 %v16757_v12  ;;  %vm2344_vm6 = vcmp.lt.f32.partialorder %v16741_v14, 16.5 }
 0x1de   : > { %21489 = vst [vmem:[#allocation21_spill] sm:$0xff] %v16744_v19  ;;  %v16760_v63 = vadd.f32 %v16537_v46, %v1840_v51  ;;  %v21314_v41 = vcvt.s32.f32 %v16744_v19  ;;  %v3253_v51 = vsel %vm720_vm2, %v16657_v7, %v16751_v18  ;;  %vm16842_vm10 = vmand %vm2328_vm15, %vm2344_vm6 }
 0x1df   : > { %21492 = vst [vmem:[#allocation22_spill] sm:$0xff] %v16757_v12  ;;  %v2197_v32 = vmax.f32 %v2181_v38, 0.0  ;;  %v3916_v7 = vsel %vm1388_vm3, %v3911_v24, %v16774_v43  ;;  %v2312_v38 = vsub.f32 %v16712_v39, %v2296_v21  ;;  %v3255_v24 = vshrl.u32 %v14957_v8, 16  ;;  %v16824_v21 = vld [vmem:[%s15629_s30 + $0x54] sm:$0xff] }
 0x1e0   : > { %v16818_v17 = vadd.f32 0.5, %v21314_v41  ;;  %v3640_v14 = vshll.u32 %v16824_v21, 16 }
 0x1e1   : > { %v2470_v46 = vmul.f32 %v12230_v57, %v2197_v32  ;;  %vm2376_vm9 = vcmp.gt.f32.partialorder %v2312_v38, 1.0  ;;  %vm2408_vm14 = vcmp.lt.f32.partialorder %v2312_v38, 17.0 }
 0x1e2   : > { %v2266_v32 = vmul.f32 0.055555556, %v16818_v17  ;;  %vm16861_vm13 = vmand %vm16842_vm10, %vm2376_vm9  ;;  %v16877_v40 = vrot.slane %v3640_v14, 1 }
 0x1e3   : > { %v1820_v45 = vpop.f32.mrf.mxu2  ;;  %v16785_v1 = vpop.f32.mrf.mxu3  ;;  %vm16883_vm7 = vmand %vm16861_vm13, %vm2408_vm14 }
 0x1e4   : > { %v1841_v48 = vadd.f32 %v1820_v45, %v16551_v60  ;;  %v2151_v61 = vpop.f32.mrf.mxu0  ;;  %v16798_v36 = vpop.f32.mrf.mxu1  ;;  %v2297_v60 = vmul.f32 18.0, %v16754_v62  ;;  %v3258_v45 = vshll.u32 %v14957_v8, 16  ;;  %v3257_v8 = vrot.slane %v3255_v24, 3 }
 0x1e5   : > { %v2182_v15 = vadd.f32 %v2151_v61, %v16464_v3  ;;  %v16828_v61 = vadd.f32 0.5, %v21313_v44  ;;  %v16865_v62 = vfloor.f32 %v2266_v32  ;;  %v14258_v32 = vld [vmem:[#allocation6 + $0x30] sm:$0xff] }
 0x1e6   : > { %v16812_v3 = vadd.f32 %v16591_v29, %v1841_v48  ;;  %3369 = vmatmul.bf16.gmra.mxu0 %v3253_v51  ;;  %v3635_v29 = vshll.u32 %v16795_v9, 16  ;;  %v2313_v39 = vsub.f32 %v16720_v50, %v2297_v60  ;;  %v3260_v57 = vrot.slane %v3258_v45, 4  ;;  %4867 = vmatpush.bf16.msrb.mxu2 %v14258_v32 }
 0x1e7   : > { %v2198_v58 = vmax.f32 %v2182_v15, 0.0  ;;  %3504 = vmatmul.bf16.gmra.mxu1 %v15145_v49  ;;  %v21317_v45 = vshrl.u32 %v16723_v30, 16  ;;  %vm2330_vm9 = vcmp.gt.f32.partialorder %v16865_v62, 0.5  ;;  %vm2346_vm10 = vcmp.lt.f32.partialorder %v16865_v62, 16.5 }
 0x1e8   : > { %2926 = vmatmul.bf16.gmra.mxu2 %v2826_v5  ;;  %4034 = vmatmul.bf16.gmra.mxu3 %v3916_v7  ;;  %v16833_v5 = vld [vmem:[%s15629_s30 + $0x6c] sm:$0xff]  ;;  %v3637_v7 = vrot.slane %v3635_v29, 1  ;;  %vm2377_vm12 = vcmp.gt.f32.partialorder %v2313_v39, 1.0  ;;  %v14245_v29 = vld [vmem:[#allocation6 + $0x220] sm:$0xff]  ;;  %vm2409_vm6 = vcmp.lt.f32.partialorder %v2313_v39, 17.0  ;;  %vm2362_vm14 = vmand %vm2330_vm9, %vm2346_vm10 }
 0x1e9   : > { %v2471_v48 = vmul.f32 %v12231_v31, %v2198_v58  ;;  %v3633_v31 = vshrl.u32 %v16795_v9, 16  ;;  %v21316_v9 = vshll.u32 %v16833_v5, 16  ;;  %vm16867_vm15 = vmand %vm2361_vm11, %vm2377_vm12  ;;  %4368 = vmatpush.bf16.msra.mxu1 %v14245_v29  ;;  %v15147_v39 = vld [vmem:[%s15629_s30 + $0x5c] sm:$0xff]  }
 0x1ea   : > { %vm16903_vm8 = vmand %vm16867_vm15, %vm2409_vm6 }
 0x1eb   : > { %v14644_v51 = vpack.c.bf16 %v2471_v48, %v2470_v46  ;;  %v1823_v49 = vpop.f32.mrf.mxu2  ;;  %v16836_v15 = vpop.f32.mrf.mxu3  ;;  %v2267_v46 = vmul.f32 0.055555556, %v16828_v61  ;;  %v14235_v48 = vld [vmem:[#allocation6 + $0x1d0] sm:$0xff]  ;;  %v3638_v41 = vor.u32 %v3637_v7, %v3633_v31 }
 0x1ec   : > { %v2153_v50 = vpop.f32.mrf.mxu0  ;;  %v16847_v58 = vpop.f32.mrf.mxu1  ;;  %v1842_v24 = vadd.f32 %v1823_v49, %v16603_v28  ;;  %4184 = vmatpush.bf16.msra.mxu0 %v14235_v48  ;;  %v16871_v28 = vor.u32 %v3260_v57, %v3257_v8  ;;  %v16874_v49 = vadd.s32 88, %v16328_v2  ;;  %v14264_v48 = vld [vmem:[#allocation6 + $0x60] sm:$0xff]  ;;  %v3919_v57 = vor.u32 %v21317_v45, %v16774_v43 }
 0x1ed   : > { %14948 = vst [vmem:[#allocation2 + $0x20] sm:$0xff] %v14644_v51   ;;  %v2183_v60 = vadd.f32 %v2153_v50, %v16524_v56  ;;  %v16879_v38 = vfloor.f32 %v2267_v46  ;;  %v16892_v56 = vrot.slane %v21316_v9, 1  ;;  %v16895_v50 = vadd.s32 96, %v16328_v2  ;;  %4993 = vmatpush.bf16.msra.mxu3 %v14264_v48 }
 0x1ee   : > { %21503 = vst [vmem:[#allocation23_spill] sm:$0xff] %v16874_v49  ;;  %v16898_v31 = vadd.f32 %v16625_v52, %v1842_v24  ;;  %v2298_v43 = vmul.f32 18.0, %v16865_v62  ;;  %v3262_v52 = vsel %vm720_vm2, %v16751_v18, %v16871_v28  ;;  %v14958_v24 = vld [vmem:[%s15629_s30 + $0x78] sm:$0xff]   ;;  %v21321_v44 = vcvt.s32.f32 %v16874_v49  ;;  %v14234_v62 = vld [vmem:[#allocation6 + $0x1c8] sm:$0xff] }
 0x1ef   : > { %21506 = vst [vmem:[#allocation24_spill] sm:$0xff] %v16895_v50  ;;  %v21320_v9 = vcvt.s32.f32 %v16895_v50  ;;  %v2199_v45 = vmax.f32 %v2183_v60, 0.0  ;;  %v2299_v48 = vmul.f32 18.0, %v16879_v38  ;;  %v12232_v18 = vsel %vm16883_vm7, 1.0, %v21322_v20  ;;  %v14257_v50 = vld [vmem:[#allocation6 + $0x28] sm:$0xff]  ;;  %v14263_v49 = vld [vmem:[#allocation6 + $0x58] sm:$0xff] }
 0x1f0   : > { %v3924_v60 = vsel %vm1388_vm3, %v3919_v57, %v16892_v56  ;;  %v3264_v35 = vshrl.u32 %v14958_v24, 16  ;;  %v3267_v8 = vshll.u32 %v14958_v24, 16  ;;  %v16939_v14 = vadd.f32 0.5, %v21321_v44  ;;  %4185 = vmatpush.bf16.msra.mxu0 %v14234_v62  ;;  %4868 = vmatpush.bf16.msrb.mxu2 %v14257_v50 }
 0x1f1   : > { %v2472_v57 = vmul.f32 %v12232_v18, %v2199_v45  ;;  %vm2331_vm11 = vcmp.gt.f32.partialorder %v16879_v38, 0.5  ;;  %vm2347_vm12 = vcmp.lt.f32.partialorder %v16879_v38, 16.5  ;;  %v16960_v45 = vld [vmem:[%s15629_s30 + $0x74] sm:$0xff]  ;;  %v16986_v38 = vadd.s32 104, %v16328_v2  ;;  %4994 = vmatpush.bf16.msra.mxu3 %v14263_v49 }
 0x1f2   : > { %vm2363_vm15 = vmand %vm2331_vm11, %vm2347_vm12 }
 0x1f3   : > { %v1825_v7 = vpop.f32.mrf.mxu2  ;;  %v16909_v29 = vpop.f32.mrf.mxu3  ;;  %21511 = vst [vmem:[#allocation25_spill] sm:$0xff] %v16986_v38 }
 0x1f4   : > { %v1843_v46 = vadd.f32 %v1825_v7, %v16639_v23  ;;  %v2156_v51 = vpop.f32.mrf.mxu0  ;;  %v16919_v32 = vpop.f32.mrf.mxu1  ;;  %v3643_v23 = vsel %vm1388_vm3, %v3638_v41, %v16877_v40  ;;  %v12233_v7 = vsel %vm16903_vm8, 1.0, %v21322_v20  ;;  %v2314_v41 = vsub.f32 %v16818_v17, %v2298_v43  ;;  %v16948_v43 = vld [vmem:[%s15629_s30 + $0x5c] sm:$0xff] }
 0x1f5   : > { %v2184_v16 = vadd.f32 %v2156_v51, %v16574_v55  ;;  %v2315_v17 = vsub.f32 %v16828_v61, %v2299_v48  ;;  %v3266_v61 = vrot.slane %v3264_v35, 3  ;;  %v3644_v35 = vshrl.u32 %v16824_v21, 16  ;;  %v17041_v21 = vld [vmem:[%s15629_s30 + $0x80] sm:$0xff]  }
 0x1f6   : > { %v16933_v55 = vadd.f32 %v16687_v13, %v1843_v46  ;;  %3374 = vmatmul.bf16.gmra.mxu0 %v3262_v52  ;;  %v16943_v13 = vadd.f32 0.5, %v21320_v9  ;;  %v16953_v46 = vld [vmem:[%s21309_s3] ss:$0 sm:$0xff]  ;;  %vm2378_vm13 = vcmp.gt.f32.partialorder %v2314_v41, 1.0  ;;  %vm2410_vm8 = vcmp.lt.f32.partialorder %v2314_v41, 17.0 }
 0x1f7   : > { %v2200_v51 = vmax.f32 %v2184_v16, 0.0  ;;  %3509 = vmatmul.bf16.gmra.mxu1 %v15147_v39  ;;  %v2774_v52 = vadd.f32 %v16953_v46, %v16698_v34  ;;  %v3269_v34 = vrot.slane %v3267_v8, 4  ;;  %vm2379_vm6 = vcmp.gt.f32.partialorder %v2315_v17, 1.0  ;;  %vm16981_vm7 = vmand %vm2362_vm14, %vm2378_vm13 }
 0x1f8   : > { %3764 = vmatmul.bf16.vlgmr.msra.gmra.mxu2 %v3643_v23  ;;  %4039 = vmatmul.bf16.gmra.mxu3 %v3924_v60  ;;  %v2269_v60 = vmul.f32 0.055555556, %v16943_v13  ;;  %vm16988_vm9 = vmand %vm2363_vm15, %vm2379_vm6  ;;  %vm2411_vm10 = vcmp.lt.f32.partialorder %v2315_v17, 17.0  ;;  %v2775_v20 = vadd.f32 %v16953_v46, %v16731_v37  ;;  %v3276_v49 = vshll.u32 %v17041_v21, 16 }
 0x1f9   : > { %v2473_v16 = vmul.f32 %v12233_v7, %v2200_v51  ;;  %v2268_v7 = vmul.f32 0.055555556, %v16939_v14  ;;  %vm17007_vm11 = vmand %vm16981_vm7, %vm2410_vm8 }
 0x1fa   : > { %v16996_v44 = vfloor.f32 %v2269_v60  ;;  %vm17027_vm12 = vmand %vm16988_vm9, %vm2411_vm10 }
 0x1fb   : > { %v14649_v39 = vpack.c.bf16 %v2473_v16, %v2472_v57  ;;  %v2892_v24 = vpop.f32.mrf.mxu2  ;;  %v16962_v48 = vpop.f32.mrf.mxu3  ;;  %v3648_v57 = vshll.u32 %v16948_v43, 16  ;;  %v16994_v9 = vfloor.f32 %v2268_v7  ;;  %v3646_v16 = vor.u32 %v3644_v35, %v16877_v40 }
 0x1fc   : > { %v2932_v23 = vadd.f32 %v2892_v24, %v2774_v52  ;;  %v2158_v18 = vpop.f32.mrf.mxu0  ;;  %v16970_v51 = vpop.f32.mrf.mxu1  ;;  %v14244_v52 = vld [vmem:[#allocation6 + $0x218] sm:$0xff]  ;;  %v16992_v24 = vor.u32 %v3269_v34, %v3266_v61  ;;  %v21516_v34 = vshrl.u32 %v16833_v5, 16  ;;  %v21522_v61 = vcvt.s32.f32 %v16986_v38 }
 0x1fd   : > { %14949 = vst [vmem:[#allocation2 + $0x28] sm:$0xff] %v14649_v39   ;;  %4369 = vmatpush.bf16.msra.mxu1 %v14244_v52  ;;  %v2185_v62 = vadd.f32 %v2158_v18, %v16611_v4  ;;  %v17002_v8 = vrot.slane %v3648_v57, 1  ;;  %v21517_v4 = vshll.u32 %v16960_v45, 16  ;;  %v17019_v18 = vadd.s32 112, %v16328_v2 }
 0x1fe   : > { %v3927_v37 = vor.u32 %v21516_v34, %v16892_v56  ;;  %v17022_v41 = vadd.f32 %v16726_v11, %v2932_v23  ;;  %v3271_v11 = vsel %vm720_vm2, %v16871_v28, %v16992_v24  ;;  %v15149_v23 = vld [vmem:[%s15629_s30 + $0x64] sm:$0xff]   ;;  %v2300_v17 = vmul.f32 18.0, %v16994_v9 }
 0x1ff   : > { %v17016_v40 = vrot.slane %v21517_v4, 1  ;;  %21518 = vst [vmem:[#allocation26_spill] sm:$0xff] %v17019_v18  ;;  %v2301_v39 = vmul.f32 18.0, %v16996_v44  ;;  %v2201_v34 = vmax.f32 %v2185_v62, 0.0  ;;  %v17064_v12 = vadd.f32 0.5, %v21522_v61 }
 0x200   : > { %v2316_v60 = vsub.f32 %v16939_v14, %v2300_v17  ;;  %vm2332_vm13 = vcmp.gt.f32.partialorder %v16994_v9, 0.5  ;;  %vm2348_vm14 = vcmp.lt.f32.partialorder %v16994_v9, 16.5  ;;  %v2776_v14 = vadd.f32 %v16953_v46, %v16798_v36 }
 0x201   : > { %v3932_v62 = vsel %vm1388_vm3, %v3927_v37, %v17016_v40  ;;  %v17071_v37 = vld [vmem:[%s15629_s30 + $0x64] sm:$0xff]  ;;  %vm2333_vm15 = vcmp.gt.f32.partialorder %v16996_v44, 0.5  ;;  %vm2349_vm6 = vcmp.lt.f32.partialorder %v16996_v44, 16.5  ;;  %vm17094_vm7 = vmand %vm2332_vm13, %vm2348_vm14 }
 0x202   : > { %vm2380_vm8 = vcmp.gt.f32.partialorder %v2316_v60, 1.0  ;;  %vm2365_vm9 = vmand %vm2333_vm15, %vm2349_vm6 }
 0x203   : > { %v2894_v7 = vpop.f32.mrf.mxu2  ;;  %v17032_v57 = vpop.f32.mrf.mxu3 }
 0x204   : > { %v2933_v35 = vadd.f32 %v2894_v7, %v2775_v20  ;;  %v2161_v52 = vpop.f32.mrf.mxu0  ;;  %v17044_v50 = vpop.f32.mrf.mxu1  ;;  %v3651_v20 = vsel %vm1388_vm3, %v3646_v16, %v17002_v8  ;;  %v21521_v7 = vmov 0.0   ;;  %v3273_v16 = vshrl.u32 %v17041_v21, 16 }
 0x205   : > { %v2186_v4 = vadd.f32 %v2161_v52, %v16662_v27  ;;  %v12234_v28 = vsel %vm17007_vm11, 1.0, %v21521_v7  ;;  %v12235_v56 = vsel %vm17027_vm12, 1.0, %v21521_v7  ;;  %vm17115_vm11 = vmand %vm17094_vm7, %vm2380_vm8  ;;  %vm2412_vm12 = vcmp.lt.f32.partialorder %v2316_v60, 17.0 }
 0x206   : > { %v17058_v27 = vadd.f32 %v16785_v1, %v2933_v35  ;;  %3379 = vmatmul.bf16.gmra.mxu0 %v3271_v11  ;;  %v2317_v1 = vsub.f32 %v16943_v13, %v2301_v39  ;;  %v2474_v35 = vmul.f32 %v12234_v28, %v2201_v34  ;;  %v17085_v13 = vld [vmem:[%s15629_s30 + $0x7c] sm:$0xff]  ;;  %v3278_v34 = vrot.slane %v3276_v49, 4  ;;  %vm17147_vm15 = vmand %vm17115_vm11, %vm2412_vm12 }
 0x207   : > { %v2202_v52 = vmax.f32 %v2186_v4, 0.0  ;;  %3514 = vmatmul.bf16.gmra.mxu1 %v15149_v23  ;;  %v21523_v4 = vcvt.s32.f32 %v17019_v18  ;;  %v17078_v23 = vadd.s32 120, %v16328_v2  ;;  %v12236_v53 = vsel %vm17147_vm15, 1.0, %v21521_v7 }
 0x208   : > { %3769 = vmatmul.bf16.gmra.mxu2 %v3651_v20  ;;  %4044 = vmatmul.bf16.gmra.mxu3 %v3932_v62  ;;  %v2270_v20 = vmul.f32 0.055555556, %v17064_v12  ;;  %vm2381_vm10 = vcmp.gt.f32.partialorder %v2317_v1, 1.0  ;;  %vm2413_vm14 = vcmp.lt.f32.partialorder %v2317_v1, 17.0 }
 0x209   : > { %v2475_v11 = vmul.f32 %v12235_v56, %v2202_v52  ;;  %v17075_v61 = vadd.f32 0.5, %v21523_v4  ;;  %21524 = vst [vmem:[#allocation27_spill] sm:$0xff] %v17078_v23  ;;  %v3275_v56 = vrot.slane %v3273_v16, 3  ;;  %v3652_v52 = vshrl.u32 %v16948_v43, 16  ;;  %vm17123_vm13 = vmand %vm2365_vm9, %vm2381_vm10  ;;  %v17133_v4 = vld [vmem:[#allocation2 + $0x10] sm:$0xff] }
 0x20a   : > { %v3656_v16 = vshll.u32 %v17071_v37, 16  ;;  %v17121_v18 = vfloor.f32 %v2270_v20  ;;  %v21531_v20 = vcvt.s32.f32 %v17078_v23  ;;  %vm17166_vm6 = vmand %vm17123_vm13, %vm2413_vm14 }
 0x20b   : > { %v14654_v17 = vpack.c.bf16 %v2475_v11, %v2474_v35  ;;  %v2897_v39 = vpop.f32.mrf.mxu2  ;;  %v17088_v62 = vpop.f32.mrf.mxu3  ;;  %v2271_v9 = vmul.f32 0.055555556, %v17075_v61  ;;  %v17108_v35 = vld [vmem:[%s15629_s30 + $0x84] sm:$0xff]   ;;  %v14233_v11 = vld [vmem:[#allocation6 + $0x1c0] sm:$0xff]  ;;  %v17119_v44 = vor.u32 %v3278_v34, %v3275_v56 }
 0x20c   : > { %v2934_v28 = vadd.f32 %v2897_v39, %v2776_v14  ;;  %v2163_v2 = vpop.f32.mrf.mxu0  ;;  %v17100_v49 = vpop.f32.mrf.mxu1  ;;  %4186 = vmatpush.bf16.msra.mxu0 %v14233_v11  ;;  %v3654_v14 = vor.u32 %v3652_v52, %v17002_v8  ;;  %v17128_v43 = vrot.slane %v3656_v16, 1  ;;  %v17131_v36 = vunpack.c.h.b16 %v17108_v35 }
 0x20d   : > { %14950 = vst [vmem:[#allocation2 + $0x30] sm:$0xff] %v14654_v17   ;;  %v14243_v17 = vld [vmem:[#allocation6 + $0x210] sm:$0xff]  ;;  %v2187_v56 = vadd.f32 %v2163_v2, %v16715_v0  ;;  %v17136_v34 = vfloor.f32 %v2271_v9  ;;  %v17140_v11 = vadd.f32 0.5, %v21531_v20  ;;  %v2777_v8 = vadd.f32 %v16953_v46, %v16847_v58 }
 0x20e   : > { %4370 = vmatpush.bf16.msra.mxu1 %v14243_v17  ;;  %v21534_v0 = vshrl.u32 %v16960_v45, 16  ;;  %v21535_v16 = vshll.u32 %v17085_v13, 16  ;;  %v17159_v17 = vadd.f32 %v16836_v15, %v2934_v28  ;;  %v17161_v20 = vld [vmem:[#allocation2 + $0x8] sm:$0xff]  ;;  %v2302_v39 = vmul.f32 18.0, %v17121_v18 }
 0x20f   : > { %21536 = vst [vmem:[#allocation28_spill] sm:$0xff] %v17161_v20  ;;  %v15151_v28 = vld [vmem:[%s15629_s30 + $0x6c] sm:$0xff]   ;;  %v3659_v1 = vsel %vm1388_vm3, %v3654_v14, %v17128_v43  ;;  %v3209_v38 = vpack.c.b16 %v17131_v36, %v17131_v36  ;;  %v2203_v19 = vmax.f32 %v2187_v56, 0.0  ;;  %v12237_v14 = vsel %vm17166_vm6, 1.0, %v21521_v7 }
 0x210   : > { %v3935_v2 = vor.u32 %v21534_v0, %v17016_v40  ;;  %v17156_v9 = vrot.slane %v21535_v16, 1  ;;  %v3280_v40 = vsel %vm720_vm2, %v16992_v24, %v17119_v44  ;;  %v2303_v24 = vmul.f32 18.0, %v17136_v34 }
 0x211   : > { %v17197_v59 = vsub.f32 %v17064_v12, %v2302_v39  ;;  %vm2334_vm7 = vcmp.gt.f32.partialorder %v17121_v18, 0.5  ;;  %vm2350_vm8 = vcmp.lt.f32.partialorder %v17121_v18, 16.5  ;;  %v3285_v60 = vshll.u32 %v3209_v38, 16  ;;  %v17244_v18 = vld [vmem:[#allocation2 + $0x20] sm:$0xff] }
 0x212   : > { %v3940_v56 = vsel %vm1388_vm3, %v3935_v2, %v17156_v9  ;;  %v3282_v2 = vshrl.u32 %v3209_v38, 16  ;;  %v2778_v38 = vadd.f32 %v16953_v46, %v16919_v32  ;;  %vm2335_vm9 = vcmp.gt.f32.partialorder %v17136_v34, 0.5  ;;  %vm17232_vm12 = vmand %vm2334_vm7, %vm2350_vm8 }
 0x213   : > { %v2899_v58 = vpop.f32.mrf.mxu2  ;;  %v17174_v16 = vpop.f32.mrf.mxu3  ;;  %vm2351_vm10 = vcmp.lt.f32.partialorder %v17136_v34, 16.5  ;;  %vm2382_vm11 = vcmp.gt.f32.partialorder %v17197_v59, 1.0  ;;  %vm2414_vm6 = vcmp.lt.f32.partialorder %v17197_v59, 17.0  ;;  %v6636_v32 = vrot.slane %v17244_v18, 3 }
 0x214   : > { %v2935_v0 = vadd.f32 %v2899_v58, %v2777_v8  ;;  %v2166_v15 = vpop.f32.mrf.mxu0  ;;  %v17183_v10 = vpop.f32.mrf.mxu1  ;;  %v2272_v8 = vmul.f32 0.055555556, %v17140_v11  ;;  %v14256_v58 = vld [vmem:[#allocation6 + $0x20] sm:$0xff]  ;;  %vm2367_vm13 = vmand %vm2335_vm9, %vm2351_vm10 }
 0x215   : > { %v2188_v26 = vadd.f32 %v2166_v15, %v16760_v63  ;;  %v14262_v63 = vld [vmem:[#allocation6 + $0x50] sm:$0xff]  ;;  %v21342_v15 = vrot.slane %v17161_v20, 3  ;;  %4869 = vmatpush.bf16.msrb.mxu2 %v14256_v58  ;;  %v14334_v58 = vld [vmem:[#allocation2 + $0x18] sm:$0xff]  ;;  %vm2398_vm15 = vmand %vm17232_vm12, %vm2382_vm11 }
 0x216   : > { %3384 = vmatmul.bf16.gmra.mxu0 %v3280_v40  ;;  %v17201_v52 = vadd.f32 %v16909_v29, %v2935_v0  ;;  %v2476_v40 = vmul.f32 %v12236_v53, %v2203_v19  ;;  %v2319_v29 = vsub.f32 %v17075_v61, %v2303_v24  ;;  %v17215_v0 = vfloor.f32 %v2272_v8  ;;  %v17222_v20 = vld [vmem:[%s15629_s30 + $0x84] sm:$0xff]  ;;  %4995 = vmatpush.bf16.msra.mxu3 %v14262_v63  ;;  %vm17273_vm9 = vmand %vm2398_vm15, %vm2414_vm6 }
 0x217   : > { %v2204_v23 = vmax.f32 %v2188_v26, 0.0  ;;  %3519 = vmatmul.bf16.gmra.mxu1 %v15151_v28  ;;  %v21539_v26 = vrot.slane %v17133_v4, 3  ;;  %v14242_v28 = vld [vmem:[#allocation6 + $0x208] sm:$0xff]  ;;  %v3660_v61 = vshrl.u32 %v17071_v37, 16  ;;  %v3664_v63 = vshll.u32 %v17205_v6, 16 }
 0x218   : > { %3774 = vmatmul.bf16.gmra.mxu2 %v3659_v1  ;;  %4049 = vmatmul.bf16.gmra.mxu3 %v3940_v56  ;;  %v14291_v1 = vld [vmem:[#allocation6 + $0x138] sm:$0xff]  ;;  %v3287_v56 = vrot.slane %v3285_v60, 4  ;;  %vm2383_vm14 = vcmp.gt.f32.partialorder %v2319_v29, 1.0  ;;  %vm2415_vm8 = vcmp.lt.f32.partialorder %v2319_v29, 17.0  ;;  %vm2336_vm10 = vcmp.gt.f32.partialorder %v17215_v0, 0.5 }
 0x219   : > { %v17212_v12 = vsel %vm560_vm1, %v21342_v15, %v21539_v26  ;;  %v2477_v39 = vmul.f32 %v12237_v14, %v2204_v23  ;;  %4371 = vmatpush.bf16.msra.mxu1 %v14242_v28  ;;  %5440 = vmatpush.bf16.msrb.mxu0 %v14291_v1  ;;  %v3284_v14 = vrot.slane %v3282_v2, 3  ;;  %v2304_v26 = vmul.f32 18.0, %v17215_v0  ;;  %v14255_v60 = vld [vmem:[#allocation6 + $0x18] sm:$0xff]  ;;  %v14261_v28 = vld [vmem:[#allocation6 + $0x48] sm:$0xff]  ;;  %vm17258_vm7 = vmand %vm2367_vm13, %vm2383_vm14 }
 0x21a   : > { %v21343_v2 = vshll.u32 %v17222_v20, 16  ;;  %4870 = vmatpush.bf16.msrb.mxu2 %v14255_v60  ;;  %4996 = vmatpush.bf16.msra.mxu3 %v14261_v28  ;;  %vm2352_vm11 = vcmp.lt.f32.partialorder %v17215_v0, 16.5  ;;  %vm17289_vm12 = vmand %vm17258_vm7, %vm2415_vm8  ;;  %v17307_v28 = vld [vmem:[#allocation2 + $0x28] sm:$0xff] }
 0x21b   : > { %v14659_v53 = vpack.c.bf16 %v2477_v39, %v2476_v40  ;;  %v2902_v19 = vpop.f32.mrf.mxu2  ;;  %v17226_v24 = vpop.f32.mrf.mxu3  ;;  %v6634_v40 = vrot.slane %v14334_v58, 3  ;;  %v21346_v39 = vshrl.u32 %v17085_v13, 16  ;;  %v3288_v58 = vor.u32 %v3287_v56, %v3284_v14  ;;  %vm2368_vm13 = vmand %vm2336_vm10, %vm2352_vm11  ;;  %v14241_v14 = vld [vmem:[#allocation6 + $0x200] sm:$0xff]  ;;  %v3837_v15 = vld [vmem:[%s15629_s30 + $0x94] sm:$0x1] }
 0x21c   : > { %v2936_v23 = vadd.f32 %v2902_v19, %v2778_v38  ;;  %v2168_v8 = vpop.f32.mrf.mxu0  ;;  %v17237_v37 = vpop.f32.mrf.mxu1  ;;  %v2779_v38 = vadd.f32 %v16953_v46, %v16970_v51  ;;  %v2320_v19 = vsub.f32 %v17140_v11, %v2304_v26  ;;  %v15153_v26 = vld [vmem:[%s15629_s30 + $0x74] sm:$0xff]   ;;  %v21347_v11 = vrot.slane %v17307_v28, 3 }
 0x21d   : > { %14951 = vst [vmem:[#allocation2 + $0x38] sm:$0xff] %v14659_v53   ;;  %v3662_v53 = vor.u32 %v3660_v61, %v17128_v43  ;;  %v2189_v51 = vadd.f32 %v2168_v8, %v16812_v3  ;;  %v3943_v43 = vor.u32 %v21346_v39, %v17156_v9  ;;  %v17282_v3 = vrot.slane %v21343_v2, 1  ;;  %4372 = vmatpush.bf16.msra.mxu1 %v14241_v14  ;;  %v17352_v14 = vld [vmem:[%s15629_s30 + $0x5c] sm:$0xff] }
 0x21e   : > { %v17249_v1 = vadd.f32 %v16962_v48, %v2936_v23  ;;  %v17263_v48 = vrot.slane %v3664_v63, 1  ;;  %v21544_v23 = vrot.slane %v17133_v4, 3  ;;  %v17294_v61 = vsel %vm560_vm1, %v6634_v40, %v6636_v32 }
 0x21f   : > { %21550 = vst [vmem:[#allocation30_spill] sm:$0xff] %v17294_v61  ;;  %v3289_v63 = vsel %vm720_vm2, %v17119_v44, %v3288_v58  ;;  %v2205_v0 = vmax.f32 %v2189_v51, 0.0  ;;  %vm2384_vm14 = vcmp.gt.f32.partialorder %v2320_v19, 1.0  ;;  %v12239_v44 = vsel %vm17289_vm12, 1.0, %v21521_v7 }
 0x220   : > { %v17270_v59 = vsel %vm560_vm1, %v21544_v23, %v6634_v40  ;;  %v3667_v60 = vsel %vm1388_vm3, %v3662_v53, %v17263_v48  ;;  %v15309_v40 = vld [vmem:[%s15629_s30 + $0x54] sm:$0xe]  ;;  %vm2400_vm15 = vmand %vm2368_vm13, %vm2384_vm14  ;;  %vm2416_vm6 = vcmp.lt.f32.partialorder %v2320_v19, 17.0 }
 0x221   : > { %21545 = vst [vmem:[#allocation29_spill] sm:$0xff] %v17270_v59  ;;  %v17321_v23 = vld [vmem:[%s15629_s30 + $0x74] sm:$0xff]  ;;  %vm2432_vm7 = vmand %vm2400_vm15, %vm2416_vm6  ;;  %v17480_v59 = vld [vmem:[%s15629_s30 + $0x88] sm:$0xff] }
 0x223   : > { %v2904_v4 = vpop.f32.mrf.mxu2  ;;  %v17296_v8 = vpop.f32.mrf.mxu3 }
 0x224   : > { %v2937_v9 = vadd.f32 %v2904_v4, %v2779_v38  ;;  %v2171_v56 = vpop.f32.mrf.mxu0  ;;  %v17302_v18 = vpop.f32.mrf.mxu1  ;;  %v12238_v38 = vsel %vm17273_vm9, 1.0, %v21521_v7  ;;  %v14290_v4 = vld [vmem:[#allocation6 + $0x130] sm:$0xff] }
 0x225   : > { %v2190_v29 = vadd.f32 %v2171_v56, %v16898_v31  ;;  %v3948_v31 = vsel %vm1388_vm3, %v3943_v43, %v17282_v3  ;;  %v2478_v53 = vmul.f32 %v12238_v38, %v2205_v0  ;;  %v2780_v43 = vadd.f32 %v16953_v46, %v17044_v50  ;;  %5441 = vmatpush.bf16.msrb.mxu0 %v14290_v4 }
 0x226   : > { %v17318_v34 = vadd.f32 %v17032_v57, %v2937_v9  ;;  %3389 = vmatmul.bf16.gmra.mxu0 %v3289_v63  ;;  %v17327_v57 = vld [vmem:[%s15629_s30 + $0x8c] sm:$0xff]  ;;  %v17332_v0 = vor.u32 %v15309_v40, %v16565_v47  ;;  %v3668_v50 = vshrl.u32 %v17205_v6, 16  ;;  %v3672_v38 = vshll.u32 %v17321_v23, 16 }
 0x227   : > { %v2206_v58 = vmax.f32 %v2190_v29, 0.0  ;;  %3524 = vmatmul.bf16.gmra.mxu1 %v15153_v26  ;;  %v21344_v47 = vshll.u32 %v17327_v57, 16  ;;  %v14254_v40 = vld [vmem:[#allocation6 + $0x10] sm:$0xff] }
 0x228   : > { %3779 = vmatmul.bf16.gmra.mxu2 %v3667_v60  ;;  %4054 = vmatmul.bf16.gmra.mxu3 %v3948_v31  ;;  %v12240_v31 = vsel %vm2432_vm7, 1.0, %v21521_v7 }
 0x229   : > { %v2479_v51 = vmul.f32 %v12239_v44, %v2206_v58  ;;  %v17342_v44 = vsel %vm560_vm1, %v6636_v32, %v21347_v11  ;;  %v21345_v58 = vshrl.u32 %v17222_v20, 16  ;;  %v21348_v32 = vrot.slane %v17352_v14, 1  ;;  %4871 = vmatpush.bf16.msrb.mxu2 %v14254_v40 }
 0x22a   : > { %21551 = vst [vmem:[#allocation31_spill] sm:$0xff] %v17342_v44 }
 0x22b   : > { %v14664_v9 = vpack.c.bf16 %v2479_v51, %v2478_v53  ;;  %v2907_v56 = vpop.f32.mrf.mxu2  ;;  %v17329_v63 = vpop.f32.mrf.mxu3  ;;  %v14260_v53 = vld [vmem:[#allocation6 + $0x40] sm:$0xff]  ;;  %v4106_v51 = vrot.slane %v17332_v0, 1 }
 0x22c   : > { %v2938_v19 = vadd.f32 %v2907_v56, %v2780_v43  ;;  %v2173_v26 = vpop.f32.mrf.mxu0  ;;  %v17335_v60 = vpop.f32.mrf.mxu1  ;;  %4997 = vmatpush.bf16.msra.mxu3 %v14260_v53  ;;  %v3670_v43 = vor.u32 %v3668_v50, %v17263_v48  ;;  %v2781_v56 = vadd.f32 %v16953_v46, %v17100_v49  ;;  %v15154_v48 = vld [vmem:[%s15629_s30 + $0x7c] sm:$0xff]  }
 0x22d   : > { %14952 = vst [vmem:[#allocation2 + $0x40] sm:$0xff] %v14664_v9   ;;  %v2191_v29 = vadd.f32 %v2173_v26, %v16933_v55  ;;  %v3674_v9 = vrot.slane %v3672_v38, 1  ;;  %v4108_v49 = vsel %vm1865_vm4, %v4106_v51, %v21348_v32  ;;  %v17383_v51 = vld [vmem:[%s15629_s30 + $0x7c] sm:$0xff] }
 0x22e   : > { %v17348_v55 = vadd.f32 %v17088_v62, %v2938_v19  ;;  %v3951_v62 = vor.u32 %v21345_v58, %v17282_v3  ;;  %v3955_v19 = vrot.slane %v21344_v47, 1  ;;  %v17406_v47 = vld [vmem:[#allocation2 + $0x30] sm:$0xff] }
 0x22f   : > { %v2207_v6 = vmax.f32 %v2191_v29, 0.0  ;;  %v3675_v38 = vsel %vm1388_vm3, %v3670_v43, %v3674_v9  ;;  %v21351_v58 = vrot.slane %v17406_v47, 3 }
 0x230   : > { %v3956_v53 = vsel %vm1388_vm3, %v3951_v62, %v3955_v19 }
 0x231   : > { %v2480_v4 = vmul.f32 %v12240_v31, %v2207_v6  ;;  %v3887_v6 = vunpack.c.l.b16 %v3837_v15 }
 0x233   : > { %v2496_v26 = vpack.c.bf16 %v2480_v4, %v2480_v4  ;;  %v2909_v29 = vpop.f32.mrf.mxu2  ;;  %v17364_v40 = vpop.f32.mrf.mxu3  ;;  %v17387_v43 = vpack.c.b16 %v3887_v6, %v3887_v6 }
 0x234   : > { %v2939_v2 = vadd.f32 %v2909_v29, %v2781_v56  ;;  %v3355_v31 = vpop.f32.mrf.mxu0  ;;  %v17370_v50 = vpop.f32.mrf.mxu1  ;;  %v17380_v56 = vld [vmem:[#allocation2 + $0x1c] sm:$0xff]  ;;  %v14304_v29 = vld [vmem:[#allocation6 + $0x178] sm:$0xff] }
 0x235   : > { %2512 = vst [vmem:[#allocation2 + $0x48] sm:$0xf] %v2496_v26  ;;  %v17373_v3 = vadd.f32 %v3355_v31, %v17022_v41  ;;  %v14289_v26 = vld [vmem:[#allocation6 + $0x128] sm:$0xff]  ;;  %v2782_v41 = vadd.f32 %v16953_v46, %v17183_v10  ;;  %5625 = vmatpush.bf16.msrb.mxu1 %v14304_v29  ;;  %v21349_v10 = vshrl.u32 %v17380_v56, 16 }
 0x236   : > { %v17378_v4 = vadd.f32 %v17174_v16, %v2939_v2  ;;  %4187 = vmatmul.bf16.vlgmr.msra.gmra.mxu0 %v4108_v49  ;;  %21552 = vst [vmem:[#allocation32_spill] sm:$0xff] %v17380_v56  ;;  %v3676_v49 = vshrl.u32 %v17321_v23, 16  ;;  %v14253_v29 = vld [vmem:[#allocation6 + $0x8] sm:$0xff]  ;;  %v7910_v23 = vld [vmem:[#allocation2 + $0x14] sm:$0xe] }
 0x237   : > { %3529 = vmatmul.bf16.gmra.mxu1 %v15154_v48  ;;  %5442 = vmatpush.bf16.msrb.mxu0 %v14289_v26  ;;  %v3961_v26 = vshll.u32 %v17387_v43, 16  ;;  %v8098_v6 = vrot.slane %v21349_v10, 1  ;;  %v7929_v61 = vunpack.c.l.b16 %v7910_v23 }
 0x238   : > { %3784 = vmatmul.bf16.gmra.mxu2 %v3675_v38  ;;  %4059 = vmatmul.bf16.gmra.mxu3 %v3956_v53  ;;  %v3680_v38 = vshll.u32 %v17383_v51, 16  ;;  %v17398_v53 = vld [vmem:[#allocation2 + $0x14] sm:$0xff]   ;;  %v3678_v11 = vor.u32 %v3676_v49, %v3674_v9 }
 0x239   : > { %21553 = vst [vmem:[#allocation33_spill] sm:$0xff] %v17398_v53  ;;  %4872 = vmatpush.bf16.msrb.mxu2 %v14253_v29  ;;  %v21350_v39 = vunpack.c.h.b16 %v17398_v53  ;;  %v3963_v44 = vrot.slane %v3961_v26, 1  ;;  %v21555_v29 = vshll.u32 %v17380_v56, 16 }
 0x23a   : > { %v3682_v32 = vrot.slane %v3680_v38, 1 }
 0x23b   : > { %v2912_v62 = vpop.f32.mrf.mxu2  ;;  %v17389_v15 = vpop.f32.mrf.mxu3  ;;  %v17431_v23 = vpack.c.b16 %v21350_v39, %v7929_v61 }
 0x23c   : > { %v2940_v16 = vadd.f32 %v2912_v62, %v2782_v41  ;;  %v3357_v2 = vpop.f32.mrf.mxu0  ;;  %v17391_v31 = vpop.f32.mrf.mxu1  ;;  %v14283_v41 = vld [vmem:[#allocation6 + $0xf8] sm:$0xff] }
 0x23d   : > { %v17394_v48 = vadd.f32 %v3357_v2, %v17058_v27  ;;  %v14693_v2 = vunpack.c.h.b16 %v17041_v21  ;;  %5324 = vmatpush.bf16.msrb.mxu3 %v14283_v41  ;;  %v8099_v41 = vrot.slane %v21555_v29, 2  ;;  %21558 = vst [vmem:[#allocation34_spill] sm:$0xff] %v17431_v23 }
 0x23e   : > { %v17404_v62 = vadd.f32 %v17226_v24, %v2940_v16  ;;  %v2783_v24 = vadd.f32 %v16953_v46, %v17237_v37  ;;  %v21554_v16 = vshrl.u32 %v17327_v57, 16  ;;  %v21556_v37 = vrot.slane %v16723_v30, 1 }
 0x23f   : > { %v3434_v10 = vpack.c.b16 %v17131_v36, %v14693_v2  ;;  %v21559_v36 = vrot.slane %v17307_v28, 3  ;;  %v4268_v28 = vshll.u32 %v17332_v0, 16 }
 0x240   : > { %v3959_v27 = vor.u32 %v21554_v16, %v3955_v19  ;;  %v21557_v19 = vrot.slane %v17352_v14, 1  ;;  %v17446_v14 = vor.u32 %v8099_v41, %v8098_v6  ;;  %v8091_v6 = vshrl.u32 %v17431_v23, 16 }
 0x241   : > { %v17444_v2 = vsel %vm560_vm1, %v21559_v36, %v21351_v58  ;;  %v8094_v41 = vshll.u32 %v17431_v23, 16  ;;  %v3684_v36 = vshrl.u32 %v17383_v51, 16 }
 0x242   : > { %v4110_v26 = vsel %vm1865_vm4, %v21557_v19, %v21556_v37  ;;  %21560 = vst [vmem:[#allocation35_spill] sm:$0xff] %v17444_v2  ;;  %v3964_v29 = vsel %vm1388_vm3, %v3959_v27, %v3963_v44  ;;  %v17453_v37 = vld [vmem:[%s15629_s30 + $0x84] sm:$0xff]  ;;  %v14288_v44 = vld [vmem:[#allocation6 + $0x120] sm:$0xff] }
 0x243   : > { %v2914_v21 = vpop.f32.mrf.mxu2  ;;  %v17421_v49 = vpop.f32.mrf.mxu3  ;;  %v14282_v27 = vld [vmem:[#allocation6 + $0xf0] sm:$0xff]  ;;  %v3688_v39 = vshll.u32 %v17453_v37, 16  ;;  %5443 = vmatpush.bf16.msrb.mxu0 %v14288_v44 }
 0x244   : > { %v2941_v9 = vadd.f32 %v2914_v21, %v2783_v24  ;;  %v3360_v38 = vpop.f32.mrf.mxu0  ;;  %v17433_v16 = vpop.f32.mrf.mxu1  ;;  %v3683_v21 = vsel %vm1388_vm3, %v3678_v11, %v3682_v32  ;;  %v4908_v11 = vld [vmem:[%s15629_s30 + $0x80] sm:$0x8]  ;;  %5325 = vmatpush.bf16.msrb.mxu3 %v14282_v27 }
 0x245   : > { %v17436_v24 = vadd.f32 %v3360_v38, %v17159_v17  ;;  %v4265_v17 = vshrl.u32 %v17332_v0, 16  ;;  %v17458_v38 = vld [vmem:[#allocation2 + $0x24] sm:$0xff]  ;;  %v17490_v27 = vrot.slane %v3688_v39, 1 }
 0x246   : > { %v17450_v61 = vadd.f32 %v17296_v8, %v2941_v9  ;;  %4192 = vmatmul.bf16.gmra.mxu0 %v4110_v26  ;;  %21561 = vst [vmem:[#allocation36_spill] sm:$0xff] %v17458_v38  ;;  %v14303_v8 = vld [vmem:[#allocation6 + $0x170] sm:$0xff]  ;;  %v21562_v9 = vshrl.u32 %v16622_v25, 16  ;;  %v2784_v26 = vadd.f32 %v16953_v46, %v17302_v18  ;;  %v4270_v18 = vrot.slane %v4268_v28, 2 }
 0x247   : > { %3534 = vmatmul.bf16.gmra.mxu1 %v3434_v10  ;;  %v4267_v58 = vrot.slane %v4265_v17, 1  ;;  %v8093_v10 = vrot.slane %v8091_v6, 1  ;;  %v21357_v17 = vshll.u32 %v17458_v38, 16  ;;  %v21356_v6 = vshrl.u32 %v17458_v38, 16 }
 0x248   : > { %3789 = vmatmul.bf16.gmra.mxu2 %v3683_v21  ;;  %4064 = vmatmul.bf16.gmra.mxu3 %v3964_v29  ;;  %v4272_v19 = vrot.slane %v21562_v9, 1  ;;  %v4926_v21 = vunpack.c.l.b16 %v4908_v11  ;;  %v21563_v29 = vshll.u32 %v16622_v25, 16  ;;  %v8096_v11 = vrot.slane %v8094_v41, 2 }
 0x249   : > { %5626 = vmatpush.bf16.msrb.mxu1 %v14303_v8  ;;  %v21564_v25 = vunpack.c.l.b16 %v17108_v35  ;;  %v14252_v8 = vld [vmem:[#allocation6] sm:$0xff]  ;;  %v3686_v41 = vor.u32 %v3684_v36, %v3682_v32  ;;  %v2785_v32 = vadd.f32 %v16953_v46, %v17335_v60  ;;  %v3572_v36 = vld [vmem:[%s15629_s30 + $0x8c] sm:$0x1] }
 0x24a   : > { %v4273_v23 = vrot.slane %v21563_v29, 2  ;;  %4873 = vmatpush.bf16.msrb.mxu2 %v14252_v8  ;;  %v8102_v29 = vrot.slane %v21356_v6, 1  ;;  %v21566_v8 = vrot.slane %v16723_v30, 1 }
 0x24b   : > { %v2917_v0 = vpop.f32.mrf.mxu2  ;;  %v17471_v9 = vpop.f32.mrf.mxu3  ;;  %v17484_v44 = vpack.c.b16 %v21564_v25, %v4926_v21  ;;  %v8097_v21 = vor.u32 %v8096_v11, %v8093_v10  ;;  %v3691_v60 = vsel %vm1388_vm3, %v3686_v41, %v17490_v27 }
 0x24c   : > { %v2942_v56 = vadd.f32 %v2917_v0, %v2784_v26  ;;  %v3362_v2 = vpop.f32.mrf.mxu0  ;;  %v17473_v53 = vpop.f32.mrf.mxu1  ;;  %v4271_v26 = vor.u32 %v4270_v18, %v4267_v58  ;;  %v17495_v0 = vor.u32 %v4273_v23, %v4272_v19 }
 0x24d   : > { %v17476_v51 = vadd.f32 %v3362_v2, %v17201_v52  ;;  %v21360_v52 = vrot.slane %v16833_v5, 1  ;;  %v17493_v2 = vld [vmem:[#allocation2 + $0x38] sm:$0xff]  ;;  %v4928_v39 = vrot.slane %v17484_v44, 3  ;;  %v17508_v58 = vsel %vm2025_vm5, %v8097_v21, %v17446_v14 }
 0x24e   : > { %v17487_v28 = vadd.f32 %v17329_v63, %v2942_v56  ;;  %v8103_v63 = vrot.slane %v21357_v17, 2  ;;  %v21359_v56 = vrot.slane %v17480_v59, 3  ;;  %21565 = vst [vmem:[#allocation37_spill] sm:$0xff] %v17508_v58  ;;  %v21358_v19 = vrot.slane %v17493_v2, 3  ;;  %v14281_v17 = vld [vmem:[#allocation6 + $0xe8] sm:$0xff] }
 0x24f   : > { %v4112_v6 = vsel %vm1865_vm4, %v21566_v8, %v21360_v52  ;;  %v4275_v21 = vsel %vm2025_vm5, %v4271_v26, %v17495_v0  ;;  %5326 = vmatpush.bf16.msrb.mxu3 %v14281_v17  ;;  %v21573_v58 = vrot.slane %v16960_v45, 1 }
 0x250   : > { %v17511_v10 = vor.u32 %v8103_v63, %v8102_v29 }
 0x252   : > { %v17537_v8 = vsel %vm2025_vm5, %v17446_v14, %v17511_v10  ;;  %v14302_v14 = vld [vmem:[#allocation6 + $0x168] sm:$0xff] }
 0x253   : > { %v2919_v23 = vpop.f32.mrf.mxu2  ;;  %v17513_v11 = vpop.f32.mrf.mxu3  ;;  %21569 = vst [vmem:[#allocation39_spill] sm:$0xff] %v17537_v8  ;;  %5627 = vmatpush.bf16.msrb.mxu1 %v14302_v14 }
 0x254   : > { %v2943_v18 = vadd.f32 %v2919_v23, %v2785_v32  ;;  %v3365_v25 = vpop.f32.mrf.mxu0  ;;  %v3500_v63 = vpop.f32.mrf.mxu1  ;;  %v3622_v32 = vunpack.c.l.b16 %v3572_v36  ;;  %v21567_v23 = vrot.slane %v17406_v47, 3 }
 0x255   : > { %v17525_v29 = vadd.f32 %v3365_v25, %v17249_v1  ;;  %v17540_v26 = vadd.f32 %v3500_v63, %v17373_v3  ;;  %v4930_v1 = vsel %vm560_vm1, %v4928_v39, %v21359_v56  ;;  %v14287_v25 = vld [vmem:[#allocation6 + $0x118] sm:$0xff]  ;;  %v2786_v3 = vadd.f32 %v16953_v46, %v17370_v50 }
 0x256   : > { %v17532_v41 = vsel %vm560_vm1, %v21567_v23, %v21358_v19  ;;  %v17546_v36 = vadd.f32 %v17364_v40, %v2943_v18  ;;  %4197 = vmatmul.bf16.gmra.mxu0 %v4112_v6  ;;  %v3631_v47 = vpack.c.b16 %v3622_v32, %v3622_v32  ;;  %v17550_v63 = vld [vmem:[#allocation2 + $0x2c] sm:$0xff]  ;;  %v21571_v39 = vshrl.u32 %v16723_v30, 16 }
 0x257   : > { %21568 = vst [vmem:[#allocation38_spill] sm:$0xff] %v17532_v41  ;;  %4373 = vmatmul.bf16.vlgmr.msra.gmra.mxu1 %v4275_v21  ;;  %5444 = vmatpush.bf16.msrb.mxu0 %v14287_v25  ;;  %v17563_v56 = vld [vmem:[%s15629_s30 + $0x90] sm:$0xff]  ;;  %v21362_v25 = vshll.u32 %v17550_v63, 16 }
 0x258   : > { %3794 = vmatmul.bf16.gmra.mxu2 %v3691_v60  ;;  %4998 = vmatmul.bf16.vlgmr.msra.gmra.mxu3 %v4930_v1  ;;  %21570 = vst [vmem:[#allocation40_spill] sm:$0xff] %v17550_v63  ;;  %v4276_v18 = vrot.slane %v21571_v39, 1  ;;  %v21572_v60 = vshll.u32 %v16723_v30, 16  ;;  %v3692_v1 = vshrl.u32 %v17453_v37, 16  ;;  %v3696_v19 = vshll.u32 %v3631_v47, 16  ;;  %v14280_v39 = vld [vmem:[#allocation6 + $0xe0] sm:$0xff] }
 0x259   : > { %5327 = vmatpush.bf16.msrb.mxu3 %v14280_v39  ;;  %v6347_v37 = vld [vmem:[#allocation2 + $0x40] sm:$0x7] }
 0x25a   : > { %v4277_v21 = vrot.slane %v21572_v60, 2  ;;  %v3698_v52 = vrot.slane %v3696_v19, 1 }
 0x25b   : > { %v2922_v23 = vpop.f32.mrf.mxu2  ;;  %v17552_v40 = vpop.f32.mrf.mxu3 }
 0x25c   : > { %v2944_v17 = vadd.f32 %v2922_v23, %v2786_v3  ;;  %v3367_v6 = vpop.f32.mrf.mxu0  ;;  %v3502_v50 = vpop.f32.mrf.mxu1  ;;  %v4718_v3 = vld [vmem:[%s15629_s30 + $0x80] sm:$0xc]  ;;  %v14275_v23 = vld [vmem:[#allocation6 + $0xb8] sm:$0xff]  ;;  %v17575_v60 = vor.u32 %v4277_v21, %v4276_v18 }
 0x25d   : > { %v17559_v32 = vadd.f32 %v3367_v6, %v17318_v34  ;;  %v17567_v14 = vadd.f32 %v3502_v50, %v17394_v48  ;;  %v21361_v34 = vshrl.u32 %v17550_v63, 16  ;;  %5134 = vmatpush.bf16.msra.mxu2 %v14275_v23  ;;  %v8107_v48 = vrot.slane %v21362_v25, 2 }
 0x25e   : > { %v17571_v30 = vadd.f32 %v17389_v15, %v2944_v17  ;;  %v3694_v50 = vor.u32 %v3692_v1, %v17490_v27  ;;  %v4754_v15 = vunpack.c.l.b16 %v4718_v3  ;;  %v2787_v17 = vadd.f32 %v16953_v46, %v17391_v31 }
 0x25f   : > { %v8106_v47 = vrot.slane %v21361_v34, 1  ;;  %v21363_v6 = vrot.slane %v17563_v56, 3  ;;  %v6397_v23 = vunpack.c.l.b16 %v6347_v37  ;;  %v21574_v25 = vrot.slane %v16833_v5, 1 }
 0x260   : > { %v4279_v31 = vsel %vm2025_vm5, %v17495_v0, %v17575_v60  ;;  %v3699_v3 = vsel %vm1388_vm3, %v3694_v50, %v3698_v52  ;;  %v21575_v37 = vunpack.c.l.b16 %v17108_v35  ;;  %v21577_v0 = vrot.slane %v17480_v59, 3  ;;  %v14274_v50 = vld [vmem:[#allocation6 + $0xb0] sm:$0xff] }
 0x261   : > { %v17585_v18 = vor.u32 %v8107_v48, %v8106_v47  ;;  %v4114_v27 = vsel %vm1865_vm4, %v21574_v25, %v21573_v58  ;;  %v17619_v35 = vpack.c.b16 %v6397_v23, %v6397_v23  ;;  %v21364_v52 = vshrl.u32 %v17480_v59, 16  ;;  %5135 = vmatpush.bf16.msra.mxu2 %v14274_v50 }
 0x262   : > { %v4764_v47 = vpack.c.b16 %v21575_v37, %v4754_v15  ;;  %v14279_v15 = vld [vmem:[#allocation6 + $0xd8] sm:$0xff]  ;;  %v21579_v23 = vshrl.u32 %v16833_v5, 16 }
 0x263   : > { %v2924_v21 = vpop.f32.mrf.mxu2  ;;  %v17587_v8 = vpop.f32.mrf.mxu3  ;;  %v17606_v48 = vsel %vm2025_vm5, %v17511_v10, %v17585_v18  ;;  %21578 = vst [vmem:[#allocation42_spill] sm:$0xff] %v17619_v35  ;;  %v21365_v10 = vshll.u32 %v17480_v59, 16  ;;  %5328 = vmatpush.bf16.msrb.mxu3 %v14279_v15 }
 0x264   : > { %v2945_v39 = vadd.f32 %v2924_v21, %v2787_v17  ;;  %v3370_v34 = vpop.f32.mrf.mxu0  ;;  %v3505_v1 = vpop.f32.mrf.mxu1  ;;  %21576 = vst [vmem:[#allocation41_spill] sm:$0xff] %v17606_v48  ;;  %v14286_v17 = vld [vmem:[#allocation6 + $0x110] sm:$0xff]  ;;  %v2788_v21 = vadd.f32 %v16953_v46, %v17433_v16  ;;  %v4780_v46 = vrot.slane %v21364_v52, 2  ;;  %v14273_v52 = vld [vmem:[#allocation6 + $0xa8] sm:$0xff] }
 0x265   : > { %v17598_v19 = vadd.f32 %v3370_v34, %v17348_v55  ;;  %v17609_v58 = vadd.f32 %v3505_v1, %v17436_v24  ;;  %v4932_v55 = vsel %vm560_vm1, %v21577_v0, %v21363_v6  ;;  %v4770_v24 = vshrl.u32 %v4764_v47, 16  ;;  %v17628_v1 = vld [vmem:[#allocation2 + $0x34] sm:$0xff]  ;;  %5445 = vmatpush.bf16.msrb.mxu0 %v14286_v17  ;;  %5136 = vmatpush.bf16.msra.mxu2 %v14273_v52 }
 0x266   : > { %v17617_v25 = vadd.f32 %v17421_v49, %v2945_v39  ;;  %4202 = vmatmul.bf16.gmra.mxu0 %v4114_v27  ;;  %v4773_v34 = vshll.u32 %v4764_v47, 16  ;;  %v14301_v49 = vld [vmem:[#allocation6 + $0x160] sm:$0xff]  ;;  %v4280_v27 = vrot.slane %v21579_v23, 1  ;;  %21580 = vst [vmem:[#allocation43_spill] sm:$0xff] %v17628_v1  ;;  %v21581_v0 = vshll.u32 %v16833_v5, 16 }
 0x267   : > { %4378 = vmatmul.bf16.gmra.mxu1 %v4279_v31  ;;  %v6644_v31 = vrot.slane %v17619_v35, 3  ;;  %v4783_v16 = vrot.slane %v21365_v10, 3  ;;  %v4772_v23 = vrot.slane %v4770_v24, 2  ;;  %v14278_v10 = vld [vmem:[#allocation6 + $0xd0] sm:$0xff]  ;;  %v21369_v24 = vrot.slane %v17085_v13, 1  ;;  %v14356_v35 = vld [vmem:[#allocation8 + $0x88] sm:$0xff] }
 0x268   : > { %3799 = vmatmul.bf16.gmra.mxu2 %v3699_v3  ;;  %5003 = vmatmul.bf16.gmra.mxu3 %v4932_v55  ;;  %v4281_v55 = vrot.slane %v21581_v0, 2  ;;  %v17650_v0 = vld [vmem:[%s15629_s30 + $0x98] sm:$0xff] }
 0x269   : > { %5628 = vmatpush.bf16.msrb.mxu1 %v14301_v49  ;;  %5329 = vmatpush.bf16.msrb.mxu3 %v14278_v10 }
 0x26b   : > { %v2927_v39 = vpop.f32.mrf.mxu2  ;;  %v17630_v37 = vpop.f32.mrf.mxu3 }
 0x26c   : > { %v2946_v3 = vadd.f32 %v2927_v39, %v2788_v21  ;;  %v3372_v47 = vpop.f32.mrf.mxu0  ;;  %v3507_v15 = vpop.f32.mrf.mxu1  ;;  %v4775_v21 = vrot.slane %v4773_v34, 3  ;;  %v21582_v39 = vrot.slane %v17493_v2, 3  ;;  %v21366_v2 = vshrl.u32 %v17628_v1, 16 }
 0x26d   : > { %v17639_v50 = vadd.f32 %v3372_v47, %v17378_v4  ;;  %v17647_v5 = vadd.f32 %v3507_v15, %v17476_v51  ;;  %v21367_v4 = vshll.u32 %v17628_v1, 16  ;;  %v17658_v34 = vor.u32 %v4281_v55, %v4280_v27 }
 0x26e   : > { %v17644_v6 = vsel %vm560_vm1, %v21582_v39, %v6644_v31  ;;  %v17653_v17 = vadd.f32 %v17471_v9, %v2946_v3  ;;  %v4776_v49 = vor.u32 %v4775_v21, %v4772_v23  ;;  %v17660_v51 = vor.u32 %v4783_v16, %v4780_v46  ;;  %v15281_v9 = vld [vmem:[%s21309_s3] ss:$0 sm:$0xff] }
 0x26f   : > { %21583 = vst [vmem:[#allocation44_spill] sm:$0xff] %v17644_v6  ;;  %v8111_v31 = vrot.slane %v21367_v4, 2  ;;  %v2789_v3 = vadd.f32 %v15281_v9, %v17473_v53  ;;  %v21368_v47 = vrot.slane %v17650_v0, 3  ;;  %v8110_v52 = vrot.slane %v21366_v2, 1  ;;  %v14272_v4 = vld [vmem:[#allocation6 + $0xa0] sm:$0xff] }
 0x270   : > { %v21584_v16 = vrot.slane %v16960_v45, 1  ;;  %v4283_v39 = vsel %vm2025_vm5, %v17575_v60, %v17658_v34  ;;  %v4785_v9 = vsel %vm336_vm0, %v4776_v49, %v17660_v51  ;;  %v17702_v60 = vld [vmem:[%s15629_s30 + $0xa0] sm:$0xf]  ;;  %v4727_v49 = vld [vmem:[%s15629_s30 + $0xa4] sm:$0x7]  ;;  %5137 = vmatpush.bf16.msra.mxu2 %v14272_v4 }
 0x271   : > { %v8112_v23 = vor.u32 %v8111_v31, %v8110_v52 }
 0x272   : > { %v4116_v15 = vsel %vm1865_vm4, %v21584_v16, %v21369_v24  ;;  %v14285_v16 = vld [vmem:[#allocation6 + $0x108] sm:$0xff]  ;;  %v21591_v24 = vunpack.c.l.b16 %v17702_v60 }
 0x273   : > { %v2929_v10 = vpop.f32.mrf.mxu2  ;;  %v17671_v55 = vpop.f32.mrf.mxu3  ;;  %v17699_v52 = vsel %vm2025_vm5, %v17585_v18, %v8112_v23  ;;  %5446 = vmatpush.bf16.msrb.mxu0 %v14285_v16  ;;  %v21589_v16 = vshll.u32 %v16960_v45, 16 }
 0x274   : > { %v2947_v27 = vadd.f32 %v2929_v10, %v2789_v3  ;;  %v3375_v46 = vpop.f32.mrf.mxu0  ;;  %v3510_v21 = vpop.f32.mrf.mxu1  ;;  %v21585_v10 = vrot.slane %v17563_v56, 3  ;;  %21586 = vst [vmem:[#allocation45_spill] sm:$0xff] %v17699_v52 }
 0x275   : > { %v17679_v53 = vadd.f32 %v3375_v46, %v17404_v62  ;;  %v17687_v3 = vadd.f32 %v3510_v21, %v17525_v29  ;;  %v21370_v29 = vshrl.u32 %v17563_v56, 16  ;;  %v14300_v21 = vld [vmem:[#allocation6 + $0x158] sm:$0xff] }
 0x276   : > { %v4934_v31 = vsel %vm560_vm1, %v21585_v10, %v21368_v47  ;;  %v17695_v62 = vadd.f32 %v17513_v11, %v2947_v27  ;;  %4207 = vmatmul.bf16.gmra.mxu0 %v4116_v15  ;;  %v4763_v27 = vunpack.c.l.b16 %v4727_v49  ;;  %v17708_v10 = vld [vmem:[#allocation2 + $0x3c] sm:$0xff]  ;;  %5629 = vmatpush.bf16.msrb.mxu1 %v14300_v21  ;;  %v4285_v21 = vrot.slane %v21589_v16, 2 }
 0x277   : > { %4383 = vmatmul.bf16.gmra.mxu1 %v4283_v39  ;;  %21587 = vst [vmem:[#allocation46_spill] sm:$0xff] %v17708_v10  ;;  %v14277_v47 = vld [vmem:[#allocation6 + $0xc8] sm:$0xff]  ;;  %v21373_v11 = vshrl.u32 %v17708_v10, 16 }
 0x278   : > { %4874 = vmatmul.bf16.vlgmr.msrb.gmra.mxu2 %v4785_v9  ;;  %5008 = vmatmul.bf16.gmra.mxu3 %v4934_v31  ;;  %v21588_v9 = vshrl.u32 %v16960_v45, 16  ;;  %v17731_v48 = vpack.c.b16 %v4763_v27, %v21591_v24  ;;  %v6970_v45 = vld [vmem:[#allocation2 + $0x48] sm:$0xf]  ;;  %v15033_v16 = vld [vmem:[#allocation2 + $0x40] sm:$0xff]  }
 0x279   : > { %5330 = vmatpush.bf16.msrb.mxu3 %v14277_v47  ;;  %v17745_v24 = vunpack.c.l.b16 %v6970_v45  ;;  %v14820_v27 = vunpack.c.h.b16 %v15033_v16 }
 0x27a   : > { %v4284_v31 = vrot.slane %v21588_v9, 1  ;;  %v21376_v4 = vrot.slane %v17731_v48, 3 }
 0x27b   : > { %v3765_v18 = vpop.f32.mrf.mxu2  ;;  %v17711_v2 = vpop.f32.mrf.mxu3  ;;  %21593 = vst [vmem:[#allocation47_spill] sm:$0xff] %v17745_v24  ;;  %v17772_v16 = vpack.c.b16 %v17745_v24, %v14820_v27  ;;  %v14299_v27 = vld [vmem:[#allocation6 + $0x150] sm:$0xff] }
 0x27c   : > { %v3805_v15 = vadd.f32 %v3765_v18, %v17540_v26  ;;  %v3377_v39 = vpop.f32.mrf.mxu0  ;;  %v3512_v46 = vpop.f32.mrf.mxu1  ;;  %v4789_v26 = vrot.slane %v21370_v29, 2  ;;  %v21590_v18 = vshll.u32 %v17563_v56, 16  ;;  %v8114_v29 = vrot.slane %v21373_v11, 1  ;;  %5630 = vmatpush.bf16.msrb.mxu1 %v14299_v27  ;;  %v14330_v24 = vld [vmem:[#allocation6 + $0x230] sm:$0xff] }
 0x27d   : > { %v17718_v49 = vadd.f32 %v3377_v39, %v17450_v61  ;;  %v17727_v9 = vadd.f32 %v3512_v46, %v17559_v32  ;;  %v17741_v46 = vor.u32 %v4285_v21, %v4284_v31  ;;  %v21595_v31 = vrot.slane %v17085_v13, 1  ;;  %21597 = vst [vmem:[#allocation49_spill] sm:$0xff] %v17772_v16 }
 0x27e   : > { %v4792_v52 = vrot.slane %v21590_v18, 3  ;;  %v17734_v61 = vadd.f32 %v17552_v40, %v3805_v15  ;;  %v21592_v18 = vshll.u32 %v17708_v10, 16  ;;  %v21594_v10 = vrot.slane %v17222_v20, 1 }
 0x280   : > { %v8115_v32 = vrot.slane %v21592_v18, 2  ;;  %v17743_v1 = vor.u32 %v4792_v52, %v4789_v26  ;;  %v4118_v52 = vsel %vm1865_vm4, %v21595_v31, %v21594_v10  ;;  %v14271_v18 = vld [vmem:[#allocation6 + $0x98] sm:$0xff] }
 0x281   : > { %5138 = vmatpush.bf16.msra.mxu2 %v14271_v18  ;;  %v21601_v18 = vshll.u32 %v17085_v13, 16 }
 0x282   : > { %v17748_v40 = vor.u32 %v8115_v32, %v8114_v29  ;;  %v4794_v45 = vsel %vm336_vm0, %v17660_v51, %v17743_v1  ;;  %v17785_v51 = vld [vmem:[#allocation2 + $0x44] sm:$0xff]  ;;  %v21377_v32 = vshll.u32 %v17650_v0, 16 }
 0x283   : > { %v3767_v47 = vpop.f32.mrf.mxu2  ;;  %v17751_v39 = vpop.f32.mrf.mxu3  ;;  %21599 = vst [vmem:[#allocation50_spill] sm:$0xff] %v17785_v51 }
 0x284   : > { %v3806_v15 = vadd.f32 %v3767_v47, %v17567_v14  ;;  %v3380_v11 = vpop.f32.mrf.mxu0  ;;  %v17760_v21 = vsel %vm2025_vm5, %v8112_v23, %v17748_v40  ;;  %v3515_v26 = vpop.f32.mrf.mxu1  ;;  %v4287_v14 = vsel %vm2025_vm5, %v17658_v34, %v17741_v46  ;;  %v14284_v47 = vld [vmem:[#allocation6 + $0x100] sm:$0xff]  ;;  %v4801_v27 = vrot.slane %v21377_v32, 3 }
 0x285   : > { %21596 = vst [vmem:[#allocation48_spill] sm:$0xff] %v17760_v21  ;;  %v17763_v29 = vadd.f32 %v3380_v11, %v17487_v28  ;;  %v17775_v10 = vadd.f32 %v3515_v26, %v17598_v19  ;;  %v21598_v28 = vrot.slane %v17650_v0, 3  ;;  %v14276_v11 = vld [vmem:[#allocation6 + $0xc0] sm:$0xff]  ;;  %v21378_v19 = vshrl.u32 %v17650_v0, 16  ;;  %5447 = vmatpush.bf16.msrb.mxu0 %v14284_v47 }
 0x286   : > { %v17783_v34 = vadd.f32 %v17587_v8, %v3806_v15  ;;  %4212 = vmatmul.bf16.gmra.mxu0 %v4118_v52  ;;  %5331 = vmatpush.bf16.msrb.mxu3 %v14276_v11  ;;  %v21600_v26 = vshrl.u32 %v17085_v13, 16  ;;  %v4289_v47 = vrot.slane %v21601_v18, 2  ;;  %v21603_v32 = vshll.u32 %v17785_v51, 16 }
 0x287   : > { %v4936_v23 = vsel %vm560_vm1, %v21598_v28, %v21376_v4  ;;  %4388 = vmatmul.bf16.gmra.mxu1 %v4287_v14  ;;  %v17810_v4 = vld [vmem:[%s15629_s30 + $0x8c] sm:$0xf]  ;;  %v14323_v28 = vld [vmem:[#allocation6 + $0x1f8] sm:$0xff] }
 0x288   : > { %4879 = vmatmul.bf16.gmra.mxu2 %v4794_v45  ;;  %5013 = vmatmul.bf16.gmra.mxu3 %v4936_v23  ;;  %v4288_v14 = vrot.slane %v21600_v26, 1  ;;  %v14270_v45 = vld [vmem:[#allocation6 + $0x90] sm:$0xff]  ;;  %v21379_v16 = vunpack.c.l.b16 %v17810_v4 }
 0x289   : > { %5139 = vmatpush.bf16.msra.mxu2 %v14270_v45 }
 0x28a   : > { %5934 = vmatpush.bf16.msra.mxu3 %v14323_v28  ;;  %v17820_v21 = vor.u32 %v4289_v47, %v4288_v14 }
 0x28b   : > { %v3770_v31 = vpop.f32.mrf.mxu2  ;;  %v17790_v15 = vpop.f32.mrf.mxu3 }
 0x28c   : > { %v3807_v8 = vadd.f32 %v3770_v31, %v17609_v58  ;;  %v3382_v52 = vpop.f32.mrf.mxu0  ;;  %v3517_v11 = vpop.f32.mrf.mxu1  ;;  %v4798_v58 = vrot.slane %v21378_v19, 2  ;;  %v5176_v31 = vld [vmem:[%s15629_s30 + $0x88] sm:$0x8]  ;;  %v8119_v19 = vrot.slane %v21603_v32, 2  ;;  %v21605_v32 = vrot.slane %v17222_v20, 1 }
 0x28d   : > { %v17797_v23 = vadd.f32 %v3382_v52, %v17546_v36  ;;  %v17807_v26 = vadd.f32 %v3517_v11, %v17639_v50  ;;  %v21602_v52 = vshrl.u32 %v17785_v51, 16  ;;  %v5212_v11 = vunpack.c.l.b16 %v5176_v31 }
 0x28e   : > { %v17813_v36 = vadd.f32 %v17630_v37, %v3807_v8  ;;  %v17822_v50 = vor.u32 %v4801_v27, %v4798_v58 }
 0x28f   : > { %v8118_v18 = vrot.slane %v21602_v52, 1  ;;  %v21604_v52 = vrot.slane %v17327_v57, 1  ;;  %v5222_v31 = vpack.c.b16 %v21379_v16, %v5212_v11 }
 0x290   : > { %v4803_v27 = vsel %vm336_vm0, %v17743_v1, %v17822_v50  ;;  %v4808_v1 = vshll.u32 %v17731_v48, 16 }
 0x291   : > { %v17825_v37 = vor.u32 %v8119_v19, %v8118_v18  ;;  %v4120_v14 = vsel %vm1865_vm4, %v21605_v32, %v21604_v52  ;;  %v5231_v11 = vshll.u32 %v5222_v31, 16  ;;  %v14298_v52 = vld [vmem:[#allocation6 + $0x148] sm:$0xff] }
 0x292   : > { %v14269_v32 = vld [vmem:[#allocation6 + $0x88] sm:$0xff]  ;;  %5631 = vmatpush.bf16.msrb.mxu1 %v14298_v52  ;;  %v4810_v52 = vrot.slane %v4808_v1, 3 }
 0x293   : > { %v3772_v8 = vpop.f32.mrf.mxu2  ;;  %v17828_v28 = vpop.f32.mrf.mxu3  ;;  %v17838_v47 = vsel %vm2025_vm5, %v17748_v40, %v17825_v37  ;;  %5140 = vmatpush.bf16.msra.mxu2 %v14269_v32  ;;  %v5233_v38 = vrot.slane %v5231_v11, 4  ;;  %v21610_v11 = vrot.slane %v17327_v57, 1 }
 0x294   : > { %v3808_v45 = vadd.f32 %v3772_v8, %v17647_v5  ;;  %v3385_v13 = vpop.f32.mrf.mxu0  ;;  %21606 = vst [vmem:[#allocation51_spill] sm:$0xff] %v17838_v47  ;;  %v3520_v58 = vpop.f32.mrf.mxu1  ;;  %v4291_v5 = vsel %vm2025_vm5, %v17741_v46, %v17820_v21  ;;  %v4805_v46 = vshrl.u32 %v17731_v48, 16  ;;  %v5228_v8 = vshrl.u32 %v5222_v31, 16 }
 0x295   : > { %v17841_v19 = vadd.f32 %v3385_v13, %v17571_v30  ;;  %v17852_v18 = vadd.f32 %v3520_v58, %v17679_v53  ;;  %v17858_v30 = vld [vmem:[%s15629_s30 + $0x90] sm:$0xff]   ;;  %v21607_v13 = vrot.slane %v17731_v48, 3  ;;  %v21608_v48 = vshrl.u32 %v17222_v20, 16 }
 0x296   : > { %v17855_v40 = vadd.f32 %v17671_v55, %v3808_v45  ;;  %4217 = vmatmul.bf16.gmra.mxu0 %v4120_v14  ;;  %v14331_v53 = vld [vmem:[#allocation6 + $0x238] sm:$0xff]  ;;  %v5236_v55 = vshrl.u32 %v17858_v30, 16  ;;  %v5239_v45 = vshll.u32 %v17858_v30, 16  ;;  %v14322_v14 = vld [vmem:[#allocation6 + $0x1f0] sm:$0xff]  ;;  %v21609_v31 = vshll.u32 %v17222_v20, 16 }
 0x297   : > { %4393 = vmatmul.bf16.gmra.mxu1 %v4291_v5  ;;  %6078 = vmatpush.bf16.msra.mxu0 %v14331_v53  ;;  %v4292_v16 = vrot.slane %v21608_v48, 1  ;;  %v4807_v51 = vrot.slane %v4805_v46, 2  ;;  %v5230_v53 = vrot.slane %v5228_v8, 3  ;;  %v4121_v20 = vrot.slane %v17387_v43, 1 }
 0x298   : > { %4884 = vmatmul.bf16.gmra.mxu2 %v4803_v27  ;;  %5018 = vmatmul.bf16.gmra.mxu3 %v21607_v13  ;;  %v4293_v47 = vrot.slane %v21609_v31, 2  ;;  %v5241_v41 = vrot.slane %v5239_v45, 4  ;;  %v14321_v45 = vld [vmem:[#allocation6 + $0x1e8] sm:$0xff] }
 0x299   : > { %5935 = vmatpush.bf16.msra.mxu3 %v14322_v14  ;;  %v17883_v32 = vor.u32 %v4810_v52, %v4807_v51  ;;  %v14329_v52 = vld [vmem:[#allocation6 + $0x228] sm:$0xff] }
 0x29a   : > { %v4294_v46 = vor.u32 %v4293_v47, %v4292_v16 }
 0x29b   : > { %v3775_v58 = vpop.f32.mrf.mxu2  ;;  %v17867_v27 = vpop.f32.mrf.mxu3  ;;  %6079 = vmatpush.bf16.msra.mxu0 %v14330_v24 }
 0x29c   : > { %v3809_v5 = vadd.f32 %v3775_v58, %v17687_v3  ;;  %v3387_v13 = vpop.f32.mrf.mxu0  ;;  %v3522_v6 = vpop.f32.mrf.mxu1  ;;  %v5238_v58 = vrot.slane %v5236_v55, 3  ;;  %v14268_v55 = vld [vmem:[#allocation6 + $0x80] sm:$0xff] }
 0x29d   : > { %v17874_v63 = vadd.f32 %v3387_v13, %v17617_v25  ;;  %v17877_v3 = vadd.f32 %v3522_v6, %v17718_v49  ;;  %v5234_v25 = vor.u32 %v5233_v38, %v5230_v53  ;;  %v4295_v38 = vsel %vm2025_vm5, %v17820_v21, %v4294_v46  ;;  %5141 = vmatpush.bf16.msra.mxu2 %v14268_v55  ;;  %v14297_v21 = vld [vmem:[#allocation6 + $0x140] sm:$0xff] }
 0x29e   : > { %v17880_v48 = vadd.f32 %v17711_v2, %v3809_v5  ;;  %v5242_v14 = vor.u32 %v5241_v41, %v5238_v58  ;;  %v4122_v2 = vsel %vm1865_vm4, %v21610_v11, %v4121_v20  ;;  %v4812_v41 = vsel %vm336_vm0, %v17822_v50, %v17883_v32  ;;  %5936 = vmatpush.bf16.msra.mxu3 %v14321_v45  ;;  %v14320_v55 = vld [vmem:[#allocation6 + $0x1e0] sm:$0xff] }
 0x29f   : > { %5632 = vmatpush.bf16.msrb.mxu1 %v14297_v21  ;;  %v21611_v58 = vshrl.u32 %v17327_v57, 16  ;;  %6080 = vmatpush.bf16.msra.mxu0 %v14329_v52 }
 0x2a0   : > { %v5243_v16 = vsel %vm720_vm2, %v5234_v25, %v5242_v14  ;;  %v21612_v25 = vshll.u32 %v17327_v57, 16 }
 0x2a1   : > { %v4296_v20 = vrot.slane %v21611_v58, 1 }
 0x2a2   : > { %5937 = vmatpush.bf16.msra.mxu3 %v14320_v55 }
 0x2a3   : > { %v3777_v1 = vpop.f32.mrf.mxu2  ;;  %v17886_v6 = vpop.f32.mrf.mxu3 }
 0x2a4   : > { %v3810_v8 = vadd.f32 %v3777_v1, %v17727_v9  ;;  %v3390_v49 = vpop.f32.mrf.mxu0  ;;  %v3525_v24 = vpop.f32.mrf.mxu1  ;;  %v4297_v1 = vrot.slane %v21612_v25, 2 }
 0x2a5   : > { %v17892_v43 = vadd.f32 %v3390_v49, %v17653_v17  ;;  %v17900_v9 = vadd.f32 %v3525_v24, %v17763_v29  ;;  %v14998_v17 = vld [vmem:[%s15629_s30 + $0x98] sm:$0xff]  }
 0x2a6   : > { %v17904_v51 = vadd.f32 %v17751_v39, %v3810_v8  ;;  %4222 = vmatmul.bf16.gmra.mxu0 %v4122_v2  ;;  %v5245_v47 = vshrl.u32 %v14998_v17, 16  ;;  %v5248_v5 = vshll.u32 %v14998_v17, 16  ;;  %v14315_v2 = vld [vmem:[#allocation6 + $0x1b8] sm:$0xff]  ;;  %v17925_v24 = vor.u32 %v4297_v1, %v4296_v20 }
 0x2a7   : > { %4398 = vmatmul.bf16.gmra.mxu1 %v4295_v38  ;;  %5810 = vmatpush.bf16.msrb.mxu2 %v14315_v2  ;;  %v4446_v20 = vadd.f32 128.5, %v16338_v33 }
 0x2a8   : > { %4889 = vmatmul.bf16.gmra.mxu2 %v4812_v41  ;;  %5332 = vmatmul.bf16.vlgmr.msrb.gmra.mxu3 %v5243_v16  ;;  %v5247_v49 = vrot.slane %v5245_v47, 3  ;;  %v5250_v11 = vrot.slane %v5248_v5, 4  ;;  %v21613_v41 = vunpack.c.l.b16 %v17810_v4 }
 0x2aa   : > { %v17927_v38 = vor.u32 %v5250_v11, %v5247_v49  ;;  %v21615_v11 = vshll.u32 %v17480_v59, 16 }
 0x2ab   : > { %v3780_v50 = vpop.f32.mrf.mxu2  ;;  %v17908_v13 = vpop.f32.mrf.mxu3 }
 0x2ac   : > { %v3811_v29 = vadd.f32 %v3780_v50, %v17775_v10  ;;  %v3392_v31 = vpop.f32.mrf.mxu0  ;;  %v3527_v53 = vpop.f32.mrf.mxu1  ;;  %v4244_v10 = vld [vmem:[%s15629_s30 + $0x94] sm:$0x3] }
 0x2ad   : > { %v17911_v39 = vadd.f32 %v3392_v31, %v17695_v62  ;;  %v17918_v8 = vadd.f32 %v3527_v53, %v17797_v23  ;;  %v14731_v62 = vunpack.c.l.b16 %v17858_v30  ;;  %v4262_v57 = vunpack.c.l.b16 %v4244_v10 }
 0x2ae   : > { %v17922_v45 = vadd.f32 %v17790_v15, %v3811_v29  ;;  %v4299_v30 = vsel %vm2025_vm5, %v4294_v46, %v17925_v24  ;;  %v5252_v29 = vsel %vm720_vm2, %v5242_v14, %v17927_v38  ;;  %v5053_v46 = vshrl.u32 %v17484_v44, 16 }
 0x2af   : > { %v5382_v16 = vpack.c.b16 %v14731_v62, %v21613_v41  ;;  %v4263_v5 = vpack.c.b16 %v4262_v57, %v4262_v57  ;;  %v5056_v53 = vshll.u32 %v17484_v44, 16  ;;  %v5061_v10 = vrot.slane %v21615_v11, 4 }
 0x2b0   : > { %v5055_v62 = vrot.slane %v5053_v46, 3  ;;  %v14327_v46 = vld [vmem:[#allocation6 + $0x218] sm:$0xff] }
 0x2b1   : > { %v4301_v31 = vshrl.u32 %v4263_v5, 16  ;;  %v4304_v52 = vshll.u32 %v4263_v5, 16  ;;  %v5058_v57 = vrot.slane %v5056_v53, 4  ;;  %v14346_v5 = vld [vmem:[#allocation8 + $0x38] sm:$0xff]  ;;  %v14313_v53 = vld [vmem:[#allocation6 + $0x1a8] sm:$0xff] }
 0x2b2   : > { %6543 = vmatpush.bf16.msra.mxu1 %v14346_v5 }
 0x2b3   : > { %v3782_v23 = vpop.f32.mrf.mxu2  ;;  %v17932_v21 = vpop.f32.mrf.mxu3  ;;  %v4303_v55 = vrot.slane %v4301_v31, 1  ;;  %v4306_v44 = vrot.slane %v4304_v52, 2 }
 0x2b4   : > { %v3812_v17 = vadd.f32 %v3782_v23, %v17807_v26  ;;  %v17934_v15 = vpop.f32.mrf.mxu0  ;;  %v3530_v47 = vpop.f32.mrf.mxu1  ;;  %v14999_v26 = vld [vmem:[%s15629_s30 + $0xa0] sm:$0xff]  }
 0x2b5   : > { %v17939_v50 = vadd.f32 %v3530_v47, %v17841_v19  ;;  %v5254_v19 = vshrl.u32 %v14999_v26, 16  ;;  %v5257_v58 = vshll.u32 %v14999_v26, 16  ;;  %v14314_v47 = vld [vmem:[#allocation6 + $0x1b0] sm:$0xff]  ;;  %v5059_v26 = vor.u32 %v5058_v57, %v5055_v62 }
 0x2b6   : > { %v17944_v4 = vadd.f32 %v17828_v28, %v3812_v17  ;;  %5448 = vmatmul.bf16.vlgmr.msrb.gmra.mxu0 %v5382_v16  ;;  %v4462_v16 = vmul.f32 0.055555556, %v4446_v20  ;;  %v14328_v17 = vld [vmem:[#allocation6 + $0x220] sm:$0xff]  ;;  %5811 = vmatpush.bf16.msrb.mxu2 %v14314_v47 }
 0x2b7   : > { %4403 = vmatmul.bf16.gmra.mxu1 %v4299_v30  ;;  %v5256_v41 = vrot.slane %v5254_v19, 3  ;;  %v14319_v30 = vld [vmem:[#allocation6 + $0x1d8] sm:$0xff]  ;;  %6081 = vmatpush.bf16.msra.mxu0 %v14328_v17  ;;  %v14318_v19 = vld [vmem:[#allocation6 + $0x1d0] sm:$0xff]  ;;  %v18001_v17 = vadd.f32 128.5, %v16412_v22 }
 0x2b8   : > { %4894 = vmatmul.bf16.gmra.mxu2 %v17883_v32  ;;  %5337 = vmatmul.bf16.gmra.mxu3 %v5252_v29  ;;  %v21614_v32 = vshrl.u32 %v17480_v59, 16  ;;  %v4307_v29 = vor.u32 %v4306_v44, %v4303_v55  ;;  %v4478_v52 = vfloor.f32 %v4462_v16  ;;  %v17981_v55 = vld [vmem:[%s15629_s30 + $0xa8] sm:$0xff]   ;;  %v17998_v16 = vld [vmem:[%s15629_s30 + $0x94] sm:$0xff] }
 0x2b9   : > { %5938 = vmatpush.bf16.msra.mxu3 %v14319_v30  ;;  %v14292_v44 = vld [vmem:[%s15629_s30 + $0x8c] sm:$0xff]  ;;  %v5266_v47 = vshll.u32 %v17981_v55, 16 }
 0x2ba   : > { %v5060_v49 = vrot.slane %v21614_v32, 3  ;;  %v14345_v32 = vld [vmem:[#allocation8 + $0x30] sm:$0xff]  ;;  %5812 = vmatpush.bf16.msrb.mxu2 %v14313_v53  ;;  %v4494_v57 = vmul.f32 18.0, %v4478_v52  ;;  %vm4526_vm8 = vcmp.gt.f32.partialorder %v4478_v52, 0.5  ;;  %vm4542_vm9 = vcmp.lt.f32.partialorder %v4478_v52, 16.5 }
 0x2bb   : > { %v3785_v14 = vpop.f32.mrf.mxu2  ;;  %v17952_v25 = vpop.f32.mrf.mxu3  ;;  %6082 = vmatpush.bf16.msra.mxu0 %v14327_v46  ;;  %6544 = vmatpush.bf16.msra.mxu1 %v14345_v32  ;;  %v21616_v46 = vshrl.u32 %v17563_v56, 16  ;;  %v5534_v32 = vshrl.u32 %v14292_v44, 16  ;;  %vm4558_vm10 = vmand %vm4526_vm8, %vm4542_vm9 }
 0x2bc   : > { %v3813_v28 = vadd.f32 %v3785_v14, %v17852_v18  ;;  %v17954_v1 = vpop.f32.mrf.mxu0  ;;  %v3532_v2 = vpop.f32.mrf.mxu1  ;;  %v5259_v18 = vrot.slane %v5257_v58, 4  ;;  %v17966_v31 = vor.u32 %v5061_v10, %v5060_v49  ;;  %v15157_v14 = vld [vmem:[%s15629_s30 + $0x94] sm:$0xff]   ;;  %v4308_v10 = vsel %vm2025_vm5, %v17925_v24, %v4307_v29 }
 0x2bd   : > { %v17961_v23 = vadd.f32 %v3532_v2, %v17874_v63  ;;  %5939 = vmatpush.bf16.msra.mxu3 %v14318_v19  ;;  %v17994_v24 = vadd.f32 128.5, %v16395_v42  ;;  %v5064_v53 = vrot.slane %v21616_v46, 3  ;;  %v21617_v19 = vshll.u32 %v17563_v56, 16  ;;  %v14351_v42 = vld [vmem:[#allocation8 + $0x60] sm:$0xff] }
 0x2be   : > { %v17964_v59 = vadd.f32 %v17867_v27, %v3813_v28  ;;  %v17968_v63 = vor.u32 %v5259_v18, %v5256_v41  ;;  %v5063_v2 = vsel %vm720_vm2, %v5059_v26, %v17966_v31  ;;  %v5263_v18 = vshrl.u32 %v17981_v55, 16 }
 0x2bf   : > { %v4463_v30 = vmul.f32 0.055555556, %v17994_v24 }
 0x2c0   : > { %v5261_v62 = vsel %vm720_vm2, %v17927_v38, %v17968_v63  ;;  %v4510_v38 = vsub.f32 %v4446_v20, %v4494_v57  ;;  %v5265_v20 = vrot.slane %v5263_v18, 3  ;;  %v14312_v57 = vld [vmem:[#allocation6 + $0x1a0] sm:$0xff] }
 0x2c1   : > { %v4479_v18 = vfloor.f32 %v4463_v30  ;;  %5813 = vmatpush.bf16.msrb.mxu2 %v14312_v57 }
 0x2c2   : > { %vm4574_vm11 = vcmp.gt.f32.partialorder %v4510_v38, 1.0  ;;  %vm4606_vm13 = vcmp.lt.f32.partialorder %v4510_v38, 17.0  ;;  %v14325_v38 = vld [vmem:[#allocation6 + $0x208] sm:$0xff] }
 0x2c3   : > { %v3787_v58 = vpop.f32.mrf.mxu2  ;;  %v17972_v28 = vpop.f32.mrf.mxu3  ;;  %vm18025_vm12 = vmand %vm4558_vm10, %vm4574_vm11  ;;  %vm4527_vm15 = vcmp.gt.f32.partialorder %v4479_v18, 0.5  ;;  %vm4543_vm6 = vcmp.lt.f32.partialorder %v4479_v18, 16.5 }
 0x2c4   : > { %v3814_v27 = vadd.f32 %v3787_v58, %v17877_v3  ;;  %v17974_v11 = vpop.f32.mrf.mxu0  ;;  %v3535_v49 = vpop.f32.mrf.mxu1  ;;  %v5065_v58 = vrot.slane %v21617_v19, 4  ;;  %v4495_v19 = vmul.f32 18.0, %v4479_v18  ;;  %vm4622_vm14 = vmand %vm18025_vm12, %vm4606_vm13 }
 0x2c5   : > { %v17985_v3 = vadd.f32 %v3535_v49, %v17892_v43  ;;  %v5536_v43 = vshll.u32 %v14292_v44, 16  ;;  %v5541_v49 = vshll.u32 %v17998_v16, 16  ;;  %v14317_v44 = vld [vmem:[#allocation6 + $0x1c8] sm:$0xff]  ;;  %vm18066_vm9 = vmand %vm4527_vm15, %vm4543_vm6 }
 0x2c6   : > { %v17991_v41 = vadd.f32 %v17886_v6, %v3814_v27  ;;  %5453 = vmatmul.bf16.gmra.mxu0 %v15157_v14  ;;  %5940 = vmatpush.bf16.msra.mxu3 %v14317_v44  ;;  %v21620_v44 = vld [vmem:[#allocation16_spill] sm:$0xff] }
 0x2c7   : > { %4408 = vmatmul.bf16.gmra.mxu1 %v4308_v10  ;;  %v5538_v27 = vrot.slane %v5536_v43, 1  ;;  %v4464_v10 = vmul.f32 0.055555556, %v18001_v17  ;;  %v14344_v43 = vld [vmem:[#allocation8 + $0x28] sm:$0xff] }
 0x2c8   : > { %5142 = vmatmul.bf16.vlgmr.msra.gmra.mxu2 %v5063_v2  ;;  %5342 = vmatmul.bf16.gmra.mxu3 %v5261_v62  ;;  %v5268_v2 = vrot.slane %v5266_v47, 4  ;;  %v14326_v62 = vld [vmem:[#allocation6 + $0x210] sm:$0xff]  ;;  %v18029_v47 = vrot.slane %v5541_v49, 1 }
 0x2c9   : > { %6083 = vmatpush.bf16.msra.mxu0 %v14326_v62  ;;  %v5539_v52 = vor.u32 %v5538_v27, %v5534_v32  ;;  %v4480_v46 = vfloor.f32 %v4464_v10  ;;  %6545 = vmatpush.bf16.msra.mxu1 %v14344_v43  ;;  %v12617_v10 = vsel %vm4622_vm14, 1.0, %v21521_v7  ;;  %v18060_v43 = vadd.f32 128.5, %v21620_v44 }
 0x2cb   : > { %v3790_v6 = vpop.f32.mrf.mxu2  ;;  %v18006_v29 = vpop.f32.mrf.mxu3  ;;  %v5544_v27 = vsel %vm1388_vm3, %v5539_v52, %v18029_v47  ;;  %v4496_v49 = vmul.f32 18.0, %v4480_v46  ;;  %vm4528_vm7 = vcmp.gt.f32.partialorder %v4480_v46, 0.5  ;;  %vm4544_vm8 = vcmp.lt.f32.partialorder %v4480_v46, 16.5 }
 0x2cc   : > { %v3815_v5 = vadd.f32 %v3790_v6, %v17900_v9  ;;  %v18008_v26 = vpop.f32.mrf.mxu0  ;;  %v3537_v14 = vpop.f32.mrf.mxu1  ;;  %v18023_v6 = vor.u32 %v5065_v58, %v5064_v53  ;;  %v4228_v53 = vadd.f32 %v17934_v15, %v17734_v61  ;;  %vm4560_vm11 = vmand %vm4528_vm7, %vm4544_vm8 }
 0x2cd   : > { %v18017_v9 = vadd.f32 %v3537_v14, %v17911_v39  ;;  %6084 = vmatpush.bf16.msra.mxu0 %v14325_v38 }
 0x2ce   : > { %v18021_v56 = vadd.f32 %v17908_v13, %v3815_v5  ;;  %v18031_v13 = vor.u32 %v5268_v2, %v5265_v20  ;;  %v15159_v5 = vld [vmem:[%s15629_s30 + $0x9c] sm:$0xff]   ;;  %v5067_v20 = vsel %vm720_vm2, %v17966_v31, %v18023_v6  ;;  %v4511_v2 = vsub.f32 %v17994_v24, %v4495_v19 }
 0x2cf   : > { %v18057_v31 = vadd.f32 128.5, %v16508_v54 }
 0x2d0   : > { %vm4575_vm10 = vcmp.gt.f32.partialorder %v4511_v2, 1.0  ;;  %vm4607_vm14 = vcmp.lt.f32.partialorder %v4511_v2, 17.0 }
 0x2d1   : > { %v4465_v18 = vmul.f32 0.055555556, %v18057_v31  ;;  %vm4591_vm13 = vmand %vm18066_vm9, %vm4575_vm10 }
 0x2d2   : > { %vm18099_vm7 = vmand %vm4591_vm13, %vm4607_vm14 }
 0x2d3   : > { %v3792_v30 = vpop.f32.mrf.mxu2  ;;  %v18037_v14 = vpop.f32.mrf.mxu3 }
 0x2d4   : > { %v3816_v58 = vadd.f32 %v3792_v30, %v17918_v8  ;;  %v18039_v62 = vpop.f32.mrf.mxu0  ;;  %v4374_v32 = vpop.f32.mrf.mxu1  ;;  %v5270_v8 = vsel %vm720_vm2, %v17968_v63, %v18031_v13  ;;  %v18064_v63 = vld [vmem:[%s15629_s30 + $0x9c] sm:$0xff] }
 0x2d5   : > { %v4414_v61 = vadd.f32 %v4374_v32, %v4228_v53  ;;  %v14316_v30 = vld [vmem:[#allocation6 + $0x1c0] sm:$0xff]  ;;  %v4466_v32 = vmul.f32 0.055555556, %v18060_v43 }
 0x2d6   : > { %v18052_v15 = vadd.f32 %v17932_v21, %v3816_v58  ;;  %5458 = vmatmul.bf16.gmra.mxu0 %v15159_v5  ;;  %v4512_v21 = vsub.f32 %v18001_v17, %v4496_v49  ;;  %v21623_v58 = vshrl.u32 %v17650_v0, 16  ;;  %v21624_v49 = vshll.u32 %v17650_v0, 16  ;;  %5941 = vmatpush.bf16.msra.mxu3 %v14316_v30 }
 0x2d7   : > { %v4430_v57 = vmax.f32 %v4414_v61, 0.0  ;;  %5633 = vmatmul.bf16.vlgmr.msrb.gmra.mxu1 %v5544_v27 }
 0x2d8   : > { %5147 = vmatmul.bf16.gmra.mxu2 %v5067_v20  ;;  %5347 = vmatmul.bf16.gmra.mxu3 %v5270_v8  ;;  %v5068_v38 = vrot.slane %v21623_v58, 3  ;;  %v5032_v20 = vld [vmem:[%s15629_s30 + $0xa4] sm:$0xf]  ;;  %vm4576_vm12 = vcmp.gt.f32.partialorder %v4512_v21, 1.0  ;;  %v5069_v61 = vrot.slane %v21624_v49, 4  ;;  %v5545_v8 = vshrl.u32 %v17998_v16, 16 }
 0x2d9   : > { %v4670_v39 = vmul.f32 %v12617_v10, %v4430_v57  ;;  %v14311_v10 = vld [vmem:[#allocation6 + $0x198] sm:$0xff]  ;;  %v14343_v57 = vld [vmem:[#allocation8 + $0x20] sm:$0xff]  ;;  %v5050_v46 = vunpack.c.l.b16 %v5032_v20  ;;  %vm18090_vm15 = vmand %vm4560_vm11, %vm4576_vm12  ;;  %vm4608_vm6 = vcmp.lt.f32.partialorder %v4512_v21, 17.0  ;;  %v18094_v16 = vfloor.f32 %v4466_v32 }
 0x2da   : > { %5814 = vmatpush.bf16.msrb.mxu2 %v14311_v10  ;;  %6546 = vmatpush.bf16.msra.mxu1 %v14343_v57  ;;  %v14310_v21 = vld [vmem:[#allocation6 + $0x190] sm:$0xff]  ;;  %v14342_v58 = vld [vmem:[#allocation8 + $0x18] sm:$0xff]  ;;  %vm18110_vm8 = vmand %vm18090_vm15, %vm4608_vm6  ;;  %v21631_v20 = vunpack.c.l.b16 %v17702_v60  ;;  %v12618_v60 = vsel %vm18099_vm7, 1.0, %v21521_v7 }
 0x2db   : > { %v3795_v24 = vpop.f32.mrf.mxu2  ;;  %v4686_v5 = vpack.c.bf16 %v4670_v39, %v4670_v39  ;;  %v18072_v53 = vpop.f32.mrf.mxu3  ;;  %v4481_v39 = vfloor.f32 %v4465_v18  ;;  %v18103_v18 = vor.u32 %v5069_v61, %v5068_v38  ;;  %v14362_v49 = vld [vmem:[#allocation8 + $0xb8] sm:$0xff]  ;;  %v4498_v10 = vmul.f32 18.0, %v18094_v16 }
 0x2dc   : > { %v3817_v19 = vadd.f32 %v3795_v24, %v17939_v50  ;;  %v18074_v17 = vpop.f32.mrf.mxu0  ;;  %v4376_v27 = vpop.f32.mrf.mxu1  ;;  %v5549_v50 = vshll.u32 %v18064_v63, 16  ;;  %v4229_v24 = vadd.f32 %v17954_v1, %v17783_v34  ;;  %v5547_v34 = vor.u32 %v5545_v8, %v18029_v47  ;;  %6889 = vmatpush.bf16.msrb.mxu3 %v14362_v49 }
 0x2dd   : > { %4702 = vst [vmem:[#allocation2 + $0x4c] sm:$0xf] %v4686_v5  ;;  %v14324_v5 = vld [vmem:[#allocation6 + $0x200] sm:$0xff]  ;;  %v4497_v38 = vmul.f32 18.0, %v4481_v39  ;;  %v5051_v47 = vpack.c.b16 %v5050_v46, %v21631_v20  ;;  %v12619_v2 = vsel %vm18110_vm8, 1.0, %v21521_v7  ;;  %vm4529_vm9 = vcmp.gt.f32.partialorder %v4481_v39, 0.5 }
 0x2de   : > { %v18097_v52 = vadd.f32 %v17952_v25, %v3817_v19  ;;  %v18106_v1 = vrot.slane %v5549_v50, 1  ;;  %v4415_v30 = vadd.f32 %v4376_v27, %v4229_v24  ;;  %v15160_v19 = vld [vmem:[%s15629_s30 + $0xa4] sm:$0xff]   ;;  %v4230_v27 = vadd.f32 %v17974_v11, %v17813_v36  ;;  %6085 = vmatpush.bf16.msra.mxu0 %v14324_v5  ;;  %5815 = vmatpush.bf16.msrb.mxu2 %v14310_v21  ;;  %v18134_v11 = vld [vmem:[%s15629_s30 + $0x94] sm:$0xff]  }
 0x2df   : > { %v5071_v36 = vsel %vm720_vm2, %v18023_v6, %v18103_v18  ;;  %v15467_v46 = vld [vmem:[%s15629_s30 + $0x94] sm:$0xf0]  ;;  %6547 = vmatpush.bf16.msra.mxu1 %v14342_v58  ;;  %v15468_v5 = vld [vmem:[%s15629_s30 + $0x94] sm:$0xe]  ;;  %v4513_v6 = vsub.f32 %v18057_v31, %v4497_v38  ;;  %v5073_v21 = vshrl.u32 %v5051_v47, 16  ;;  %vm4545_vm10 = vcmp.lt.f32.partialorder %v4481_v39, 16.5 }
 0x2e0   : > { %v4431_v24 = vmax.f32 %v4415_v30, 0.0  ;;  %v4514_v30 = vsub.f32 %v18060_v43, %v4498_v10  ;;  %v18147_v58 = vld [vmem:[%s15629_s30 + $0xa4] sm:$0xff]  ;;  %vm4530_vm11 = vcmp.gt.f32.partialorder %v18094_v16, 0.5  ;;  %vm4546_vm12 = vcmp.lt.f32.partialorder %v18094_v16, 16.5  ;;  %v21633_v38 = vld [vmem:[#allocation18_spill] sm:$0xff]  ;;  %vm18159_vm13 = vmand %vm4529_vm9, %vm4545_vm10 }
 0x2e1   : > { %v21632_v31 = vld [vmem:[#allocation17_spill] sm:$0xff]  ;;  %vm4577_vm14 = vcmp.gt.f32.partialorder %v4513_v6, 1.0  ;;  %vm4562_vm15 = vmand %vm4530_vm11, %vm4546_vm12  ;;  %v5557_v39 = vshll.u32 %v18147_v58, 16  ;;  %vm4609_vm8 = vcmp.lt.f32.partialorder %v4513_v6, 17.0 }
 0x2e2   : > { %v18153_v25 = vadd.f32 128.5, %v21632_v31  ;;  %vm4578_vm6 = vcmp.gt.f32.partialorder %v4514_v30, 1.0  ;;  %vm18183_vm7 = vmand %vm18159_vm13, %vm4577_vm14  ;;  %vm4610_vm10 = vcmp.lt.f32.partialorder %v4514_v30, 17.0 }
 0x2e3   : > { %v3797_v32 = vpop.f32.mrf.mxu2  ;;  %v18120_v8 = vpop.f32.mrf.mxu3  ;;  %vm18188_vm9 = vmand %vm4562_vm15, %vm4578_vm6  ;;  %v18198_v43 = vrot.slane %v5557_v39, 1  ;;  %v4232_v39 = vadd.f32 %v18039_v62, %v17880_v48 }
 0x2e4   : > { %v3818_v61 = vadd.f32 %v3797_v32, %v17961_v23  ;;  %v18122_v50 = vpop.f32.mrf.mxu0  ;;  %v4379_v57 = vpop.f32.mrf.mxu1  ;;  %v5552_v23 = vsel %vm1388_vm3, %v5547_v34, %v18106_v1  ;;  %v5076_v32 = vshll.u32 %v5051_v47, 16  ;;  %v18156_v47 = vadd.f32 128.5, %v21633_v38  ;;  %vm4625_vm11 = vmand %vm18183_vm7, %vm4609_vm8 }
 0x2e5   : > { %v4416_v0 = vadd.f32 %v4379_v57, %v4230_v27  ;;  %vm18213_vm12 = vmand %vm18188_vm9, %vm4610_vm10 }
 0x2e6   : > { %5463 = vmatmul.bf16.gmra.mxu0 %v15160_v19  ;;  %v18143_v34 = vadd.f32 %v17972_v28, %v3818_v61  ;;  %v4671_v19 = vmul.f32 %v12618_v60, %v4431_v24  ;;  %v5078_v27 = vrot.slane %v5076_v32, 4  ;;  %v5553_v61 = vshrl.u32 %v18064_v63, 16  ;;  %v18175_v24 = vld [vmem:[%s15629_s30 + $0x9c] sm:$0xff] }
 0x2e7   : > { %v4432_v20 = vmax.f32 %v4416_v0, 0.0  ;;  %5638 = vmatmul.bf16.gmra.mxu1 %v5552_v23  ;;  %v18177_v0 = vor.u32 %v15468_v5, %v15467_v46  ;;  %v4467_v63 = vmul.f32 0.055555556, %v18153_v25  ;;  %v4468_v16 = vmul.f32 0.055555556, %v18156_v47  ;;  %v14341_v5 = vld [vmem:[#allocation8 + $0x10] sm:$0xff] }
 0x2e8   : > { %5152 = vmatmul.bf16.gmra.mxu2 %v5071_v36  ;;  %5352 = vmatmul.bf16.gmra.mxu3 %v18031_v13  ;;  %v5075_v13 = vrot.slane %v5073_v21, 3  ;;  %v14309_v21 = vld [vmem:[#allocation6 + $0x188] sm:$0xff]  ;;  %v14744_v46 = vunpack.c.h.b16 %v17981_v55  ;;  %v21389_v55 = vrot.slane %v18175_v24, 1  ;;  %v12621_v48 = vsel %vm18213_vm12, 1.0, %v21521_v7 }
 0x2e9   : > { %v4672_v28 = vmul.f32 %v12619_v2, %v4432_v20  ;;  %v14370_v2 = vld [vmem:[#allocation8 + $0xf8] sm:$0xff]  ;;  %v14361_v20 = vld [vmem:[#allocation8 + $0xb0] sm:$0xff]  ;;  %5816 = vmatpush.bf16.msrb.mxu2 %v14309_v21  ;;  %v18205_v38 = vfloor.f32 %v4467_v63  ;;  %6548 = vmatpush.bf16.msra.mxu1 %v14341_v5  ;;  %v18217_v6 = vfloor.f32 %v4468_v16  ;;  %v12620_v63 = vsel %vm4625_vm11, 1.0, %v21521_v7  ;;  %v14340_v16 = vld [vmem:[#allocation8 + $0x8] sm:$0xff] }
 0x2ea   : > { %7167 = vmatpush.bf16.msrb.mxu0 %v14370_v2  ;;  %6890 = vmatpush.bf16.msrb.mxu3 %v14361_v20  ;;  %v14360_v2 = vld [vmem:[#allocation8 + $0xa8] sm:$0xff]  ;;  %v12823_v20 = vld [vmem:[%s15629_s30 + $0xac] sm:$0xf] }
 0x2eb   : > { %v3800_v49 = vpop.f32.mrf.mxu2  ;;  %v14697_v10 = vpack.c.bf16 %v4672_v28, %v4671_v19  ;;  %v18165_v60 = vpop.f32.mrf.mxu3  ;;  %v4231_v19 = vadd.f32 %v18008_v26, %v17855_v40  ;;  %v18195_v28 = vor.u32 %v5078_v27, %v5075_v13  ;;  %v14369_v13 = vld [vmem:[#allocation8 + $0xf0] sm:$0xff]  ;;  %v4499_v32 = vmul.f32 18.0, %v18205_v38 }
 0x2ec   : > { %v3819_v57 = vadd.f32 %v3800_v49, %v17985_v3  ;;  %v18167_v36 = vpop.f32.mrf.mxu0  ;;  %v4381_v23 = vpop.f32.mrf.mxu1  ;;  %v5555_v49 = vor.u32 %v5553_v61, %v18106_v1  ;;  %v5386_v61 = vpack.c.b16 %v14744_v46, %v14744_v46  ;;  %v14308_v3 = vld [vmem:[#allocation6 + $0x180] sm:$0xff]  ;;  %v4500_v5 = vmul.f32 18.0, %v18217_v6 }
 0x2ed   : > { %14990 = vst [vmem:[#allocation2 + $0x50] sm:$0xff] %v14697_v10   ;;  %v5872_v10 = vrot.slane %v18177_v0, 1  ;;  %v4417_v26 = vadd.f32 %v4381_v23, %v4231_v19  ;;  %v5080_v23 = vsel %vm720_vm2, %v18103_v18, %v18195_v28  ;;  %v14296_v19 = vld [vmem:[%s15629_s30 + $0xac] sm:$0x10]  ;;  %5817 = vmatpush.bf16.msrb.mxu2 %v14308_v3  ;;  %6549 = vmatpush.bf16.msra.mxu1 %v14340_v16  ;;  %vm4531_vm13 = vcmp.gt.f32.partialorder %v18205_v38, 0.5  ;;  %v21643_v3 = vld [vmem:[#allocation20_spill] sm:$0xff] }
 0x2ee   : > { %v18208_v40 = vadd.f32 %v18006_v29, %v3819_v57  ;;  %7168 = vmatpush.bf16.msrb.mxu0 %v14369_v13  ;;  %v5997_v13 = vshrl.u32 %v18177_v0, 16  ;;  %6891 = vmatpush.bf16.msrb.mxu3 %v14360_v2  ;;  %vm4547_vm14 = vcmp.lt.f32.partialorder %v18205_v38, 16.5  ;;  %vm4532_vm15 = vcmp.gt.f32.partialorder %v18217_v6, 0.5 }
 0x2ef   : > { %v5874_v62 = vsel %vm1865_vm4, %v5872_v10, %v21389_v55  ;;  %v4433_v46 = vmax.f32 %v4417_v26, 0.0  ;;  %v21387_v10 = vshrl.u32 %v18175_v24, 16  ;;  %v18259_v16 = vadd.f32 128.5, %v21643_v3  ;;  %vm4563_vm7 = vmand %vm4531_vm13, %vm4547_vm14  ;;  %v14339_v55 = vld [vmem:[#allocation8] sm:$0xff]  ;;  %v14378_v3 = vld [vmem:[#allocation8 + $0x138] sm:$0xff] }
 0x2f0   : > { %vm4548_vm6 = vcmp.lt.f32.partialorder %v18217_v6, 16.5 }
 0x2f1   : > { %v4673_v2 = vmul.f32 %v12620_v63, %v4433_v46  ;;  %v18271_v63 = vld [vmem:[%s21309_s3] ss:$0 sm:$0xff]  ;;  %vm4564_vm9 = vmand %vm4532_vm15, %vm4548_vm6  ;;  %6550 = vmatpush.bf16.msra.mxu1 %v14339_v55 }
 0x2f3   : > { %v3802_v27 = vpop.f32.mrf.mxu2  ;;  %v18223_v30 = vpop.f32.mrf.mxu3 }
 0x2f4   : > { %v3820_v29 = vadd.f32 %v3802_v27, %v18017_v9  ;;  %v18225_v57 = vpop.f32.mrf.mxu0  ;;  %v4384_v21 = vpop.f32.mrf.mxu1  ;;  %v5560_v9 = vsel %vm1388_vm3, %v5555_v49, %v18198_v43  ;;  %v21388_v49 = vshll.u32 %v18175_v24, 16  ;;  %v6000_v27 = vshll.u32 %v18177_v0, 16 }
 0x2f5   : > { %v4418_v18 = vadd.f32 %v4384_v21, %v4232_v39  ;;  %v21642_v39 = vld [vmem:[#allocation19_spill] sm:$0xff]  ;;  %v4516_v21 = vsub.f32 %v18156_v47, %v4500_v5  ;;  %7313 = vmatpush.bf16.msrb.mxu1 %v14378_v3  ;;  %v4236_v3 = vadd.f32 %v18225_v57, %v17964_v59 }
 0x2f6   : > { %v18243_v1 = vadd.f32 %v18037_v14, %v3820_v29  ;;  %5468 = vmatmul.bf16.gmra.mxu0 %v5386_v61  ;;  %v18252_v14 = vadd.f32 128.5, %v21642_v39  ;;  %v4515_v61 = vsub.f32 %v18153_v25, %v4499_v32  ;;  %v18256_v29 = vor.u32 %v14296_v19, %v12823_v20 }
 0x2f7   : > { %v4434_v26 = vmax.f32 %v4418_v18, 0.0  ;;  %5643 = vmatmul.bf16.gmra.mxu1 %v5560_v9  ;;  %v5561_v9 = vshrl.u32 %v18147_v58, 16  ;;  %v5999_v18 = vrot.slane %v5997_v13, 1  ;;  %v6004_v25 = vrot.slane %v21387_v10, 1 }
 0x2f8   : > { %5157 = vmatmul.bf16.gmra.mxu2 %v5080_v23  ;;  %5942 = vmatmul.bf16.vlgmr.msra.gmra.mxu3 %v5874_v62  ;;  %v6005_v62 = vrot.slane %v21388_v49, 2  ;;  %v6002_v58 = vrot.slane %v6000_v27, 2  ;;  %v4469_v5 = vmul.f32 0.055555556, %v18252_v14  ;;  %vm4579_vm8 = vcmp.gt.f32.partialorder %v4515_v61, 1.0  ;;  %v14368_v27 = vld [vmem:[#allocation8 + $0xe8] sm:$0xff] }
 0x2f9   : > { %v4674_v23 = vmul.f32 %v12621_v48, %v4434_v26  ;;  %v5565_v19 = vshll.u32 %v18256_v29, 16  ;;  %v4470_v13 = vmul.f32 0.055555556, %v18259_v16  ;;  %vm4580_vm10 = vcmp.gt.f32.partialorder %v4516_v21, 1.0  ;;  %v18290_v26 = vld [vmem:[%s15629_s30 + $0xa4] sm:$0xff]  ;;  %vm18295_vm12 = vmand %vm4563_vm7, %vm4579_vm8  ;;  %7169 = vmatpush.bf16.msrb.mxu0 %v14368_v27 }
 0x2fa   : > { %vm4611_vm11 = vcmp.lt.f32.partialorder %v4515_v61, 17.0  ;;  %v5563_v38 = vor.u32 %v5561_v9, %v18198_v43  ;;  %v4485_v10 = vfloor.f32 %v4469_v5  ;;  %vm18304_vm13 = vmand %vm4564_vm9, %vm4580_vm10  ;;  %vm4612_vm14 = vcmp.lt.f32.partialorder %v4516_v21, 17.0 }
 0x2fb   : > { %v4875_v0 = vpop.f32.mrf.mxu2  ;;  %v14702_v32 = vpack.c.bf16 %v4674_v23, %v4673_v2  ;;  %v18274_v48 = vpop.f32.mrf.mxu3  ;;  %v4233_v2 = vadd.f32 %v18074_v17, %v17904_v51  ;;  %v18308_v51 = vrot.slane %v5565_v19, 1  ;;  %v4486_v17 = vfloor.f32 %v4470_v13  ;;  %vm18314_vm15 = vmand %vm18295_vm12, %vm4611_vm11 }
 0x2fc   : > { %v4899_v47 = vadd.f32 %v18271_v63, %v4875_v0  ;;  %v18276_v46 = vpop.f32.mrf.mxu0  ;;  %v4386_v20 = vpop.f32.mrf.mxu1  ;;  %v6003_v0 = vor.u32 %v6002_v58, %v5999_v18  ;;  %v21390_v9 = vrot.slane %v18290_v26, 1  ;;  %v14354_v18 = vld [vmem:[#allocation8 + $0x78] sm:$0xff]  ;;  %v4234_v21 = vadd.f32 %v18122_v50, %v17922_v45  ;;  %vm4628_vm6 = vmand %vm18304_vm13, %vm4612_vm14 }
 0x2fd   : > { %14991 = vst [vmem:[#allocation2 + $0x58] sm:$0xff] %v14702_v32   ;;  %v18299_v32 = vor.u32 %v6005_v62, %v6004_v25  ;;  %v4419_v43 = vadd.f32 %v4386_v20, %v4233_v2  ;;  %v14359_v25 = vld [vmem:[#allocation8 + $0xa0] sm:$0xff]  ;;  %v4501_v20 = vmul.f32 18.0, %v4485_v10  ;;  %6702 = vmatpush.bf16.msra.mxu2 %v14354_v18  ;;  %v5568_v13 = vsel %vm1388_vm3, %v5563_v38, %v18308_v51  ;;  %v6331_v38 = vld [vmem:[#allocation2] sm:$0xc] }
 0x2fe   : > { %v18302_v6 = vadd.f32 %v18072_v53, %v4899_v47  ;;  %v4502_v45 = vmul.f32 18.0, %v4486_v17  ;;  %6892 = vmatpush.bf16.msrb.mxu3 %v14359_v25  ;;  %v12622_v27 = vsel %vm18314_vm15, 1.0, %v21521_v7  ;;  %v21650_v49 = vrot.slane %v18175_v24, 1 }
 0x2ff   : > { %v6007_v61 = vsel %vm2025_vm5, %v6003_v0, %v18299_v32  ;;  %v4435_v50 = vmax.f32 %v4419_v43, 0.0  ;;  %v12623_v55 = vsel %vm4628_vm6, 1.0, %v21521_v7  ;;  %vm4533_vm7 = vcmp.gt.f32.partialorder %v4485_v10, 0.5 }
 0x300   : > { %v5876_v23 = vsel %vm1865_vm4, %v21650_v49, %v21390_v9  ;;  %vm4549_vm8 = vcmp.lt.f32.partialorder %v4485_v10, 16.5  ;;  %v4517_v18 = vsub.f32 %v18252_v14, %v4501_v20  ;;  %v21391_v53 = vshrl.u32 %v18290_v26, 16  ;;  %v21653_v14 = vld [vmem:[#allocation22_spill] sm:$0xff] }
 0x301   : > { %vm4534_vm9 = vcmp.gt.f32.partialorder %v4486_v17, 0.5  ;;  %vm4550_vm10 = vcmp.lt.f32.partialorder %v4486_v17, 16.5  ;;  %v21654_v20 = vcvt.s32.f32 %v21653_v14  ;;  %vm18368_vm11 = vmand %vm4533_vm7, %vm4549_vm8  ;;  %v5719_v10 = vshrl.u32 %v18134_v11, 16 }
 0x302   : > { %vm4581_vm12 = vcmp.gt.f32.partialorder %v4517_v18, 1.0  ;;  %vm18377_vm13 = vmand %vm4534_vm9, %vm4550_vm10  ;;  %v4235_v39 = vadd.f32 %v18167_v36, %v17944_v4  ;;  %vm4613_vm6 = vcmp.lt.f32.partialorder %v4517_v18, 17.0  ;;  %v21664_v36 = vshll.u32 %v18175_v24, 16  ;;  %v21670_v18 = vld [vmem:[#allocation23_spill] sm:$0xff] }
 0x303   : > { %v4877_v62 = vpop.f32.mrf.mxu2  ;;  %v18321_v58 = vpop.f32.mrf.mxu3  ;;  %vm18396_vm15 = vmand %vm18368_vm11, %vm4581_vm12  ;;  %v21671_v31 = vcvt.s32.f32 %v21670_v18 }
 0x304   : > { %v4900_v47 = vadd.f32 %v18271_v63, %v4877_v62  ;;  %v18323_v5 = vpop.f32.mrf.mxu0  ;;  %v4389_v19 = vpop.f32.mrf.mxu1  ;;  %v18347_v62 = vld [vmem:[#allocation2 + $0x4] sm:$0xf]  ;;  %vm18420_vm9 = vmand %vm18396_vm15, %vm4613_vm6 }
 0x305   : > { %v4420_v2 = vadd.f32 %v4389_v19, %v4234_v21  ;;  %v4518_v21 = vsub.f32 %v18259_v16, %v4502_v45  ;;  %v21392_v16 = vunpack.c.l.b16 %v18347_v62 }
 0x306   : > { %6086 = vmatmul.bf16.vlgmr.msra.gmra.mxu0 %v6007_v61  ;;  %v18341_v0 = vadd.f32 %v18120_v8, %v4900_v47  ;;  %v5721_v61 = vshll.u32 %v18134_v11, 16  ;;  %v21651_v8 = vld [vmem:[#allocation21_spill] sm:$0xff] }
 0x307   : > { %v4436_v43 = vmax.f32 %v4420_v2, 0.0  ;;  %5648 = vmatmul.bf16.gmra.mxu1 %v5568_v13  ;;  %v21652_v47 = vcvt.s32.f32 %v21651_v8  ;;  %v18357_v2 = vadd.f32 128.5, %v21654_v20  ;;  %vm4582_vm14 = vcmp.gt.f32.partialorder %v4518_v21, 1.0  ;;  %v14367_v20 = vld [vmem:[#allocation8 + $0xe0] sm:$0xff]  ;;  %v14352_v8 = vld [vmem:[#allocation8 + $0x68] sm:$0xff] }
 0x308   : > { %5162 = vmatmul.bf16.gmra.mxu2 %v18195_v28  ;;  %5947 = vmatmul.bf16.gmra.mxu3 %v5876_v23  ;;  %v4675_v28 = vmul.f32 %v12622_v27, %v4435_v50  ;;  %v6381_v23 = vunpack.c.l.b16 %v6331_v38  ;;  %v6008_v27 = vrot.slane %v21391_v53, 1  ;;  %v14353_v53 = vld [vmem:[#allocation8 + $0x70] sm:$0xff]  ;;  %vm18406_vm7 = vmand %vm18377_vm13, %vm4582_vm14  ;;  %vm4614_vm8 = vcmp.lt.f32.partialorder %v4518_v21, 17.0 }
 0x309   : > { %v18353_v19 = vadd.f32 128.5, %v21652_v47  ;;  %v4676_v13 = vmul.f32 %v12623_v55, %v4436_v43  ;;  %v21657_v55 = vshll.u32 %v18290_v26, 16  ;;  %v5723_v47 = vrot.slane %v5721_v61, 1  ;;  %7170 = vmatpush.bf16.msrb.mxu0 %v14367_v20  ;;  %6703 = vmatpush.bf16.msra.mxu2 %v14353_v53  ;;  %v14357_v20 = vld [vmem:[#allocation8 + $0x90] sm:$0xff]  ;;  %vm18435_vm10 = vmand %vm18406_vm7, %vm4614_vm8 }
 0x30a   : > { %v4472_v14 = vmul.f32 0.055555556, %v18357_v2  ;;  %v18389_v17 = vpack.c.b16 %v21392_v16, %v6381_v23  ;;  %v5569_v61 = vshrl.u32 %v18256_v29, 16  ;;  %v18412_v50 = vrot.slane %v21664_v36, 1  ;;  %v18453_v36 = vld [vmem:[%s15629_s30 + $0xb4] sm:$0xf] }
 0x30b   : > { %v18359_v49 = vpop.f32.mrf.mxu2  ;;  %v14707_v45 = vpack.c.bf16 %v4676_v13, %v4675_v28  ;;  %v18362_v9 = vpop.f32.mrf.mxu3  ;;  %v6009_v38 = vrot.slane %v21657_v55, 2  ;;  %v18383_v28 = vld [vmem:[%s15629_s30 + $0xac] sm:$0xff]  ;;  %v4471_v13 = vmul.f32 0.055555556, %v18353_v19  ;;  %v5724_v4 = vor.u32 %v5723_v47, %v5719_v10 }
 0x30c   : > { %v18364_v25 = vpop.f32.mrf.mxu0  ;;  %v4391_v43 = vpop.f32.mrf.mxu1  ;;  %v14358_v55 = vld [vmem:[#allocation8 + $0x98] sm:$0xff]  ;;  %v18415_v53 = vfloor.f32 %v4472_v14 }
 0x30d   : > { %14992 = vst [vmem:[#allocation2 + $0x60] sm:$0xff] %v14707_v45   ;;  %v18401_v45 = vor.u32 %v6009_v38, %v6008_v27  ;;  %v4487_v16 = vfloor.f32 %v4471_v13  ;;  %6893 = vmatpush.bf16.msrb.mxu3 %v14358_v55  ;;  %v4421_v29 = vadd.f32 %v4391_v43, %v4235_v39  ;;  %v21393_v27 = vrot.slane %v18383_v28, 1  ;;  %v14366_v38 = vld [vmem:[#allocation8 + $0xd8] sm:$0xff]  ;;  %6704 = vmatpush.bf16.msra.mxu2 %v14352_v8 }
 0x30e   : > { %v5571_v13 = vor.u32 %v5569_v61, %v18308_v51  ;;  %7171 = vmatpush.bf16.msrb.mxu0 %v14366_v38  ;;  %v5729_v57 = vsel %vm1388_vm3, %v5724_v4, %v18412_v50  ;;  %v6408_v55 = vshrl.u32 %v18389_v17, 16  ;;  %v21669_v51 = vrot.slane %v18290_v26, 1  ;;  %v5676_v38 = vld [vmem:[%s15629_s30 + $0xb8] sm:$0x1] }
 0x30f   : > { %v6011_v14 = vsel %vm2025_vm5, %v18299_v32, %v18401_v45  ;;  %v4503_v21 = vmul.f32 18.0, %v4487_v16  ;;  %v4437_v11 = vmax.f32 %v4421_v29, 0.0  ;;  %v4504_v32 = vmul.f32 18.0, %v18415_v53 }
 0x310   : > { %v5878_v61 = vsel %vm1865_vm4, %v21669_v51, %v21393_v27  ;;  %v12624_v4 = vsel %vm18420_vm9, 1.0, %v21521_v7  ;;  %v12625_v29 = vsel %vm18435_vm10, 1.0, %v21521_v7  ;;  %vm4535_vm11 = vcmp.gt.f32.partialorder %v4487_v16, 0.5 }
 0x311   : > { %6894 = vmatpush.bf16.msrb.mxu3 %v14357_v20  ;;  %v6411_v8 = vshll.u32 %v18389_v17, 16  ;;  %vm4551_vm12 = vcmp.lt.f32.partialorder %v4487_v16, 16.5  ;;  %v4519_v10 = vsub.f32 %v18353_v19, %v4503_v21  ;;  %v21400_v51 = vunpack.c.l.b16 %v18453_v36  ;;  %v18480_v19 = vld [vmem:[#allocation2 + $0x8] sm:$0xff]  ;;  %6705 = vmatpush.bf16.msra.mxu2 %v14351_v42 }
 0x312   : > { %v5712_v27 = vunpack.c.l.b16 %v5676_v38  ;;  %v4677_v44 = vmul.f32 %v12624_v4, %v4437_v11  ;;  %vm4536_vm13 = vcmp.gt.f32.partialorder %v18415_v53, 0.5  ;;  %vm4552_vm14 = vcmp.lt.f32.partialorder %v18415_v53, 16.5  ;;  %vm18494_vm15 = vmand %vm4535_vm11, %vm4551_vm12 }
 0x313   : > { %v18424_v47 = vpop.f32.mrf.mxu2  ;;  %v18428_v39 = vpop.f32.mrf.mxu3  ;;  %v21401_v21 = vshll.u32 %v18480_v19, 16  ;;  %v21674_v38 = vshll.u32 %v18383_v28, 16  ;;  %vm4583_vm6 = vcmp.gt.f32.partialorder %v4519_v10, 1.0  ;;  %v6410_v18 = vrot.slane %v6408_v55, 2  ;;  %vm18504_vm7 = vmand %vm4536_vm13, %vm4552_vm14  ;;  %v14377_v55 = vld [vmem:[#allocation8 + $0x130] sm:$0xff] }
 0x314   : > { %v18430_v43 = vpop.f32.mrf.mxu0  ;;  %v4394_v59 = vpop.f32.mrf.mxu1  ;;  %v18510_v16 = vpack.c.b16 %v5712_v27, %v21400_v51  ;;  %v4901_v27 = vadd.f32 %v18271_v63, %v18359_v49  ;;  %vm18524_vm9 = vmand %vm18494_vm15, %vm4583_vm6  ;;  %vm4615_vm10 = vcmp.lt.f32.partialorder %v4519_v10, 17.0  ;;  %7314 = vmatpush.bf16.msrb.mxu1 %v14377_v55  ;;  %v21683_v49 = vshrl.u32 %v18175_v24, 16 }
 0x315   : > { %v4422_v23 = vadd.f32 %v4394_v59, %v4236_v3  ;;  %v21395_v59 = vshrl.u32 %v18383_v28, 16  ;;  %v6013_v4 = vrot.slane %v21674_v38, 2  ;;  %v14365_v38 = vld [vmem:[#allocation8 + $0xd0] sm:$0xff]  ;;  %v6421_v22 = vrot.slane %v21401_v21, 3  ;;  %6895 = vmatpush.bf16.msrb.mxu3 %v14356_v35  ;;  %vm18548_vm13 = vmand %vm18524_vm9, %vm4615_vm10 }
 0x316   : > { %6091 = vmatmul.bf16.gmra.mxu0 %v6011_v14  ;;  %v18469_v14 = vadd.f32 128.5, %v21671_v31  ;;  %v21402_v31 = vshrl.u32 %v18480_v19, 16  ;;  %v21684_v21 = vshll.u32 %v18290_v26, 16  ;;  %v4238_v42 = vadd.f32 %v18323_v5, %v18021_v56 }
 0x317   : > { %v4438_v20 = vmax.f32 %v4422_v23, 0.0  ;;  %5653 = vmatmul.bf16.gmra.mxu1 %v5571_v13  ;;  %v4520_v13 = vsub.f32 %v18357_v2, %v4504_v32  ;;  %v6012_v32 = vrot.slane %v21395_v59, 1  ;;  %v6413_v59 = vrot.slane %v6411_v8, 3  ;;  %7172 = vmatpush.bf16.msrb.mxu0 %v14365_v38 }
 0x318   : > { %5818 = vmatmul.bf16.vlgmr.msrb.gmra.mxu2 %v5729_v57  ;;  %5952 = vmatmul.bf16.gmra.mxu3 %v5878_v61  ;;  %v21672_v57 = vld [vmem:[#allocation24_spill] sm:$0xff]  ;;  %v6418_v53 = vrot.slane %v21402_v31, 2  ;;  %v18542_v31 = vrot.slane %v21684_v21, 1  ;;  %v21687_v51 = vunpack.c.l.b16 %v18453_v36 }
 0x319   : > { %v4678_v17 = vmul.f32 %v12625_v29, %v4438_v20  ;;  %v21673_v23 = vcvt.s32.f32 %v21672_v57  ;;  %vm4584_vm8 = vcmp.gt.f32.partialorder %v4520_v13, 1.0  ;;  %vm4616_vm12 = vcmp.lt.f32.partialorder %v4520_v13, 17.0 }
 0x31a   : > { %vm18533_vm11 = vmand %vm18504_vm7, %vm4584_vm8  ;;  %v5732_v20 = vor.u32 %v21683_v49, %v18412_v50  ;;  %v6414_v50 = vor.u32 %v6413_v59, %v6410_v18  ;;  %v18554_v38 = vor.u32 %v6421_v22, %v6418_v53  ;;  %v14364_v59 = vld [vmem:[#allocation8 + $0xc8] sm:$0xff]  ;;  %v18569_v22 = vadd.f32 %v18165_v60, %v4901_v27 }
 0x31b   : > { %v18474_v54 = vadd.f32 128.5, %v21673_v23  ;;  %v18476_v3 = vpop.f32.mrf.mxu2  ;;  %v14712_v11 = vpack.c.bf16 %v4678_v17, %v4677_v44  ;;  %v18484_v61 = vpop.f32.mrf.mxu3  ;;  %v4473_v44 = vmul.f32 0.055555556, %v18469_v14  ;;  %v5976_v17 = vld [vmem:[%s15629_s30 + $0xb8] sm:$0x3]  ;;  %vm4632_vm14 = vmand %vm18533_vm11, %vm4616_vm12  ;;  %7173 = vmatpush.bf16.msrb.mxu0 %v14364_v59  ;;  %v12626_v60 = vsel %vm18548_vm13, 1.0, %v21521_v7 }
 0x31c   : > { %v18486_v2 = vpop.f32.mrf.mxu0  ;;  %v4396_v29 = vpop.f32.mrf.mxu1  ;;  %v5737_v56 = vsel %vm1388_vm3, %v5732_v20, %v18542_v31  ;;  %v12627_v36 = vsel %vm4632_vm14, 1.0, %v21521_v7  ;;  %v6423_v53 = vsel %vm336_vm0, %v6414_v50, %v18554_v38  ;;  %v4902_v27 = vadd.f32 %v18271_v63, %v18424_v47 }
 0x31d   : > { %14993 = vst [vmem:[#allocation2 + $0x68] sm:$0xff] %v14712_v11   ;;  %v4474_v23 = vmul.f32 0.055555556, %v18474_v54  ;;  %v4237_v11 = vadd.f32 %v18276_v46, %v17991_v41  ;;  %v18528_v41 = vor.u32 %v6013_v4, %v6012_v32  ;;  %v5994_v46 = vunpack.c.l.b16 %v5976_v17 }
 0x31e   : > { %v4489_v32 = vfloor.f32 %v4473_v44  ;;  %v5879_v17 = vrot.slane %v18510_v16, 1 }
 0x31f   : > { %v4423_v4 = vadd.f32 %v4396_v29, %v4237_v11  ;;  %v4490_v57 = vfloor.f32 %v4474_v23  ;;  %v6015_v10 = vsel %vm2025_vm5, %v18401_v45, %v18528_v41  ;;  %v5995_v29 = vpack.c.b16 %v5994_v46, %v21687_v51  ;;  %v21691_v51 = vld [vmem:[#allocation26_spill] sm:$0xff] }
 0x320   : > { %v4505_v5 = vmul.f32 18.0, %v4489_v32  ;;  %v21688_v23 = vrot.slane %v18383_v28, 1  ;;  %vm4537_vm15 = vcmp.gt.f32.partialorder %v4489_v32, 0.5  ;;  %vm4553_vm6 = vcmp.lt.f32.partialorder %v4489_v32, 16.5 }
 0x321   : > { %v4439_v13 = vmax.f32 %v4423_v4, 0.0  ;;  %v4506_v11 = vmul.f32 18.0, %v4490_v57  ;;  %v6017_v8 = vshrl.u32 %v5995_v29, 16  ;;  %v6020_v49 = vshll.u32 %v5995_v29, 16  ;;  %v21689_v4 = vld [vmem:[#allocation25_spill] sm:$0xff]  ;;  %v18598_v29 = vld [vmem:[#allocation2 + $0x10] sm:$0xff]  ;;  %vm4569_vm9 = vmand %vm4537_vm15, %vm4553_vm6 }
 0x322   : > { %v5880_v45 = vsel %vm1865_vm4, %v21688_v23, %v5879_v17  ;;  %v4521_v20 = vsub.f32 %v18469_v14, %v4505_v5  ;;  %v21690_v55 = vcvt.s32.f32 %v21689_v4  ;;  %v21692_v47 = vcvt.s32.f32 %v21691_v51 }
 0x323   : > { %v18552_v24 = vpop.f32.mrf.mxu2  ;;  %v5021_v35 = vpop.f32.mrf.mxu3  ;;  %v4522_v50 = vsub.f32 %v18474_v54, %v4506_v11  ;;  %vm4538_vm7 = vcmp.gt.f32.partialorder %v4490_v57, 0.5  ;;  %vm4554_vm8 = vcmp.lt.f32.partialorder %v4490_v57, 16.5  ;;  %v21404_v14 = vshrl.u32 %v18598_v29, 16 }
 0x324   : > { %v18558_v21 = vpop.f32.mrf.mxu0  ;;  %v4399_v18 = vpop.f32.mrf.mxu1  ;;  %v4679_v35 = vmul.f32 %v12626_v60, %v4439_v13  ;;  %v18594_v59 = vadd.f32 128.5, %v21692_v47  ;;  %v6019_v54 = vrot.slane %v6017_v8, 1  ;;  %v6022_v23 = vrot.slane %v6020_v49, 2  ;;  %vm18614_vm11 = vmand %vm4538_vm7, %vm4554_vm8  ;;  %v14376_v49 = vld [vmem:[#allocation8 + $0x128] sm:$0xff] }
 0x325   : > { %v4424_v44 = vadd.f32 %v4399_v18, %v4238_v42  ;;  %v18589_v42 = vadd.f32 128.5, %v21690_v55  ;;  %vm4585_vm10 = vcmp.gt.f32.partialorder %v4521_v20, 1.0  ;;  %vm4586_vm12 = vcmp.gt.f32.partialorder %v4522_v50, 1.0  ;;  %7315 = vmatpush.bf16.msrb.mxu1 %v14376_v49 }
 0x326   : > { %6096 = vmatmul.bf16.gmra.mxu0 %v6015_v10  ;;  %v6427_v32 = vrot.slane %v21404_v14, 2  ;;  %v4239_v4 = vadd.f32 %v18364_v25, %v18052_v15  ;;  %vm18625_vm13 = vmand %vm4569_vm9, %vm4585_vm10  ;;  %vm4617_vm14 = vcmp.lt.f32.partialorder %v4521_v20, 17.0  ;;  %v18629_v55 = vor.u32 %v6022_v23, %v6019_v54  ;;  %v21699_v54 = vld [vmem:[#allocation27_spill] sm:$0xff] }
 0x327   : > { %v4440_v46 = vmax.f32 %v4424_v44, 0.0  ;;  %6551 = vmatmul.bf16.vlgmr.msra.gmra.mxu1 %v6423_v53  ;;  %v4475_v60 = vmul.f32 0.055555556, %v18589_v42  ;;  %vm4602_vm15 = vmand %vm18614_vm11, %vm4586_vm12  ;;  %vm4618_vm6 = vcmp.lt.f32.partialorder %v4522_v50, 17.0  ;;  %v21698_v15 = vshll.u32 %v18383_v28, 16 }
 0x328   : > { %5823 = vmatmul.bf16.gmra.mxu2 %v5737_v56  ;;  %5957 = vmatmul.bf16.gmra.mxu3 %v5880_v45  ;;  %v21403_v56 = vshll.u32 %v18598_v29, 16  ;;  %v18607_v45 = vadd.f32 %v18223_v30, %v4902_v27  ;;  %v14355_v30 = vld [vmem:[#allocation8 + $0x80] sm:$0xff]  ;;  %v14350_v27 = vld [vmem:[#allocation8 + $0x58] sm:$0xff]  ;;  %v21700_v23 = vcvt.s32.f32 %v21699_v54  ;;  %vm18648_vm7 = vmand %vm18625_vm13, %vm4617_vm14  ;;  %v4241_v14 = vadd.f32 %v18486_v2, %v18143_v34 }
 0x329   : > { %v4680_v10 = vmul.f32 %v12627_v36, %v4440_v46  ;;  %v6608_v36 = vld [vmem:[#allocation2] sm:$0x8]  ;;  %v4476_v46 = vmul.f32 0.055555556, %v18594_v59  ;;  %6896 = vmatpush.bf16.msrb.mxu3 %v14355_v30  ;;  %6706 = vmatpush.bf16.msra.mxu2 %v14350_v27  ;;  %v18638_v25 = vrot.slane %v21698_v15, 1  ;;  %v4491_v47 = vfloor.f32 %v4475_v60  ;;  %vm4634_vm8 = vmand %vm4602_vm15, %vm4618_vm6  ;;  %v14349_v15 = vld [vmem:[#allocation8 + $0x50] sm:$0xff] }
 0x32a   : > { %v6430_v8 = vrot.slane %v21403_v56, 3  ;;  %v4240_v60 = vadd.f32 %v18430_v43, %v18097_v52  ;;  %v21703_v30 = vunpack.c.l.b16 %v18347_v62  ;;  %v12629_v62 = vsel %vm4634_vm8, 1.0, %v21521_v7 }
 0x32b   : > { %v18596_v18 = vpop.f32.mrf.mxu2  ;;  %v14717_v5 = vpack.c.bf16 %v4680_v10, %v4679_v35  ;;  %v18602_v44 = vpop.f32.mrf.mxu3  ;;  %v6627_v35 = vunpack.c.l.b16 %v6608_v36  ;;  %v21697_v10 = vshrl.u32 %v18290_v26, 16  ;;  %v18644_v36 = vadd.f32 128.5, %v21700_v23 }
 0x32c   : > { %v18604_v13 = vpop.f32.mrf.mxu0  ;;  %v4401_v11 = vpop.f32.mrf.mxu1  ;;  %vm4539_vm9 = vcmp.gt.f32.partialorder %v4491_v47, 0.5  ;;  %vm4555_vm10 = vcmp.lt.f32.partialorder %v4491_v47, 16.5  ;;  %v21712_v34 = vshrl.u32 %v18383_v28, 16 }
 0x32d   : > { %14994 = vst [vmem:[#allocation2 + $0x70] sm:$0xff] %v14717_v5   ;;  %v5740_v51 = vor.u32 %v21697_v10, %v18542_v31  ;;  %v4425_v20 = vadd.f32 %v4401_v11, %v4239_v4  ;;  %v18640_v5 = vfloor.f32 %v4476_v46  ;;  %v18654_v31 = vor.u32 %v6430_v8, %v6427_v32  ;;  %v14363_v10 = vld [vmem:[#allocation8 + $0xc0] sm:$0xff]  ;;  %6707 = vmatpush.bf16.msra.mxu2 %v14349_v15  ;;  %vm18706_vm13 = vmand %vm4539_vm9, %vm4555_vm10 }
 0x32e   : > { %v6024_v46 = vsel %vm2025_vm5, %v18528_v41, %v18629_v55  ;;  %v18667_v27 = vpack.c.b16 %v21703_v30, %v6627_v35  ;;  %v4507_v8 = vmul.f32 18.0, %v4491_v47  ;;  %v4477_v57 = vmul.f32 0.055555556, %v18644_v36  ;;  %7174 = vmatpush.bf16.msrb.mxu0 %v14363_v10 }
 0x32f   : > { %v5745_v32 = vsel %vm1388_vm3, %v5740_v51, %v18638_v25  ;;  %v4441_v4 = vmax.f32 %v4425_v20, 0.0  ;;  %v4508_v43 = vmul.f32 18.0, %v18640_v5  ;;  %v12628_v41 = vsel %vm18648_vm7, 1.0, %v21521_v7  ;;  %v14409_v51 = vld [vmem:[#allocation8 + $0x1b8] sm:$0xff] }
 0x330   : > { %v6432_v35 = vsel %vm336_vm0, %v18554_v38, %v18654_v31  ;;  %v6789_v54 = vshrl.u32 %v18667_v27, 16  ;;  %v6792_v23 = vshll.u32 %v18667_v27, 16  ;;  %v4523_v50 = vsub.f32 %v18589_v42, %v4507_v8  ;;  %v14375_v38 = vld [vmem:[#allocation8 + $0x120] sm:$0xff]  ;;  %7845 = vmatpush.bf16.msra.mxu3 %v14409_v51 }
 0x331   : > { %v4681_v30 = vmul.f32 %v12628_v41, %v4441_v4  ;;  %vm4540_vm11 = vcmp.gt.f32.partialorder %v18640_v5, 0.5  ;;  %vm4556_vm12 = vcmp.lt.f32.partialorder %v18640_v5, 16.5  ;;  %7316 = vmatpush.bf16.msrb.mxu1 %v14375_v38  ;;  %v5750_v41 = vshll.u32 %v18510_v16, 16 }
 0x332   : > { %vm4587_vm14 = vcmp.gt.f32.partialorder %v4523_v50, 1.0  ;;  %v18713_v51 = vrot.slane %v6792_v23, 4  ;;  %vm18721_vm15 = vmand %vm4540_vm11, %vm4556_vm12  ;;  %vm4619_vm8 = vcmp.lt.f32.partialorder %v4523_v50, 17.0  ;;  %v5748_v2 = vor.u32 %v21712_v34, %v18638_v25 }
 0x333   : > { %v18652_v26 = vpop.f32.mrf.mxu2  ;;  %v18658_v11 = vpop.f32.mrf.mxu3  ;;  %vm4603_vm7 = vmand %vm18706_vm13, %vm4587_vm14  ;;  %v18754_v50 = vrot.slane %v5750_v41, 1 }
 0x334   : > { %v18660_v53 = vpop.f32.mrf.mxu0  ;;  %v4404_v49 = vpop.f32.mrf.mxu1  ;;  %vm18762_vm11 = vmand %vm4603_vm7, %vm4619_vm8 }
 0x335   : > { %v4426_v52 = vadd.f32 %v4404_v49, %v4240_v60  ;;  %v4903_v60 = vadd.f32 %v18271_v63, %v18476_v3  ;;  %v18690_v3 = vld [vmem:[#allocation2 + $0x4c] sm:$0xff] }
 0x336   : > { %6101 = vmatmul.bf16.gmra.mxu0 %v6024_v46  ;;  %v14417_v46 = vld [vmem:[#allocation8 + $0x1f8] sm:$0xff]  ;;  %v21408_v23 = vshrl.u32 %v18690_v3, 16 }
 0x337   : > { %v4442_v20 = vmax.f32 %v4426_v52, 0.0  ;;  %6556 = vmatmul.bf16.gmra.mxu1 %v6432_v35  ;;  %v18688_v52 = vfloor.f32 %v4477_v57  ;;  %v14348_v35 = vld [vmem:[#allocation8 + $0x48] sm:$0xff]  ;;  %8004 = vmatpush.bf16.msra.mxu0 %v14417_v46  ;;  %v6954_v57 = vld [vmem:[#allocation2 + $0x8] sm:$0x8] }
 0x338   : > { %5828 = vmatmul.bf16.gmra.mxu2 %v5745_v32  ;;  %5962 = vmatmul.bf16.gmra.mxu3 %v5879_v17  ;;  %v4524_v32 = vsub.f32 %v18594_v59, %v4508_v43  ;;  %v18696_v17 = vld [vmem:[#allocation2 + $0x18] sm:$0xff]  ;;  %v14408_v46 = vld [vmem:[#allocation8 + $0x1b0] sm:$0xff]  ;;  %v8122_v47 = vrot.slane %v21408_v23, 1 }
 0x339   : > { %v4682_v49 = vmul.f32 %v12629_v62, %v4442_v20  ;;  %v21405_v42 = vshrl.u32 %v18696_v17, 16  ;;  %v21406_v8 = vshll.u32 %v18696_v17, 16  ;;  %v18711_v62 = vrot.slane %v6789_v54, 3  ;;  %v18715_v20 = vld [vmem:[#allocation2 + $0xc] sm:$0xf]  ;;  %6708 = vmatpush.bf16.msra.mxu2 %v14348_v35  ;;  %7846 = vmatpush.bf16.msra.mxu3 %v14408_v46 }
 0x33a   : > { %vm4588_vm6 = vcmp.gt.f32.partialorder %v4524_v32, 1.0  ;;  %v4509_v38 = vmul.f32 18.0, %v18688_v52  ;;  %v18727_v54 = vadd.f32 %v18274_v48, %v4903_v60  ;;  %v21708_v48 = vshrl.u32 %v18480_v19, 16 }
 0x33b   : > { %v18692_v56 = vpop.f32.mrf.mxu2  ;;  %v14722_v59 = vpack.c.bf16 %v4682_v49, %v4681_v30  ;;  %v18700_v4 = vpop.f32.mrf.mxu3  ;;  %v6436_v30 = vrot.slane %v21405_v42, 2  ;;  %v6439_v5 = vrot.slane %v21406_v8, 3  ;;  %v7005_v49 = vunpack.c.l.b16 %v6954_v57  ;;  %vm18747_vm9 = vmand %vm18721_vm15, %vm4588_vm6 }
 0x33c   : > { %v18702_v43 = vpop.f32.mrf.mxu0  ;;  %v4406_v10 = vpop.f32.mrf.mxu1  ;;  %v6796_v60 = vrot.slane %v21708_v48, 3  ;;  %v21709_v35 = vshll.u32 %v18480_v19, 16  ;;  %vm4620_vm10 = vcmp.lt.f32.partialorder %v4524_v32, 17.0  ;;  %v21417_v15 = vunpack.c.l.b16 %v18715_v20 }
 0x33d   : > { %14995 = vst [vmem:[#allocation2 + $0x78] sm:$0xff] %v14722_v59   ;;  %v21416_v59 = vshll.u32 %v18690_v3, 16  ;;  %v4904_v19 = vadd.f32 %v18271_v63, %v18552_v24  ;;  %v4427_v46 = vadd.f32 %v4406_v10, %v4241_v14  ;;  %v4525_v48 = vsub.f32 %v18644_v36, %v4509_v38  ;;  %vm18779_vm14 = vmand %vm18747_vm9, %vm4620_vm10 }
 0x33e   : > { %v6797_v42 = vrot.slane %v21709_v35, 4  ;;  %v18766_v28 = vor.u32 %v6439_v5, %v6436_v30  ;;  %vm4541_vm12 = vcmp.gt.f32.partialorder %v18688_v52, 0.5  ;;  %vm4557_vm13 = vcmp.lt.f32.partialorder %v18688_v52, 16.5  ;;  %v18797_v30 = vld [vmem:[#allocation2 + $0x4c] sm:$0xf]  ;;  %v15071_v5 = vld [vmem:[#allocation2 + $0x50] sm:$0xff]  }
 0x33f   : > { %v8123_v24 = vrot.slane %v21416_v59, 2  ;;  %v4242_v14 = vadd.f32 %v18558_v21, %v18208_v40  ;;  %v6795_v10 = vor.u32 %v18713_v51, %v18711_v62  ;;  %v5753_v40 = vsel %vm1388_vm3, %v5748_v2, %v18754_v50  ;;  %vm18803_vm15 = vmand %vm4541_vm12, %vm4557_vm13  ;;  %v18807_v62 = vld [vmem:[#allocation2 + $0x10] sm:$0xff]  }
 0x340   : > { %v18787_v41 = vor.u32 %v6797_v42, %v6796_v60  ;;  %v18793_v21 = vpack.c.b16 %v21417_v15, %v7005_v49  ;;  %v4443_v57 = vmax.f32 %v4427_v46, 0.0  ;;  %vm4589_vm6 = vcmp.gt.f32.partialorder %v4525_v48, 1.0  ;;  %v14347_v51 = vld [vmem:[#allocation8 + $0x40] sm:$0xff] }
 0x341   : > { %v18795_v32 = vor.u32 %v8123_v24, %v8122_v47  ;;  %v18810_v49 = vadd.f32 %v18321_v58, %v4904_v19  ;;  %v12630_v60 = vsel %vm18762_vm11, 1.0, %v21521_v7  ;;  %v12631_v2 = vsel %vm18779_vm14, 1.0, %v21521_v7  ;;  %vm18833_vm7 = vmand %vm18803_vm15, %vm4589_vm6  ;;  %6709 = vmatpush.bf16.msra.mxu2 %v14347_v51  ;;  %v14374_v24 = vld [vmem:[#allocation8 + $0x118] sm:$0xff] }
 0x342   : > { %v6441_v52 = vsel %vm336_vm0, %v18654_v31, %v18766_v28  ;;  %v6799_v19 = vsel %vm720_vm2, %v6795_v10, %v18787_v41  ;;  %v21407_v47 = vunpack.c.l.b16 %v18797_v30  ;;  %v14851_v35 = vunpack.c.l.b16 %v15071_v5  ;;  %7317 = vmatpush.bf16.msrb.mxu1 %v14374_v24 }
 0x343   : > { %v4897_v8 = vpop.f32.mrf.mxu2  ;;  %v18774_v25 = vpop.f32.mrf.mxu3  ;;  %v18825_v46 = vsel %vm2025_vm5, %v17825_v37, %v18795_v32  ;;  %vm4621_vm8 = vcmp.lt.f32.partialorder %v4525_v48, 17.0  ;;  %v7040_v37 = vshrl.u32 %v18807_v62, 16  ;;  %v7043_v31 = vshll.u32 %v18807_v62, 16 }
 0x344   : > { %v18783_v8 = vpop.f32.mrf.mxu0  ;;  %v4409_v38 = vpop.f32.mrf.mxu1  ;;  %v4905_v36 = vadd.f32 %v18271_v63, %v18596_v18  ;;  %v4683_v10 = vmul.f32 %v12630_v60, %v4443_v57  ;;  %v7032_v51 = vshrl.u32 %v18793_v21, 16  ;;  %v4243_v18 = vadd.f32 %v18604_v13, %v18243_v1  ;;  %vm4637_vm9 = vmand %vm18833_vm7, %vm4621_vm8 }
 0x345   : > { %v4428_v34 = vadd.f32 %v4409_v38, %v4242_v14  ;;  %v14416_v14 = vld [vmem:[#allocation8 + $0x1f0] sm:$0xff]  ;;  %v21721_v24 = vshrl.u32 %v18598_v29, 16  ;;  %v7042_v13 = vrot.slane %v7040_v37, 3  ;;  %v7045_v48 = vrot.slane %v7043_v31, 4 }
 0x346   : > { %6106 = vmatmul.bf16.gmra.mxu0 %v18629_v55  ;;  %v14407_v55 = vld [vmem:[#allocation8 + $0x1a8] sm:$0xff] }
 0x347   : > { %v4444_v58 = vmax.f32 %v4428_v34, 0.0  ;;  %6561 = vmatmul.bf16.gmra.mxu1 %v6441_v52  ;;  %v18845_v34 = vld [vmem:[#allocation2 + $0x20] sm:$0xff]  ;;  %8005 = vmatpush.bf16.msra.mxu0 %v14416_v14  ;;  %v6800_v14 = vrot.slane %v21721_v24, 3 }
 0x348   : > { %5833 = vmatmul.bf16.gmra.mxu2 %v5753_v40  ;;  %6897 = vmatmul.bf16.vlgmr.msrb.gmra.mxu3 %v6799_v19  ;;  %v18843_v40 = vpack.c.b16 %v14851_v35, %v21407_v47  ;;  %v6443_v42 = vshrl.u32 %v18845_v34, 16  ;;  %v6446_v52 = vshll.u32 %v18845_v34, 16  ;;  %v7035_v19 = vshll.u32 %v18793_v21, 16 }
 0x349   : > { %v4684_v38 = vmul.f32 %v12631_v2, %v4444_v58  ;;  %v21722_v47 = vshll.u32 %v18598_v29, 16  ;;  %v12632_v21 = vsel %vm4637_vm9, 1.0, %v21521_v7  ;;  %7847 = vmatpush.bf16.msra.mxu3 %v14407_v55 }
 0x34a   : > { %v6445_v23 = vrot.slane %v6443_v42, 2  ;;  %v6448_v29 = vrot.slane %v6446_v52, 3  ;;  %v7037_v31 = vrot.slane %v7035_v19, 4 }
 0x34b   : > { %v5143_v5 = vpop.f32.mrf.mxu2  ;;  %v14727_v57 = vpack.c.bf16 %v4684_v38, %v4683_v10  ;;  %v18853_v2 = vpop.f32.mrf.mxu3  ;;  %v6801_v1 = vrot.slane %v21722_v47, 4  ;;  %v14394_v38 = vld [vmem:[#allocation8 + $0x178] sm:$0xff]  ;;  %v7034_v47 = vrot.slane %v7032_v51, 3 }
 0x34c   : > { %v5167_v60 = vadd.f32 %v5143_v5, %v18302_v6  ;;  %v18858_v58 = vpop.f32.mrf.mxu0  ;;  %v4411_v35 = vpop.f32.mrf.mxu1  ;;  %v18867_v5 = vadd.f32 %v18362_v9, %v4905_v36  ;;  %7579 = vmatpush.bf16.msrb.mxu2 %v14394_v38  ;;  %v4906_v9 = vadd.f32 %v18271_v63, %v18652_v26  ;;  %v18882_v24 = vor.u32 %v6448_v29, %v6445_v23  ;;  %v9909_v38 = vld [vmem:[#allocation2 + $0x54] sm:$0xe] }
 0x34d   : > { %14996 = vst [vmem:[#allocation2 + $0x80] sm:$0xff] %v14727_v57   ;;  %v4429_v10 = vadd.f32 %v4411_v35, %v4243_v18  ;;  %v18878_v18 = vor.u32 %v7045_v48, %v7042_v13  ;;  %v18884_v51 = vor.u32 %v6801_v1, %v6800_v14  ;;  %v7038_v26 = vor.u32 %v7037_v31, %v7034_v47 }
 0x34e   : > { %v5357_v6 = vadd.f32 %v18602_v44, %v5167_v60  ;;  %v5754_v44 = vshrl.u32 %v18510_v16, 16  ;;  %v18880_v60 = vld [vmem:[#allocation2 + $0x54] sm:$0xff]   ;;  %v18899_v1 = vadd.f32 %v18428_v39, %v4906_v9  ;;  %v14415_v39 = vld [vmem:[#allocation8 + $0x1e8] sm:$0xff]  ;;  %v18912_v9 = vld [vmem:[#allocation2 + $0x28] sm:$0xff] }
 0x34f   : > { %v4445_v37 = vmax.f32 %v4429_v10, 0.0  ;;  %v21409_v48 = vunpack.c.h.b16 %v18880_v60  ;;  %v7047_v14 = vsel %vm720_vm2, %v7038_v26, %v18878_v18  ;;  %8006 = vmatpush.bf16.msra.mxu0 %v14415_v39 }
 0x350   : > { %v5473_v57 = vadd.f32 %v18660_v53, %v5357_v6  ;;  %v5756_v6 = vor.u32 %v5754_v44, %v18754_v50  ;;  %v6450_v50 = vsel %vm336_vm0, %v18766_v28, %v18882_v24  ;;  %v4907_v28 = vadd.f32 %v18271_v63, %v18692_v56 }
 0x351   : > { %v4685_v36 = vmul.f32 %v12632_v21, %v4445_v37  ;;  %v9927_v21 = vunpack.c.l.b16 %v9909_v38 }
 0x353   : > { %v5145_v35 = vpop.f32.mrf.mxu2  ;;  %v4701_v10 = vpack.c.bf16 %v4685_v36, %v4685_v36  ;;  %v18887_v16 = vpop.f32.mrf.mxu3  ;;  %v9928_v44 = vpack.c.b16 %v21409_v48, %v9927_v21  ;;  %v6452_v36 = vshrl.u32 %v18912_v9, 16 }
 0x354   : > { %v5168_v53 = vadd.f32 %v5145_v35, %v18341_v0  ;;  %v18889_v19 = vpop.f32.mrf.mxu0  ;;  %v5634_v13 = vpop.f32.mrf.mxu1  ;;  %v15028_v0 = vld [vmem:[#allocation2 + $0x18] sm:$0xff]  }
 0x355   : > { %4717 = vst [vmem:[#allocation2 + $0x88] sm:$0xf] %v4701_v10  ;;  %v18894_v55 = vadd.f32 %v5634_v13, %v5473_v57  ;;  %v7049_v47 = vshrl.u32 %v15028_v0, 16  ;;  %v7052_v37 = vshll.u32 %v15028_v0, 16  ;;  %v14373_v57 = vld [vmem:[#allocation8 + $0x110] sm:$0xff]  ;;  %v10088_v56 = vshrl.u32 %v9928_v44, 16 }
 0x356   : > { %v5358_v23 = vadd.f32 %v18658_v11, %v5168_v53  ;;  %7175 = vmatmul.bf16.vlgmr.msrb.gmra.mxu0 %v7047_v14  ;;  %v6803_v11 = vsel %vm720_vm2, %v18787_v41, %v18884_v51  ;;  %v6455_v41 = vshll.u32 %v18912_v9, 16  ;;  %7318 = vmatpush.bf16.msrb.mxu1 %v14373_v57  ;;  %v18921_v53 = vld [vmem:[#allocation2 + $0x5c] sm:$0xff]  ;;  %v14406_v14 = vld [vmem:[#allocation8 + $0x1a0] sm:$0xff]  ;;  %v18927_v0 = vadd.f32 %v18484_v61, %v4907_v28 }
 0x357   : > { %6566 = vmatmul.bf16.gmra.mxu1 %v6450_v50  ;;  %v7051_v26 = vrot.slane %v7049_v47, 3  ;;  %v7054_v63 = vrot.slane %v7052_v37, 4  ;;  %v6454_v50 = vrot.slane %v6452_v36, 2  ;;  %v21724_v37 = vshll.u32 %v18696_v17, 16  ;;  %7848 = vmatpush.bf16.msra.mxu3 %v14406_v14 }
 0x358   : > { %5838 = vmatmul.bf16.gmra.mxu2 %v5756_v6  ;;  %v5474_v29 = vadd.f32 %v18702_v43, %v5358_v23  ;;  %6902 = vmatmul.bf16.gmra.mxu3 %v6803_v11  ;;  %v14393_v23 = vld [vmem:[#allocation8 + $0x170] sm:$0xff]  ;;  %v6457_v21 = vrot.slane %v6455_v41, 3  ;;  %v21723_v11 = vshrl.u32 %v18696_v17, 16  ;;  %v21415_v61 = vshll.u32 %v18921_v53, 16 }
 0x359   : > { %7580 = vmatpush.bf16.msrb.mxu2 %v14393_v23  ;;  %v18939_v57 = vor.u32 %v7054_v63, %v7051_v26  ;;  %v21410_v39 = vshrl.u32 %v18921_v53, 16  ;;  %v9929_v28 = vrot.slane %v9928_v44, 1  ;;  %v6629_v17 = vrot.slane %v18667_v27, 3 }
 0x35a   : > { %v6804_v47 = vrot.slane %v21723_v11, 3  ;;  %v18943_v11 = vor.u32 %v6457_v21, %v6454_v50  ;;  %v21726_v21 = vld [vmem:[#allocation28_spill] sm:$0xff] }
 0x35b   : > { %v5148_v31 = vpop.f32.mrf.mxu2  ;;  %v18917_v35 = vpop.f32.mrf.mxu3 }
 0x35c   : > { %v5169_v43 = vadd.f32 %v5148_v31, %v18569_v22  ;;  %v18919_v10 = vpop.f32.mrf.mxu0  ;;  %v5636_v6 = vpop.f32.mrf.mxu1  ;;  %v10091_v22 = vshll.u32 %v9928_v44, 16  ;;  %v9930_v31 = vrot.slane %v18921_v53, 1  ;;  %v10095_v44 = vrot.slane %v21410_v39, 1 }
 0x35d   : > { %v18924_v13 = vadd.f32 %v5636_v6, %v5474_v29  ;;  %v6459_v50 = vsel %vm336_vm0, %v18882_v24, %v18943_v11  ;;  %v14372_v24 = vld [vmem:[#allocation8 + $0x108] sm:$0xff] }
 0x35e   : > { %v5359_v38 = vadd.f32 %v18700_v4, %v5169_v43  ;;  %v6805_v4 = vrot.slane %v21724_v37, 4  ;;  %v10090_v43 = vrot.slane %v10088_v56, 1  ;;  %v10093_v6 = vrot.slane %v10091_v22, 2  ;;  %7319 = vmatpush.bf16.msrb.mxu1 %v14372_v24 }
 0x35f   : > { %v18958_v63 = vsel %vm1865_vm4, %v9929_v28, %v9930_v31  ;;  %v10096_v56 = vrot.slane %v21415_v61, 2  ;;  %v15029_v28 = vld [vmem:[#allocation2 + $0x20] sm:$0xff]  }
 0x360   : > { %v5475_v29 = vadd.f32 %v18783_v8, %v5359_v38  ;;  %v18946_v37 = vor.u32 %v6805_v4, %v6804_v47  ;;  %21725 = vst [vmem:[#allocation21_spill] sm:$0xff] %v18958_v63  ;;  %v10094_v14 = vor.u32 %v10093_v6, %v10090_v43  ;;  %v21727_v47 = vrot.slane %v21726_v21, 3  ;;  %v14414_v43 = vld [vmem:[#allocation8 + $0x1e0] sm:$0xff] }
 0x361   : > { %v18968_v22 = vor.u32 %v10096_v56, %v10095_v44  ;;  %v7058_v6 = vshrl.u32 %v15029_v28, 16  ;;  %v18984_v44 = vld [vmem:[#allocation2 + $0x30] sm:$0xff]  ;;  %8007 = vmatpush.bf16.msra.mxu0 %v14414_v43 }
 0x362   : > { %v6631_v4 = vsel %vm560_vm1, %v6629_v17, %v21727_v47  ;;  %v6461_v56 = vshrl.u32 %v18984_v44, 16 }
 0x363   : > { %v5150_v48 = vpop.f32.mrf.mxu2  ;;  %v18949_v38 = vpop.f32.mrf.mxu3  ;;  %v7060_v47 = vrot.slane %v7058_v6, 3 }
 0x364   : > { %v5170_v8 = vadd.f32 %v5150_v48, %v18607_v45  ;;  %v18951_v26 = vpop.f32.mrf.mxu0  ;;  %v5639_v27 = vpop.f32.mrf.mxu1  ;;  %v7056_v45 = vsel %vm720_vm2, %v18878_v18, %v18939_v57  ;;  %v6463_v24 = vrot.slane %v6461_v56, 2 }
 0x365   : > { %v18966_v23 = vadd.f32 %v5639_v27, %v5475_v29  ;;  %v18982_v29 = vsel %vm2025_vm5, %v10094_v14, %v18968_v22  ;;  %v6464_v27 = vshll.u32 %v18984_v44, 16 }
 0x366   : > { %v5360_v48 = vadd.f32 %v18774_v25, %v5170_v8  ;;  %7180 = vmatmul.bf16.gmra.mxu0 %v7056_v45  ;;  %v6807_v25 = vsel %vm720_vm2, %v18884_v51, %v18946_v37  ;;  %21728 = vst [vmem:[#allocation22_spill] sm:$0xff] %v18982_v29  ;;  %v7061_v8 = vshll.u32 %v15029_v28, 16  ;;  %v14392_v28 = vld [vmem:[#allocation8 + $0x168] sm:$0xff]  ;;  %v21775_v29 = vld [vmem:[#allocation19_spill] sm:$0xff] }
 0x367   : > { %6571 = vmatmul.bf16.gmra.mxu1 %v6459_v50  ;;  %7581 = vmatpush.bf16.msrb.mxu2 %v14392_v28 }
 0x368   : > { %6710 = vmatmul.bf16.vlgmr.msra.gmra.mxu2 %v6631_v4  ;;  %v5476_v18 = vadd.f32 %v18858_v58, %v5360_v48  ;;  %6907 = vmatmul.bf16.gmra.mxu3 %v6807_v25  ;;  %v18993_v48 = vld [vmem:[#allocation2 + $0x64] sm:$0xff]  ;;  %v7063_v4 = vrot.slane %v7061_v8, 4  ;;  %v14405_v25 = vld [vmem:[#allocation8 + $0x198] sm:$0xff] }
 0x369   : > { %7849 = vmatpush.bf16.msra.mxu3 %v14405_v25  ;;  %v21411_v6 = vshrl.u32 %v18993_v48, 16 }
 0x36a   : > { %v19009_v8 = vor.u32 %v7063_v4, %v7060_v47 }
 0x36b   : > { %v5153_v17 = vpop.f32.mrf.mxu2  ;;  %v18989_v51 = vpop.f32.mrf.mxu3 }
 0x36c   : > { %v5171_v58 = vadd.f32 %v5153_v17, %v18727_v54  ;;  %v18991_v45 = vpop.f32.mrf.mxu0  ;;  %v5641_v14 = vpop.f32.mrf.mxu1  ;;  %v6466_v54 = vrot.slane %v6464_v27, 3  ;;  %v6808_v17 = vrot.slane %v6443_v42, 3 }
 0x36d   : > { %v18996_v21 = vadd.f32 %v5641_v14, %v5476_v18  ;;  %v21412_v18 = vshll.u32 %v18993_v48, 16 }
 0x36e   : > { %v5361_v50 = vadd.f32 %v18853_v2, %v5171_v58  ;;  %v6809_v2 = vrot.slane %v6446_v52, 4  ;;  %v9932_v58 = vrot.slane %v18993_v48, 1  ;;  %v19012_v39 = vor.u32 %v6466_v54, %v6463_v24 }
 0x36f   : > { %v10100_v4 = vrot.slane %v21412_v18, 2 }
 0x370   : > { %v5477_v43 = vadd.f32 %v18889_v19, %v5361_v50  ;;  %v10099_v19 = vrot.slane %v21411_v6, 1  ;;  %v19019_v50 = vor.u32 %v6809_v2, %v6808_v17  ;;  %v19026_v47 = vsel %vm1865_vm4, %v9930_v31, %v9932_v58  ;;  %v15030_v31 = vld [vmem:[#allocation2 + $0x28] sm:$0xff]   ;;  %v14371_v2 = vld [vmem:[#allocation8 + $0x100] sm:$0xff] }
 0x371   : > { %21729 = vst [vmem:[#allocation23_spill] sm:$0xff] %v19026_v47  ;;  %v6468_v17 = vsel %vm336_vm0, %v18943_v11, %v19012_v39  ;;  %v7067_v11 = vshrl.u32 %v15030_v31, 16  ;;  %7320 = vmatpush.bf16.msrb.mxu1 %v14371_v2 }
 0x372   : > { %v19036_v54 = vor.u32 %v10100_v4, %v10099_v19  ;;  %v7070_v19 = vshll.u32 %v15030_v31, 16 }
 0x373   : > { %v5155_v14 = vpop.f32.mrf.mxu2  ;;  %v5355_v34 = vpop.f32.mrf.mxu3  ;;  %v7069_v31 = vrot.slane %v7067_v11, 3 }
 0x374   : > { %v5172_v42 = vadd.f32 %v5155_v14, %v18810_v49  ;;  %v19017_v52 = vpop.f32.mrf.mxu0  ;;  %v5644_v28 = vpop.f32.mrf.mxu1  ;;  %v7065_v49 = vsel %vm720_vm2, %v18939_v57, %v19009_v8  ;;  %v19049_v57 = vsel %vm2025_vm5, %v18968_v22, %v19036_v54  ;;  %v14413_v14 = vld [vmem:[#allocation8 + $0x1d8] sm:$0xff]  ;;  %v19051_v34 = vld [vmem:[#allocation2 + $0x38] sm:$0xff] }
 0x375   : > { %v19031_v24 = vadd.f32 %v5644_v28, %v5477_v43  ;;  %21730 = vst [vmem:[#allocation24_spill] sm:$0xff] %v19049_v57  ;;  %v21418_v4 = vshll.u32 %v19051_v34, 16  ;;  %8008 = vmatpush.bf16.msra.mxu0 %v14413_v14  ;;  %v19058_v28 = vld [vmem:[#allocation2 + $0x6c] sm:$0xff]  ;;  %v6813_v14 = vrot.slane %v6455_v41, 4  ;;  %v6129_v41 = vadd.f32 256.5, %v16338_v33 }
 0x376   : > { %v5362_v25 = vadd.f32 %v18887_v16, %v5172_v42  ;;  %7185 = vmatmul.bf16.gmra.mxu0 %v7065_v49  ;;  %v6811_v16 = vsel %vm720_vm2, %v18946_v37, %v19019_v50 }
 0x377   : > { %6576 = vmatmul.bf16.gmra.mxu1 %v6468_v17  ;;  %v6475_v2 = vrot.slane %v21418_v4, 3 }
 0x378   : > { %6715 = vmatmul.bf16.gmra.mxu2 %v17212_v12  ;;  %v5478_v43 = vadd.f32 %v18919_v10, %v5362_v25  ;;  %6912 = vmatmul.bf16.gmra.mxu3 %v6811_v16  ;;  %v6470_v12 = vshrl.u32 %v19051_v34, 16  ;;  %v7072_v16 = vrot.slane %v7070_v19, 4 }
 0x37a   : > { %v6472_v6 = vrot.slane %v6470_v12, 2  ;;  %v19074_v11 = vor.u32 %v7072_v16, %v7069_v31 }
 0x37b   : > { %v5158_v42 = vpop.f32.mrf.mxu2  ;;  %v19056_v37 = vpop.f32.mrf.mxu3 }
 0x37c   : > { %v5173_v10 = vadd.f32 %v5158_v42, %v18867_v5  ;;  %v5471_v22 = vpop.f32.mrf.mxu0  ;;  %v5646_v25 = vpop.f32.mrf.mxu1  ;;  %v6812_v5 = vrot.slane %v6452_v36, 3  ;;  %v7074_v33 = vsel %vm720_vm2, %v19009_v8, %v19074_v11  ;;  %v14404_v8 = vld [vmem:[#allocation8 + $0x190] sm:$0xff] }
 0x37d   : > { %v19061_v17 = vadd.f32 %v5646_v25, %v5478_v43  ;;  %v21413_v43 = vshrl.u32 %v19058_v28, 16  ;;  %v9934_v25 = vrot.slane %v19058_v28, 1  ;;  %7850 = vmatpush.bf16.msra.mxu3 %v14404_v8  ;;  %v14425_v8 = vld [vmem:[#allocation8 + $0x238] sm:$0xff] }
 0x37e   : > { %v5363_v49 = vadd.f32 %v18917_v35, %v5173_v10  ;;  %v21414_v35 = vshll.u32 %v19058_v28, 16  ;;  %v19076_v10 = vor.u32 %v6475_v2, %v6472_v6  ;;  %v19078_v22 = vor.u32 %v6813_v14, %v6812_v5  ;;  %v15031_v14 = vld [vmem:[#allocation2 + $0x30] sm:$0xff]   ;;  %8191 = vmatpush.bf16.msra.mxu1 %v14425_v8 }
 0x37f   : > { %v19096_v31 = vsel %vm1865_vm4, %v9932_v58, %v9934_v25 }
 0x380   : > { %v5479_v42 = vadd.f32 %v18951_v26, %v5363_v49  ;;  %v10103_v26 = vrot.slane %v21413_v43, 1  ;;  %v10104_v49 = vrot.slane %v21414_v35, 2  ;;  %21731 = vst [vmem:[#allocation25_spill] sm:$0xff] %v19096_v31  ;;  %v6477_v5 = vsel %vm336_vm0, %v19012_v39, %v19076_v10  ;;  %v14412_v35 = vld [vmem:[#allocation8 + $0x1d0] sm:$0xff] }
 0x381   : > { %v7076_v39 = vshrl.u32 %v15031_v14, 16  ;;  %8009 = vmatpush.bf16.msra.mxu0 %v14412_v35 }
 0x382   : > { %v19104_v2 = vor.u32 %v10104_v49, %v10103_v26  ;;  %v7079_v49 = vshll.u32 %v15031_v14, 16 }
 0x383   : > { %v5160_v19 = vpop.f32.mrf.mxu2  ;;  %v19082_v18 = vpop.f32.mrf.mxu3  ;;  %v7078_v14 = vrot.slane %v7076_v39, 3 }
 0x384   : > { %v5174_v36 = vadd.f32 %v5160_v19, %v18899_v1  ;;  %v19084_v9 = vpop.f32.mrf.mxu0  ;;  %v5649_v6 = vpop.f32.mrf.mxu1  ;;  %v21732_v19 = vld [vmem:[#allocation29_spill] sm:$0xff]  ;;  %v19117_v26 = vsel %vm2025_vm5, %v19036_v54, %v19104_v2 }
 0x385   : > { %v19099_v16 = vadd.f32 %v5649_v6, %v5479_v42  ;;  %v6138_v42 = vmul.f32 0.055555556, %v6129_v41  ;;  %21733 = vst [vmem:[#allocation26_spill] sm:$0xff] %v19117_v26 }
 0x386   : > { %v5364_v1 = vadd.f32 %v18949_v38, %v5174_v36  ;;  %7190 = vmatmul.bf16.gmra.mxu0 %v7074_v33  ;;  %v6815_v38 = vsel %vm720_vm2, %v19019_v50, %v19078_v22  ;;  %v14391_v36 = vld [vmem:[#allocation8 + $0x160] sm:$0xff]  ;;  %v21734_v33 = vld [vmem:[#allocation42_spill] sm:$0xff] }
 0x387   : > { %6581 = vmatmul.bf16.gmra.mxu1 %v6477_v5  ;;  %7582 = vmatpush.bf16.msrb.mxu2 %v14391_v36  ;;  %v6479_v5 = vshrl.u32 %v21734_v33, 16  ;;  %v6482_v50 = vshll.u32 %v21734_v33, 16  ;;  %v7081_v36 = vrot.slane %v7079_v49, 4  ;;  %v19137_v49 = vld [vmem:[#allocation2 + $0x74] sm:$0xff] }
 0x388   : > { %6720 = vmatmul.bf16.gmra.mxu2 %v21732_v19  ;;  %v5480_v58 = vadd.f32 %v18991_v45, %v5364_v1  ;;  %6917 = vmatmul.bf16.gmra.mxu3 %v6815_v38  ;;  %v6147_v38 = vfloor.f32 %v6138_v42  ;;  %v6817_v42 = vrot.slane %v6464_v27, 4 }
 0x389   : > { %v6481_v59 = vrot.slane %v6479_v5, 2  ;;  %v6484_v15 = vrot.slane %v6482_v50, 3  ;;  %v19134_v4 = vor.u32 %v7081_v36, %v7078_v14  ;;  %v21736_v50 = vld [vmem:[#allocation14_spill] sm:$0xff]  ;;  %v15032_v14 = vld [vmem:[#allocation2 + $0x38] sm:$0xff]  }
 0x38a   : > { %v19146_v44 = vadd.f32 256.5, %v21736_v50  ;;  %vm6174_vm10 = vcmp.gt.f32.partialorder %v6147_v38, 0.5  ;;  %vm6183_vm11 = vcmp.lt.f32.partialorder %v6147_v38, 16.5  ;;  %v21737_v36 = vld [vmem:[#allocation30_spill] sm:$0xff] }
 0x38b   : > { %v5163_v6 = vpop.f32.mrf.mxu2  ;;  %v19122_v1 = vpop.f32.mrf.mxu3  ;;  %vm6192_vm12 = vmand %vm6174_vm10, %vm6183_vm11 }
 0x38c   : > { %v5175_v45 = vadd.f32 %v5163_v6, %v18927_v0  ;;  %v19124_v19 = vpop.f32.mrf.mxu0  ;;  %v5651_v43 = vpop.f32.mrf.mxu1  ;;  %v6816_v0 = vrot.slane %v6461_v56, 3  ;;  %v6156_v6 = vmul.f32 18.0, %v6147_v38  ;;  %v6140_v8 = vmul.f32 0.055555556, %v19146_v44 }
 0x38d   : > { %v19127_v61 = vadd.f32 %v5651_v43, %v5480_v58  ;;  %v6485_v43 = vor.u32 %v6484_v15, %v6481_v59  ;;  %v21735_v58 = vld [vmem:[#allocation13_spill] sm:$0xff]  ;;  %v7083_v59 = vsel %vm720_vm2, %v19074_v11, %v19134_v4  ;;  %v14390_v11 = vld [vmem:[#allocation8 + $0x158] sm:$0xff] }
 0x38e   : > { %v5365_v54 = vadd.f32 %v18989_v51, %v5175_v45  ;;  %v6130_v39 = vadd.f32 256.5, %v21735_v58  ;;  %v6165_v56 = vsub.f32 %v6129_v41, %v6156_v6  ;;  %v21419_v41 = vrot.slane %v19137_v49, 1  ;;  %7583 = vmatpush.bf16.msrb.mxu2 %v14390_v11 }
 0x38f   : > { %v6486_v15 = vsel %vm336_vm0, %v19076_v10, %v6485_v43  ;;  %v6149_v50 = vfloor.f32 %v6140_v8 }
 0x390   : > { %v5481_v33 = vadd.f32 %v19017_v52, %v5365_v54  ;;  %v19143_v52 = vor.u32 %v6817_v42, %v6816_v0  ;;  %v6139_v54 = vmul.f32 0.055555556, %v6130_v39  ;;  %vm6201_vm13 = vcmp.gt.f32.partialorder %v6165_v56, 1.0 }
 0x391   : > { %v19166_v10 = vsel %vm1865_vm4, %v9934_v25, %v21419_v41  ;;  %v7085_v0 = vshrl.u32 %v15032_v14, 16  ;;  %v7088_v42 = vshll.u32 %v15032_v14, 16  ;;  %vm6210_vm14 = vmand %vm6192_vm12, %vm6201_vm13  ;;  %vm6219_vm15 = vcmp.lt.f32.partialorder %v6165_v56, 17.0 }
 0x392   : > { %v6819_v38 = vsel %vm720_vm2, %v19078_v22, %v19143_v52  ;;  %21738 = vst [vmem:[#allocation27_spill] sm:$0xff] %v19166_v10  ;;  %v6148_v22 = vfloor.f32 %v6139_v54  ;;  %vm6228_vm6 = vmand %vm6210_vm14, %vm6219_vm15  ;;  %v21739_v54 = vshll.u32 %v19051_v34, 16  ;;  %v21741_v34 = vld [vmem:[#allocation16_spill] sm:$0xff]  ;;  %vm6176_vm9 = vcmp.gt.f32.partialorder %v6149_v50, 0.5 }
 0x393   : > { %v5165_v51 = vpop.f32.mrf.mxu2  ;;  %v19139_v5 = vpop.f32.mrf.mxu3  ;;  %v7087_v14 = vrot.slane %v7085_v0, 3  ;;  %v14795_v0 = vunpack.c.l.b16 %v18807_v62  ;;  %vm6185_vm10 = vcmp.lt.f32.partialorder %v6149_v50, 16.5  ;;  %v19382_v10 = vadd.f32 256.5, %v21775_v29 }
 0x394   : > { %v19141_v35 = vpop.f32.mrf.mxu0  ;;  %v5654_v27 = vpop.f32.mrf.mxu1  ;;  %v6157_v56 = vmul.f32 18.0, %v6148_v22  ;;  %v6821_v11 = vrot.slane %v21739_v54, 4  ;;  %vm6175_vm7 = vcmp.gt.f32.partialorder %v6148_v22, 0.5  ;;  %v19189_v54 = vadd.f32 256.5, %v21741_v34  ;;  %vm6194_vm13 = vmand %vm6176_vm9, %vm6185_vm10  ;;  %v14402_v34 = vld [vmem:[#allocation8 + $0x180] sm:$0xff] }
 0x395   : > { %v19148_v45 = vadd.f32 %v5654_v27, %v5481_v33  ;;  %v14403_v33 = vld [vmem:[#allocation8 + $0x188] sm:$0xff]  ;;  %vm6184_vm8 = vcmp.lt.f32.partialorder %v6148_v22, 16.5 }
 0x396   : > { %7195 = vmatmul.bf16.gmra.mxu0 %v7083_v59  ;;  %7851 = vmatpush.bf16.msra.mxu3 %v14403_v33  ;;  %v14411_v27 = vld [vmem:[#allocation8 + $0x1c8] sm:$0xff]  ;;  %v14424_v59 = vld [vmem:[#allocation8 + $0x230] sm:$0xff]  ;;  %v6158_v33 = vmul.f32 18.0, %v6149_v50  ;;  %v6166_v41 = vsub.f32 %v6130_v39, %v6157_v56  ;;  %vm19206_vm11 = vmand %vm6175_vm7, %vm6184_vm8 }
 0x397   : > { %6586 = vmatmul.bf16.gmra.mxu1 %v6486_v15  ;;  %8010 = vmatpush.bf16.msra.mxu0 %v14411_v27 }
 0x398   : > { %6725 = vmatmul.bf16.gmra.mxu2 %v21737_v36  ;;  %6922 = vmatmul.bf16.gmra.mxu3 %v6819_v38  ;;  %v7090_v36 = vrot.slane %v7088_v42, 4  ;;  %v6767_v38 = vld [vmem:[#allocation2 + $0x40] sm:$0xf]  ;;  %v21740_v42 = vld [vmem:[#allocation15_spill] sm:$0xff]  ;;  %v6167_v62 = vsub.f32 %v19146_v44, %v6158_v33  ;;  %vm6202_vm12 = vcmp.gt.f32.partialorder %v6166_v41, 1.0 }
 0x399   : > { %8192 = vmatpush.bf16.msra.mxu1 %v14424_v59  ;;  %v19184_v27 = vadd.f32 256.5, %v21740_v42  ;;  %v15290_v44 = vld [vmem:[#allocation2 + $0x40] sm:$0xff]   ;;  %vm19221_vm15 = vmand %vm19206_vm11, %vm6202_vm12 }
 0x39a   : > { %v7094_v33 = vshrl.u32 %v15290_v44, 16  ;;  %vm6203_vm14 = vcmp.gt.f32.partialorder %v6167_v62, 1.0  ;;  %7852 = vmatpush.bf16.msra.mxu3 %v14402_v34  ;;  %vm6221_vm8 = vcmp.lt.f32.partialorder %v6167_v62, 17.0  ;;  %v14423_v34 = vld [vmem:[#allocation8 + $0x228] sm:$0xff]  ;;  %v21752_v62 = vld [vmem:[#allocation47_spill] sm:$0xff] }
 0x39b   : > { %v5819_v6 = vpop.f32.mrf.mxu2  ;;  %v19169_v43 = vpop.f32.mrf.mxu3  ;;  %vm19225_vm7 = vmand %vm6194_vm13, %vm6203_vm14 }
 0x39c   : > { %v5843_v51 = vadd.f32 %v5819_v6, %v18894_v55  ;;  %v19171_v58 = vpop.f32.mrf.mxu0  ;;  %v5656_v15 = vpop.f32.mrf.mxu1  ;;  %v6820_v55 = vrot.slane %v6470_v12, 3  ;;  %v12965_v6 = vsel %vm6228_vm6, 1.0, %v21521_v7  ;;  %vm6220_vm6 = vcmp.lt.f32.partialorder %v6166_v41, 17.0  ;;  %vm6230_vm10 = vmand %vm19225_vm7, %vm6221_vm8 }
 0x39d   : > { %v6786_v15 = vunpack.c.l.b16 %v6767_v38  ;;  %vm6229_vm9 = vmand %vm19221_vm15, %vm6220_vm6  ;;  %8193 = vmatpush.bf16.msra.mxu1 %v14423_v34 }
 0x39e   : > { %v5967_v25 = vadd.f32 %v19056_v37, %v5843_v51  ;;  %v19180_v51 = vor.u32 %v7090_v36, %v7087_v14  ;;  %v19186_v12 = vor.u32 %v6821_v11, %v6820_v55  ;;  %v21742_v11 = vunpack.c.l.b16 %v18715_v20  ;;  %v21745_v20 = vld [vmem:[#allocation31_spill] sm:$0xff] }
 0x39f   : > { %v6787_v39 = vpack.c.b16 %v6786_v15, %v6786_v15  ;;  %v6142_v15 = vmul.f32 0.055555556, %v19189_v54 }
 0x3a0   : > { %v6111_v8 = vadd.f32 %v19084_v9, %v5967_v25  ;;  %v7092_v55 = vsel %vm720_vm2, %v19134_v4, %v19180_v51  ;;  %v6823_v22 = vsel %vm720_vm2, %v19143_v52, %v19186_v12 }
 0x3a2   : > { %v6120_v37 = vmax.f32 %v6111_v8, 0.0  ;;  %v6141_v8 = vmul.f32 0.055555556, %v19184_v27 }
 0x3a3   : > { %v5821_v59 = vpop.f32.mrf.mxu2  ;;  %v19192_v38 = vpop.f32.mrf.mxu3 }
 0x3a4   : > { %v6255_v9 = vmul.f32 %v12965_v6, %v6120_v37  ;;  %v5844_v25 = vadd.f32 %v5821_v59, %v18924_v13  ;;  %v19194_v14 = vpop.f32.mrf.mxu0  ;;  %v19197_v36 = vpop.f32.mrf.mxu1  ;;  %v7249_v13 = vpack.c.b16 %v14795_v0, %v21742_v11  ;;  %v15291_v37 = vld [vmem:[#allocation2 + $0x14] sm:$0xff]   ;;  %v7097_v0 = vshll.u32 %v15290_v44, 16  ;;  %v14389_v59 = vld [vmem:[#allocation8 + $0x150] sm:$0xff] }
 0x3a5   : > { %v7695_v42 = vunpack.c.l.b16 %v15291_v37  ;;  %v6150_v52 = vfloor.f32 %v6141_v8  ;;  %7584 = vmatpush.bf16.msrb.mxu2 %v14389_v59  ;;  %v21750_v11 = vld [vmem:[#allocation33_spill] sm:$0xff]  ;;  %v14410_v59 = vld [vmem:[#allocation8 + $0x1c0] sm:$0xff] }
 0x3a6   : > { %v6264_v56 = vpack.c.bf16 %v6255_v9, %v6255_v9  ;;  %7200 = vmatmul.bf16.gmra.mxu0 %v7092_v55  ;;  %v5968_v4 = vadd.f32 %v19082_v18, %v5844_v25  ;;  %v6825_v9 = vshrl.u32 %v6787_v39, 16  ;;  %v6828_v55 = vshll.u32 %v6787_v39, 16 }
 0x3a7   : > { %7321 = vmatmul.bf16.vlgmr.msrb.gmra.mxu1 %v7249_v13  ;;  %v21751_v39 = vunpack.c.h.b16 %v21750_v11  ;;  %8011 = vmatpush.bf16.msra.mxu0 %v14410_v59  ;;  %vm6177_vm11 = vcmp.gt.f32.partialorder %v6150_v52, 0.5  ;;  %vm6186_vm12 = vcmp.lt.f32.partialorder %v6150_v52, 16.5 }
 0x3a8   : > { %6273 = vst [vmem:[#allocation2 + $0x8c] sm:$0xf] %v6264_v56  ;;  %6730 = vmatmul.bf16.gmra.mxu2 %v21745_v20  ;;  %6927 = vmatmul.bf16.gmra.mxu3 %v6823_v22  ;;  %v6151_v56 = vfloor.f32 %v6142_v15  ;;  %v6112_v6 = vadd.f32 %v19124_v19, %v5968_v4  ;;  %v7096_v20 = vrot.slane %v7094_v33, 3  ;;  %v7099_v22 = vrot.slane %v7097_v0, 4  ;;  %vm19273_vm15 = vmand %vm6177_vm11, %vm6186_vm12 }
 0x3a9   : > { %v19231_v13 = vpack.c.b16 %v21751_v39, %v7695_v42  ;;  %v6827_v42 = vrot.slane %v6825_v9, 3  ;;  %v6830_v11 = vrot.slane %v6828_v55, 4  ;;  %v12966_v9 = vsel %vm6229_vm9, 1.0, %v21521_v7 }
 0x3aa   : > { %v6160_v33 = vmul.f32 18.0, %v6151_v56  ;;  %v6121_v4 = vmax.f32 %v6112_v6, 0.0  ;;  %v19249_v0 = vor.u32 %v7099_v22, %v7096_v20  ;;  %v12967_v55 = vsel %vm6230_vm10, 1.0, %v21521_v7  ;;  %v21754_v22 = vld [vmem:[#allocation18_spill] sm:$0xff] }
 0x3ab   : > { %v5824_v50 = vpop.f32.mrf.mxu2  ;;  %v19235_v37 = vpop.f32.mrf.mxu3  ;;  %v7724_v18 = vshll.u32 %v19231_v13, 16  ;;  %vm6178_vm13 = vcmp.gt.f32.partialorder %v6151_v56, 0.5  ;;  %v19262_v59 = vadd.f32 256.5, %v21754_v22  ;;  %vm6187_vm14 = vcmp.lt.f32.partialorder %v6151_v56, 16.5  ;;  %v19350_v56 = vld [vmem:[#allocation2 + $0x84] sm:$0xff] }
 0x3ac   : > { %v5845_v44 = vadd.f32 %v5824_v50, %v18966_v23  ;;  %v19237_v8 = vpop.f32.mrf.mxu0  ;;  %v19242_v15 = vpop.f32.mrf.mxu1  ;;  %v6159_v23 = vmul.f32 18.0, %v6150_v52  ;;  %v7030_v50 = vpack.c.b16 %v21752_v62, %v21752_v62  ;;  %v6169_v20 = vsub.f32 %v19189_v54, %v6160_v33  ;;  %v15163_v33 = vld [vmem:[#allocation2 + $0x14] sm:$0xff]   ;;  %vm19283_vm7 = vmand %vm6178_vm13, %vm6187_vm14  ;;  %21772 = vst [vmem:[#allocation42_spill] sm:$0xff] %v19350_v56 }
 0x3ad   : > { %v6256_v34 = vmul.f32 %v12966_v9, %v6121_v4  ;;  %v15077_v9 = vld [vmem:[#allocation2 + $0x80] sm:$0xff]   ;;  %v6144_v52 = vmul.f32 0.055555556, %v19262_v59  ;;  %v7726_v22 = vrot.slane %v7724_v18, 1 }
 0x3ae   : > { %v5969_v19 = vadd.f32 %v19122_v1, %v5845_v44  ;;  %v6831_v1 = vor.u32 %v6830_v11, %v6827_v42  ;;  %v6168_v39 = vsub.f32 %v19184_v27, %v6159_v23  ;;  %v21753_v44 = vld [vmem:[#allocation17_spill] sm:$0xff]  ;;  %v7103_v62 = vshrl.u32 %v7030_v50, 16 }
 0x3af   : > { %v19258_v6 = vadd.f32 256.5, %v21753_v44  ;;  %v8973_v27 = vld [vmem:[#allocation2 + $0x84] sm:$0xff]   ;;  %v7106_v44 = vshll.u32 %v7030_v50, 16  ;;  %vm6205_vm8 = vcmp.gt.f32.partialorder %v6169_v20, 1.0  ;;  %vm6223_vm12 = vcmp.lt.f32.partialorder %v6169_v20, 17.0  ;;  %v14456_v50 = vld [vmem:[#allocation8 + $0xb8] sm:$0xff] }
 0x3b0   : > { %v6113_v41 = vadd.f32 %v19141_v35, %v5969_v19  ;;  %vm6204_vm6 = vcmp.gt.f32.partialorder %v6168_v39, 1.0  ;;  %vm6222_vm10 = vcmp.lt.f32.partialorder %v6168_v39, 17.0  ;;  %vm19307_vm11 = vmand %vm19283_vm7, %vm6205_vm8  ;;  %v19316_v54 = vfloor.f32 %v6144_v52  ;;  %8892 = vmatpush.bf16.msrb.mxu0 %v14456_v50 }
 0x3b1   : > { %v6143_v4 = vmul.f32 0.055555556, %v19258_v6  ;;  %vm19296_vm9 = vmand %vm19273_vm15, %vm6204_vm6  ;;  %v21423_v50 = vrot.slane %v19350_v56, 1 }
 0x3b2   : > { %v6122_v25 = vmax.f32 %v6113_v41, 0.0  ;;  %vm19326_vm13 = vmand %vm19296_vm9, %vm6222_vm10  ;;  %vm6180_vm7 = vcmp.gt.f32.partialorder %v19316_v54, 0.5  ;;  %vm6189_vm8 = vcmp.lt.f32.partialorder %v19316_v54, 16.5 }
 0x3b3   : > { %v5826_v35 = vpop.f32.mrf.mxu2  ;;  %v19265_v19 = vpop.f32.mrf.mxu3  ;;  %v19311_v18 = vfloor.f32 %v6143_v4  ;;  %vm19338_vm14 = vmand %vm19307_vm11, %vm6223_vm12 }
 0x3b4   : > { %v6257_v42 = vmul.f32 %v12967_v55, %v6122_v25  ;;  %v5846_v11 = vadd.f32 %v5826_v35, %v18996_v21  ;;  %v19267_v41 = vpop.f32.mrf.mxu0  ;;  %v19269_v23 = vpop.f32.mrf.mxu1  ;;  %v7101_v21 = vsel %vm720_vm2, %v19180_v51, %v19249_v0  ;;  %v19288_v25 = vunpack.c.h.b16 %v8973_v27  ;;  %v21759_v35 = vld [vmem:[#allocation35_spill] sm:$0xff]  ;;  %vm19427_vm12 = vmand %vm6180_vm7, %vm6189_vm8 }
 0x3b5   : > { %v6832_v51 = vsel %vm720_vm2, %v19186_v12, %v6831_v1  ;;  %v21420_v1 = vshrl.u32 %v19137_v49, 16  ;;  %v21421_v12 = vshll.u32 %v19137_v49, 16  ;;  %vm6179_vm15 = vcmp.gt.f32.partialorder %v19311_v18, 0.5 }
 0x3b6   : > { %v14748_v26 = vpack.c.bf16 %v6257_v42, %v6256_v34  ;;  %v5970_v55 = vadd.f32 %v19139_v5, %v5846_v11  ;;  %7205 = vmatmul.bf16.gmra.mxu0 %v7101_v21  ;;  %v14388_v5 = vld [vmem:[#allocation8 + $0x148] sm:$0xff]  ;;  %v14448_v34 = vld [vmem:[#allocation8 + $0x78] sm:$0xff]  ;;  %v19300_v42 = vrot.slane %v7103_v62, 3  ;;  %v14876_v11 = vunpack.c.h.b16 %v15077_v9 }
 0x3b7   : > { %7326 = vmatmul.bf16.gmra.mxu1 %v15163_v33  ;;  %7585 = vmatpush.bf16.msrb.mxu2 %v14388_v5  ;;  %v19318_v21 = vld [vmem:[#allocation2 + $0x7c] sm:$0xff]  ;;  %vm6188_vm6 = vcmp.lt.f32.partialorder %v19311_v18, 16.5 }
 0x3b8   : > { %15016 = vst [vmem:[#allocation2 + $0x90] sm:$0xff] %v14748_v26   ;;  %6735 = vmatmul.bf16.gmra.mxu2 %v21759_v35  ;;  %6932 = vmatmul.bf16.gmra.mxu3 %v6832_v51  ;;  %v19302_v26 = vrot.slane %v7106_v44, 4  ;;  %v6114_v27 = vadd.f32 %v19171_v58, %v5970_v55  ;;  %v7722_v44 = vshrl.u32 %v19231_v13, 16  ;;  %v19321_v33 = vpack.c.b16 %v19288_v25, %v14876_v11  ;;  %v14422_v13 = vld [vmem:[#allocation8 + $0x220] sm:$0xff]  ;;  %vm19412_vm9 = vmand %vm6179_vm15, %vm6188_vm6 }
 0x3b9   : > { %8706 = vmatpush.bf16.msrb.mxu3 %v14448_v34  ;;  %21764 = vst [vmem:[#allocation28_spill] sm:$0xff] %v19318_v21  ;;  %v6161_v11 = vmul.f32 18.0, %v19311_v18  ;;  %8194 = vmatpush.bf16.msra.mxu1 %v14422_v13 }
 0x3ba   : > { %21765 = vst [vmem:[#allocation29_spill] sm:$0xff] %v19321_v33  ;;  %v7109_v35 = vor.u32 %v19302_v26, %v19300_v42  ;;  %v7727_v51 = vor.u32 %v7726_v22, %v7722_v44  ;;  %v6123_v57 = vmax.f32 %v6114_v27, 0.0  ;;  %v12968_v22 = vsel %vm19326_vm13, 1.0, %v21521_v7  ;;  %v15172_v33 = vld [vmem:[#allocation2 + $0x3c] sm:$0xff]  }
 0x3bb   : > { %v5829_v62 = vpop.f32.mrf.mxu2  ;;  %v19331_v58 = vpop.f32.mrf.mxu3  ;;  %v6162_v42 = vmul.f32 18.0, %v19316_v54  ;;  %v9938_v26 = vrot.slane %v19318_v21, 1  ;;  %v12969_v44 = vsel %vm19338_vm14, 1.0, %v21521_v7  ;;  %v21773_v27 = vrot.slane %v19137_v49, 1  ;;  %v19469_v54 = vld [vmem:[#allocation2 + $0x1c] sm:$0xff] }
 0x3bc   : > { %v5847_v9 = vadd.f32 %v5829_v62, %v19031_v24  ;;  %v19333_v55 = vpop.f32.mrf.mxu0  ;;  %v19342_v39 = vpop.f32.mrf.mxu1  ;;  %v21770_v24 = vld [vmem:[#allocation32_spill] sm:$0xff]  ;;  %v10107_v62 = vrot.slane %v21420_v1, 1  ;;  %v6258_v1 = vmul.f32 %v12968_v22, %v6123_v57  ;;  %v21778_v57 = vshrl.u32 %v19318_v21, 16 }
 0x3bd   : > { %v21771_v5 = vshll.u32 %v21770_v24, 16  ;;  %v19373_v4 = vsel %vm1865_vm4, %v21773_v27, %v9938_v26  ;;  %v6171_v13 = vsub.f32 %v19262_v59, %v6162_v42  ;;  %v19387_v27 = vsel %vm1865_vm4, %v9938_v26, %v21423_v50 }
 0x3be   : > { %v5971_v20 = vadd.f32 %v19169_v43, %v5847_v9  ;;  %21774 = vst [vmem:[#allocation13_spill] sm:$0xff] %v19373_v4  ;;  %v21777_v4 = vld [vmem:[#allocation20_spill] sm:$0xff]  ;;  %v10111_v59 = vrot.slane %v21778_v57, 1  ;;  %v7110_v26 = vsel %vm720_vm2, %v19249_v0, %v7109_v35  ;;  %v21786_v57 = vshrl.u32 %v19350_v56, 16 }
 0x3bf   : > { %v19348_v34 = vrot.slane %v21771_v5, 1  ;;  %v6170_v5 = vsub.f32 %v19258_v6, %v6161_v11  ;;  %21776 = vst [vmem:[#allocation14_spill] sm:$0xff] %v19387_v27  ;;  %vm6207_vm11 = vcmp.gt.f32.partialorder %v6171_v13, 1.0  ;;  %vm6225_vm6 = vcmp.lt.f32.partialorder %v6171_v13, 17.0  ;;  %v9660_v27 = vld [vmem:[#allocation2 + $0x94] sm:$0x1] }
 0x3c0   : > { %v6115_v43 = vadd.f32 %v19194_v14, %v5971_v20  ;;  %v10108_v20 = vrot.slane %v21421_v12, 2  ;;  %v19393_v12 = vadd.f32 256.5, %v21777_v4  ;;  %v21779_v4 = vshll.u32 %v19318_v21, 16  ;;  %vm6216_vm15 = vmand %vm19427_vm12, %vm6207_vm11 }
 0x3c1   : > { %v7732_v29 = vsel %vm1388_vm3, %v7727_v51, %v19348_v34  ;;  %vm6206_vm10 = vcmp.gt.f32.partialorder %v6170_v5, 1.0  ;;  %vm6224_vm14 = vcmp.lt.f32.partialorder %v6170_v5, 17.0  ;;  %vm6234_vm8 = vmand %vm6216_vm15, %vm6225_vm6 }
 0x3c2   : > { %v6124_v14 = vmax.f32 %v6115_v43, 0.0  ;;  %v10109_v42 = vor.u32 %v10108_v20, %v10107_v62  ;;  %v21783_v62 = vld [vmem:[#allocation38_spill] sm:$0xff]  ;;  %v6146_v20 = vmul.f32 0.055555556, %v19393_v12  ;;  %vm19437_vm13 = vmand %vm19412_vm9, %vm6206_vm10 }
 0x3c3   : > { %v5831_v9 = vpop.f32.mrf.mxu2  ;;  %v5965_v11 = vpop.f32.mrf.mxu3  ;;  %vm6233_vm7 = vmand %vm19437_vm13, %vm6224_vm14 }
 0x3c4   : > { %v6259_v43 = vmul.f32 %v12969_v44, %v6124_v14  ;;  %v5848_v6 = vadd.f32 %v5831_v9, %v19061_v17  ;;  %v19390_v52 = vpop.f32.mrf.mxu0  ;;  %v19397_v22 = vpop.f32.mrf.mxu1  ;;  %v15165_v44 = vld [vmem:[#allocation2 + $0x1c] sm:$0xff]   ;;  %v21422_v9 = vshll.u32 %v19350_v56, 16  ;;  %v10112_v14 = vrot.slane %v21779_v4, 2  ;;  %v14447_v11 = vld [vmem:[#allocation8 + $0x70] sm:$0xff] }
 0x3c5   : > { %v19419_v0 = vsel %vm2025_vm5, %v19104_v2, %v10109_v42  ;;  %8707 = vmatpush.bf16.msrb.mxu3 %v14447_v11  ;;  %v12970_v5 = vsel %vm6233_vm7, 1.0, %v21521_v7 }
 0x3c6   : > { %v14753_v17 = vpack.c.bf16 %v6259_v43, %v6258_v1  ;;  %7210 = vmatmul.bf16.gmra.mxu0 %v7110_v26  ;;  %v6145_v1 = vmul.f32 0.055555556, %v19382_v10  ;;  %21782 = vst [vmem:[#allocation30_spill] sm:$0xff] %v19419_v0  ;;  %v5972_v35 = vadd.f32 %v19192_v38, %v5848_v6  ;;  %v14387_v43 = vld [vmem:[#allocation8 + $0x140] sm:$0xff]  ;;  %v10113_v2 = vor.u32 %v10112_v14, %v10111_v59  ;;  %v14421_v38 = vld [vmem:[#allocation8 + $0x218] sm:$0xff]  ;;  %v14455_v6 = vld [vmem:[#allocation8 + $0xb0] sm:$0xff] }
 0x3c7   : > { %7331 = vmatmul.bf16.gmra.mxu1 %v15165_v44  ;;  %7586 = vmatpush.bf16.msrb.mxu2 %v14387_v43  ;;  %v10116_v59 = vrot.slane %v21422_v9, 2 }
 0x3c8   : > { %15017 = vst [vmem:[#allocation2 + $0x98] sm:$0xff] %v14753_v17   ;;  %6740 = vmatmul.bf16.gmra.mxu2 %v21783_v62  ;;  %v10115_v17 = vrot.slane %v21786_v57, 1  ;;  %7853 = vmatmul.bf16.vlgmr.msra.gmra.mxu3 %v7732_v29  ;;  %v19442_v26 = vsel %vm2025_vm5, %v10109_v42, %v10113_v2  ;;  %v6154_v29 = vfloor.f32 %v6145_v1  ;;  %v6116_v4 = vadd.f32 %v19237_v8, %v5972_v35  ;;  %v14440_v1 = vld [vmem:[#allocation8 + $0x38] sm:$0xff]  ;;  %v14446_v35 = vld [vmem:[#allocation8 + $0x68] sm:$0xff] }
 0x3c9   : > { %21789 = vst [vmem:[#allocation15_spill] sm:$0xff] %v19442_v26  ;;  %8195 = vmatpush.bf16.msra.mxu1 %v14421_v38  ;;  %8893 = vmatpush.bf16.msrb.mxu0 %v14455_v6  ;;  %v6155_v62 = vfloor.f32 %v6146_v20  ;;  %v19574_v26 = vld [vmem:[#allocation2 + $0x24] sm:$0xff] }
 0x3ca   : > { %v19453_v43 = vor.u32 %v10116_v59, %v10115_v17  ;;  %v6125_v11 = vmax.f32 %v6116_v4, 0.0  ;;  %v12971_v17 = vsel %vm6234_vm8, 1.0, %v21521_v7  ;;  %8708 = vmatpush.bf16.msrb.mxu3 %v14446_v35  ;;  %vm6181_vm9 = vcmp.gt.f32.partialorder %v6154_v29, 0.5 }
 0x3cb   : > { %v5834_v44 = vpop.f32.mrf.mxu2  ;;  %v19451_v51 = vpop.f32.mrf.mxu3  ;;  %v6164_v57 = vmul.f32 18.0, %v6155_v62  ;;  %8548 = vmatpush.bf16.msra.mxu2 %v14440_v1  ;;  %vm6190_vm10 = vcmp.lt.f32.partialorder %v6154_v29, 16.5  ;;  %vm6182_vm11 = vcmp.gt.f32.partialorder %v6155_v62, 0.5  ;;  %vm6191_vm12 = vcmp.lt.f32.partialorder %v6155_v62, 16.5 }
 0x3cc   : > { %v5849_v14 = vadd.f32 %v5834_v44, %v19099_v16  ;;  %v6109_v42 = vpop.f32.mrf.mxu0  ;;  %v19458_v18 = vpop.f32.mrf.mxu1  ;;  %v19463_v8 = vsel %vm2025_vm5, %v10113_v2, %v19453_v43  ;;  %v6163_v16 = vmul.f32 18.0, %v6154_v29  ;;  %v21424_v2 = vrot.slane %v19469_v54, 1  ;;  %vm6199_vm13 = vmand %vm6181_vm9, %vm6190_vm10 }
 0x3cd   : > { %21790 = vst [vmem:[#allocation16_spill] sm:$0xff] %v19463_v8  ;;  %v6260_v42 = vmul.f32 %v12970_v5, %v6125_v11  ;;  %v21795_v11 = vld [vmem:[#allocation44_spill] sm:$0xff]  ;;  %vm6200_vm15 = vmand %vm6182_vm11, %vm6191_vm12  ;;  %v19497_v5 = vld [vmem:[#allocation2 + $0x14] sm:$0xff] }
 0x3ce   : > { %v5973_v13 = vadd.f32 %v19235_v37, %v5849_v14  ;;  %v21791_v37 = vld [vmem:[#allocation34_spill] sm:$0xff]  ;;  %v6172_v44 = vsub.f32 %v19382_v10, %v6163_v16  ;;  %v15167_v16 = vld [vmem:[#allocation2 + $0x24] sm:$0xff]  }
 0x3cf   : > { %v7931_v6 = vrot.slane %v21791_v37, 1  ;;  %v6173_v37 = vsub.f32 %v19393_v12, %v6164_v57  ;;  %v14454_v57 = vld [vmem:[#allocation8 + $0xa8] sm:$0xff] }
 0x3d0   : > { %v6117_v20 = vadd.f32 %v19267_v41, %v5973_v13  ;;  %v21792_v41 = vld [vmem:[#allocation36_spill] sm:$0xff]  ;;  %vm6208_vm14 = vcmp.gt.f32.partialorder %v6172_v44, 1.0  ;;  %vm6226_vm8 = vcmp.lt.f32.partialorder %v6172_v44, 17.0  ;;  %8894 = vmatpush.bf16.msrb.mxu0 %v14454_v57 }
 0x3d1   : > { %v21793_v4 = vshll.u32 %v21792_v41, 16  ;;  %vm6209_vm6 = vcmp.gt.f32.partialorder %v6173_v37, 1.0  ;;  %vm6217_vm7 = vmand %vm6199_vm13, %vm6208_vm14  ;;  %vm6227_vm10 = vcmp.lt.f32.partialorder %v6173_v37, 17.0  ;;  %v7463_v37 = vshll.u32 %v19497_v5, 16 }
 0x3d2   : > { %v6126_v38 = vmax.f32 %v6117_v20, 0.0  ;;  %vm6218_vm9 = vmand %vm6200_vm15, %vm6209_vm6 }
 0x3d3   : > { %v5836_v59 = vpop.f32.mrf.mxu2  ;;  %v19475_v14 = vrot.slane %v21793_v4, 1  ;;  %v19478_v35 = vpop.f32.mrf.mxu3  ;;  %v21794_v4 = vshrl.u32 %v21770_v24, 16  ;;  %v14379_v24 = vld [vmem:[#allocation2 + $0xc] sm:$0xff]  ;;  %vm6235_vm11 = vmand %vm6217_vm7, %vm6226_vm8  ;;  %v7465_v57 = vrot.slane %v7463_v37, 1 }
 0x3d4   : > { %v6261_v13 = vmul.f32 %v12971_v17, %v6126_v38  ;;  %v5850_v1 = vadd.f32 %v5836_v59, %v19127_v61  ;;  %v19480_v20 = vpop.f32.mrf.mxu0  ;;  %v19483_v9 = vpop.f32.mrf.mxu1  ;;  %v7933_v61 = vsel %vm1865_vm4, %v7931_v6, %v21424_v2  ;;  %v7458_v59 = vshll.u32 %v14379_v24, 16  ;;  %vm6236_vm12 = vmand %vm6218_vm9, %vm6227_vm10 }
 0x3d5   : > { %v7735_v50 = vor.u32 %v21794_v4, %v19348_v34  ;;  %v14420_v34 = vld [vmem:[#allocation8 + $0x210] sm:$0xff] }
 0x3d6   : > { %v14758_v10 = vpack.c.bf16 %v6261_v13, %v6260_v42  ;;  %8012 = vmatmul.bf16.vlgmr.msra.gmra.mxu0 %v7933_v61  ;;  %v5974_v12 = vadd.f32 %v19265_v19, %v5850_v1  ;;  %8196 = vmatpush.bf16.msra.mxu1 %v14420_v34  ;;  %v14439_v42 = vld [vmem:[#allocation8 + $0x30] sm:$0xff]  ;;  %v14445_v13 = vld [vmem:[#allocation8 + $0x60] sm:$0xff]  ;;  %v7460_v4 = vrot.slane %v7458_v59, 1  ;;  %v7456_v34 = vshrl.u32 %v14379_v24, 16  ;;  %v21796_v59 = vld [vmem:[#allocation40_spill] sm:$0xff] }
 0x3d7   : > { %7336 = vmatmul.bf16.gmra.mxu1 %v15167_v16  ;;  %v7740_v62 = vsel %vm1388_vm3, %v7735_v50, %v19475_v14  ;;  %v6282_v1 = vld [vmem:[%s15629_s30 + $0xc] sm:$0xf]  ;;  %8549 = vmatpush.bf16.msra.mxu2 %v14439_v42  ;;  %v12973_v16 = vsel %vm6236_vm12, 1.0, %v21521_v7  ;;  %v21798_v24 = vshrl.u32 %v21792_v41, 16 }
 0x3d8   : > { %15018 = vst [vmem:[#allocation2 + $0xa0] sm:$0xff] %v14758_v10   ;;  %6745 = vmatmul.bf16.gmra.mxu2 %v21795_v11  ;;  %7858 = vmatmul.bf16.gmra.mxu3 %v7740_v62  ;;  %v6118_v19 = vadd.f32 %v19333_v55, %v5974_v12  ;;  %v6298_v61 = vunpack.c.l.bf16 %v6282_v1  ;;  %v19518_v11 = vld [vmem:[#allocation2 + $0x24] sm:$0xff]  ;;  %v7461_v1 = vor.u32 %v7460_v4, %v7456_v34 }
 0x3d9   : > { %8709 = vmatpush.bf16.msrb.mxu3 %v14445_v13  ;;  %v7934_v62 = vrot.slane %v19518_v11, 1  ;;  %v15169_v11 = vld [vmem:[#allocation2 + $0x2c] sm:$0xff]   ;;  %v7743_v37 = vor.u32 %v21798_v24, %v19475_v14  ;;  %v14438_v24 = vld [vmem:[#allocation8 + $0x28] sm:$0xff] }
 0x3da   : > { %v6127_v10 = vmax.f32 %v6118_v19, 0.0 }
 0x3db   : > { %v5839_v29 = vpop.f32.mrf.mxu2  ;;  %v19501_v17 = vpop.f32.mrf.mxu3  ;;  %8550 = vmatpush.bf16.msra.mxu2 %v14438_v24 }
 0x3dc   : > { %v5851_v50 = vadd.f32 %v5839_v29, %v19148_v45  ;;  %v19503_v38 = vpop.f32.mrf.mxu0  ;;  %v19505_v6 = vpop.f32.mrf.mxu1  ;;  %v12972_v45 = vsel %vm6235_vm11, 1.0, %v21521_v7 }
 0x3dd   : > { %v6262_v29 = vmul.f32 %v12972_v45, %v6127_v10  ;;  %v21799_v10 = vrot.slane %v19469_v54, 1 }
 0x3de   : > { %v5975_v44 = vadd.f32 %v19331_v58, %v5851_v50  ;;  %v19516_v58 = vld [vmem:[%s21309_s3 + $0x1] ss:$0 sm:$0xff] }
 0x3df   : > { %v7935_v45 = vsel %vm1865_vm4, %v21799_v10, %v7934_v62 }
 0x3e0   : > { %v6119_v55 = vadd.f32 %v19390_v52, %v5975_v44  ;;  %v21797_v44 = vshll.u32 %v21796_v59, 16 }
 0x3e2   : > { %v6128_v12 = vmax.f32 %v6119_v55, 0.0  ;;  %v7747_v42 = vrot.slane %v21797_v44, 1  ;;  %v6315_v55 = vadd.f32 %v19516_v58, %v6298_v61  ;;  %v14419_v61 = vld [vmem:[#allocation8 + $0x208] sm:$0xff] }
 0x3e3   : > { %v5841_v52 = vpop.f32.mrf.mxu2  ;;  %v19521_v50 = vpop.f32.mrf.mxu3  ;;  %8197 = vmatpush.bf16.msra.mxu1 %v14419_v61  ;;  %v7467_v61 = vshrl.u32 %v19497_v5, 16  ;;  %v21802_v5 = vshrl.u32 %v21796_v59, 16 }
 0x3e4   : > { %v6263_v19 = vmul.f32 %v12973_v16, %v6128_v12  ;;  %v19523_v7 = vpop.f32.mrf.mxu0  ;;  %v19527_v13 = vpop.f32.mrf.mxu1  ;;  %v15020_v16 = vld [vmem:[%s15629_s30 + $0x10] sm:$0xff]   ;;  %v7466_v12 = vsel %vm1388_vm3, %v7461_v1, %v7465_v57  ;;  %v7748_v4 = vsel %vm1388_vm3, %v7743_v37, %v7747_v42  ;;  %v14453_v52 = vld [vmem:[#allocation8 + $0xa0] sm:$0xff]  ;;  %v6592_v34 = vadd.f32 %v19197_v36, %v6315_v55 }
 0x3e5   : > { %v14767_v41 = vunpack.c.l.bf16 %v15020_v16  ;;  %8895 = vmatpush.bf16.msrb.mxu0 %v14453_v52  ;;  %v14444_v36 = vld [vmem:[#allocation8 + $0x58] sm:$0xff]  ;;  %v14768_v10 = vunpack.c.h.bf16 %v15020_v16 }
 0x3e6   : > { %v14763_v2 = vpack.c.bf16 %v6263_v19, %v6262_v29  ;;  %8017 = vmatmul.bf16.gmra.mxu0 %v7935_v45  ;;  %v19540_v29 = vld [vmem:[#allocation2 + $0x1c] sm:$0xff]  ;;  %8710 = vmatpush.bf16.msrb.mxu3 %v14444_v36  ;;  %v15294_v45 = vld [vmem:[#allocation2 + $0x2c] sm:$0xff]  ;;  %v7469_v36 = vor.u32 %v7467_v61, %v7465_v57  ;;  %v14418_v57 = vld [vmem:[#allocation8 + $0x200] sm:$0xff] }
 0x3e7   : > { %7341 = vmatmul.bf16.gmra.mxu1 %v15169_v11  ;;  %v6316_v1 = vadd.f32 %v19516_v58, %v14767_v41  ;;  %v7471_v55 = vshll.u32 %v19540_v29, 16 }
 0x3e8   : > { %15019 = vst [vmem:[#allocation2 + $0xa8] sm:$0xff] %v14763_v2   ;;  %7587 = vmatmul.bf16.vlgmr.msrb.gmra.mxu2 %v7466_v12  ;;  %7863 = vmatmul.bf16.gmra.mxu3 %v7748_v4  ;;  %v7936_v12 = vrot.slane %v15294_v45, 1  ;;  %v15021_v45 = vld [vmem:[%s15629_s30 + $0x18] sm:$0xff]  }
 0x3e9   : > { %v6593_v37 = vadd.f32 %v19242_v15, %v6316_v1  ;;  %v7473_v52 = vrot.slane %v7471_v55, 1  ;;  %v6317_v15 = vadd.f32 %v19516_v58, %v14768_v10  ;;  %v15171_v1 = vld [vmem:[#allocation2 + $0x34] sm:$0xff]   ;;  %v7751_v55 = vor.u32 %v21802_v5, %v7747_v42  ;;  %v14452_v10 = vld [vmem:[#allocation8 + $0x98] sm:$0xff]  ;;  %8198 = vmatpush.bf16.msra.mxu1 %v14418_v57 }
 0x3ea   : > { %v14771_v61 = vunpack.c.l.bf16 %v15021_v45  ;;  %8896 = vmatpush.bf16.msrb.mxu0 %v14452_v10  ;;  %v14772_v57 = vunpack.c.h.bf16 %v15021_v45 }
 0x3eb   : > { %v6711_v14 = vpop.f32.mrf.mxu2  ;;  %v19542_v19 = vpop.f32.mrf.mxu3 }
 0x3ec   : > { %v6751_v54 = vadd.f32 %v6711_v14, %v6592_v34  ;;  %v19544_v44 = vpop.f32.mrf.mxu0  ;;  %v19546_v2 = vpop.f32.mrf.mxu1  ;;  %v21800_v14 = vld [vmem:[#allocation43_spill] sm:$0xff] }
 0x3ee   : > { %v19550_v11 = vadd.f32 %v19451_v51, %v6751_v54  ;;  %v21801_v54 = vshll.u32 %v21800_v14, 16 }
 0x3f0   : > { %v7755_v8 = vrot.slane %v21801_v54, 1  ;;  %v19617_v47 = vadd.f32 %v19480_v20, %v19550_v11 }
 0x3f2   : > { %v7756_v54 = vsel %vm1388_vm3, %v7751_v55, %v7755_v8  ;;  %v14437_v55 = vld [vmem:[#allocation8 + $0x20] sm:$0xff] }
 0x3f3   : > { %v6713_v4 = vpop.f32.mrf.mxu2  ;;  %v19555_v41 = vpop.f32.mrf.mxu3  ;;  %8551 = vmatpush.bf16.msra.mxu2 %v14437_v55  ;;  %v21803_v55 = vld [vmem:[#allocation46_spill] sm:$0xff] }
 0x3f4   : > { %v6752_v34 = vadd.f32 %v6713_v4, %v6593_v37  ;;  %v19557_v51 = vpop.f32.mrf.mxu0  ;;  %v19561_v24 = vpop.f32.mrf.mxu1  ;;  %v7937_v37 = vsel %vm1865_vm4, %v7934_v62, %v7936_v12  ;;  %v7474_v4 = vsel %vm1388_vm3, %v7469_v36, %v7473_v52 }
 0x3f6   : > { %v19565_v16 = vadd.f32 %v19478_v35, %v6752_v34  ;;  %8022 = vmatmul.bf16.gmra.mxu0 %v7937_v37  ;;  %v6594_v35 = vadd.f32 %v19269_v23, %v6317_v15  ;;  %v14443_v23 = vld [vmem:[#allocation8 + $0x50] sm:$0xff]  ;;  %v7479_v15 = vshll.u32 %v19574_v26, 16  ;;  %v19587_v37 = vld [vmem:[#allocation2 + $0x34] sm:$0xff] }
 0x3f7   : > { %7346 = vmatmul.bf16.gmra.mxu1 %v15171_v1  ;;  %v6318_v1 = vadd.f32 %v19516_v58, %v14771_v61  ;;  %8711 = vmatpush.bf16.msrb.mxu3 %v14443_v23  ;;  %v21804_v23 = vshll.u32 %v21803_v55, 16  ;;  %v21805_v45 = vrot.slane %v19587_v37, 1 }
 0x3f8   : > { %7592 = vmatmul.bf16.gmra.mxu2 %v7474_v4  ;;  %7868 = vmatmul.bf16.gmra.mxu3 %v7756_v54  ;;  %v19592_v61 = vrot.slane %v7479_v15, 1  ;;  %v19607_v15 = vld [vmem:[#allocation2 + $0x88] sm:$0xff] }
 0x3f9   : > { %v6595_v54 = vadd.f32 %v19342_v39, %v6318_v1  ;;  %v19600_v0 = vrot.slane %v21804_v23, 1  ;;  %v9710_v1 = vunpack.c.l.b16 %v9660_v27  ;;  %21806 = vst [vmem:[#allocation31_spill] sm:$0xff] %v19607_v15  ;;  %v21807_v23 = vshrl.u32 %v21800_v14, 16  ;;  %v14464_v14 = vld [vmem:[#allocation8 + $0xf8] sm:$0xff] }
 0x3fa   : > { %v21426_v20 = vshrl.u32 %v19607_v15, 16  ;;  %v21427_v11 = vshll.u32 %v19607_v15, 16  ;;  %9169 = vmatpush.bf16.msrb.mxu1 %v14464_v14 }
 0x3fb   : > { %v6716_v34 = vpop.f32.mrf.mxu2  ;;  %v19576_v59 = vpop.f32.mrf.mxu3  ;;  %v7759_v31 = vor.u32 %v21807_v23, %v7755_v8  ;;  %v14451_v8 = vld [vmem:[#allocation8 + $0x90] sm:$0xff]  ;;  %v21810_v23 = vrot.slane %v19350_v56, 1 }
 0x3fc   : > { %v6753_v62 = vadd.f32 %v6716_v34, %v6594_v35  ;;  %v19578_v42 = vpop.f32.mrf.mxu0  ;;  %v19580_v36 = vpop.f32.mrf.mxu1  ;;  %v7475_v35 = vshrl.u32 %v19540_v29, 16  ;;  %v7939_v29 = vsel %vm1865_vm4, %v7936_v12, %v21805_v45  ;;  %v19626_v12 = vpack.c.b16 %v9710_v1, %v9710_v1  ;;  %8897 = vmatpush.bf16.msrb.mxu0 %v14451_v8 }
 0x3fd   : > { %v10655_v8 = vrot.slane %v21427_v11, 4  ;;  %v19664_v11 = vld [vmem:[#allocation2 + $0x3c] sm:$0xff] }
 0x3fe   : > { %v19584_v5 = vadd.f32 %v19501_v17, %v6753_v62  ;;  %v7477_v39 = vor.u32 %v7475_v35, %v7473_v52  ;;  %v19619_v52 = vld [vmem:[#allocation2 + $0x8c] sm:$0xff]  ;;  %v15022_v35 = vld [vmem:[%s15629_s30 + $0x20] sm:$0xff]   ;;  %21809 = vst [vmem:[#allocation47_spill] sm:$0xff] %v19626_v12 }
 0x3ff   : > { %21808 = vst [vmem:[#allocation33_spill] sm:$0xff] %v19619_v52 }
 0x400   : > { %v7482_v27 = vsel %vm1388_vm3, %v7477_v39, %v19592_v61  ;;  %v9942_v39 = vrot.slane %v19619_v52, 1 }
 0x403   : > { %v6718_v10 = vpop.f32.mrf.mxu2  ;;  %v19594_v34 = vpop.f32.mrf.mxu3 }
 0x404   : > { %v6754_v17 = vadd.f32 %v6718_v10, %v6595_v54  ;;  %v19596_v62 = vpop.f32.mrf.mxu0  ;;  %v19602_v4 = vpop.f32.mrf.mxu1  ;;  %v6319_v54 = vadd.f32 %v19516_v58, %v14772_v57 }
 0x406   : > { %v19611_v10 = vadd.f32 %v19521_v50, %v6754_v17  ;;  %8027 = vmatmul.bf16.gmra.mxu0 %v7939_v29  ;;  %v7764_v50 = vsel %vm1388_vm3, %v7759_v31, %v19600_v0  ;;  %v6596_v57 = vadd.f32 %v19397_v22, %v6319_v54  ;;  %v14775_v17 = vunpack.c.l.bf16 %v15022_v35 }
 0x407   : > { %7351 = vmatmul.bf16.gmra.mxu1 %v15172_v33  ;;  %v19632_v33 = vld [vmem:[#allocation2 + $0x2c] sm:$0xff]  ;;  %v9944_v22 = vrot.slane %v19626_v12, 1 }
 0x408   : > { %7597 = vmatmul.bf16.gmra.mxu2 %v7482_v27  ;;  %7873 = vmatmul.bf16.gmra.mxu3 %v7764_v50  ;;  %v19641_v27 = vsel %vm1865_vm4, %v21810_v23, %v9942_v39  ;;  %v10654_v50 = vrot.slane %v21426_v20, 3  ;;  %v6320_v14 = vadd.f32 %v19516_v58, %v14775_v17  ;;  %v14436_v23 = vld [vmem:[#allocation8 + $0x18] sm:$0xff]  ;;  %v7487_v63 = vshll.u32 %v19632_v33, 16 }
 0x409   : > { %21811 = vst [vmem:[#allocation17_spill] sm:$0xff] %v19641_v27  ;;  %v14442_v27 = vld [vmem:[#allocation8 + $0x48] sm:$0xff]  ;;  %v19659_v12 = vsel %vm1865_vm4, %v9942_v39, %v9944_v22  ;;  %8552 = vmatpush.bf16.msra.mxu2 %v14436_v23 }
 0x40a   : > { %21812 = vst [vmem:[#allocation18_spill] sm:$0xff] %v19659_v12  ;;  %v19662_v20 = vor.u32 %v10655_v8, %v10654_v50  ;;  %8712 = vmatpush.bf16.msrb.mxu3 %v14442_v27  ;;  %v6597_v17 = vadd.f32 %v19458_v18, %v6320_v14  ;;  %v19669_v15 = vrot.slane %v7487_v63, 1  ;;  %v21814_v8 = vld [vmem:[#allocation50_spill] sm:$0xff]  ;;  %v21816_v18 = vrot.slane %v19664_v11, 1 }
 0x40b   : > { %v6721_v45 = vpop.f32.mrf.mxu2  ;;  %v19634_v29 = vpop.f32.mrf.mxu3  ;;  %v21815_v27 = vshll.u32 %v21814_v8, 16  ;;  %v19685_v63 = vld [vmem:[#allocation2 + $0x90] sm:$0xff] }
 0x40c   : > { %v6755_v31 = vadd.f32 %v6721_v45, %v6596_v57  ;;  %v19636_v1 = vpop.f32.mrf.mxu0  ;;  %v19644_v54 = vpop.f32.mrf.mxu1  ;;  %v19656_v45 = vadd.f32 %v19503_v38, %v19565_v16  ;;  %21813 = vst [vmem:[#allocation35_spill] sm:$0xff] %v19662_v20  ;;  %v7483_v16 = vshrl.u32 %v19574_v26, 16 }
 0x40d   : > { %v7771_v23 = vrot.slane %v21815_v27, 1  ;;  %21818 = vst [vmem:[#allocation32_spill] sm:$0xff] %v19685_v63 }
 0x40e   : > { %v19652_v57 = vadd.f32 %v19542_v19, %v6755_v31  ;;  %v14776_v31 = vunpack.c.h.bf16 %v15022_v35  ;;  %v7485_v19 = vor.u32 %v7483_v16, %v19592_v61  ;;  %v21817_v35 = vrot.slane %v19587_v37, 1  ;;  %v15023_v16 = vld [vmem:[%s15629_s30 + $0x28] sm:$0xff]  }
 0x40f   : > { %v19696_v61 = vadd.f32 %v19523_v7, %v19584_v5  ;;  %v21435_v7 = vshll.u32 %v19685_v63, 16 }
 0x410   : > { %v7941_v26 = vsel %vm1865_vm4, %v21817_v35, %v21816_v18  ;;  %v6321_v14 = vadd.f32 %v19516_v58, %v14776_v31  ;;  %v7490_v37 = vsel %vm1388_vm3, %v7485_v19, %v19669_v15  ;;  %v21820_v18 = vld [vmem:[#allocation49_spill] sm:$0xff]  ;;  %v14779_v35 = vunpack.c.l.bf16 %v15023_v16  ;;  %v19707_v19 = vld [vmem:[#allocation2 + $0x34] sm:$0xff] }
 0x411   : > { %v7495_v21 = vshll.u32 %v19707_v19, 16 }
 0x412   : > { %v6598_v5 = vadd.f32 %v19483_v9, %v6321_v14  ;;  %v10659_v9 = vrot.slane %v21435_v7, 4  ;;  %v21821_v14 = vshrl.u32 %v19619_v52, 16  ;;  %v21822_v7 = vshll.u32 %v19619_v52, 16 }
 0x413   : > { %v6723_v38 = vpop.f32.mrf.mxu2  ;;  %v19671_v22 = vpop.f32.mrf.mxu3 }
 0x414   : > { %v6756_v39 = vadd.f32 %v6723_v38, %v6597_v17  ;;  %v19673_v50 = vpop.f32.mrf.mxu0  ;;  %v19677_v12 = vpop.f32.mrf.mxu1  ;;  %v21819_v38 = vshrl.u32 %v21803_v55, 16  ;;  %v10119_v56 = vrot.slane %v21821_v14, 1  ;;  %v19735_v14 = vld [vmem:[#allocation2 + $0x44] sm:$0xff] }
 0x416   : > { %v19689_v17 = vadd.f32 %v19555_v41, %v6756_v39  ;;  %v7767_v27 = vor.u32 %v21819_v38, %v19600_v0  ;;  %8032 = vmatmul.bf16.gmra.mxu0 %v7941_v26  ;;  %v14450_v41 = vld [vmem:[#allocation8 + $0x88] sm:$0xff]  ;;  %v14463_v39 = vld [vmem:[#allocation8 + $0xf0] sm:$0xff]  ;;  %v21434_v0 = vshrl.u32 %v19685_v63, 16  ;;  %v14441_v26 = vld [vmem:[#allocation8 + $0x40] sm:$0xff]  ;;  %v10120_v63 = vrot.slane %v21822_v7, 2 }
 0x417   : > { %7356 = vmatmul.bf16.gmra.mxu1 %v21820_v18  ;;  %8898 = vmatpush.bf16.msrb.mxu0 %v14450_v41  ;;  %v6322_v41 = vadd.f32 %v19516_v58, %v14779_v35  ;;  %v19747_v7 = vrot.slane %v7495_v21, 1  ;;  %v21827_v21 = vshrl.u32 %v21814_v8, 16  ;;  %v15024_v8 = vld [vmem:[%s15629_s30 + $0x30] sm:$0xff]  }
 0x418   : > { %7602 = vmatmul.bf16.gmra.mxu2 %v7490_v37  ;;  %v7772_v31 = vsel %vm1388_vm3, %v7767_v27, %v7771_v23  ;;  %9170 = vmatpush.bf16.msrb.mxu1 %v14463_v39  ;;  %v10658_v55 = vrot.slane %v21434_v0, 3 }
 0x419   : > { %7878 = vmatmul.bf16.gmra.mxu3 %v7772_v31  ;;  %v6599_v35 = vadd.f32 %v19505_v6, %v6322_v41  ;;  %v21828_v41 = vrot.slane %v19735_v14, 1 }
 0x41a   : > { %v19731_v0 = vor.u32 %v10659_v9, %v10658_v55  ;;  %8713 = vmatpush.bf16.msrb.mxu3 %v14441_v26  ;;  %v14780_v55 = vunpack.c.h.bf16 %v15023_v16  ;;  %v7491_v9 = vshrl.u32 %v19632_v33, 16  ;;  %v7775_v33 = vor.u32 %v21827_v21, %v7771_v23  ;;  %v21831_v23 = vld [vmem:[#allocation37_spill] sm:$0xff]  ;;  %v19789_v21 = vld [vmem:[#allocation2 + $0x3c] sm:$0xff] }
 0x41b   : > { %v6726_v38 = vpop.f32.mrf.mxu2  ;;  %v19710_v37 = vpop.f32.mrf.mxu3 }
 0x41c   : > { %v6757_v27 = vadd.f32 %v6726_v38, %v6598_v5  ;;  %v19712_v18 = vpop.f32.mrf.mxu0  ;;  %v19714_v31 = vpop.f32.mrf.mxu1  ;;  %v19728_v5 = vadd.f32 %v19544_v44, %v19611_v10  ;;  %v14435_v38 = vld [vmem:[#allocation8 + $0x10] sm:$0xff]  ;;  %v19741_v44 = vsel %vm720_vm2, %v19662_v20, %v19731_v0  ;;  %v19743_v10 = vor.u32 %v10120_v63, %v10119_v56 }
 0x41d   : > { %8553 = vmatpush.bf16.msra.mxu2 %v14435_v38  ;;  %21823 = vst [vmem:[#allocation19_spill] sm:$0xff] %v19741_v44  ;;  %v21826_v56 = vshll.u32 %v18690_v3, 16  ;;  %v7493_v16 = vor.u32 %v7491_v9, %v19669_v15  ;;  %v21829_v20 = vrot.slane %v19664_v11, 1  ;;  %v19779_v15 = vadd.f32 %v19557_v51, %v19652_v57  ;;  %v14462_v9 = vld [vmem:[#allocation8 + $0xe8] sm:$0xff] }
 0x41e   : > { %v19724_v39 = vadd.f32 %v19576_v59, %v6757_v27  ;;  %21824 = vst [vmem:[#allocation20_spill] sm:$0xff] %v19743_v10  ;;  %v19752_v26 = vsel %vm2025_vm5, %v19453_v43, %v19743_v10  ;;  %v6323_v10 = vadd.f32 %v19516_v58, %v14780_v55  ;;  %v14783_v57 = vunpack.c.l.bf16 %v15024_v8  ;;  %9171 = vmatpush.bf16.msrb.mxu1 %v14462_v9  ;;  %v14488_v9 = vld [vmem:[#allocation8 + $0x178] sm:$0xff] }
 0x41f   : > { %21825 = vst [vmem:[#allocation38_spill] sm:$0xff] %v19752_v26  ;;  %v7779_v6 = vrot.slane %v21826_v56, 1  ;;  %v7943_v43 = vsel %vm1865_vm4, %v21829_v20, %v21828_v41  ;;  %v7498_v11 = vsel %vm1388_vm3, %v7493_v16, %v19747_v7  ;;  %9579 = vmatpush.bf16.msra.mxu3 %v14488_v9 }
 0x420   : > { %v6600_v51 = vadd.f32 %v19527_v13, %v6323_v10  ;;  %v6324_v10 = vadd.f32 %v19516_v58, %v14783_v57  ;;  %v19816_v57 = vld [vmem:[#allocation2 + $0x4c] sm:$0xff] }
 0x421   : > { %v7780_v20 = vsel %vm1388_vm3, %v7775_v33, %v7779_v6 }
 0x423   : > { %v6728_v27 = vpop.f32.mrf.mxu2  ;;  %v19754_v59 = vpop.f32.mrf.mxu3 }
 0x424   : > { %v6758_v38 = vadd.f32 %v6728_v27, %v6599_v35  ;;  %v19756_v44 = vpop.f32.mrf.mxu0  ;;  %v7322_v63 = vpop.f32.mrf.mxu1  ;;  %v7660_v35 = vld [vmem:[#allocation2 + $0x54] sm:$0x1]  ;;  %v19768_v27 = vld [vmem:[#allocation2 + $0x98] sm:$0xff] }
 0x425   : > { %21830 = vst [vmem:[#allocation34_spill] sm:$0xff] %v19768_v27  ;;  %v19775_v56 = vadd.f32 %v7322_v63, %v19617_v47  ;;  %v7711_v55 = vunpack.c.l.b16 %v7660_v35  ;;  %v21441_v47 = vshrl.u32 %v19768_v27, 16 }
 0x426   : > { %v19772_v26 = vadd.f32 %v19594_v34, %v6758_v38  ;;  %8037 = vmatmul.bf16.gmra.mxu0 %v7943_v43  ;;  %v14449_v34 = vld [vmem:[#allocation8 + $0x80] sm:$0xff]  ;;  %v21440_v38 = vshll.u32 %v19768_v27, 16 }
 0x427   : > { %8199 = vmatmul.bf16.vlgmr.msra.gmra.mxu1 %v21831_v23  ;;  %8899 = vmatpush.bf16.msrb.mxu0 %v14449_v34  ;;  %v19795_v43 = vpack.c.b16 %v7711_v55, %v7711_v55  ;;  %v19810_v34 = vadd.f32 %v19578_v42, %v19689_v17  ;;  %v14434_v55 = vld [vmem:[#allocation8 + $0x8] sm:$0xff]  ;;  %v6601_v42 = vadd.f32 %v19546_v2, %v6324_v10  ;;  %v14784_v17 = vunpack.c.h.bf16 %v15024_v8 }
 0x428   : > { %7607 = vmatmul.bf16.gmra.mxu2 %v7498_v11  ;;  %v10662_v11 = vrot.slane %v21441_v47, 3  ;;  %v10663_v13 = vrot.slane %v21440_v38, 4  ;;  %v21833_v47 = vshrl.u32 %v18690_v3, 16  ;;  %v21834_v2 = vrot.slane %v19816_v57, 1  ;;  %v10320_v10 = vld [vmem:[#allocation2 + $0xa0] sm:$0xff]  }
 0x429   : > { %7883 = vmatmul.bf16.gmra.mxu3 %v7780_v20  ;;  %v7785_v38 = vshll.u32 %v19795_v43, 16  ;;  %8554 = vmatpush.bf16.msra.mxu2 %v14434_v55  ;;  %v21835_v8 = vrot.slane %v19735_v14, 1 }
 0x42b   : > { %v6731_v63 = vpop.f32.mrf.mxu2  ;;  %v19791_v33 = vpop.f32.mrf.mxu3  ;;  %v7787_v27 = vrot.slane %v7785_v38, 1 }
 0x42c   : > { %v6759_v16 = vadd.f32 %v6731_v63, %v6600_v51  ;;  %v19793_v41 = vpop.f32.mrf.mxu0  ;;  %v7324_v35 = vpop.f32.mrf.mxu1  ;;  %v7503_v51 = vshll.u32 %v19789_v21, 16  ;;  %v19813_v63 = vor.u32 %v10663_v13, %v10662_v11 }
 0x42d   : > { %v19806_v23 = vadd.f32 %v7324_v35, %v19656_v45  ;;  %v7499_v35 = vshrl.u32 %v19707_v19, 16  ;;  %v7945_v19 = vsel %vm1865_vm4, %v21835_v8, %v21834_v2 }
 0x42e   : > { %v19803_v20 = vadd.f32 %v19634_v29, %v6759_v16  ;;  %v19822_v45 = vsel %vm720_vm2, %v19731_v0, %v19813_v63  ;;  %v19826_v11 = vrot.slane %v7503_v51, 1  ;;  %v7783_v29 = vor.u32 %v21833_v47, %v7779_v6  ;;  %v19840_v51 = vld [vmem:[#allocation2 + $0xa0] sm:$0xf]   ;;  %v21837_v47 = vld [vmem:[#allocation39_spill] sm:$0xff] }
 0x42f   : > { %21832 = vst [vmem:[#allocation36_spill] sm:$0xff] %v19822_v45  ;;  %v7501_v45 = vor.u32 %v7499_v35, %v19747_v7  ;;  %v19852_v7 = vadd.f32 %v19596_v62, %v19724_v39  ;;  %v19859_v35 = vld [vmem:[#allocation2 + $0x44] sm:$0xf] }
 0x430   : > { %21836 = vst [vmem:[#allocation44_spill] sm:$0xff] %v19840_v51  ;;  %v7788_v6 = vsel %vm1388_vm3, %v7783_v29, %v7787_v27  ;;  %v19861_v39 = vld [vmem:[#allocation2 + $0x44] sm:$0xff]  ;;  %v21446_v8 = vunpack.c.l.b16 %v19859_v35 }
 0x431   : > { %v7506_v14 = vsel %vm1388_vm3, %v7501_v45, %v19826_v11 }
 0x433   : > { %v6733_v16 = vpop.f32.mrf.mxu2  ;;  %v19828_v55 = vpop.f32.mrf.mxu3 }
 0x434   : > { %v6760_v13 = vadd.f32 %v6733_v16, %v6601_v42  ;;  %v19830_v9 = vpop.f32.mrf.mxu0  ;;  %v7327_v0 = vpop.f32.mrf.mxu1  ;;  %v6325_v42 = vadd.f32 %v19516_v58, %v14784_v17  ;;  %v15025_v16 = vld [vmem:[%s15629_s30 + $0x38] sm:$0xff]  }
 0x435   : > { %v19848_v3 = vadd.f32 %v7327_v0, %v19696_v61  ;;  %v14787_v38 = vunpack.c.l.bf16 %v15025_v16  ;;  %v14503_v17 = vld [vmem:[#allocation8 + $0x1b8] sm:$0xff] }
 0x436   : > { %v19845_v52 = vadd.f32 %v19671_v22, %v6760_v13  ;;  %8042 = vmatmul.bf16.gmra.mxu0 %v7945_v19  ;;  %v14461_v22 = vld [vmem:[#allocation8 + $0xe0] sm:$0xff]  ;;  %v6602_v61 = vadd.f32 %v19561_v24, %v6325_v42  ;;  %v8613_v13 = vld [vmem:[#allocation2 + $0x40] sm:$0x8] }
 0x437   : > { %8204 = vmatmul.bf16.gmra.mxu1 %v21837_v47  ;;  %9844 = vmatpush.bf16.msra.mxu0 %v14503_v17  ;;  %v6326_v29 = vadd.f32 %v19516_v58, %v14787_v38  ;;  %v8631_v19 = vunpack.c.l.b16 %v8613_v13  ;;  %v14487_v47 = vld [vmem:[#allocation8 + $0x170] sm:$0xff]  ;;  %v7511_v17 = vshll.u32 %v19861_v39, 16  ;;  %v10670_v38 = vshll.u32 %v10320_v10, 16 }
 0x438   : > { %7612 = vmatmul.bf16.gmra.mxu2 %v7506_v14  ;;  %9172 = vmatpush.bf16.msrb.mxu1 %v14461_v22  ;;  %v19877_v14 = vadd.f32 %v19636_v1, %v19772_v26  ;;  %v10667_v22 = vshrl.u32 %v10320_v10, 16  ;;  %v14788_v26 = vunpack.c.h.bf16 %v15025_v16  ;;  %v21839_v16 = vrot.slane %v19816_v57, 1  ;;  %v15026_v57 = vld [vmem:[%s15629_s30 + $0x40] sm:$0xff]  }
 0x439   : > { %7888 = vmatmul.bf16.gmra.mxu3 %v7788_v6  ;;  %v14433_v6 = vld [vmem:[#allocation8] sm:$0xff]  ;;  %v6603_v1 = vadd.f32 %v19580_v36, %v6326_v29  ;;  %v19887_v51 = vrot.slane %v7511_v17, 1 }
 0x43a   : > { %8555 = vmatpush.bf16.msra.mxu2 %v14433_v6  ;;  %9580 = vmatpush.bf16.msra.mxu3 %v14487_v47  ;;  %v10669_v13 = vrot.slane %v10667_v22, 3 }
 0x43b   : > { %v6736_v62 = vpop.f32.mrf.mxu2  ;;  %v19863_v0 = vpop.f32.mrf.mxu3 }
 0x43c   : > { %v6761_v45 = vadd.f32 %v6736_v62, %v6602_v61  ;;  %v19865_v27 = vpop.f32.mrf.mxu0  ;;  %v7329_v2 = vpop.f32.mrf.mxu1  ;;  %v19880_v61 = vld [vmem:[#allocation2 + $0x48] sm:$0xff]  ;;  %v10672_v62 = vrot.slane %v10670_v38, 4 }
 0x43d   : > { %v19873_v42 = vadd.f32 %v7329_v2, %v19728_v5  ;;  %v8632_v5 = vpack.c.b16 %v21446_v8, %v8631_v19  ;;  %v7507_v2 = vshrl.u32 %v19789_v21, 16  ;;  %v7394_v19 = vld [vmem:[#allocation2 + $0x4c] sm:$0x1] }
 0x43e   : > { %v19870_v24 = vadd.f32 %v19710_v37, %v6761_v45  ;;  %v7946_v37 = vrot.slane %v19795_v43, 1  ;;  %v19889_v10 = vor.u32 %v10672_v62, %v10669_v13  ;;  %v21448_v43 = vrot.slane %v19880_v61, 3 }
 0x43f   : > { %v7509_v36 = vor.u32 %v7507_v2, %v19826_v11  ;;  %v8633_v29 = vrot.slane %v8632_v5, 3  ;;  %v6327_v13 = vadd.f32 %v19516_v58, %v14788_v26  ;;  %v19914_v11 = vadd.f32 %v19673_v50, %v19803_v20  ;;  %v14460_v50 = vld [vmem:[#allocation8 + $0xd8] sm:$0xff]  ;;  %v14502_v20 = vld [vmem:[#allocation8 + $0x1b0] sm:$0xff] }
 0x440   : > { %21838 = vst [vmem:[#allocation40_spill] sm:$0xff] %v19889_v10  ;;  %v7947_v21 = vsel %vm1865_vm4, %v21839_v16, %v7946_v37  ;;  %v19903_v17 = vsel %vm720_vm2, %v19813_v63, %v19889_v10  ;;  %v21840_v63 = vld [vmem:[#allocation41_spill] sm:$0xff]  ;;  %v21449_v26 = vshll.u32 %v19880_v61, 16  ;;  %v8795_v16 = vshll.u32 %v8632_v5, 16  ;;  %9173 = vmatpush.bf16.msrb.mxu1 %v14460_v50  ;;  %9845 = vmatpush.bf16.msra.mxu0 %v14502_v20  ;;  %v14472_v50 = vld [vmem:[#allocation8 + $0x138] sm:$0xff]  ;;  %v14486_v20 = vld [vmem:[#allocation8 + $0x168] sm:$0xff] }
 0x441   : > { %v7514_v37 = vsel %vm1388_vm3, %v7509_v36, %v19887_v51  ;;  %v6604_v2 = vadd.f32 %v19602_v4, %v6327_v13  ;;  %9314 = vmatpush.bf16.msrb.mxu2 %v14472_v50  ;;  %9581 = vmatpush.bf16.msra.mxu3 %v14486_v20  ;;  %v6297_v20 = vld [vmem:[%s15629_s30 + $0x48] sm:$0xf] }
 0x442   : > { %v8800_v8 = vrot.slane %v21449_v26, 4 }
 0x443   : > { %v6738_v45 = vpop.f32.mrf.mxu2  ;;  %v19891_v47 = vpop.f32.mrf.mxu3 }
 0x444   : > { %v6762_v6 = vadd.f32 %v6738_v45, %v6603_v1  ;;  %v19893_v22 = vpop.f32.mrf.mxu0  ;;  %v7332_v38 = vpop.f32.mrf.mxu1  ;;  %v7445_v45 = vunpack.c.l.b16 %v7394_v19  ;;  %v8792_v19 = vshrl.u32 %v8632_v5, 16 }
 0x445   : > { %v19910_v1 = vadd.f32 %v7332_v38, %v19779_v15  ;;  %v21447_v15 = vshrl.u32 %v19880_v61, 16 }
 0x446   : > { %v19907_v62 = vadd.f32 %v19754_v59, %v6762_v6  ;;  %8047 = vmatmul.bf16.gmra.mxu0 %v7947_v21  ;;  %v8635_v59 = vsel %vm560_vm1, %v8633_v29, %v21448_v43  ;;  %v14791_v6 = vunpack.c.l.bf16 %v15026_v57  ;;  %v7454_v36 = vpack.c.b16 %v7445_v45, %v7445_v45  ;;  %v19945_v43 = vld [vmem:[#allocation2 + $0x50] sm:$0xff] }
 0x447   : > { %8209 = vmatmul.bf16.gmra.mxu1 %v21840_v63  ;;  %v19943_v45 = vadd.f32 %v19712_v18, %v19845_v52  ;;  %v7515_v52 = vshrl.u32 %v19861_v39, 16 }
 0x448   : > { %7617 = vmatmul.bf16.gmra.mxu2 %v7514_v37  ;;  %v6328_v4 = vadd.f32 %v19516_v58, %v14791_v6 }
 0x449   : > { %8714 = vmatmul.bf16.vlgmr.msrb.gmra.mxu3 %v8635_v59  ;;  %v8799_v59 = vrot.slane %v21447_v15, 3  ;;  %v8797_v15 = vrot.slane %v8795_v16, 4  ;;  %v8636_v16 = vrot.slane %v19945_v43, 3 }
 0x44b   : > { %v6741_v38 = vpop.f32.mrf.mxu2  ;;  %v19926_v37 = vpop.f32.mrf.mxu3  ;;  %v19947_v6 = vor.u32 %v8800_v8, %v8799_v59  ;;  %v7517_v8 = vor.u32 %v7515_v52, %v19887_v51  ;;  %v21841_v51 = vld [vmem:[#allocation45_spill] sm:$0xff] }
 0x44c   : > { %v6763_v21 = vadd.f32 %v6741_v38, %v6604_v2  ;;  %v19928_v29 = vpop.f32.mrf.mxu0  ;;  %v7334_v63 = vpop.f32.mrf.mxu1  ;;  %v7519_v2 = vshll.u32 %v7454_v36, 16  ;;  %v8794_v38 = vrot.slane %v8792_v19, 3 }
 0x44d   : > { %v19939_v5 = vadd.f32 %v7334_v63, %v19810_v34  ;;  %v8336_v34 = vld [vmem:[#allocation2 + $0x40] sm:$0xc] }
 0x44e   : > { %v19936_v13 = vadd.f32 %v19791_v33, %v6763_v21  ;;  %v6605_v33 = vadd.f32 %v19644_v54, %v6328_v4  ;;  %v14792_v21 = vunpack.c.h.bf16 %v15026_v57  ;;  %v7521_v18 = vrot.slane %v7519_v2, 1 }
 0x44f   : > { %v8798_v26 = vor.u32 %v8797_v15, %v8794_v38  ;;  %v8386_v57 = vunpack.c.l.b16 %v8336_v34  ;;  %v19968_v4 = vadd.f32 %v19756_v44, %v19870_v24  ;;  %v8430_v44 = vshrl.u32 %v19945_v43, 16  ;;  %v14459_v38 = vld [vmem:[#allocation8 + $0xd0] sm:$0xff] }
 0x450   : > { %v6329_v59 = vadd.f32 %v19516_v58, %v14792_v21  ;;  %v7522_v2 = vsel %vm1388_vm3, %v7517_v8, %v7521_v18  ;;  %v21451_v24 = vshll.u32 %v19945_v43, 16  ;;  %v6313_v34 = vunpack.c.l.bf16 %v6297_v20  ;;  %9174 = vmatpush.bf16.msrb.mxu1 %v14459_v38 }
 0x451   : > { %v8802_v54 = vsel %vm720_vm2, %v8798_v26, %v19947_v6  ;;  %v21842_v26 = vrot.slane %v19880_v61, 3  ;;  %v21845_v38 = vshll.u32 %v19880_v61, 16 }
 0x452   : > { %v6606_v21 = vadd.f32 %v19677_v12, %v6329_v59  ;;  %v6330_v12 = vadd.f32 %v19516_v58, %v6313_v34 }
 0x453   : > { %v6743_v63 = vpop.f32.mrf.mxu2  ;;  %v19951_v36 = vpop.f32.mrf.mxu3 }
 0x454   : > { %v6764_v10 = vadd.f32 %v6743_v63, %v6605_v33  ;;  %v19953_v19 = vpop.f32.mrf.mxu0  ;;  %v7337_v50 = vpop.f32.mrf.mxu1  ;;  %v14501_v33 = vld [vmem:[#allocation8 + $0x1a8] sm:$0xff] }
 0x455   : > { %v19964_v15 = vadd.f32 %v7337_v50, %v19852_v7  ;;  %v21843_v7 = vunpack.c.l.b16 %v19859_v35  ;;  %9846 = vmatpush.bf16.msra.mxu0 %v14501_v33  ;;  %v8426_v33 = vrot.slane %v21845_v38, 3 }
 0x456   : > { %v19961_v39 = vadd.f32 %v19828_v55, %v6764_v10  ;;  %8900 = vmatmul.bf16.vlgmr.msrb.gmra.mxu0 %v8802_v54  ;;  %v8637_v55 = vsel %vm560_vm1, %v21842_v26, %v8636_v16  ;;  %v14471_v26 = vld [vmem:[#allocation8 + $0x130] sm:$0xff] }
 0x457   : > { %8214 = vmatmul.bf16.gmra.mxu1 %v21841_v51  ;;  %v8403_v10 = vpack.c.b16 %v21843_v7, %v8386_v57  ;;  %v8803_v57 = vrot.slane %v8430_v44, 3  ;;  %v20000_v51 = vadd.f32 %v19793_v41, %v19907_v62  ;;  %v21844_v7 = vshrl.u32 %v19880_v61, 16  ;;  %9315 = vmatpush.bf16.msrb.mxu2 %v14471_v26  ;;  %v14500_v26 = vld [vmem:[#allocation8 + $0x1a0] sm:$0xff] }
 0x458   : > { %7622 = vmatmul.bf16.gmra.mxu2 %v7522_v2  ;;  %v8804_v2 = vrot.slane %v21451_v24, 4 }
 0x459   : > { %8719 = vmatmul.bf16.gmra.mxu3 %v8637_v55  ;;  %v8413_v35 = vshrl.u32 %v8403_v10, 16  ;;  %v8416_v54 = vshll.u32 %v8403_v10, 16  ;;  %v14485_v55 = vld [vmem:[#allocation8 + $0x160] sm:$0xff]  ;;  %v8423_v10 = vrot.slane %v21844_v7, 2  ;;  %9847 = vmatpush.bf16.msra.mxu0 %v14500_v26 }
 0x45a   : > { %9582 = vmatpush.bf16.msra.mxu3 %v14485_v55  ;;  %v8805_v34 = vor.u32 %v8804_v2, %v8803_v57  ;;  %v21846_v2 = vld [vmem:[#allocation48_spill] sm:$0xff] }
 0x45b   : > { %v6746_v63 = vpop.f32.mrf.mxu2  ;;  %v19983_v18 = vpop.f32.mrf.mxu3  ;;  %v8415_v58 = vrot.slane %v8413_v35, 2  ;;  %v8427_v41 = vor.u32 %v8426_v33, %v8423_v10 }
 0x45c   : > { %v6765_v52 = vadd.f32 %v6746_v63, %v6606_v21  ;;  %v19985_v50 = vpop.f32.mrf.mxu0  ;;  %v7339_v8 = vpop.f32.mrf.mxu1  ;;  %v20006_v21 = vld [vmem:[#allocation2 + $0x58] sm:$0xff] }
 0x45d   : > { %v19996_v20 = vadd.f32 %v7339_v8, %v19877_v14  ;;  %v6607_v14 = vadd.f32 %v19714_v31, %v6330_v12  ;;  %v8638_v7 = vrot.slane %v20006_v21, 3  ;;  %v8806_v31 = vsel %vm720_vm2, %v19947_v6, %v8805_v34  ;;  %v14458_v12 = vld [vmem:[#allocation8 + $0xc8] sm:$0xff] }
 0x45e   : > { %v19993_v59 = vadd.f32 %v19863_v0, %v6765_v52  ;;  %v8418_v0 = vrot.slane %v8416_v54, 3  ;;  %v20024_v54 = vadd.f32 %v19830_v9, %v19936_v13  ;;  %v8442_v6 = vshll.u32 %v20006_v21, 16  ;;  %9175 = vmatpush.bf16.msrb.mxu1 %v14458_v12 }
 0x460   : > { %v8419_v38 = vor.u32 %v8418_v0, %v8415_v58 }
 0x462   : > { %v8428_v57 = vsel %vm336_vm0, %v8419_v38, %v8427_v41 }
 0x463   : > { %v6748_v63 = vpop.f32.mrf.mxu2  ;;  %v20009_v52 = vpop.f32.mrf.mxu3 }
 0x464   : > { %v6766_v62 = vadd.f32 %v6748_v63, %v6607_v14  ;;  %v20011_v8 = vpop.f32.mrf.mxu0  ;;  %v7342_v61 = vpop.f32.mrf.mxu1  ;;  %v8808_v14 = vrot.slane %v8442_v6, 4  ;;  %v14470_v63 = vld [vmem:[#allocation8 + $0x128] sm:$0xff] }
 0x465   : > { %v20018_v35 = vadd.f32 %v7342_v61, %v19914_v11  ;;  %v8439_v11 = vshrl.u32 %v20006_v21, 16  ;;  %v20046_v21 = vadd.f32 %v19865_v27, %v19961_v39  ;;  %v21847_v61 = vshll.u32 %v19945_v43, 16  ;;  %9316 = vmatpush.bf16.msrb.mxu2 %v14470_v63 }
 0x466   : > { %v20015_v24 = vadd.f32 %v19891_v47, %v6766_v62  ;;  %8905 = vmatmul.bf16.gmra.mxu0 %v8806_v31  ;;  %v8639_v47 = vsel %vm560_vm1, %v8636_v16, %v8638_v7  ;;  %v14484_v62 = vld [vmem:[#allocation8 + $0x158] sm:$0xff]  ;;  %v20052_v31 = vld [vmem:[#allocation2 + $0x60] sm:$0xff] }
 0x467   : > { %8219 = vmatmul.bf16.gmra.mxu1 %v21846_v2  ;;  %v8807_v58 = vrot.slane %v8439_v11, 3  ;;  %v8435_v38 = vrot.slane %v21847_v61, 3  ;;  %9583 = vmatpush.bf16.msra.mxu3 %v14484_v62  ;;  %v8640_v39 = vrot.slane %v20052_v31, 3 }
 0x468   : > { %8556 = vmatmul.bf16.vlgmr.msra.gmra.mxu2 %v8428_v57 }
 0x469   : > { %8724 = vmatmul.bf16.gmra.mxu3 %v8639_v47 }
 0x46b   : > { %v7588_v55 = vpop.f32.mrf.mxu2  ;;  %v20034_v13 = vpop.f32.mrf.mxu3 }
 0x46c   : > { %v7628_v9 = vadd.f32 %v7588_v55, %v19775_v56  ;;  %v20036_v10 = vpop.f32.mrf.mxu0  ;;  %v7344_v33 = vpop.f32.mrf.mxu1  ;;  %v8432_v56 = vrot.slane %v8430_v44, 2  ;;  %v20069_v55 = vadd.f32 %v19893_v22, %v19993_v59 }
 0x46d   : > { %v20042_v0 = vadd.f32 %v7344_v33, %v19943_v45  ;;  %v8641_v33 = vsel %vm560_vm1, %v8638_v7, %v8640_v39 }
 0x46e   : > { %v20039_v16 = vadd.f32 %v19926_v37, %v7628_v9  ;;  %v8809_v37 = vor.u32 %v8808_v14, %v8807_v58  ;;  %v8436_v57 = vor.u32 %v8435_v38, %v8432_v56  ;;  %v21848_v9 = vld [vmem:[#allocation51_spill] sm:$0xff]  ;;  %v8451_v14 = vshll.u32 %v20052_v31, 16 }
 0x46f   : > { %v14457_v58 = vld [vmem:[#allocation8 + $0xc0] sm:$0xff]  ;;  %v20091_v38 = vadd.f32 %v19928_v29, %v20015_v24 }
 0x470   : > { %v8810_v26 = vsel %vm720_vm2, %v8805_v34, %v8809_v37  ;;  %9176 = vmatpush.bf16.msrb.mxu1 %v14457_v58  ;;  %v8812_v61 = vrot.slane %v8451_v14, 4 }
 0x473   : > { %v7590_v45 = vpop.f32.mrf.mxu2  ;;  %v20055_v47 = vpop.f32.mrf.mxu3 }
 0x474   : > { %v7629_v2 = vadd.f32 %v7590_v45, %v19806_v23  ;;  %v20057_v27 = vpop.f32.mrf.mxu0  ;;  %v7347_v12 = vpop.f32.mrf.mxu1  ;;  %v8437_v23 = vsel %vm336_vm0, %v8427_v41, %v8436_v57  ;;  %v14483_v45 = vld [vmem:[#allocation8 + $0x150] sm:$0xff] }
 0x475   : > { %v20064_v43 = vadd.f32 %v7347_v12, %v19968_v4  ;;  %v14499_v4 = vld [vmem:[#allocation8 + $0x198] sm:$0xff]  ;;  %v8444_v12 = vrot.slane %v8442_v6, 3  ;;  %9584 = vmatpush.bf16.msra.mxu3 %v14483_v45 }
 0x476   : > { %v20061_v44 = vadd.f32 %v19951_v36, %v7629_v2  ;;  %8910 = vmatmul.bf16.gmra.mxu0 %v8810_v26  ;;  %v8448_v36 = vshrl.u32 %v20052_v31, 16  ;;  %v8441_v2 = vrot.slane %v8439_v11, 2  ;;  %v20093_v26 = vld [vmem:[#allocation2 + $0x68] sm:$0xff] }
 0x477   : > { %8224 = vmatmul.bf16.gmra.mxu1 %v21848_v9  ;;  %9848 = vmatpush.bf16.msra.mxu0 %v14499_v4  ;;  %v8642_v29 = vrot.slane %v20093_v26, 3 }
 0x478   : > { %8561 = vmatmul.bf16.gmra.mxu2 %v8437_v23  ;;  %v8811_v7 = vrot.slane %v8448_v36, 3  ;;  %v8069_v23 = vld [vmem:[#allocation2 + $0x54] sm:$0x3] }
 0x479   : > { %8729 = vmatmul.bf16.gmra.mxu3 %v8641_v33  ;;  %v8445_v33 = vor.u32 %v8444_v12, %v8441_v2  ;;  %v8088_v58 = vunpack.c.l.b16 %v8069_v23 }
 0x47a   : > { %v8813_v9 = vor.u32 %v8812_v61, %v8811_v7  ;;  %v8643_v61 = vsel %vm560_vm1, %v8640_v39, %v8642_v29 }
 0x47b   : > { %v7593_v34 = vpop.f32.mrf.mxu2  ;;  %v20077_v59 = vpop.f32.mrf.mxu3  ;;  %v8089_v7 = vpack.c.b16 %v8088_v58, %v8088_v58 }
 0x47c   : > { %v7630_v22 = vadd.f32 %v7593_v34, %v19848_v3  ;;  %v20079_v41 = vpop.f32.mrf.mxu0  ;;  %v7349_v63 = vpop.f32.mrf.mxu1  ;;  %v14469_v3 = vld [vmem:[#allocation8 + $0x120] sm:$0xff] }
 0x47d   : > { %v20087_v56 = vadd.f32 %v7349_v63, %v20000_v51  ;;  %9317 = vmatpush.bf16.msrb.mxu2 %v14469_v3  ;;  %v20110_v63 = vadd.f32 %v19953_v19, %v20039_v16  ;;  %v14498_v3 = vld [vmem:[#allocation8 + $0x190] sm:$0xff]  ;;  %v8127_v2 = vshrl.u32 %v8089_v7, 16  ;;  %v8130_v19 = vshll.u32 %v8089_v7, 16  ;;  %v20138_v7 = vld [vmem:[#allocation2 + $0x70] sm:$0xff] }
 0x47e   : > { %v20084_v62 = vadd.f32 %v19983_v18, %v7630_v22  ;;  %v8814_v22 = vsel %vm720_vm2, %v8809_v37, %v8813_v9  ;;  %v14511_v37 = vld [vmem:[#allocation8 + $0x1f8] sm:$0xff]  ;;  %9849 = vmatpush.bf16.msra.mxu0 %v14498_v3  ;;  %v8644_v31 = vrot.slane %v20138_v7, 3 }
 0x47f   : > { %10002 = vmatpush.bf16.msra.mxu1 %v14511_v37 }
 0x483   : > { %v7595_v18 = vpop.f32.mrf.mxu2  ;;  %v20096_v4 = vpop.f32.mrf.mxu3 }
 0x484   : > { %v7631_v51 = vadd.f32 %v7595_v18, %v19873_v42  ;;  %v20098_v34 = vpop.f32.mrf.mxu0  ;;  %v7352_v24 = vpop.f32.mrf.mxu1  ;;  %v8446_v42 = vsel %vm336_vm0, %v8436_v57, %v8445_v33 }
 0x485   : > { %v20105_v6 = vadd.f32 %v7352_v24, %v20024_v54  ;;  %v8460_v54 = vshll.u32 %v20093_v26, 16  ;;  %v8132_v24 = vrot.slane %v8130_v19, 2 }
 0x486   : > { %v20102_v11 = vadd.f32 %v20009_v52, %v7631_v51  ;;  %8915 = vmatmul.bf16.gmra.mxu0 %v8814_v22  ;;  %v8457_v52 = vshrl.u32 %v20093_v26, 16  ;;  %v8129_v51 = vrot.slane %v8127_v2, 1  ;;  %v8450_v22 = vrot.slane %v8448_v36, 2  ;;  %v8957_v36 = vld [vmem:[#allocation2 + $0x48] sm:$0x8] }
 0x487   : > { %8229 = vmatmul.bf16.gmra.mxu1 %v18825_v46  ;;  %v8816_v58 = vrot.slane %v8460_v54, 4 }
 0x488   : > { %8566 = vmatmul.bf16.gmra.mxu2 %v8446_v42  ;;  %v8815_v39 = vrot.slane %v8457_v52, 3  ;;  %v8453_v42 = vrot.slane %v8451_v14, 3  ;;  %v8133_v37 = vor.u32 %v8132_v24, %v8129_v51  ;;  %v9007_v51 = vunpack.c.l.b16 %v8957_v36  ;;  %v14510_v24 = vld [vmem:[#allocation8 + $0x1f0] sm:$0xff] }
 0x489   : > { %8734 = vmatmul.bf16.gmra.mxu3 %v8643_v61  ;;  %v14468_v61 = vld [vmem:[#allocation8 + $0x118] sm:$0xff]  ;;  %10003 = vmatpush.bf16.msra.mxu1 %v14510_v24  ;;  %v14467_v24 = vld [vmem:[#allocation8 + $0x110] sm:$0xff] }
 0x48a   : > { %9318 = vmatpush.bf16.msrb.mxu2 %v14468_v61 }
 0x48b   : > { %v7598_v45 = vpop.f32.mrf.mxu2  ;;  %v20118_v57 = vpop.f32.mrf.mxu3 }
 0x48c   : > { %v7632_v16 = vadd.f32 %v7598_v45, %v19910_v1  ;;  %v20120_v12 = vpop.f32.mrf.mxu0  ;;  %v7354_v46 = vpop.f32.mrf.mxu1  ;;  %v20134_v1 = vadd.f32 %v19985_v50, %v20061_v44  ;;  %v20142_v45 = vor.u32 %v8453_v42, %v8450_v22 }
 0x48d   : > { %v20128_v18 = vadd.f32 %v7354_v46, %v20046_v21  ;;  %v14482_v21 = vld [vmem:[#allocation8 + $0x148] sm:$0xff] }
 0x48e   : > { %v20125_v23 = vadd.f32 %v20034_v13, %v7632_v16  ;;  %v20140_v13 = vor.u32 %v8816_v58, %v8815_v39  ;;  %9585 = vmatpush.bf16.msra.mxu3 %v14482_v21  ;;  %v8134_v39 = vsel %vm2025_vm5, %v18795_v32, %v8133_v37  ;;  %v8455_v58 = vsel %vm336_vm0, %v8445_v33, %v20142_v45  ;;  %v14497_v32 = vld [vmem:[#allocation8 + $0x188] sm:$0xff]  ;;  %v15299_v33 = vld [vmem:[#allocation2 + $0x50] sm:$0xff]  }
 0x48f   : > { %v9042_v42 = vshrl.u32 %v15299_v33, 16  ;;  %v9045_v61 = vshll.u32 %v15299_v33, 16  ;;  %9850 = vmatpush.bf16.msra.mxu0 %v14497_v32  ;;  %9319 = vmatpush.bf16.msrb.mxu2 %v14467_v24 }
 0x490   : > { %v8818_v46 = vsel %vm720_vm2, %v8813_v9, %v20140_v13  ;;  %v8469_v9 = vshll.u32 %v20138_v7, 16 }
 0x493   : > { %v7600_v3 = vpop.f32.mrf.mxu2  ;;  %v20145_v50 = vpop.f32.mrf.mxu3 }
 0x494   : > { %v7633_v16 = vadd.f32 %v7600_v3, %v19939_v5  ;;  %v20147_v44 = vpop.f32.mrf.mxu0  ;;  %v7357_v14 = vpop.f32.mrf.mxu1  ;;  %v20160_v5 = vadd.f32 %v20011_v8, %v20084_v62  ;;  %v21849_v8 = vunpack.c.l.b16 %v18797_v30 }
 0x495   : > { %v20154_v19 = vadd.f32 %v7357_v14, %v20069_v55  ;;  %v8466_v55 = vshrl.u32 %v20138_v7, 16 }
 0x496   : > { %v20151_v2 = vadd.f32 %v20055_v47, %v7633_v16  ;;  %8920 = vmatmul.bf16.gmra.mxu0 %v8818_v46  ;;  %v8645_v47 = vsel %vm560_vm1, %v8642_v29, %v8644_v31  ;;  %v9024_v62 = vpack.c.b16 %v21849_v8, %v9007_v51  ;;  %v8462_v51 = vrot.slane %v8460_v54, 3 }
 0x497   : > { %8234 = vmatmul.bf16.gmra.mxu1 %v8134_v39  ;;  %v8819_v30 = vrot.slane %v8466_v55, 3  ;;  %v20190_v39 = vadd.f32 %v20036_v10, %v20102_v11  ;;  %v9047_v8 = vrot.slane %v9045_v61, 4 }
 0x498   : > { %8571 = vmatmul.bf16.gmra.mxu2 %v8455_v58  ;;  %v9034_v16 = vshrl.u32 %v9024_v62, 16  ;;  %v9037_v36 = vshll.u32 %v9024_v62, 16  ;;  %v8459_v58 = vrot.slane %v8457_v52, 2 }
 0x499   : > { %8739 = vmatmul.bf16.gmra.mxu3 %v8645_v47  ;;  %v9044_v47 = vrot.slane %v9042_v42, 3 }
 0x49a   : > { %v9036_v62 = vrot.slane %v9034_v16, 3  ;;  %v20201_v10 = vor.u32 %v8462_v51, %v8459_v58  ;;  %v14496_v58 = vld [vmem:[#allocation8 + $0x180] sm:$0xff]  ;;  %v14509_v51 = vld [vmem:[#allocation8 + $0x1e8] sm:$0xff] }
 0x49b   : > { %v7603_v22 = vpop.f32.mrf.mxu2  ;;  %v20203_v11 = vor.u32 %v9047_v8, %v9044_v47  ;;  %9851 = vmatpush.bf16.msra.mxu0 %v14496_v58  ;;  %10004 = vmatpush.bf16.msra.mxu1 %v14509_v51  ;;  %v14466_v58 = vld [vmem:[#allocation8 + $0x108] sm:$0xff]  ;;  %v14530_v51 = vld [vmem:[#allocation8 + $0x38] sm:$0xff] }
 0x49c   : > { %v7634_v21 = vadd.f32 %v7603_v22, %v19964_v15  ;;  %v20174_v3 = vpop.f32.mrf.mxu3  ;;  %v20176_v37 = vpop.f32.mrf.mxu0  ;;  %v8820_v15 = vrot.slane %v8469_v9, 4  ;;  %v14481_v22 = vld [vmem:[#allocation8 + $0x140] sm:$0xff]  ;;  %9320 = vmatpush.bf16.msrb.mxu2 %v14466_v58 }
 0x49d   : > { %v7359_v29 = vpop.f32.mrf.mxu1  ;;  %9586 = vmatpush.bf16.msra.mxu3 %v14481_v22  ;;  %v20299_v58 = vld [vmem:[#allocation2 + $0x54] sm:$0xff] }
 0x49e   : > { %v20181_v14 = vadd.f32 %v20077_v59, %v7634_v21  ;;  %v20184_v46 = vadd.f32 %v7359_v29, %v20091_v38  ;;  %v20196_v59 = vld [vmem:[#allocation2 + $0x78] sm:$0xff]  ;;  %v9039_v38 = vrot.slane %v9037_v36, 4  ;;  %v20198_v32 = vor.u32 %v8820_v15, %v8819_v30 }
 0x49f   : > { %v8646_v42 = vrot.slane %v20196_v59, 3  ;;  %v8464_v36 = vsel %vm336_vm0, %v20142_v45, %v20201_v10  ;;  %v8478_v45 = vshll.u32 %v20196_v59, 16 }
 0x4a0   : > { %v9040_v21 = vor.u32 %v9039_v38, %v9036_v62  ;;  %v8822_v16 = vsel %vm720_vm2, %v20140_v13, %v20198_v32  ;;  %v15072_v13 = vld [vmem:[#allocation2 + $0x58] sm:$0xff]  }
 0x4a1   : > { %v9051_v8 = vshrl.u32 %v15072_v13, 16  ;;  %v9054_v62 = vshll.u32 %v15072_v13, 16  ;;  %10460 = vmatpush.bf16.msrb.mxu3 %v14530_v51 }
 0x4a2   : > { %v9049_v15 = vsel %vm720_vm2, %v9040_v21, %v20203_v11 }
 0x4a3   : > { %v7605_v33 = vpop.f32.mrf.mxu2 }
 0x4a4   : > { %v7635_v52 = vadd.f32 %v7605_v33, %v19996_v20  ;;  %v20206_v26 = vpop.f32.mrf.mxu3  ;;  %v20208_v54 = vpop.f32.mrf.mxu0  ;;  %v20220_v20 = vadd.f32 %v20057_v27, %v20125_v23  ;;  %v8352_v27 = vld [vmem:[#allocation2 + $0x80] sm:$0x7]  ;;  %v8475_v23 = vshrl.u32 %v20196_v59, 16 }
 0x4a5   : > { %v8200_v61 = vpop.f32.mrf.mxu1  ;;  %v8402_v22 = vunpack.c.l.b16 %v8352_v27 }
 0x4a6   : > { %v20212_v29 = vadd.f32 %v20096_v4, %v7635_v52  ;;  %v8240_v30 = vadd.f32 %v8200_v61, %v20110_v63  ;;  %8925 = vmatmul.bf16.gmra.mxu0 %v8822_v16  ;;  %v8647_v63 = vsel %vm560_vm1, %v8644_v31, %v8646_v42  ;;  %v8823_v52 = vrot.slane %v8475_v23, 3 }
 0x4a7   : > { %9177 = vmatmul.bf16.vlgmr.msrb.gmra.mxu1 %v9049_v15  ;;  %v20252_v16 = vadd.f32 %v20079_v41, %v20151_v2  ;;  %v8471_v15 = vrot.slane %v8469_v9, 3  ;;  %v20258_v13 = vpack.c.b16 %v8402_v22, %v8402_v22 }
 0x4a8   : > { %v8256_v4 = vmax.f32 %v8240_v30, 0.0  ;;  %8576 = vmatmul.bf16.gmra.mxu2 %v8464_v36  ;;  %v8771_v30 = vld [vmem:[#allocation2 + $0x80] sm:$0xf]  ;;  %v8468_v36 = vrot.slane %v8466_v55, 2 }
 0x4a9   : > { %8744 = vmatmul.bf16.gmra.mxu3 %v8647_v63  ;;  %v9056_v63 = vrot.slane %v9054_v62, 4 }
 0x4aa   : > { %8272 = vst [vmem:[%s20233_s20] sm:$0xff] %v8256_v4  ;;  %v9053_v4 = vrot.slane %v9051_v8, 3  ;;  %v20263_v41 = vor.u32 %v8471_v15, %v8468_v36  ;;  %v8648_v8 = vrot.slane %v20258_v13, 3  ;;  %v14508_v36 = vld [vmem:[#allocation8 + $0x1e0] sm:$0xff] }
 0x4ab   : > { %v7608_v47 = vpop.f32.mrf.mxu2  ;;  %10005 = vmatpush.bf16.msra.mxu1 %v14508_v36 }
 0x4ac   : > { %v7636_v38 = vadd.f32 %v7608_v47, %v20018_v35  ;;  %v20238_v31 = vpop.f32.mrf.mxu3  ;;  %v20240_v24 = vpop.f32.mrf.mxu0  ;;  %v8824_v35 = vrot.slane %v8478_v45, 4  ;;  %v20265_v2 = vor.u32 %v9056_v63, %v9053_v4 }
 0x4ad   : > { %v8202_v33 = vpop.f32.mrf.mxu1 }
 0x4ae   : > { %v20245_v61 = vadd.f32 %v20118_v57, %v7636_v38  ;;  %v8241_v21 = vadd.f32 %v8202_v33, %v20134_v1  ;;  %v8789_v1 = vunpack.c.l.b16 %v8771_v30  ;;  %v20261_v27 = vor.u32 %v8824_v35, %v8823_v52 }
 0x4af   : > { %v20282_v52 = vadd.f32 %v20098_v34, %v20181_v14  ;;  %v14473_v14 = vld [vmem:[#allocation2 + $0x4c] sm:$0xff] }
 0x4b0   : > { %v8257_v57 = vmax.f32 %v8241_v21, 0.0  ;;  %v8790_v38 = vpack.c.b16 %v8789_v1, %v8789_v1  ;;  %v8473_v21 = vsel %vm336_vm0, %v20201_v10, %v20263_v41  ;;  %v14538_v10 = vld [vmem:[#allocation8 + $0x78] sm:$0xff] }
 0x4b1   : > { %10584 = vmatpush.bf16.msrb.mxu0 %v14538_v10  ;;  %v15300_v10 = vld [vmem:[#allocation2 + $0x54] sm:$0xff]  }
 0x4b2   : > { %8273 = vst [vmem:[%s20233_s20 + $0x8] sm:$0xff] %v8257_v57  ;;  %v8828_v34 = vshrl.u32 %v8790_v38, 16  ;;  %v8831_v30 = vshll.u32 %v8790_v38, 16  ;;  %v8477_v38 = vrot.slane %v8475_v23, 2 }
 0x4b3   : > { %v7610_v47 = vpop.f32.mrf.mxu2 }
 0x4b4   : > { %v7637_v55 = vadd.f32 %v7610_v47, %v20042_v0  ;;  %v20268_v7 = vpop.f32.mrf.mxu3  ;;  %v20270_v9 = vpop.f32.mrf.mxu0  ;;  %v8826_v0 = vsel %vm720_vm2, %v20198_v32, %v20261_v27  ;;  %v15073_v32 = vld [vmem:[#allocation2 + $0x60] sm:$0xff]   ;;  %v8830_v51 = vrot.slane %v8828_v34, 3  ;;  %v9458_v47 = vshll.u32 %v14473_v14, 16 }
 0x4b5   : > { %v8205_v62 = vpop.f32.mrf.mxu1  ;;  %v9060_v4 = vshrl.u32 %v15073_v32, 16  ;;  %v9063_v63 = vshll.u32 %v15073_v32, 16  ;;  %v14529_v32 = vld [vmem:[#allocation8 + $0x30] sm:$0xff] }
 0x4b6   : > { %v20274_v22 = vadd.f32 %v20145_v50, %v7637_v55  ;;  %v8242_v33 = vadd.f32 %v8205_v62, %v20160_v5  ;;  %8930 = vmatmul.bf16.gmra.mxu0 %v8826_v0  ;;  %v9058_v50 = vsel %vm720_vm2, %v20203_v11, %v20265_v2  ;;  %v8649_v5 = vsel %vm560_vm1, %v8646_v42, %v8648_v8 }
 0x4b7   : > { %9182 = vmatmul.bf16.gmra.mxu1 %v9058_v50  ;;  %v8833_v62 = vrot.slane %v8831_v30, 4  ;;  %v9062_v0 = vrot.slane %v9060_v4, 3  ;;  %10461 = vmatpush.bf16.msrb.mxu3 %v14529_v32 }
 0x4b8   : > { %v8258_v35 = vmax.f32 %v8242_v33, 0.0  ;;  %8581 = vmatmul.bf16.gmra.mxu2 %v8473_v21  ;;  %v8480_v33 = vrot.slane %v8478_v45, 3  ;;  %v9065_v21 = vrot.slane %v9063_v63, 4  ;;  %v20362_v32 = vadd.f32 %v20176_v37, %v20274_v22 }
 0x4b9   : > { %8749 = vmatmul.bf16.gmra.mxu3 %v8649_v5  ;;  %v8834_v5 = vor.u32 %v8833_v62, %v8830_v51  ;;  %v14537_v62 = vld [vmem:[#allocation8 + $0x70] sm:$0xff]  ;;  %v9467_v37 = vshrl.u32 %v20299_v58, 16 }
 0x4ba   : > { %8274 = vst [vmem:[%s20233_s20 + $0x10] sm:$0xff] %v8258_v35  ;;  %v9463_v35 = vshll.u32 %v20299_v58, 16  ;;  %v20315_v30 = vor.u32 %v8480_v33, %v8477_v38  ;;  %v8484_v38 = vshrl.u32 %v20258_v13, 16  ;;  %v8487_v33 = vshll.u32 %v20258_v13, 16  ;;  %10585 = vmatpush.bf16.msrb.mxu0 %v14537_v62 }
 0x4bb   : > { %v7613_v15 = vpop.f32.mrf.mxu2 }
 0x4bc   : > { %v7638_v11 = vadd.f32 %v7613_v15, %v20064_v43  ;;  %v20295_v57 = vpop.f32.mrf.mxu3  ;;  %v20297_v1 = vpop.f32.mrf.mxu0  ;;  %v20307_v43 = vadd.f32 %v20120_v12, %v20212_v29  ;;  %v20317_v12 = vor.u32 %v9065_v21, %v9062_v0  ;;  %v9456_v29 = vshrl.u32 %v14473_v14, 16 }
 0x4bd   : > { %v8207_v42 = vpop.f32.mrf.mxu1  ;;  %v20324_v36 = vrot.slane %v9463_v35, 1  ;;  %v9694_v15 = vunpack.c.l.b16 %v15300_v10  ;;  %v8482_v51 = vsel %vm336_vm0, %v20263_v41, %v20315_v30 }
 0x4be   : > { %v20302_v55 = vadd.f32 %v20174_v3, %v7638_v11  ;;  %v8243_v8 = vadd.f32 %v8207_v42, %v20190_v39  ;;  %v9460_v3 = vrot.slane %v9458_v47, 1  ;;  %v14465_v39 = vld [vmem:[#allocation8 + $0x100] sm:$0xff]  ;;  %v20334_v42 = vadd.f32 %v20147_v44, %v20245_v61  ;;  %v14507_v61 = vld [vmem:[#allocation8 + $0x1d8] sm:$0xff] }
 0x4bf   : > { %9321 = vmatpush.bf16.msrb.mxu2 %v14465_v39  ;;  %v9067_v47 = vsel %vm720_vm2, %v20265_v2, %v20317_v12  ;;  %10006 = vmatpush.bf16.msra.mxu1 %v14507_v61  ;;  %v9469_v62 = vor.u32 %v9467_v37, %v20324_v36 }
 0x4c0   : > { %v8259_v50 = vmax.f32 %v8243_v8, 0.0  ;;  %v9461_v63 = vor.u32 %v9460_v3, %v9456_v29  ;;  %v21850_v8 = vunpack.c.h.b16 %v18880_v60  ;;  %v20354_v60 = vld [vmem:[#allocation2 + $0x5c] sm:$0xff] }
 0x4c2   : > { %8275 = vst [vmem:[%s20233_s20 + $0x18] sm:$0xff] %v8259_v50  ;;  %v9711_v44 = vpack.c.b16 %v21850_v8, %v9694_v15  ;;  %v9471_v15 = vshll.u32 %v20354_v60, 16 }
 0x4c3   : > { %v7615_v34 = vpop.f32.mrf.mxu2 }
 0x4c4   : > { %v7639_v23 = vadd.f32 %v7615_v34, %v20087_v56  ;;  %v20320_v59 = vpop.f32.mrf.mxu3  ;;  %v20322_v45 = vpop.f32.mrf.mxu0  ;;  %v8835_v56 = vsel %vm720_vm2, %v20261_v27, %v8834_v5  ;;  %v15074_v27 = vld [vmem:[#allocation2 + $0x68] sm:$0xff]   ;;  %v9723_v3 = vshll.u32 %v9711_v44, 16  ;;  %v8489_v34 = vrot.slane %v8487_v33, 3 }
 0x4c5   : > { %v8210_v4 = vpop.f32.mrf.mxu1  ;;  %v9069_v2 = vshrl.u32 %v15074_v27, 16  ;;  %v9072_v0 = vshll.u32 %v15074_v27, 16  ;;  %v9473_v8 = vrot.slane %v9471_v15, 1 }
 0x4c6   : > { %v20327_v11 = vadd.f32 %v20206_v26, %v7639_v23  ;;  %v8244_v14 = vadd.f32 %v8210_v4, %v20220_v20  ;;  %8935 = vmatmul.bf16.gmra.mxu0 %v8835_v56  ;;  %v9466_v20 = vsel %vm1388_vm3, %v9461_v63, %v20324_v36  ;;  %v9725_v4 = vrot.slane %v9723_v3, 1  ;;  %v14519_v56 = vld [vmem:[#allocation8 + $0x238] sm:$0xff] }
 0x4c7   : > { %9187 = vmatmul.bf16.gmra.mxu1 %v9067_v47  ;;  %v9071_v29 = vrot.slane %v9069_v2, 3  ;;  %v9074_v23 = vrot.slane %v9072_v0, 4  ;;  %v9721_v63 = vshrl.u32 %v9711_v44, 16  ;;  %10188 = vmatpush.bf16.msra.mxu2 %v14519_v56  ;;  %v14506_v0 = vld [vmem:[#allocation8 + $0x1d0] sm:$0xff] }
 0x4c8   : > { %v8260_v26 = vmax.f32 %v8244_v14, 0.0  ;;  %8586 = vmatmul.bf16.gmra.mxu2 %v8482_v51  ;;  %v21851_v14 = vshll.u32 %v18921_v53, 16  ;;  %v14528_v51 = vld [vmem:[#allocation8 + $0x28] sm:$0xff]  ;;  %10007 = vmatpush.bf16.msra.mxu1 %v14506_v0 }
 0x4c9   : > { %9587 = vmatmul.bf16.vlgmr.msra.gmra.mxu3 %v9466_v20  ;;  %v9726_v61 = vor.u32 %v9725_v4, %v9721_v63  ;;  %v8288_v63 = vld [vmem:[%s15629_s30 + $0x4c] sm:$0xf] }
 0x4ca   : > { %8276 = vst [vmem:[%s20233_s20 + $0x20] sm:$0xff] %v8260_v26  ;;  %v20368_v26 = vor.u32 %v9074_v23, %v9071_v29  ;;  %10462 = vmatpush.bf16.msrb.mxu3 %v14528_v51  ;;  %v20406_v23 = vadd.f32 %v20240_v24, %v20327_v11  ;;  %v14518_v51 = vld [vmem:[#allocation8 + $0x230] sm:$0xff] }
 0x4cb   : > { %v7618_v41 = vpop.f32.mrf.mxu2  ;;  %10189 = vmatpush.bf16.msra.mxu2 %v14518_v51  ;;  %v21854_v51 = vshll.u32 %v19058_v28, 16 }
 0x4cc   : > { %v7640_v21 = vadd.f32 %v7618_v41, %v20105_v6  ;;  %v20350_v50 = vpop.f32.mrf.mxu3  ;;  %v20352_v35 = vpop.f32.mrf.mxu0  ;;  %v8486_v6 = vrot.slane %v8484_v38, 2  ;;  %v9076_v2 = vsel %vm720_vm2, %v20317_v12, %v20368_v26 }
 0x4cd   : > { %v8212_v5 = vpop.f32.mrf.mxu1 }
 0x4ce   : > { %v20357_v39 = vadd.f32 %v20238_v31, %v7640_v21  ;;  %v8245_v13 = vadd.f32 %v8212_v5, %v20252_v16  ;;  %v9730_v31 = vrot.slane %v21851_v14, 1  ;;  %v8490_v47 = vor.u32 %v8489_v34, %v8486_v6  ;;  %v14536_v21 = vld [vmem:[#allocation8 + $0x68] sm:$0xff] }
 0x4cf   : > { %10586 = vmatpush.bf16.msrb.mxu0 %v14536_v21  ;;  %v21852_v14 = vshll.u32 %v18993_v48, 16 }
 0x4d0   : > { %v8261_v10 = vmax.f32 %v8245_v13, 0.0  ;;  %v9731_v58 = vsel %vm1388_vm3, %v9726_v61, %v9730_v31  ;;  %v8491_v33 = vsel %vm336_vm0, %v20315_v30, %v8490_v47  ;;  %v20398_v13 = vld [vmem:[#allocation2 + $0x64] sm:$0xff]  ;;  %v21853_v61 = vshrl.u32 %v18921_v53, 16 }
 0x4d1   : > { %v9479_v4 = vshll.u32 %v20398_v13, 16  ;;  %v20413_v56 = vrot.slane %v21852_v14, 1 }
 0x4d2   : > { %8277 = vst [vmem:[%s20233_s20 + $0x28] sm:$0xff] %v8261_v10 }
 0x4d3   : > { %v7620_v16 = vpop.f32.mrf.mxu2 }
 0x4d4   : > { %v7641_v22 = vadd.f32 %v7620_v16, %v20128_v18  ;;  %v20372_v20 = vpop.f32.mrf.mxu3  ;;  %v20374_v27 = vpop.f32.mrf.mxu0  ;;  %v20384_v18 = vadd.f32 %v20208_v54, %v20302_v55 }
 0x4d5   : > { %v8215_v44 = vpop.f32.mrf.mxu1 }
 0x4d6   : > { %v20378_v41 = vadd.f32 %v20268_v7, %v7641_v22  ;;  %v8246_v38 = vadd.f32 %v8215_v44, %v20282_v52  ;;  %9852 = vmatmul.bf16.vlgmr.msra.gmra.mxu0 %v9731_v58  ;;  %v9474_v7 = vsel %vm1388_vm3, %v9469_v62, %v9473_v8  ;;  %v15075_v52 = vld [vmem:[#allocation2 + $0x70] sm:$0xff]   ;;  %v9481_v22 = vrot.slane %v9479_v4, 1 }
 0x4d7   : > { %9192 = vmatmul.bf16.gmra.mxu1 %v9076_v2  ;;  %v9078_v55 = vshrl.u32 %v15075_v52, 16  ;;  %v9081_v3 = vshll.u32 %v15075_v52, 16  ;;  %v9734_v44 = vor.u32 %v21853_v61, %v9730_v31  ;;  %v8304_v62 = vunpack.c.l.bf16 %v8288_v63 }
 0x4d8   : > { %v8262_v36 = vmax.f32 %v8246_v38, 0.0  ;;  %8591 = vmatmul.bf16.gmra.mxu2 %v8491_v33  ;;  %v20433_v2 = vadd.f32 %v20270_v9, %v20357_v39  ;;  %v15076_v9 = vld [vmem:[#allocation2 + $0x78] sm:$0xff]   ;;  %v15064_v39 = vld [vmem:[%s15629_s30 + $0x50] sm:$0xff]  }
 0x4d9   : > { %9592 = vmatmul.bf16.gmra.mxu3 %v9474_v7  ;;  %v9080_v10 = vrot.slane %v9078_v55, 3  ;;  %v9087_v52 = vshrl.u32 %v15076_v9, 16  ;;  %v9090_v0 = vshll.u32 %v15076_v9, 16  ;;  %v14823_v55 = vunpack.c.l.bf16 %v15064_v39  ;;  %v14504_v9 = vld [vmem:[#allocation8 + $0x1c0] sm:$0xff] }
 0x4da   : > { %8278 = vst [vmem:[%s20233_s20 + $0x30] sm:$0xff] %v8262_v36  ;;  %v14505_v36 = vld [vmem:[#allocation8 + $0x1c8] sm:$0xff] }
 0x4db   : > { %v7623_v54 = vpop.f32.mrf.mxu2  ;;  %10008 = vmatpush.bf16.msra.mxu1 %v14505_v36 }
 0x4dc   : > { %v7642_v30 = vadd.f32 %v7623_v54, %v20154_v19  ;;  %v20394_v5 = vpop.f32.mrf.mxu3  ;;  %v20396_v12 = vpop.f32.mrf.mxu0  ;;  %v9083_v19 = vrot.slane %v9081_v3, 4  ;;  %v20452_v3 = vld [vmem:[#allocation2 + $0x6c] sm:$0xff] }
 0x4dd   : > { %v8217_v6 = vpop.f32.mrf.mxu1  ;;  %v9487_v14 = vshll.u32 %v20452_v3, 16 }
 0x4de   : > { %v20401_v34 = vadd.f32 %v20295_v57, %v7642_v30  ;;  %v8247_v29 = vadd.f32 %v8217_v6, %v20307_v43  ;;  %v14527_v57 = vld [vmem:[#allocation8 + $0x20] sm:$0xff]  ;;  %v20415_v47 = vor.u32 %v9083_v19, %v9080_v10  ;;  %v9475_v43 = vshrl.u32 %v20354_v60, 16 }
 0x4df   : > { %10463 = vmatpush.bf16.msrb.mxu3 %v14527_v57  ;;  %v9739_v60 = vsel %vm1388_vm3, %v9734_v44, %v20413_v56  ;;  %v20460_v10 = vadd.f32 %v20297_v1, %v20378_v41  ;;  %v9089_v19 = vrot.slane %v9087_v52, 3  ;;  %v20467_v57 = vrot.slane %v21854_v51, 1  ;;  %10009 = vmatpush.bf16.msra.mxu1 %v14504_v9 }
 0x4e0   : > { %v8263_v15 = vmax.f32 %v8247_v29, 0.0  ;;  %v9477_v58 = vor.u32 %v9475_v43, %v9473_v8  ;;  %v9085_v53 = vsel %vm720_vm2, %v20368_v26, %v20415_v47  ;;  %v14535_v26 = vld [vmem:[#allocation8 + $0x60] sm:$0xff]  ;;  %v9483_v1 = vshrl.u32 %v20398_v13, 16 }
 0x4e1   : > { %10587 = vmatpush.bf16.msrb.mxu0 %v14535_v26  ;;  %v9489_v44 = vrot.slane %v9487_v14, 1 }
 0x4e2   : > { %8279 = vst [vmem:[%s20233_s20 + $0x38] sm:$0xff] %v8263_v15  ;;  %v9092_v15 = vrot.slane %v9090_v0, 4 }
 0x4e3   : > { %v7625_v16 = vpop.f32.mrf.mxu2 }
 0x4e4   : > { %v7643_v24 = vadd.f32 %v7625_v16, %v20184_v46  ;;  %v20419_v11 = vpop.f32.mrf.mxu3  ;;  %v20421_v37 = vpop.f32.mrf.mxu0  ;;  %v14526_v16 = vld [vmem:[#allocation8 + $0x18] sm:$0xff] }
 0x4e5   : > { %v8220_v38 = vpop.f32.mrf.mxu1  ;;  %10464 = vmatpush.bf16.msrb.mxu3 %v14526_v16 }
 0x4e6   : > { %v20426_v33 = vadd.f32 %v20320_v59, %v7643_v24  ;;  %v8248_v46 = vadd.f32 %v8220_v38, %v20334_v42  ;;  %9857 = vmatmul.bf16.gmra.mxu0 %v9739_v60  ;;  %v9482_v59 = vsel %vm1388_vm3, %v9477_v58, %v9481_v22  ;;  %v20443_v42 = vld [vmem:[%s21309_s3 + $0x1] ss:$0 sm:$0xff]  ;;  %v14824_v58 = vunpack.c.h.bf16 %v15064_v39  ;;  %v14534_v39 = vld [vmem:[#allocation8 + $0x58] sm:$0xff] }
 0x4e7   : > { %9197 = vmatmul.bf16.gmra.mxu1 %v9085_v53  ;;  %v8320_v8 = vadd.f32 %v20443_v42, %v8304_v62  ;;  %v8321_v63 = vadd.f32 %v20443_v42, %v14823_v55  ;;  %v21855_v62 = vshrl.u32 %v18993_v48, 16  ;;  %v9485_v60 = vor.u32 %v9483_v1, %v9481_v22  ;;  %v15065_v22 = vld [vmem:[%s15629_s30 + $0x58] sm:$0xff]   ;;  %10588 = vmatpush.bf16.msrb.mxu0 %v14534_v39 }
 0x4e8   : > { %v8264_v31 = vmax.f32 %v8248_v46, 0.0  ;;  %9322 = vmatmul.bf16.vlgmr.msrb.gmra.mxu2 %v18843_v40  ;;  %v20487_v48 = vadd.f32 %v20322_v45, %v20401_v34  ;;  %v15302_v45 = vld [vmem:[#allocation2 + $0x80] sm:$0xff]   ;;  %v14827_v0 = vunpack.c.l.bf16 %v15065_v22 }
 0x4e9   : > { %9597 = vmatmul.bf16.gmra.mxu3 %v9482_v59  ;;  %v9742_v38 = vor.u32 %v21855_v62, %v20413_v56  ;;  %v9096_v34 = vshrl.u32 %v15302_v45, 16  ;;  %v9099_v26 = vshll.u32 %v15302_v45, 16 }
 0x4ea   : > { %8280 = vst [vmem:[%s20233_s20 + $0x40] sm:$0xff] %v8264_v31  ;;  %v15175_v31 = vld [vmem:[#allocation2 + $0x54] sm:$0xff]   ;;  %v8323_v14 = vadd.f32 %v20443_v42, %v14827_v0 }
 0x4eb   : > { %v8557_v7 = vpop.f32.mrf.mxu2  ;;  %v9747_v59 = vsel %vm1388_vm3, %v9742_v38, %v20467_v57 }
 0x4ec   : > { %v8597_v21 = vadd.f32 %v8557_v7, %v8320_v8  ;;  %v20448_v40 = vpop.f32.mrf.mxu3  ;;  %v20450_v54 = vpop.f32.mrf.mxu0 }
 0x4ed   : > { %v8222_v30 = vpop.f32.mrf.mxu1 }
 0x4ee   : > { %v20455_v6 = vadd.f32 %v20350_v50, %v8597_v21  ;;  %v8249_v29 = vadd.f32 %v8222_v30, %v20362_v32  ;;  %v14517_v50 = vld [vmem:[#allocation8 + $0x228] sm:$0xff]  ;;  %v20469_v32 = vor.u32 %v9092_v15, %v9089_v19  ;;  %v20500_v21 = vld [vmem:[#allocation2 + $0x74] sm:$0xff]  ;;  %v20508_v19 = vadd.f32 %v20352_v35, %v20426_v33 }
 0x4ef   : > { %10190 = vmatpush.bf16.msra.mxu2 %v14517_v50  ;;  %v9098_v15 = vrot.slane %v9096_v34, 3  ;;  %v9495_v51 = vshll.u32 %v20500_v21, 16  ;;  %v21856_v50 = vshll.u32 %v19137_v49, 16  ;;  %v9491_v35 = vshrl.u32 %v20452_v3, 16  ;;  %v20550_v34 = vld [vmem:[#allocation2 + $0x7c] sm:$0xff] }
 0x4f0   : > { %v8265_v4 = vmax.f32 %v8249_v29, 0.0  ;;  %v9094_v56 = vsel %vm720_vm2, %v20415_v47, %v20469_v32 }
 0x4f1   : > { %v20515_v16 = vrot.slane %v21856_v50, 1  ;;  %v9497_v38 = vrot.slane %v9495_v51, 1  ;;  %v9503_v50 = vshll.u32 %v20550_v34, 16 }
 0x4f2   : > { %8281 = vst [vmem:[%s20233_s20 + $0x48] sm:$0xff] %v8265_v4  ;;  %v9101_v4 = vrot.slane %v9099_v26, 4 }
 0x4f3   : > { %v8559_v43 = vpop.f32.mrf.mxu2 }
 0x4f4   : > { %v8598_v41 = vadd.f32 %v8559_v43, %v8321_v63  ;;  %v20472_v24 = vpop.f32.mrf.mxu3  ;;  %v20474_v61 = vpop.f32.mrf.mxu0  ;;  %v14525_v43 = vld [vmem:[#allocation8 + $0x10] sm:$0xff] }
 0x4f5   : > { %v8225_v46 = vpop.f32.mrf.mxu1  ;;  %10465 = vmatpush.bf16.msrb.mxu3 %v14525_v43 }
 0x4f6   : > { %v20480_v53 = vadd.f32 %v20372_v20, %v8598_v41  ;;  %v8250_v13 = vadd.f32 %v8225_v46, %v20384_v18  ;;  %9862 = vmatmul.bf16.gmra.mxu0 %v9747_v59  ;;  %v9490_v20 = vsel %vm1388_vm3, %v9485_v60, %v9489_v44  ;;  %v8322_v18 = vadd.f32 %v20443_v42, %v14824_v58 }
 0x4f7   : > { %9202 = vmatmul.bf16.gmra.mxu1 %v9094_v56  ;;  %v21857_v58 = vshrl.u32 %v19058_v28, 16  ;;  %v14828_v60 = vunpack.c.h.bf16 %v15065_v22  ;;  %v15177_v56 = vld [vmem:[#allocation2 + $0x5c] sm:$0xff]   ;;  %v20535_v28 = vadd.f32 %v20374_v27, %v20455_v6  ;;  %v14533_v22 = vld [vmem:[#allocation8 + $0x50] sm:$0xff]  ;;  %v14554_v27 = vld [vmem:[#allocation8 + $0xf8] sm:$0xff] }
 0x4f8   : > { %v8266_v8 = vmax.f32 %v8250_v13, 0.0  ;;  %9327 = vmatmul.bf16.gmra.mxu2 %v15175_v31  ;;  %v9493_v31 = vor.u32 %v9491_v35, %v9489_v44  ;;  %10589 = vmatpush.bf16.msrb.mxu0 %v14533_v22  ;;  %v20592_v22 = vld [vmem:[#allocation2 + $0x84] sm:$0xff] }
 0x4f9   : > { %9602 = vmatmul.bf16.gmra.mxu3 %v9490_v20  ;;  %v9750_v46 = vor.u32 %v21857_v58, %v20467_v57  ;;  %v8324_v20 = vadd.f32 %v20443_v42, %v14828_v60  ;;  %10918 = vmatpush.bf16.msrb.mxu1 %v14554_v27  ;;  %v9505_v58 = vrot.slane %v9503_v50, 1 }
 0x4fa   : > { %8282 = vst [vmem:[%s20233_s20 + $0x50] sm:$0xff] %v8266_v8 }
 0x4fb   : > { %v8562_v36 = vpop.f32.mrf.mxu2  ;;  %v9755_v8 = vsel %vm1388_vm3, %v9750_v46, %v20515_v16  ;;  %v21860_v46 = vshrl.u32 %v19137_v49, 16 }
 0x4fc   : > { %v8599_v7 = vadd.f32 %v8562_v36, %v8322_v18  ;;  %v20496_v47 = vpop.f32.mrf.mxu3  ;;  %v20498_v52 = vpop.f32.mrf.mxu0  ;;  %v15066_v18 = vld [vmem:[%s15629_s30 + $0x60] sm:$0xff]  }
 0x4fd   : > { %v8227_v55 = vpop.f32.mrf.mxu1  ;;  %v14831_v45 = vunpack.c.l.bf16 %v15066_v18  ;;  %v9758_v60 = vor.u32 %v21860_v46, %v20515_v16 }
 0x4fe   : > { %v20503_v30 = vadd.f32 %v20394_v5, %v8599_v7  ;;  %v8251_v29 = vadd.f32 %v8227_v55, %v20406_v23  ;;  %v14516_v5 = vld [vmem:[#allocation8 + $0x220] sm:$0xff]  ;;  %v20517_v23 = vor.u32 %v9101_v4, %v9098_v15  ;;  %v20558_v55 = vadd.f32 %v20396_v12, %v20480_v53  ;;  %v14524_v15 = vld [vmem:[#allocation8 + $0x8] sm:$0xff] }
 0x4ff   : > { %10191 = vmatpush.bf16.msra.mxu2 %v14516_v5  ;;  %v8325_v51 = vadd.f32 %v20443_v42, %v14831_v45  ;;  %10466 = vmatpush.bf16.msrb.mxu3 %v14524_v15  ;;  %v9499_v12 = vshrl.u32 %v20500_v21, 16  ;;  %v14523_v45 = vld [vmem:[#allocation8] sm:$0xff]  ;;  %v21861_v15 = vld [vmem:[#allocation42_spill] sm:$0xff] }
 0x500   : > { %v8267_v63 = vmax.f32 %v8251_v29, 0.0  ;;  %v9103_v57 = vsel %vm720_vm2, %v20469_v32, %v20517_v23  ;;  %v14515_v29 = vld [vmem:[#allocation8 + $0x218] sm:$0xff] }
 0x502   : > { %8283 = vst [vmem:[%s20233_s20 + $0x58] sm:$0xff] %v8267_v63 }
 0x503   : > { %v8564_v1 = vpop.f32.mrf.mxu2  ;;  %10192 = vmatpush.bf16.msra.mxu2 %v14515_v29  ;;  %v9511_v29 = vshll.u32 %v20592_v22, 16  ;;  %10467 = vmatpush.bf16.msrb.mxu3 %v14523_v45 }
 0x504   : > { %v8600_v33 = vadd.f32 %v8564_v1, %v8323_v14  ;;  %v20520_v41 = vpop.f32.mrf.mxu3  ;;  %v20522_v62 = vpop.f32.mrf.mxu0 }
 0x505   : > { %v8230_v13 = vpop.f32.mrf.mxu1 }
 0x506   : > { %v20528_v59 = vadd.f32 %v20419_v11, %v8600_v33  ;;  %v8252_v3 = vadd.f32 %v8230_v13, %v20433_v2  ;;  %9867 = vmatmul.bf16.gmra.mxu0 %v9755_v8  ;;  %v9032_v11 = vpack.c.b16 %v19288_v25, %v19288_v25  ;;  %v9498_v2 = vsel %vm1388_vm3, %v9493_v31, %v9497_v38  ;;  %v15179_v8 = vld [vmem:[#allocation2 + $0x64] sm:$0xff]  }
 0x507   : > { %9207 = vmatmul.bf16.gmra.mxu1 %v9103_v57  ;;  %v14832_v13 = vunpack.c.h.bf16 %v15066_v18 }
 0x508   : > { %v8268_v44 = vmax.f32 %v8252_v3, 0.0  ;;  %9332 = vmatmul.bf16.gmra.mxu2 %v15177_v56  ;;  %v9105_v9 = vshrl.u32 %v9032_v11, 16  ;;  %v9108_v39 = vshll.u32 %v9032_v11, 16  ;;  %v9501_v3 = vor.u32 %v9499_v12, %v9497_v38 }
 0x509   : > { %9607 = vmatmul.bf16.gmra.mxu3 %v9498_v2  ;;  %v20580_v11 = vadd.f32 %v20421_v37, %v20503_v30  ;;  %v8326_v38 = vadd.f32 %v20443_v42, %v14832_v13  ;;  %v14553_v2 = vld [vmem:[#allocation8 + $0xf0] sm:$0xff] }
 0x50a   : > { %8284 = vst [vmem:[%s20233_s20 + $0x60] sm:$0xff] %v8268_v44  ;;  %v9107_v4 = vrot.slane %v9105_v9, 3  ;;  %v9110_v63 = vrot.slane %v9108_v39, 4  ;;  %v14532_v44 = vld [vmem:[#allocation8 + $0x48] sm:$0xff]  ;;  %10919 = vmatpush.bf16.msrb.mxu1 %v14553_v2  ;;  %v20600_v39 = vadd.f32 %v20450_v54, %v20528_v59  ;;  %v9513_v59 = vrot.slane %v9511_v29, 1 }
 0x50b   : > { %v8567_v6 = vpop.f32.mrf.mxu2  ;;  %10590 = vmatpush.bf16.msrb.mxu0 %v14532_v44  ;;  %v14513_v2 = vld [vmem:[#allocation8 + $0x208] sm:$0xff] }
 0x50c   : > { %v8601_v32 = vadd.f32 %v8567_v6, %v8324_v20  ;;  %v20546_v36 = vpop.f32.mrf.mxu3  ;;  %v20548_v25 = vpop.f32.mrf.mxu0  ;;  %v9111_v1 = vor.u32 %v9110_v63, %v9107_v4  ;;  %v21862_v4 = vshll.u32 %v21861_v15, 16 }
 0x50d   : > { %v8232_v26 = vpop.f32.mrf.mxu1 }
 0x50e   : > { %v20553_v7 = vadd.f32 %v20448_v40, %v8601_v32  ;;  %v8253_v0 = vadd.f32 %v8232_v26, %v20460_v10  ;;  %v21858_v40 = vld [vmem:[#allocation28_spill] sm:$0xff]  ;;  %v9112_v49 = vsel %vm720_vm2, %v20517_v23, %v9111_v1  ;;  %v14514_v32 = vld [vmem:[#allocation8 + $0x210] sm:$0xff] }
 0x50f   : > { %v21859_v5 = vshll.u32 %v21858_v40, 16  ;;  %10193 = vmatpush.bf16.msra.mxu2 %v14514_v32  ;;  %v21863_v50 = vshrl.u32 %v21858_v40, 16 }
 0x510   : > { %v8269_v14 = vmax.f32 %v8253_v0, 0.0 }
 0x511   : > { %v9762_v43 = vrot.slane %v21859_v5, 1 }
 0x512   : > { %8285 = vst [vmem:[%s20233_s20 + $0x68] sm:$0xff] %v8269_v14 }
 0x513   : > { %v8569_v10 = vpop.f32.mrf.mxu2  ;;  %v9763_v57 = vsel %vm1388_vm3, %v9758_v60, %v9762_v43  ;;  %v9766_v5 = vor.u32 %v21863_v50, %v9762_v43  ;;  %v21864_v43 = vld [vmem:[#allocation21_spill] sm:$0xff]  ;;  %10194 = vmatpush.bf16.msra.mxu2 %v14513_v2 }
 0x514   : > { %v8602_v53 = vadd.f32 %v8569_v10, %v8325_v51  ;;  %v20566_v35 = vpop.f32.mrf.mxu3  ;;  %v20568_v33 = vpop.f32.mrf.mxu0  ;;  %v20653_v50 = vld [vmem:[#allocation2 + $0x84] sm:$0xff]  }
 0x515   : > { %v8235_v31 = vpop.f32.mrf.mxu1 }
 0x516   : > { %v20574_v56 = vadd.f32 %v20472_v24, %v8602_v53  ;;  %v8254_v21 = vadd.f32 %v8235_v31, %v20487_v48  ;;  %9872 = vmatmul.bf16.gmra.mxu0 %v9763_v57  ;;  %v9506_v24 = vsel %vm1388_vm3, %v9501_v3, %v9505_v58  ;;  %v15067_v48 = vld [vmem:[%s15629_s30 + $0x68] sm:$0xff]   ;;  %v9395_v53 = vld [vmem:[#allocation2 + $0x8c] sm:$0x1]  ;;  %v20623_v31 = vadd.f32 %v20474_v61, %v20553_v7 }
 0x517   : > { %9212 = vmatmul.bf16.gmra.mxu1 %v9112_v49  ;;  %v14835_v18 = vunpack.c.l.bf16 %v15067_v48  ;;  %v14836_v10 = vunpack.c.h.bf16 %v15067_v48  ;;  %v15068_v3 = vld [vmem:[%s15629_s30 + $0x70] sm:$0xff]  }
 0x518   : > { %v8270_v16 = vmax.f32 %v8254_v21, 0.0  ;;  %9337 = vmatmul.bf16.gmra.mxu2 %v15179_v8  ;;  %v14552_v21 = vld [vmem:[#allocation8 + $0xe8] sm:$0xff]  ;;  %v14839_v7 = vunpack.c.l.bf16 %v15068_v3  ;;  %v20641_v44 = vadd.f32 %v20498_v52, %v20574_v56  ;;  %v21867_v56 = vshrl.u32 %v21861_v15, 16 }
 0x519   : > { %9612 = vmatmul.bf16.gmra.mxu3 %v9506_v24  ;;  %v8327_v0 = vadd.f32 %v20443_v42, %v14835_v18  ;;  %10920 = vmatpush.bf16.msrb.mxu1 %v14552_v21 }
 0x51a   : > { %8286 = vst [vmem:[%s20233_s20 + $0x70] sm:$0xff] %v8270_v16 }
 0x51b   : > { %v8572_v20 = vpop.f32.mrf.mxu2 }
 0x51c   : > { %v8603_v37 = vadd.f32 %v8572_v20, %v8326_v38  ;;  %v20588_v30 = vpop.f32.mrf.mxu3  ;;  %v20590_v23 = vpop.f32.mrf.mxu0  ;;  %v14546_v20 = vld [vmem:[#allocation8 + $0xb8] sm:$0xff] }
 0x51d   : > { %v8237_v27 = vpop.f32.mrf.mxu1  ;;  %10728 = vmatpush.bf16.msra.mxu3 %v14546_v20  ;;  %v14512_v20 = vld [vmem:[#allocation8 + $0x200] sm:$0xff] }
 0x51e   : > { %v20595_v6 = vadd.f32 %v20496_v47, %v8603_v37  ;;  %v8255_v9 = vadd.f32 %v8237_v27, %v20508_v19  ;;  %v9770_v47 = vrot.slane %v21862_v4, 1  ;;  %v9507_v19 = vshrl.u32 %v20550_v34, 16  ;;  %v15181_v34 = vld [vmem:[#allocation2 + $0x6c] sm:$0xff]   ;;  %v21865_v27 = vld [vmem:[#allocation33_spill] sm:$0xff]  ;;  %10195 = vmatpush.bf16.msra.mxu2 %v14512_v20 }
 0x51f   : > { %v8329_v37 = vadd.f32 %v20443_v42, %v14839_v7  ;;  %v14840_v4 = vunpack.c.h.bf16 %v15068_v3 }
 0x520   : > { %v8271_v26 = vmax.f32 %v8255_v9, 0.0  ;;  %v9509_v12 = vor.u32 %v9507_v19, %v9505_v58  ;;  %v9771_v13 = vsel %vm1388_vm3, %v9766_v5, %v9770_v47  ;;  %v8328_v58 = vadd.f32 %v20443_v42, %v14836_v10 }
 0x521   : > { %v21866_v9 = vshll.u32 %v21865_v27, 16  ;;  %v9774_v29 = vor.u32 %v21867_v56, %v9770_v47  ;;  %v10349_v5 = vunpack.c.l.b16 %v20653_v50  ;;  %v20665_v15 = vadd.f32 %v20522_v62, %v20595_v6 }
 0x522   : > { %8287 = vst [vmem:[%s20233_s20 + $0x78] sm:$0xff] %v8271_v26  ;;  %v9514_v40 = vsel %vm1388_vm3, %v9509_v12, %v9513_v59  ;;  %v21873_v56 = vshrl.u32 %v21865_v27, 16  ;;  %v15184_v27 = vld [vmem:[#allocation2 + $0x7c] sm:$0xff]  }
 0x523   : > { %v8574_v63 = vpop.f32.mrf.mxu2  ;;  %v9778_v32 = vrot.slane %v21866_v9, 1  ;;  %v21870_v9 = vld [vmem:[#allocation31_spill] sm:$0xff] }
 0x524   : > { %v8604_v14 = vadd.f32 %v8574_v63, %v8327_v0  ;;  %v20608_v51 = vpop.f32.mrf.mxu3  ;;  %v20610_v54 = vpop.f32.mrf.mxu0  ;;  %v10312_v63 = vld [vmem:[#allocation2 + $0x80] sm:$0xc] }
 0x525   : > { %v9178_v1 = vpop.f32.mrf.mxu1  ;;  %v9779_v12 = vsel %vm1388_vm3, %v9774_v29, %v9778_v32  ;;  %v10348_v47 = vunpack.c.l.b16 %v10312_v63  ;;  %v9782_v29 = vor.u32 %v21873_v56, %v9778_v32 }
 0x526   : > { %v20615_v46 = vadd.f32 %v20520_v41, %v8604_v14  ;;  %v20618_v60 = vadd.f32 %v9178_v1, %v20535_v28  ;;  %9877 = vmatmul.bf16.gmra.mxu0 %v9771_v13  ;;  %v9445_v41 = vunpack.c.l.b16 %v9395_v53  ;;  %v14531_v28 = vld [vmem:[#allocation8 + $0x40] sm:$0xff] }
 0x527   : > { %10010 = vmatmul.bf16.vlgmr.msra.gmra.mxu1 %v21864_v43  ;;  %10591 = vmatpush.bf16.msrb.mxu0 %v14531_v28  ;;  %v15183_v1 = vld [vmem:[#allocation2 + $0x74] sm:$0xff]   ;;  %v14545_v43 = vld [vmem:[#allocation8 + $0xb0] sm:$0xff] }
 0x528   : > { %9342 = vmatmul.bf16.gmra.mxu2 %v15181_v34  ;;  %v9454_v16 = vpack.c.b16 %v9445_v41, %v9445_v41  ;;  %v21868_v53 = vld [vmem:[#allocation23_spill] sm:$0xff]  ;;  %10729 = vmatpush.bf16.msra.mxu3 %v14545_v43  ;;  %v20686_v2 = vadd.f32 %v20548_v25, %v20615_v46 }
 0x529   : > { %9617 = vmatmul.bf16.gmra.mxu3 %v9514_v40  ;;  %v15069_v34 = vld [vmem:[%s15629_s30 + $0x78] sm:$0xff]  }
 0x52a   : > { %v9519_v18 = vshll.u32 %v9454_v16, 16  ;;  %v14551_v13 = vld [vmem:[#allocation8 + $0xe0] sm:$0xff]  ;;  %v14562_v40 = vld [vmem:[#allocation8 + $0x138] sm:$0xff]  ;;  %v14843_v3 = vunpack.c.l.bf16 %v15069_v34 }
 0x52b   : > { %v8577_v8 = vpop.f32.mrf.mxu2  ;;  %10921 = vmatpush.bf16.msrb.mxu1 %v14551_v13  ;;  %11034 = vmatpush.bf16.msra.mxu0 %v14562_v40  ;;  %v21869_v16 = vld [vmem:[#allocation47_spill] sm:$0xff]  ;;  %v21874_v13 = vld [vmem:[#allocation25_spill] sm:$0xff] }
 0x52c   : > { %v8605_v57 = vadd.f32 %v8577_v8, %v8328_v58  ;;  %v20629_v49 = vpop.f32.mrf.mxu3  ;;  %v20631_v61 = vpop.f32.mrf.mxu0  ;;  %v9521_v52 = vrot.slane %v9519_v18, 1  ;;  %v8331_v18 = vadd.f32 %v20443_v42, %v14843_v3  ;;  %v15070_v40 = vld [vmem:[%s15629_s30 + $0x80] sm:$0xff]  }
 0x52d   : > { %v9180_v24 = vpop.f32.mrf.mxu1 }
 0x52e   : > { %v20634_v38 = vadd.f32 %v20546_v36, %v8605_v57  ;;  %v20637_v48 = vadd.f32 %v9180_v24, %v20558_v55  ;;  %v9515_v36 = vshrl.u32 %v20592_v22, 16  ;;  %v9784_v24 = vshll.u32 %v21869_v16, 16 }
 0x530   : > { %v9517_v14 = vor.u32 %v9515_v36, %v9513_v59 }
 0x532   : > { %v9522_v59 = vsel %vm1388_vm3, %v9517_v14, %v9521_v52 }
 0x533   : > { %v8579_v45 = vpop.f32.mrf.mxu2 }
 0x534   : > { %v8606_v26 = vadd.f32 %v8579_v45, %v8329_v37  ;;  %v20647_v55 = vpop.f32.mrf.mxu3  ;;  %v20649_v0 = vpop.f32.mrf.mxu0  ;;  %v14561_v37 = vld [vmem:[#allocation8 + $0x130] sm:$0xff]  ;;  %v21871_v45 = vshrl.u32 %v21870_v9, 16 }
 0x535   : > { %v9183_v19 = vpop.f32.mrf.mxu1  ;;  %11035 = vmatpush.bf16.msra.mxu0 %v14561_v37  ;;  %v14543_v37 = vld [vmem:[#allocation8 + $0xa0] sm:$0xff] }
 0x536   : > { %v20657_v22 = vadd.f32 %v20566_v35, %v8606_v26  ;;  %v20660_v10 = vadd.f32 %v9183_v19, %v20580_v11  ;;  %9882 = vmatmul.bf16.gmra.mxu0 %v9779_v12  ;;  %v8330_v35 = vadd.f32 %v20443_v42, %v14840_v4  ;;  %v10358_v11 = vpack.c.b16 %v10349_v5, %v10348_v47 }
 0x537   : > { %10015 = vmatmul.bf16.gmra.mxu1 %v21868_v53  ;;  %v10374_v36 = vrot.slane %v21871_v45, 2  ;;  %v21872_v26 = vshll.u32 %v21870_v9, 16  ;;  %v9786_v4 = vrot.slane %v9784_v24, 1  ;;  %v14560_v24 = vld [vmem:[#allocation8 + $0x128] sm:$0xff] }
 0x538   : > { %9347 = vmatmul.bf16.gmra.mxu2 %v15183_v1  ;;  %v10364_v21 = vshrl.u32 %v10358_v11, 16  ;;  %v10367_v8 = vshll.u32 %v10358_v11, 16  ;;  %v14844_v1 = vunpack.c.h.bf16 %v15069_v34  ;;  %v20708_v11 = vadd.f32 %v20568_v33, %v20634_v38  ;;  %v21875_v45 = vld [vmem:[#allocation32_spill] sm:$0xff] }
 0x539   : > { %9622 = vmatmul.bf16.gmra.mxu3 %v9522_v59  ;;  %v9787_v32 = vsel %vm1388_vm3, %v9782_v29, %v9786_v4  ;;  %v14847_v38 = vunpack.c.l.bf16 %v15070_v40  ;;  %v20726_v20 = vadd.f32 %v20590_v23, %v20657_v22  ;;  %11036 = vmatpush.bf16.msra.mxu0 %v14560_v24  ;;  %v14541_v24 = vld [vmem:[#allocation8 + $0x90] sm:$0xff] }
 0x53a   : > { %v10369_v52 = vrot.slane %v10367_v8, 3 }
 0x53b   : > { %v8582_v58 = vpop.f32.mrf.mxu2  ;;  %v8333_v9 = vadd.f32 %v20443_v42, %v14847_v38 }
 0x53c   : > { %v8607_v62 = vadd.f32 %v8582_v58, %v8330_v35  ;;  %v20673_v6 = vpop.f32.mrf.mxu3  ;;  %v20675_v41 = vpop.f32.mrf.mxu0  ;;  %v14544_v35 = vld [vmem:[#allocation8 + $0xa8] sm:$0xff] }
 0x53d   : > { %v9185_v28 = vpop.f32.mrf.mxu1  ;;  %10730 = vmatpush.bf16.msra.mxu3 %v14544_v35  ;;  %v10502_v58 = vld [vmem:[#allocation2 + $0x80] sm:$0x8]  ;;  %v21879_v35 = vld [vmem:[#allocation27_spill] sm:$0xff] }
 0x53e   : > { %v20678_v57 = vadd.f32 %v20588_v30, %v8607_v62  ;;  %v20681_v7 = vadd.f32 %v9185_v28, %v20600_v39  ;;  %v10377_v30 = vrot.slane %v21872_v26, 3  ;;  %v10366_v39 = vrot.slane %v10364_v21, 2 }
 0x53f   : > { %v10520_v16 = vunpack.c.l.b16 %v10502_v58 }
 0x540   : > { %v10378_v14 = vor.u32 %v10377_v30, %v10374_v36  ;;  %v10370_v47 = vor.u32 %v10369_v52, %v10366_v39  ;;  %v21876_v36 = vshrl.u32 %v21875_v45, 16  ;;  %v21877_v30 = vshll.u32 %v21875_v45, 16  ;;  %v15304_v39 = vld [vmem:[#allocation2 + $0x88] sm:$0xff] }
 0x541   : > { %10731 = vmatpush.bf16.msra.mxu3 %v14543_v37  ;;  %v10523_v23 = vrot.slane %v15304_v39, 3 }
 0x542   : > { %v10379_v34 = vsel %vm336_vm0, %v10370_v47, %v10378_v14  ;;  %v10383_v26 = vrot.slane %v21876_v36, 2  ;;  %v20751_v47 = vadd.f32 %v20610_v54, %v20678_v57 }
 0x543   : > { %v8584_v25 = vpop.f32.mrf.mxu2 }
 0x544   : > { %v8608_v46 = vadd.f32 %v8584_v25, %v8331_v18  ;;  %v20695_v63 = vpop.f32.mrf.mxu3  ;;  %v20697_v19 = vpop.f32.mrf.mxu0  ;;  %v14575_v18 = vld [vmem:[#allocation8 + $0x178] sm:$0xff] }
 0x545   : > { %v9188_v12 = vpop.f32.mrf.mxu1  ;;  %11219 = vmatpush.bf16.msrb.mxu2 %v14575_v18  ;;  %v21880_v18 = vld [vmem:[#allocation34_spill] sm:$0xff] }
 0x546   : > { %v20700_v59 = vadd.f32 %v20608_v51, %v8608_v46  ;;  %v20703_v53 = vadd.f32 %v9188_v12, %v20623_v31  ;;  %9887 = vmatmul.bf16.gmra.mxu0 %v9787_v32  ;;  %v8332_v51 = vadd.f32 %v20443_v42, %v14844_v1  ;;  %v14550_v31 = vld [vmem:[#allocation8 + $0xd8] sm:$0xff]  ;;  %v14848_v46 = vunpack.c.h.bf16 %v15070_v40  ;;  %v21878_v32 = vld [vmem:[#allocation29_spill] sm:$0xff] }
 0x547   : > { %10020 = vmatmul.bf16.gmra.mxu1 %v21874_v13  ;;  %v21882_v36 = vshll.u32 %v21880_v18, 16 }
 0x548   : > { %9352 = vmatmul.bf16.gmra.mxu2 %v15184_v27  ;;  %10922 = vmatpush.bf16.msrb.mxu1 %v14550_v31  ;;  %v14559_v27 = vld [vmem:[#allocation8 + $0x120] sm:$0xff]  ;;  %v20770_v38 = vadd.f32 %v20631_v61, %v20700_v59 }
 0x549   : > { %10468 = vmatmul.bf16.vlgmr.msrb.gmra.mxu3 %v10379_v34  ;;  %v8303_v34 = vld [vmem:[%s15629_s30 + $0x88] sm:$0xf]  ;;  %11037 = vmatpush.bf16.msra.mxu0 %v14559_v27  ;;  %v21884_v27 = vld [vmem:[#allocation22_spill] sm:$0xff] }
 0x54b   : > { %v8587_v43 = vpop.f32.mrf.mxu2 }
 0x54c   : > { %v8609_v62 = vadd.f32 %v8587_v43, %v8332_v51  ;;  %v20714_v3 = vpop.f32.mrf.mxu3  ;;  %v20716_v33 = vpop.f32.mrf.mxu0  ;;  %v14549_v51 = vld [vmem:[#allocation8 + $0xd0] sm:$0xff]  ;;  %v8319_v43 = vunpack.c.l.bf16 %v8303_v34 }
 0x54d   : > { %v9190_v28 = vpop.f32.mrf.mxu1  ;;  %10923 = vmatpush.bf16.msrb.mxu1 %v14549_v51 }
 0x54e   : > { %v20719_v21 = vadd.f32 %v20629_v49, %v8609_v62  ;;  %v20722_v8 = vadd.f32 %v9190_v28, %v20641_v44  ;;  %v10386_v49 = vrot.slane %v21877_v30, 3  ;;  %v20735_v44 = vpack.c.b16 %v10349_v5, %v10520_v16  ;;  %v14574_v28 = vld [vmem:[#allocation8 + $0x170] sm:$0xff]  ;;  %v14558_v16 = vld [vmem:[#allocation8 + $0x118] sm:$0xff] }
 0x54f   : > { %v8335_v37 = vadd.f32 %v20443_v42, %v8319_v43  ;;  %11220 = vmatpush.bf16.msrb.mxu2 %v14574_v28  ;;  %11038 = vmatpush.bf16.msra.mxu0 %v14558_v16  ;;  %v15306_v16 = vld [vmem:[#allocation2 + $0x98] sm:$0xff] }
 0x550   : > { %v10387_v4 = vor.u32 %v10386_v49, %v10383_v26  ;;  %v10522_v25 = vrot.slane %v20735_v44, 3  ;;  %v10395_v26 = vrot.slane %v21882_v36, 3 }
 0x552   : > { %v10524_v12 = vsel %vm560_vm1, %v10522_v25, %v10523_v23  ;;  %v10388_v13 = vsel %vm336_vm0, %v10378_v14, %v10387_v4 }
 0x553   : > { %v8589_v22 = vpop.f32.mrf.mxu2 }
 0x554   : > { %v8610_v52 = vadd.f32 %v8589_v22, %v8333_v9  ;;  %v20737_v56 = vpop.f32.mrf.mxu3  ;;  %v20739_v29 = vpop.f32.mrf.mxu0  ;;  %v21881_v9 = vshrl.u32 %v21880_v18, 16 }
 0x555   : > { %v9193_v1 = vpop.f32.mrf.mxu1 }
 0x556   : > { %v20743_v50 = vadd.f32 %v20647_v55, %v8610_v52  ;;  %v20746_v5 = vadd.f32 %v9193_v1, %v20665_v15  ;;  %10592 = vmatmul.bf16.vlgmr.msrb.gmra.mxu0 %v10524_v12  ;;  %v8334_v55 = vadd.f32 %v20443_v42, %v14848_v46  ;;  %v14542_v15 = vld [vmem:[#allocation8 + $0x98] sm:$0xff]  ;;  %v10392_v45 = vrot.slane %v21881_v9, 2  ;;  %v21883_v12 = vld [vmem:[#allocation13_spill] sm:$0xff] }
 0x557   : > { %10025 = vmatmul.bf16.gmra.mxu1 %v21879_v35  ;;  %10732 = vmatpush.bf16.msra.mxu3 %v14542_v15  ;;  %v20788_v1 = vadd.f32 %v20649_v0, %v20719_v21  ;;  %v21885_v35 = vld [vmem:[#allocation44_spill] sm:$0xff] }
 0x558   : > { %9357 = vmatmul.bf16.gmra.mxu2 %v21878_v32  ;;  %v10396_v22 = vor.u32 %v10395_v26, %v10392_v45  ;;  %v20809_v43 = vadd.f32 %v20675_v41, %v20743_v50  ;;  %v14556_v26 = vld [vmem:[#allocation8 + $0x108] sm:$0xff] }
 0x559   : > { %10473 = vmatmul.bf16.gmra.mxu3 %v10388_v13 }
 0x55a   : > { %v10397_v32 = vsel %vm336_vm0, %v10387_v4, %v10396_v22 }
 0x55b   : > { %v8592_v40 = vpop.f32.mrf.mxu2  ;;  %10733 = vmatpush.bf16.msra.mxu3 %v14541_v24  ;;  %v10527_v24 = vrot.slane %v15306_v16, 3 }
 0x55c   : > { %v8611_v54 = vadd.f32 %v8592_v40, %v8334_v55  ;;  %v20758_v57 = vpop.f32.mrf.mxu3  ;;  %v20760_v31 = vpop.f32.mrf.mxu0 }
 0x55d   : > { %v9195_v58 = vpop.f32.mrf.mxu1 }
 0x55e   : > { %v20763_v62 = vadd.f32 %v20673_v6, %v8611_v54  ;;  %v20766_v14 = vadd.f32 %v9195_v58, %v20686_v2  ;;  %v15470_v6 = vld [vmem:[#allocation2 + $0xa0] sm:$0x70]  ;;  %v15305_v2 = vld [vmem:[#allocation2 + $0x90] sm:$0xff]  ;;  %v14540_v54 = vld [vmem:[#allocation8 + $0x88] sm:$0xff] }
 0x55f   : > { %v10525_v30 = vrot.slane %v15305_v2, 3  ;;  %v20794_v13 = vor.u32 %v15470_v6, %v21885_v35  ;;  %10734 = vmatpush.bf16.msra.mxu3 %v14540_v54  ;;  %v14539_v2 = vld [vmem:[#allocation8 + $0x80] sm:$0xff]  ;;  %v14586_v35 = vld [vmem:[#allocation8 + $0x1b8] sm:$0xff]  ;;  %v14585_v54 = vld [vmem:[#allocation8 + $0x1b0] sm:$0xff] }
 0x560   : > { %v20823_v6 = vadd.f32 %v20697_v19, %v20763_v62 }
 0x561   : > { %v10526_v46 = vsel %vm560_vm1, %v10523_v23, %v10525_v30  ;;  %v10399_v34 = vshrl.u32 %v20794_v13, 16  ;;  %v10402_v15 = vshll.u32 %v20794_v13, 16  ;;  %v10528_v50 = vsel %vm560_vm1, %v10525_v30, %v10527_v24 }
 0x563   : > { %v8594_v49 = vpop.f32.mrf.mxu2  ;;  %v10401_v58 = vrot.slane %v10399_v34, 2  ;;  %v10404_v28 = vrot.slane %v10402_v15, 3  ;;  %10735 = vmatpush.bf16.msra.mxu3 %v14539_v2  ;;  %v14594_v15 = vld [vmem:[#allocation8 + $0x1f8] sm:$0xff] }
 0x564   : > { %v8612_v61 = vadd.f32 %v8594_v49, %v8335_v37  ;;  %v20777_v59 = vpop.f32.mrf.mxu3  ;;  %v20779_v39 = vpop.f32.mrf.mxu0  ;;  %v21887_v49 = vld [vmem:[#allocation24_spill] sm:$0xff] }
 0x565   : > { %v9198_v42 = vpop.f32.mrf.mxu1 }
 0x566   : > { %v8770_v52 = vadd.f32 %v20695_v63, %v8612_v61  ;;  %v20783_v25 = vadd.f32 %v9198_v42, %v20708_v11  ;;  %10597 = vmatmul.bf16.gmra.mxu0 %v10526_v46  ;;  %v14548_v63 = vld [vmem:[#allocation8 + $0xc8] sm:$0xff]  ;;  %v14557_v11 = vld [vmem:[#allocation8 + $0x110] sm:$0xff] }
 0x567   : > { %10030 = vmatmul.bf16.gmra.mxu1 %v21883_v12  ;;  %11039 = vmatpush.bf16.msra.mxu0 %v14557_v11 }
 0x568   : > { %10196 = vmatmul.bf16.vlgmr.msra.gmra.mxu2 %v21884_v27  ;;  %10924 = vmatpush.bf16.msrb.mxu1 %v14548_v63  ;;  %v14555_v27 = vld [vmem:[#allocation8 + $0x100] sm:$0xff] }
 0x569   : > { %10478 = vmatmul.bf16.gmra.mxu3 %v10397_v32  ;;  %v14572_v32 = vld [vmem:[#allocation8 + $0x160] sm:$0xff] }
 0x56a   : > { %11404 = vmatpush.bf16.msrb.mxu3 %v14586_v35 }
 0x56b   : > { %v9323_v55 = vpop.f32.mrf.mxu2  ;;  %11040 = vmatpush.bf16.msra.mxu0 %v14556_v26  ;;  %v10771_v26 = vld [vmem:[#allocation2 + $0x8c] sm:$0xf] }
 0x56c   : > { %v9363_v23 = vadd.f32 %v9323_v55, %v20618_v60  ;;  %v20797_v0 = vpop.f32.mrf.mxu3  ;;  %v20799_v21 = vpop.f32.mrf.mxu0  ;;  %v14573_v60 = vld [vmem:[#allocation8 + $0x168] sm:$0xff] }
 0x56d   : > { %v9200_v4 = vpop.f32.mrf.mxu1  ;;  %11221 = vmatpush.bf16.msrb.mxu2 %v14573_v60 }
 0x56e   : > { %v9628_v51 = vadd.f32 %v20714_v3, %v9363_v23  ;;  %v20805_v40 = vadd.f32 %v9200_v4, %v20726_v20  ;;  %v10405_v20 = vor.u32 %v10404_v28, %v10401_v58  ;;  %v14602_v4 = vld [vmem:[#allocation8 + $0x238] sm:$0xff]  ;;  %11405 = vmatpush.bf16.msrb.mxu3 %v14585_v54  ;;  %v14592_v54 = vld [vmem:[#allocation8 + $0x1e8] sm:$0xff] }
 0x56f   : > { %11041 = vmatpush.bf16.msra.mxu0 %v14555_v27  ;;  %v21891_v27 = vld [vmem:[#allocation30_spill] sm:$0xff] }
 0x570   : > { %v10406_v61 = vsel %vm336_vm0, %v10396_v22, %v10405_v20  ;;  %v20838_v22 = vadd.f32 %v20716_v33, %v8770_v52  ;;  %v20854_v34 = vadd.f32 %v20739_v29, %v9628_v51  ;;  %v10647_v51 = vshrl.u32 %v20735_v44, 16 }
 0x571   : > { %11222 = vmatpush.bf16.msrb.mxu2 %v14572_v32  ;;  %v21892_v32 = vld [vmem:[#allocation35_spill] sm:$0xff] }
 0x573   : > { %v9325_v37 = vpop.f32.mrf.mxu2  ;;  %11672 = vmatpush.bf16.msrb.mxu0 %v14602_v4 }
 0x574   : > { %v9364_v18 = vadd.f32 %v9325_v37, %v20637_v48  ;;  %v20812_v9 = vpop.f32.mrf.mxu3  ;;  %v20814_v3 = vpop.f32.mrf.mxu0  ;;  %v21886_v48 = vld [vmem:[#allocation14_spill] sm:$0xff] }
 0x575   : > { %v9203_v45 = vpop.f32.mrf.mxu1 }
 0x576   : > { %v9629_v36 = vadd.f32 %v20737_v56, %v9364_v18  ;;  %v20818_v41 = vadd.f32 %v9203_v45, %v20751_v47  ;;  %10602 = vmatmul.bf16.gmra.mxu0 %v10528_v50  ;;  %v14547_v56 = vld [vmem:[#allocation8 + $0xc0] sm:$0xff]  ;;  %v14593_v18 = vld [vmem:[#allocation8 + $0x1f0] sm:$0xff]  ;;  %v10649_v45 = vrot.slane %v10647_v51, 3 }
 0x577   : > { %10035 = vmatmul.bf16.gmra.mxu1 %v21886_v48 }
 0x578   : > { %10201 = vmatmul.bf16.gmra.mxu2 %v21887_v49  ;;  %10925 = vmatpush.bf16.msrb.mxu1 %v14547_v56  ;;  %v20872_v37 = vadd.f32 %v20760_v31, %v9629_v36  ;;  %v10807_v31 = vunpack.c.l.b16 %v10771_v26 }
 0x579   : > { %10483 = vmatmul.bf16.gmra.mxu3 %v10406_v61 }
 0x57b   : > { %v9328_v47 = vpop.f32.mrf.mxu2 }
 0x57c   : > { %v9365_v30 = vadd.f32 %v9328_v47, %v20660_v10  ;;  %v20829_v42 = vpop.f32.mrf.mxu3  ;;  %v20831_v19 = vpop.f32.mrf.mxu0  ;;  %v10529_v10 = vrot.slane %v20794_v13, 3  ;;  %v21888_v13 = vld [vmem:[#allocation17_spill] sm:$0xff]  ;;  %11528 = vmatpush.bf16.msra.mxu1 %v14594_v15  ;;  %v14584_v47 = vld [vmem:[#allocation8 + $0x1a8] sm:$0xff] }
 0x57d   : > { %v9205_v62 = vpop.f32.mrf.mxu1  ;;  %11406 = vmatpush.bf16.msrb.mxu3 %v14584_v47  ;;  %v14599_v47 = vld [vmem:[#allocation8 + $0x220] sm:$0xff] }
 0x57e   : > { %v9630_v46 = vadd.f32 %v20758_v57, %v9365_v30  ;;  %v20835_v12 = vadd.f32 %v9205_v62, %v20770_v38  ;;  %v10530_v52 = vsel %vm560_vm1, %v10527_v24, %v10529_v10  ;;  %v10650_v24 = vshll.u32 %v20735_v44, 16  ;;  %v10770_v44 = vld [vmem:[#allocation2 + $0x88] sm:$0x8]  ;;  %v21890_v62 = vld [vmem:[#allocation18_spill] sm:$0xff] }
 0x580   : > { %11529 = vmatpush.bf16.msra.mxu1 %v14593_v18  ;;  %v10652_v50 = vrot.slane %v10650_v24, 4  ;;  %v20886_v30 = vadd.f32 %v20779_v39, %v9630_v46  ;;  %v14583_v24 = vld [vmem:[#allocation8 + $0x1a0] sm:$0xff] }
 0x581   : > { %11407 = vmatpush.bf16.msrb.mxu3 %v14583_v24 }
 0x582   : > { %v10653_v56 = vor.u32 %v10652_v50, %v10649_v45 }
 0x583   : > { %v9330_v63 = vpop.f32.mrf.mxu2 }
 0x584   : > { %v9366_v11 = vadd.f32 %v9330_v63, %v20681_v7  ;;  %v20842_v55 = vpop.f32.mrf.mxu3  ;;  %v20844_v57 = vpop.f32.mrf.mxu0  ;;  %v21889_v7 = vld [vmem:[#allocation26_spill] sm:$0xff]  ;;  %v10657_v35 = vsel %vm720_vm2, %v10653_v56, %v21892_v32  ;;  %11530 = vmatpush.bf16.msra.mxu1 %v14592_v54  ;;  %v14591_v56 = vld [vmem:[#allocation8 + $0x1e0] sm:$0xff] }
 0x585   : > { %v9208_v38 = vpop.f32.mrf.mxu1  ;;  %v15112_v63 = vld [vmem:[#allocation2 + $0x90] sm:$0xff]  }
 0x586   : > { %v20847_v23 = vadd.f32 %v20777_v59, %v9366_v11  ;;  %v20850_v33 = vadd.f32 %v9208_v38, %v20788_v1  ;;  %10607 = vmatmul.bf16.gmra.mxu0 %v10530_v52  ;;  %v10830_v11 = vshrl.u32 %v15112_v63, 16  ;;  %v10833_v38 = vshll.u32 %v15112_v63, 16 }
 0x587   : > { %10040 = vmatmul.bf16.gmra.mxu1 %v21888_v13 }
 0x588   : > { %10206 = vmatmul.bf16.gmra.mxu2 %v21889_v7  ;;  %v10835_v51 = vrot.slane %v10833_v38, 4  ;;  %11531 = vmatpush.bf16.msra.mxu1 %v14591_v56  ;;  %v14569_v38 = vld [vmem:[#allocation8 + $0x148] sm:$0xff] }
 0x589   : > { %10488 = vmatmul.bf16.gmra.mxu3 %v10405_v20  ;;  %v14601_v20 = vld [vmem:[#allocation8 + $0x230] sm:$0xff] }
 0x58a   : > { %11673 = vmatpush.bf16.msrb.mxu0 %v14601_v20  ;;  %v14895_v20 = vunpack.c.l.b16 %v15112_v63 }
 0x58b   : > { %v9333_v60 = vpop.f32.mrf.mxu2 }
 0x58c   : > { %v9367_v59 = vadd.f32 %v9333_v60, %v20703_v53  ;;  %v20859_v1 = vpop.f32.mrf.mxu3  ;;  %v20861_v58 = vpop.f32.mrf.mxu0  ;;  %v14571_v53 = vld [vmem:[#allocation8 + $0x158] sm:$0xff]  ;;  %v14600_v60 = vld [vmem:[#allocation8 + $0x228] sm:$0xff] }
 0x58d   : > { %v9210_v29 = vpop.f32.mrf.mxu1  ;;  %11223 = vmatpush.bf16.msrb.mxu2 %v14571_v53 }
 0x58e   : > { %v20865_v28 = vadd.f32 %v20797_v0, %v9367_v59  ;;  %v20868_v16 = vadd.f32 %v9210_v29, %v20809_v43  ;;  %v20905_v59 = vadd.f32 %v20799_v21, %v20847_v23  ;;  %v10832_v29 = vrot.slane %v10830_v11, 3  ;;  %11674 = vmatpush.bf16.msrb.mxu0 %v14600_v60 }
 0x592   : > { %11675 = vmatpush.bf16.msrb.mxu0 %v14599_v47  ;;  %v14580_v47 = vld [vmem:[#allocation8 + $0x188] sm:$0xff] }
 0x593   : > { %v9335_v2 = vpop.f32.mrf.mxu2 }
 0x594   : > { %v9368_v0 = vadd.f32 %v9335_v2, %v20722_v8  ;;  %v20875_v48 = vpop.f32.mrf.mxu3  ;;  %v20877_v43 = vpop.f32.mrf.mxu0  ;;  %v10806_v8 = vunpack.c.l.b16 %v10770_v44  ;;  %v10976_v2 = vpack.c.b16 %v14895_v20, %v10807_v31  ;;  %v21896_v20 = vld [vmem:[#allocation36_spill] sm:$0xff] }
 0x595   : > { %v9213_v49 = vpop.f32.mrf.mxu1 }
 0x596   : > { %v20880_v36 = vadd.f32 %v20812_v9, %v9368_v0  ;;  %v20883_v61 = vadd.f32 %v9213_v49, %v20823_v6  ;;  %10612 = vmatmul.bf16.gmra.mxu0 %v10529_v10  ;;  %v10816_v9 = vpack.c.b16 %v10807_v31, %v10806_v8  ;;  %v20920_v49 = vadd.f32 %v20814_v3, %v20865_v28  ;;  %v21893_v8 = vld [vmem:[#allocation15_spill] sm:$0xff] }
 0x597   : > { %10045 = vmatmul.bf16.gmra.mxu1 %v21890_v62  ;;  %v15113_v62 = vld [vmem:[#allocation2 + $0x98] sm:$0xff]  }
 0x598   : > { %10211 = vmatmul.bf16.gmra.mxu2 %v21891_v27  ;;  %v10822_v13 = vshrl.u32 %v10816_v9, 16  ;;  %v10825_v7 = vshll.u32 %v10816_v9, 16  ;;  %v21894_v31 = vld [vmem:[#allocation19_spill] sm:$0xff]  ;;  %v10839_v27 = vshrl.u32 %v15113_v62, 16  ;;  %v10842_v32 = vshll.u32 %v15113_v62, 16 }
 0x599   : > { %10736 = vmatmul.bf16.vlgmr.msra.gmra.mxu3 %v10657_v35  ;;  %v20938_v11 = vadd.f32 %v20831_v19, %v20880_v36  ;;  %v15187_v36 = vld [vmem:[#allocation2 + $0x94] sm:$0xff]  }
 0x59a   : > { %v10824_v53 = vrot.slane %v10822_v13, 3  ;;  %v10827_v18 = vrot.slane %v10825_v7, 4  ;;  %v10844_v13 = vrot.slane %v10842_v32, 4  ;;  %v14581_v7 = vld [vmem:[#allocation8 + $0x190] sm:$0xff] }
 0x59b   : > { %v9338_v6 = vpop.f32.mrf.mxu2 }
 0x59c   : > { %v9369_v52 = vadd.f32 %v9338_v6, %v20746_v5  ;;  %v20893_v39 = vpop.f32.mrf.mxu3  ;;  %v20895_v46 = vpop.f32.mrf.mxu0  ;;  %v14570_v5 = vld [vmem:[#allocation8 + $0x150] sm:$0xff]  ;;  %v10828_v23 = vor.u32 %v10827_v18, %v10824_v53 }
 0x59d   : > { %v9215_v10 = vpop.f32.mrf.mxu1  ;;  %11224 = vmatpush.bf16.msrb.mxu2 %v14570_v5  ;;  %v15114_v18 = vld [vmem:[#allocation2 + $0xa0] sm:$0xff]  }
 0x59e   : > { %v20898_v15 = vadd.f32 %v20829_v42, %v9369_v52  ;;  %v20901_v4 = vadd.f32 %v9215_v10, %v20838_v22  ;;  %v10836_v22 = vor.u32 %v10835_v51, %v10832_v29  ;;  %v14590_v52 = vld [vmem:[#allocation8 + $0x1d8] sm:$0xff]  ;;  %v10841_v10 = vrot.slane %v10839_v27, 3 }
 0x59f   : > { %11532 = vmatpush.bf16.msra.mxu1 %v14590_v52  ;;  %v14588_v52 = vld [vmem:[#allocation8 + $0x1c8] sm:$0xff] }
 0x5a0   : > { %v20953_v24 = vadd.f32 %v20844_v57, %v20898_v15 }
 0x5a1   : > { %11225 = vmatpush.bf16.msrb.mxu2 %v14569_v38 }
 0x5a3   : > { %v9340_v42 = vpop.f32.mrf.mxu2 }
 0x5a4   : > { %v9370_v45 = vadd.f32 %v9340_v42, %v20766_v14  ;;  %v20908_v50 = vpop.f32.mrf.mxu3  ;;  %v20910_v26 = vpop.f32.mrf.mxu0  ;;  %v10837_v14 = vsel %vm720_vm2, %v10828_v23, %v10836_v22  ;;  %v14589_v42 = vld [vmem:[#allocation8 + $0x1d0] sm:$0xff]  ;;  %v10851_v23 = vshll.u32 %v15114_v18, 16 }
 0x5a5   : > { %v10011_v21 = vpop.f32.mrf.mxu1  ;;  %11533 = vmatpush.bf16.msra.mxu1 %v14589_v42 }
 0x5a6   : > { %v20913_v0 = vadd.f32 %v20842_v55, %v9370_v45  ;;  %v20916_v44 = vadd.f32 %v10011_v21, %v20854_v34  ;;  %11042 = vmatmul.bf16.vlgmr.msra.gmra.mxu0 %v10976_v2  ;;  %v14582_v55 = vld [vmem:[#allocation8 + $0x198] sm:$0xff]  ;;  %v14597_v45 = vld [vmem:[#allocation8 + $0x210] sm:$0xff]  ;;  %v10848_v21 = vshrl.u32 %v15114_v18, 16 }
 0x5a7   : > { %10926 = vmatmul.bf16.vlgmr.msrb.gmra.mxu1 %v10837_v14  ;;  %11408 = vmatpush.bf16.msrb.mxu3 %v14582_v55 }
 0x5a8   : > { %10216 = vmatmul.bf16.gmra.mxu2 %v21893_v8  ;;  %v20971_v14 = vadd.f32 %v20861_v58, %v20913_v0  ;;  %v14568_v8 = vld [vmem:[#allocation8 + $0x140] sm:$0xff]  ;;  %v10850_v62 = vrot.slane %v10848_v21, 3  ;;  %v15189_v58 = vld [vmem:[#allocation2 + $0x9c] sm:$0xff]  }
 0x5a9   : > { %10741 = vmatmul.bf16.gmra.mxu3 %v21894_v31  ;;  %v10853_v31 = vrot.slane %v10851_v23, 4  ;;  %11226 = vmatpush.bf16.msrb.mxu2 %v14568_v8 }
 0x5aa   : > { %11534 = vmatpush.bf16.msra.mxu1 %v14588_v52 }
 0x5ab   : > { %v9343_v34 = vpop.f32.mrf.mxu2  ;;  %11409 = vmatpush.bf16.msrb.mxu3 %v14581_v7  ;;  %v20973_v27 = vor.u32 %v10853_v31, %v10850_v62  ;;  %v21897_v7 = vld [vmem:[#allocation38_spill] sm:$0xff] }
 0x5ac   : > { %v9371_v3 = vadd.f32 %v9343_v34, %v20783_v25  ;;  %v20926_v28 = vpop.f32.mrf.mxu3  ;;  %v20928_v35 = vpop.f32.mrf.mxu0  ;;  %v14598_v25 = vld [vmem:[#allocation8 + $0x218] sm:$0xff] }
 0x5ad   : > { %v10013_v63 = vpop.f32.mrf.mxu1  ;;  %11676 = vmatpush.bf16.msrb.mxu0 %v14598_v25  ;;  %v14579_v25 = vld [vmem:[#allocation8 + $0x180] sm:$0xff] }
 0x5ae   : > { %v20931_v9 = vadd.f32 %v20859_v1, %v9371_v3  ;;  %v20934_v6 = vadd.f32 %v10013_v63, %v20872_v37  ;;  %v10845_v1 = vor.u32 %v10844_v13, %v10841_v10  ;;  %v14596_v10 = vld [vmem:[#allocation8 + $0x208] sm:$0xff] }
 0x5af   : > { %11410 = vmatpush.bf16.msrb.mxu3 %v14580_v47  ;;  %v14595_v47 = vld [vmem:[#allocation8 + $0x200] sm:$0xff] }
 0x5b0   : > { %v10846_v53 = vsel %vm720_vm2, %v10836_v22, %v10845_v1  ;;  %v20988_v13 = vadd.f32 %v20877_v43, %v20931_v9 }
 0x5b1   : > { %11677 = vmatpush.bf16.msrb.mxu0 %v14597_v45  ;;  %v21011_v45 = vld [vmem:[%s21309_s3 + $0x1] ss:$0 sm:$0xff] }
 0x5b3   : > { %v9345_v54 = vpop.f32.mrf.mxu2  ;;  %11411 = vmatpush.bf16.msrb.mxu3 %v14579_v25  ;;  %v21898_v25 = vld [vmem:[#allocation20_spill] sm:$0xff] }
 0x5b4   : > { %v9372_v60 = vadd.f32 %v9345_v54, %v20805_v40  ;;  %v20941_v37 = vpop.f32.mrf.mxu3  ;;  %v20943_v5 = vpop.f32.mrf.mxu0  ;;  %v21895_v40 = vld [vmem:[#allocation16_spill] sm:$0xff]  ;;  %v20994_v54 = vld [vmem:[#allocation2 + $0xa8] sm:$0xff]  }
 0x5b5   : > { %v10016_v19 = vpop.f32.mrf.mxu1  ;;  %11678 = vmatpush.bf16.msrb.mxu0 %v14596_v10 }
 0x5b6   : > { %v20946_v29 = vadd.f32 %v20875_v48, %v9372_v60  ;;  %v20949_v51 = vadd.f32 %v10016_v19, %v20886_v30  ;;  %11047 = vmatmul.bf16.gmra.mxu0 %v15187_v36  ;;  %v10860_v19 = vshll.u32 %v20994_v54, 16 }
 0x5b7   : > { %10931 = vmatmul.bf16.gmra.mxu1 %v10846_v53 }
 0x5b8   : > { %10221 = vmatmul.bf16.gmra.mxu2 %v21895_v40  ;;  %v10862_v23 = vrot.slane %v10860_v19, 4 }
 0x5b9   : > { %10746 = vmatmul.bf16.gmra.mxu3 %v21896_v20  ;;  %11679 = vmatpush.bf16.msrb.mxu0 %v14595_v47 }
 0x5bb   : > { %v9348_v48 = vpop.f32.mrf.mxu2 }
 0x5bc   : > { %v9373_v30 = vadd.f32 %v9348_v48, %v20818_v41  ;;  %v20959_v57 = vpop.f32.mrf.mxu3  ;;  %v20961_v15 = vpop.f32.mrf.mxu0  ;;  %v10067_v41 = vld [vmem:[#allocation2 + $0x94] sm:$0x3] }
 0x5bd   : > { %v10018_v22 = vpop.f32.mrf.mxu1  ;;  %v10085_v55 = vunpack.c.l.b16 %v10067_v41 }
 0x5be   : > { %v20964_v2 = vadd.f32 %v20893_v39, %v9373_v30  ;;  %v20967_v56 = vadd.f32 %v10018_v22, %v20905_v59  ;;  %v15108_v30 = vld [vmem:[%s15629_s30 + $0x90] sm:$0xff]   ;;  %v21017_v22 = vadd.f32 %v20895_v46, %v20946_v29 }
 0x5bf   : > { %v10086_v38 = vpack.c.b16 %v10085_v55, %v10085_v55  ;;  %v14879_v62 = vunpack.c.l.bf16 %v15108_v30  ;;  %v11261_v55 = vld [vmem:[#allocation2 + $0x94] sm:$0xff]   ;;  %v15190_v29 = vld [vmem:[#allocation2 + $0xa4] sm:$0xff]  }
 0x5c1   : > { %v10127_v9 = vshll.u32 %v10086_v38, 16 }
 0x5c3   : > { %v9350_v34 = vpop.f32.mrf.mxu2  ;;  %v10129_v21 = vrot.slane %v10127_v9, 2  ;;  %v21043_v9 = vld [vmem:[#allocation2 + $0x94] sm:$0xff] }
 0x5c4   : > { %v9374_v39 = vadd.f32 %v9350_v34, %v20835_v12  ;;  %v20976_v59 = vpop.f32.mrf.mxu3  ;;  %v20978_v32 = vpop.f32.mrf.mxu0  ;;  %v10855_v12 = vsel %vm720_vm2, %v10845_v1, %v20973_v27  ;;  %v10857_v1 = vshrl.u32 %v20994_v54, 16  ;;  %v21021_v34 = vld [vmem:[#allocation2 + $0x94] sm:$0xf0] }
 0x5c5   : > { %v10021_v3 = vpop.f32.mrf.mxu1 }
 0x5c6   : > { %v20981_v0 = vadd.f32 %v20908_v50, %v9374_v39  ;;  %v20984_v63 = vadd.f32 %v10021_v3, %v20920_v49  ;;  %11052 = vmatmul.bf16.gmra.mxu0 %v15189_v58  ;;  %v10285_v50 = vld [vmem:[%s15629_s30 + $0x8c] sm:$0xf]  ;;  %v10124_v49 = vshrl.u32 %v10086_v38, 16 }
 0x5c7   : > { %10936 = vmatmul.bf16.gmra.mxu1 %v10855_v12  ;;  %v10294_v43 = vunpack.c.l.bf16 %v10285_v50  ;;  %v10304_v12 = vadd.f32 %v21011_v45, %v14879_v62  ;;  %v21040_v50 = vadd.f32 %v20910_v26, %v20964_v2 }
 0x5c8   : > { %10226 = vmatmul.bf16.gmra.mxu2 %v21897_v7  ;;  %v10126_v42 = vrot.slane %v10124_v49, 1 }
 0x5c9   : > { %10751 = vmatmul.bf16.gmra.mxu3 %v19903_v17  ;;  %v10303_v48 = vadd.f32 %v21011_v45, %v10294_v43  ;;  %v14880_v43 = vunpack.c.h.bf16 %v15108_v30  ;;  %v21062_v30 = vadd.f32 %v20928_v35, %v20981_v0 }
 0x5ca   : > { %v10130_v31 = vor.u32 %v10129_v21, %v10126_v42 }
 0x5cb   : > { %v9353_v60 = vpop.f32.mrf.mxu2  ;;  %v10305_v21 = vadd.f32 %v21011_v45, %v14880_v43 }
 0x5cc   : > { %v9375_v36 = vadd.f32 %v9353_v60, %v20850_v33  ;;  %v10469_v53 = vpop.f32.mrf.mxu3  ;;  %v21000_v40 = vpop.f32.mrf.mxu0  ;;  %v10859_v33 = vrot.slane %v10857_v1, 3  ;;  %v10131_v7 = vsel %vm2025_vm5, %v21898_v25, %v10130_v31 }
 0x5cd   : > { %v10023_v18 = vpop.f32.mrf.mxu1 }
 0x5ce   : > { %v21003_v17 = vadd.f32 %v20926_v28, %v9375_v36  ;;  %v21006_v20 = vadd.f32 %v10023_v18, %v20938_v11  ;;  %v14587_v28 = vld [vmem:[#allocation8 + $0x1c0] sm:$0xff]  ;;  %v10493_v11 = vadd.f32 %v10469_v53, %v10303_v48  ;;  %v21019_v41 = vor.u32 %v10862_v23, %v10859_v33  ;;  %v21046_v36 = vld [vmem:[#allocation2 + $0x9c] sm:$0xff] }
 0x5cf   : > { %11535 = vmatpush.bf16.msra.mxu1 %v14587_v28  ;;  %v11315_v48 = vshll.u32 %v11261_v55, 16  ;;  %v11135_v33 = vshll.u32 %v21043_v9, 16  ;;  %v11320_v23 = vshll.u32 %v21046_v36, 16  ;;  %v14908_v28 = vunpack.c.h.b16 %v20994_v54 }
 0x5d1   : > { %v11137_v31 = vrot.slane %v11135_v33, 1  ;;  %v10980_v35 = vpack.c.b16 %v14908_v28, %v14908_v28  ;;  %v11599_v28 = vrot.slane %v11320_v23, 2 }
 0x5d3   : > { %v9355_v8 = vpop.f32.mrf.mxu2 }
 0x5d4   : > { %v9376_v39 = vadd.f32 %v9355_v8, %v20868_v16  ;;  %v10471_v3 = vpop.f32.mrf.mxu3  ;;  %v10593_v58 = vpop.f32.mrf.mxu0  ;;  %v10864_v16 = vsel %vm720_vm2, %v20973_v27, %v21019_v41 }
 0x5d5   : > { %v10026_v38 = vpop.f32.mrf.mxu1  ;;  %v21024_v46 = vadd.f32 %v10593_v58, %v10493_v11  ;;  %v10494_v49 = vadd.f32 %v10471_v3, %v10304_v12  ;;  %v11322_v12 = vrot.slane %v11320_v23, 1 }
 0x5d6   : > { %v21027_v52 = vadd.f32 %v20941_v37, %v9376_v39  ;;  %v21030_v10 = vadd.f32 %v10026_v38, %v20953_v24  ;;  %11057 = vmatmul.bf16.gmra.mxu0 %v15190_v29  ;;  %v21899_v37 = vld [vmem:[#allocation40_spill] sm:$0xff]  ;;  %v14563_v24 = vld [vmem:[#allocation2 + $0x8c] sm:$0xff]  ;;  %v15316_v39 = vld [vmem:[#allocation2 + $0x94] sm:$0xe]  ;;  %v11313_v29 = vshrl.u32 %v11261_v55, 16 }
 0x5d7   : > { %10941 = vmatmul.bf16.gmra.mxu1 %v10864_v16  ;;  %v11130_v26 = vshll.u32 %v14563_v24, 16  ;;  %v11128_v62 = vshrl.u32 %v14563_v24, 16 }
 0x5d8   : > { %10231 = vmatmul.bf16.gmra.mxu2 %v10131_v7 }
 0x5d9   : > { %10756 = vmatmul.bf16.gmra.mxu3 %v21899_v37  ;;  %v11132_v47 = vrot.slane %v11130_v26, 1  ;;  %v21087_v26 = vld [vmem:[#allocation2 + $0xa4] sm:$0xff] }
 0x5db   : > { %v9358_v60 = vpop.f32.mrf.mxu2  ;;  %v11133_v0 = vor.u32 %v11132_v47, %v11128_v62  ;;  %v21101_v62 = vadd.f32 %v20961_v15, %v21027_v52 }
 0x5dc   : > { %v9377_v1 = vadd.f32 %v9358_v60, %v20883_v61  ;;  %v10474_v19 = vpop.f32.mrf.mxu3  ;;  %v10595_v27 = vpop.f32.mrf.mxu0  ;;  %v15109_v61 = vld [vmem:[%s15629_s30 + $0x98] sm:$0xff]  }
 0x5dd   : > { %v10028_v53 = vpop.f32.mrf.mxu1  ;;  %v21048_v18 = vadd.f32 %v10595_v27, %v10494_v49  ;;  %v10495_v11 = vadd.f32 %v10474_v19, %v10305_v21  ;;  %v15317_v49 = vor.u32 %v15316_v39, %v21021_v34  ;;  %v21084_v19 = vld [vmem:[#allocation2 + $0x9c] sm:$0xff]  ;;  %v11139_v39 = vshrl.u32 %v21043_v9, 16 }
 0x5de   : > { %v21051_v2 = vadd.f32 %v20959_v57, %v9377_v1  ;;  %v21054_v42 = vadd.f32 %v10028_v53, %v20971_v14  ;;  %v11317_v57 = vrot.slane %v11315_v48, 1  ;;  %v14883_v14 = vunpack.c.l.bf16 %v15109_v61 }
 0x5df   : > { %v14884_v1 = vunpack.c.h.bf16 %v15109_v61  ;;  %v11591_v34 = vshrl.u32 %v15317_v49, 16  ;;  %v11594_v48 = vshll.u32 %v15317_v49, 16  ;;  %v11141_v52 = vor.u32 %v11139_v39, %v11137_v31  ;;  %v15111_v39 = vld [vmem:[%s15629_s30 + $0xa8] sm:$0xff]  }
 0x5e0   : > { %v11318_v37 = vor.u32 %v11317_v57, %v11313_v29  ;;  %v10306_v24 = vadd.f32 %v21011_v45, %v14883_v14  ;;  %v11143_v57 = vshll.u32 %v21084_v19, 16  ;;  %v11467_v29 = vrot.slane %v21046_v36, 1 }
 0x5e1   : > { %v10307_v47 = vadd.f32 %v21011_v45, %v14884_v1  ;;  %v11596_v14 = vrot.slane %v11594_v48, 2  ;;  %v11466_v9 = vrot.slane %v15317_v49, 1 }
 0x5e2   : > { %v11323_v55 = vsel %vm1388_vm3, %v11318_v37, %v11322_v12 }
 0x5e3   : > { %v9360_v8 = vpop.f32.mrf.mxu2 }
 0x5e4   : > { %v9378_v3 = vadd.f32 %v9360_v8, %v20901_v4  ;;  %v10476_v58 = vpop.f32.mrf.mxu3  ;;  %v10598_v38 = vpop.f32.mrf.mxu0  ;;  %v11138_v4 = vsel %vm1388_vm3, %v11133_v0, %v11137_v31  ;;  %v11593_v8 = vrot.slane %v11591_v34, 1  ;;  %v21127_v34 = vld [vmem:[#allocation2 + $0xa4] sm:$0xff] }
 0x5e5   : > { %v10031_v25 = vpop.f32.mrf.mxu1  ;;  %v21066_v7 = vadd.f32 %v10598_v38, %v10495_v11  ;;  %v10496_v60 = vadd.f32 %v10476_v58, %v10306_v24  ;;  %v11328_v11 = vshll.u32 %v21087_v26, 16  ;;  %v11145_v38 = vrot.slane %v11143_v57, 1 }
 0x5e6   : > { %v21069_v54 = vadd.f32 %v20976_v59, %v9378_v3  ;;  %v21072_v16 = vadd.f32 %v10031_v25, %v20988_v13  ;;  %11062 = vmatmul.bf16.gmra.mxu0 %v10980_v35  ;;  %v21081_v59 = vadd.f32 %v20943_v5, %v21003_v17  ;;  %v11324_v13 = vshrl.u32 %v21046_v36, 16 }
 0x5e7   : > { %10946 = vmatmul.bf16.gmra.mxu1 %v21019_v41  ;;  %v11330_v37 = vrot.slane %v11328_v11, 1  ;;  %v11597_v24 = vor.u32 %v11596_v14, %v11593_v8  ;;  %v11603_v8 = vrot.slane %v11328_v11, 2 }
 0x5e8   : > { %11227 = vmatmul.bf16.vlgmr.msrb.gmra.mxu2 %v11138_v4  ;;  %v11598_v61 = vrot.slane %v11324_v13, 1 }
 0x5e9   : > { %11412 = vmatmul.bf16.vlgmr.msrb.gmra.mxu3 %v11323_v55 }
 0x5eb   : > { %v10197_v43 = vpop.f32.mrf.mxu2 }
 0x5ec   : > { %v10237_v41 = vadd.f32 %v10197_v43, %v20916_v44  ;;  %v10479_v27 = vpop.f32.mrf.mxu3  ;;  %v10600_v53 = vpop.f32.mrf.mxu0  ;;  %v15110_v44 = vld [vmem:[%s15629_s30 + $0xa0] sm:$0xff]   ;;  %v11326_v43 = vor.u32 %v11324_v13, %v11322_v12  ;;  %v11332_v12 = vshrl.u32 %v21087_v26, 16  ;;  %s15203_s30 = smul.u32 328, %s15541_s19  ;;  %s11733_s19 = scalar_lea.sflag [#allocation5], %s15625_s6 }
 0x5ed   : > { %v10033_v5 = vpop.f32.mrf.mxu1  ;;  %v21089_v17 = vadd.f32 %v10600_v53, %v10496_v60  ;;  %v10497_v3 = vadd.f32 %v10479_v27, %v10307_v47  ;;  %v14887_v58 = vunpack.c.l.bf16 %v15110_v44  ;;  %v11468_v27 = vsel %vm1865_vm4, %v11466_v9, %v11467_v29 }
 0x5ee   : > { %v10253_v21 = vmax.f32 %v10237_v41, 0.0  ;;  %v21092_v33 = vadd.f32 %v10033_v5, %v21017_v22  ;;  %v21104_v22 = vor.u32 %v11599_v28, %v11598_v61  ;;  %v11146_v41 = vsel %vm1388_vm3, %v11141_v52, %v11145_v38  ;;  %s11744_s5 = scalar_lea.hbm %s21310_s4, %s15203_s30 }
 0x5ef   : > { %v11331_v31 = vsel %vm1388_vm3, %v11326_v43, %v11330_v37  ;;  %v14888_v53 = vunpack.c.h.bf16 %v15110_v44  ;;  %v11602_v57 = vrot.slane %v11332_v12, 1  ;;  %v11151_v44 = vshll.u32 %v21127_v34, 16  ;;  %s11747_s9 = sshll.u32 %s11744_s5, 4  ;;  %s11748_s9 = int_to_ptr.hbm [resolvable:$true] %s11747_s9 }
 0x5f0   : > { %10269 = vst [vmem:[%s20233_s20 + $0x80] sm:$0xff] %v10253_v21  ;;  %v11601_v1 = vsel %vm2025_vm5, %v11597_v24, %v21104_v22  ;;  %v11334_v9 = vor.u32 %v11332_v12, %v11330_v37  ;;  %v13916_v37 = vld [vmem:[#allocation2 + $0xac] sm:$0xf]  ;;  %s15422_s11 = sshra.s32 %s11748_s9, 4  ;;  %s15423_s11 = int_to_ptr.hbm [resolvable:$true] %s15422_s11 }
 0x5f1   : > { %v10309_v14 = vadd.f32 %v21011_v45, %v14888_v53  ;;  %v11153_v11 = vrot.slane %v11151_v44, 1  ;;  %s15424_s12 = scalar_lea.hbm %s15423_s11, 328  ;;  %p15429_p11 = scmp.lt.s32.totalorder %s15423_s11, %s21310_s4 }
 0x5f2   : > { %p15425_p1 = scmp.ne.s32.totalorder %s15423_s11, %s15424_s12  ;;  %p15430_p9 = scmp.lt.s32.totalorder %s15428_s24, %s15424_s12 }
 0x5f3   : > { %v10199_v23 = vpop.f32.mrf.mxu2 }
 0x5f4   : > { %v10238_v25 = vadd.f32 %v10199_v23, %v20934_v6  ;;  %v10481_v35 = vpop.f32.mrf.mxu3  ;;  %v10603_v0 = vpop.f32.mrf.mxu0  ;;  %v10308_v6 = vadd.f32 %v21011_v45, %v14887_v58  ;;  %p15426_p4 = pnand %p15425_p1, %p15592_p3  ;;  %p15431_p2 = por %p15430_p9, %p15429_p11 }
 0x5f5   : > { %v10036_v4 = vpop.f32.mrf.mxu1  ;;  %v21108_v15 = vadd.f32 %v10603_v0, %v10497_v3  ;;  %v11147_v3 = vshrl.u32 %v21084_v19, 16  ;;  %v11469_v0 = vrot.slane %v21087_v26, 1 }
 0x5f6   : > { %v10254_v55 = vmax.f32 %v10238_v25, 0.0  ;;  %v21111_v60 = vadd.f32 %v10036_v4, %v21040_v50  ;;  %11680 = vmatmul.bf16.vlgmr.msrb.gmra.mxu0 %v11601_v1  ;;  %v21124_v50 = vadd.f32 %v20978_v32, %v21051_v2  ;;  %v10498_v49 = vadd.f32 %v10481_v35, %v10308_v6  ;;  %v21135_v2 = vld [vmem:[#allocation2 + $0xac] sm:$0xff]  ;;  %p15427_p8 = pneg %p15426_p4 }
 0x5f7   : > { %11536 = vmatmul.bf16.vlgmr.msra.gmra.mxu1 %v11468_v27  ;;  %v11336_v23 = vshll.u32 %v21135_v2, 16  ;;  %v14891_v35 = vunpack.c.l.bf16 %v15111_v39  ;;  %v11149_v19 = vor.u32 %v11147_v3, %v11145_v38  ;;  %v11270_v27 = vld [vmem:[#allocation2 + $0xb8] sm:$0x1]  ;;  %v11470_v38 = vsel %vm1865_vm4, %v11467_v29, %v11469_v0 }
 0x5f8   : > { %10270 = vst [vmem:[%s20233_s20 + $0x88] sm:$0xff] %v10254_v55  ;;  %11232 = vmatmul.bf16.gmra.mxu2 %v11146_v41  ;;  %v11269_v41 = vld [vmem:[#allocation2 + $0xb4] sm:$0xf]  ;;  %p15432_p10 = pnand %p15431_p2, %p15427_p8 }
 0x5f9   : > { %11417 = vmatmul.bf16.gmra.mxu3 %v11331_v31  ;;  %v11338_v1 = vrot.slane %v11336_v23, 1  ;;  %v11154_v31 = vsel %vm1388_vm3, %v11149_v19, %v11153_v11  ;;  %v11305_v12 = vunpack.c.l.b16 %v11269_v41 }
 0x5fb   : > { %v10202_v13 = vpop.f32.mrf.mxu2 }
 0x5fc   : > { %v10239_v48 = vadd.f32 %v10202_v13, %v20949_v51  ;;  %v10484_v5 = vpop.f32.mrf.mxu3  ;;  %v10605_v21 = vpop.f32.mrf.mxu0  ;;  %v21143_v51 = vadd.f32 %v21000_v40, %v21069_v54  ;;  %v11340_v13 = vshrl.u32 %v21135_v2, 16 }
 0x5fd   : > { %v10038_v61 = vpop.f32.mrf.mxu1  ;;  %v21130_v28 = vadd.f32 %v10605_v21, %v10498_v49  ;;  %v10499_v58 = vadd.f32 %v10484_v5, %v10309_v14  ;;  %v11306_v49 = vunpack.c.l.b16 %v11270_v27  ;;  %v14892_v5 = vunpack.c.h.bf16 %v15111_v39 }
 0x5fe   : > { %v10255_v47 = vmax.f32 %v10239_v48, 0.0  ;;  %v21133_v32 = vadd.f32 %v10038_v61, %v21062_v30  ;;  %v21147_v30 = vor.u32 %v11603_v8, %v11602_v57  ;;  %v11606_v3 = vrot.slane %v11340_v13, 1 }
 0x5ff   : > { %v21174_v8 = vpack.c.b16 %v11306_v49, %v11305_v12  ;;  %v11342_v41 = vor.u32 %v11340_v13, %v11338_v1 }
 0x600   : > { %10271 = vst [vmem:[%s20233_s20 + $0x90] sm:$0xff] %v10255_v47  ;;  %v11605_v6 = vsel %vm2025_vm5, %v21104_v22, %v21147_v30  ;;  %v14567_v22 = vld [vmem:[#allocation2 + $0xac] sm:$0x10] }
 0x601   : > { %v21169_v36 = vor.u32 %v14567_v22, %v13916_v37 }
 0x603   : > { %v10204_v25 = vpop.f32.mrf.mxu2  ;;  %v11159_v39 = vshll.u32 %v21169_v36, 16 }
 0x604   : > { %v10240_v24 = vadd.f32 %v10204_v25, %v20967_v56  ;;  %v10486_v4 = vpop.f32.mrf.mxu3  ;;  %v10608_v52 = vpop.f32.mrf.mxu0  ;;  %v10310_v56 = vadd.f32 %v21011_v45, %v14891_v35  ;;  %v10311_v25 = vadd.f32 %v21011_v45, %v14892_v5  ;;  %v11570_v35 = vld [vmem:[#allocation2 + $0xb8] sm:$0x3] }
 0x605   : > { %v10041_v40 = vpop.f32.mrf.mxu1  ;;  %v21151_v54 = vadd.f32 %v10608_v52, %v10499_v58  ;;  %v11607_v58 = vrot.slane %v11336_v23, 2  ;;  %v11588_v52 = vunpack.c.l.b16 %v11570_v35 }
 0x606   : > { %v10256_v55 = vmax.f32 %v10240_v24, 0.0  ;;  %v21154_v43 = vadd.f32 %v10041_v40, %v21081_v59  ;;  %11685 = vmatmul.bf16.gmra.mxu0 %v11605_v6  ;;  %v11339_v59 = vsel %vm1388_vm3, %v11334_v9, %v11338_v1  ;;  %v10500_v53 = vadd.f32 %v10486_v4, %v10310_v56 }
 0x607   : > { %11541 = vmatmul.bf16.gmra.mxu1 %v11470_v38  ;;  %v11155_v24 = vshrl.u32 %v21127_v34, 16  ;;  %v11608_v4 = vor.u32 %v11607_v58, %v11606_v3 }
 0x608   : > { %10272 = vst [vmem:[%s20233_s20 + $0x98] sm:$0xff] %v10256_v55  ;;  %11237 = vmatmul.bf16.gmra.mxu2 %v11154_v31  ;;  %v11161_v55 = vrot.slane %v11159_v39, 1 }
 0x609   : > { %11422 = vmatmul.bf16.gmra.mxu3 %v11339_v59  ;;  %v11157_v19 = vor.u32 %v11155_v24, %v11153_v11  ;;  %v11609_v11 = vsel %vm2025_vm5, %v21147_v30, %v11608_v4  ;;  %v11589_v59 = vpack.c.b16 %v11588_v52, %v11305_v12 }
 0x60b   : > { %v10207_v48 = vpop.f32.mrf.mxu2  ;;  %v11162_v37 = vsel %vm1388_vm3, %v11157_v19, %v11161_v55  ;;  %v11614_v1 = vshll.u32 %v11589_v59, 16 }
 0x60c   : > { %v10241_v29 = vadd.f32 %v10207_v48, %v20984_v63  ;;  %v10489_v21 = vpop.f32.mrf.mxu3  ;;  %v10610_v61 = vpop.f32.mrf.mxu0  ;;  %v11344_v63 = vshll.u32 %v21174_v8, 16 }
 0x60d   : > { %v10043_v47 = vpop.f32.mrf.mxu1  ;;  %v21172_v57 = vadd.f32 %v10610_v61, %v10500_v53  ;;  %v10501_v9 = vadd.f32 %v10489_v21, %v10311_v25  ;;  %v11616_v5 = vrot.slane %v11614_v1, 2 }
 0x60e   : > { %v10257_v14 = vmax.f32 %v10241_v29, 0.0  ;;  %v21177_v44 = vadd.f32 %v10043_v47, %v21101_v62  ;;  %v11471_v62 = vrot.slane %v21135_v2, 1  ;;  %v11346_v27 = vrot.slane %v11344_v63, 1 }
 0x60f   : > { %v11348_v29 = vshrl.u32 %v21174_v8, 16  ;;  %v11473_v47 = vrot.slane %v21174_v8, 1 }
 0x610   : > { %10273 = vst [vmem:[%s20233_s20 + $0xa0] sm:$0xff] %v10257_v14  ;;  %v11347_v2 = vsel %vm1388_vm3, %v11342_v41, %v11346_v27 }
 0x611   : > { %v11350_v25 = vor.u32 %v11348_v29, %v11346_v27  ;;  %v11474_v52 = vsel %vm1865_vm4, %v11471_v62, %v11473_v47 }
 0x613   : > { %v10209_v40 = vpop.f32.mrf.mxu2 }
 0x614   : > { %v10242_v23 = vadd.f32 %v10209_v40, %v21006_v20  ;;  %v10491_v45 = vpop.f32.mrf.mxu3  ;;  %v10613_v6 = vpop.f32.mrf.mxu0  ;;  %v11472_v20 = vsel %vm1865_vm4, %v11469_v0, %v11471_v62 }
 0x615   : > { %v10046_v56 = vpop.f32.mrf.mxu1  ;;  %v21186_v31 = vadd.f32 %v10613_v6, %v10501_v9 }
 0x616   : > { %v10258_v38 = vmax.f32 %v10242_v23, 0.0  ;;  %v21189_v34 = vadd.f32 %v10046_v56, %v21124_v50  ;;  %11690 = vmatmul.bf16.gmra.mxu0 %v11609_v11  ;;  %v11611_v50 = vshrl.u32 %v11589_v59, 16 }
 0x617   : > { %11546 = vmatmul.bf16.gmra.mxu1 %v11472_v20 }
 0x618   : > { %10274 = vst [vmem:[%s20233_s20 + $0xa8] sm:$0xff] %v10258_v38  ;;  %11242 = vmatmul.bf16.gmra.mxu2 %v11162_v37  ;;  %v11613_v48 = vrot.slane %v11611_v50, 1 }
 0x619   : > { %11427 = vmatmul.bf16.gmra.mxu3 %v11347_v2 }
 0x61a   : > { %v11617_v21 = vor.u32 %v11616_v5, %v11613_v48 }
 0x61b   : > { %v10212_v22 = vpop.f32.mrf.mxu2 }
 0x61c   : > { %v10243_v30 = vadd.f32 %v10212_v22, %v21030_v10  ;;  %v10737_v12 = vpop.f32.mrf.mxu3  ;;  %v10615_v49 = vpop.f32.mrf.mxu0  ;;  %v11618_v24 = vsel %vm2025_vm5, %v11608_v4, %v11617_v21 }
 0x61d   : > { %v10761_v13 = vadd.f32 %v10737_v12, %v21024_v46  ;;  %v10048_v26 = vpop.f32.mrf.mxu1  ;;  %v11163_v46 = vshrl.u32 %v21169_v36, 16 }
 0x61e   : > { %v10259_v53 = vmax.f32 %v10243_v30, 0.0  ;;  %v21202_v0 = vadd.f32 %v10048_v26, %v21143_v51 }
 0x61f   : > { %v11165_v63 = vor.u32 %v11163_v46, %v11161_v55 }
 0x620   : > { %10275 = vst [vmem:[%s20233_s20 + $0xb0] sm:$0xff] %v10259_v53 }
 0x623   : > { %v10214_v61 = vpop.f32.mrf.mxu2 }
 0x624   : > { %v10244_v10 = vadd.f32 %v10214_v61, %v21054_v42  ;;  %v10739_v14 = vpop.f32.mrf.mxu3  ;;  %v11043_v3 = vpop.f32.mrf.mxu0 }
 0x625   : > { %v10762_v58 = vadd.f32 %v10739_v14, %v21048_v18  ;;  %v10927_v51 = vpop.f32.mrf.mxu1 }
 0x626   : > { %v10260_v39 = vmax.f32 %v10244_v10, 0.0  ;;  %v10951_v35 = vadd.f32 %v10927_v51, %v10761_v13  ;;  %11695 = vmatmul.bf16.gmra.mxu0 %v11618_v24 }
 0x627   : > { %11551 = vmatmul.bf16.gmra.mxu1 %v11474_v52 }
 0x628   : > { %10276 = vst [vmem:[%s20233_s20 + $0xb8] sm:$0xff] %v10260_v39  ;;  %v21213_v8 = vadd.f32 %v11043_v3, %v10951_v35  ;;  %11247 = vmatmul.bf16.gmra.mxu2 %v11165_v63 }
 0x629   : > { %11432 = vmatmul.bf16.gmra.mxu3 %v11350_v25 }
 0x62b   : > { %v10217_v42 = vpop.f32.mrf.mxu2 }
 0x62c   : > { %v10245_v18 = vadd.f32 %v10217_v42, %v21072_v16  ;;  %v10742_v36 = vpop.f32.mrf.mxu3  ;;  %v11045_v9 = vpop.f32.mrf.mxu0 }
 0x62d   : > { %v10763_v40 = vadd.f32 %v10742_v36, %v21066_v7  ;;  %v10929_v19 = vpop.f32.mrf.mxu1 }
 0x62e   : > { %v10261_v4 = vmax.f32 %v10245_v18, 0.0  ;;  %v10952_v55 = vadd.f32 %v10929_v19, %v10762_v58 }
 0x630   : > { %10277 = vst [vmem:[%s20233_s20 + $0xc0] sm:$0xff] %v10261_v4  ;;  %v21218_v62 = vadd.f32 %v11045_v9, %v10952_v55 }
 0x633   : > { %v10219_v23 = vpop.f32.mrf.mxu2 }
 0x634   : > { %v10246_v45 = vadd.f32 %v10219_v23, %v21092_v33  ;;  %v10744_v6 = vpop.f32.mrf.mxu3  ;;  %v11048_v41 = vpop.f32.mrf.mxu0 }
 0x635   : > { %v10764_v27 = vadd.f32 %v10744_v6, %v21089_v17  ;;  %v10932_v16 = vpop.f32.mrf.mxu1 }
 0x636   : > { %v10262_v56 = vmax.f32 %v10246_v45, 0.0  ;;  %v10953_v38 = vadd.f32 %v10932_v16, %v10763_v40  ;;  %11700 = vmatmul.bf16.gmra.mxu0 %v11617_v21 }
 0x637   : > { %11556 = vmatmul.bf16.gmra.mxu1 %v11473_v47 }
 0x638   : > { %10278 = vst [vmem:[%s20233_s20 + $0xc8] sm:$0xff] %v10262_v56  ;;  %v21223_v7 = vadd.f32 %v11048_v41, %v10953_v38 }
 0x63b   : > { %v10222_v11 = vpop.f32.mrf.mxu2 }
 0x63c   : > { %v10247_v59 = vadd.f32 %v10222_v11, %v21111_v60  ;;  %v10747_v37 = vpop.f32.mrf.mxu3  ;;  %v11050_v20 = vpop.f32.mrf.mxu0 }
 0x63d   : > { %v10765_v33 = vadd.f32 %v10747_v37, %v21108_v15  ;;  %v10934_v2 = vpop.f32.mrf.mxu1 }
 0x63e   : > { %v10263_v50 = vmax.f32 %v10247_v59, 0.0  ;;  %v10954_v17 = vadd.f32 %v10934_v2, %v10764_v27 }
 0x640   : > { %10279 = vst [vmem:[%s20233_s20 + $0xd0] sm:$0xff] %v10263_v50  ;;  %v21228_v1 = vadd.f32 %v11050_v20, %v10954_v17 }
 0x643   : > { %v10224_v22 = vpop.f32.mrf.mxu2 }
 0x644   : > { %v10248_v30 = vadd.f32 %v10224_v22, %v21133_v32  ;;  %v10749_v12 = vpop.f32.mrf.mxu3  ;;  %v11053_v49 = vpop.f32.mrf.mxu0 }
 0x645   : > { %v10766_v13 = vadd.f32 %v10749_v12, %v21130_v28  ;;  %v10937_v60 = vpop.f32.mrf.mxu1 }
 0x646   : > { %v10264_v26 = vmax.f32 %v10248_v30, 0.0  ;;  %v10955_v53 = vadd.f32 %v10937_v60, %v10765_v33 }
 0x648   : > { %10280 = vst [vmem:[%s20233_s20 + $0xd8] sm:$0xff] %v10264_v26  ;;  %v21233_v48 = vadd.f32 %v11053_v49, %v10955_v53 }
 0x64b   : > { %v10227_v15 = vpop.f32.mrf.mxu2 }
 0x64c   : > { %v10249_v5 = vadd.f32 %v10227_v15, %v21154_v43  ;;  %v10752_v29 = vpop.f32.mrf.mxu3  ;;  %v11055_v21 = vpop.f32.mrf.mxu0 }
 0x64d   : > { %v10767_v61 = vadd.f32 %v10752_v29, %v21151_v54  ;;  %v10939_v32 = vpop.f32.mrf.mxu1 }
 0x64e   : > { %v10265_v47 = vmax.f32 %v10249_v5, 0.0  ;;  %v10956_v10 = vadd.f32 %v10939_v32, %v10766_v13 }
 0x650   : > { %10281 = vst [vmem:[%s20233_s20 + $0xe0] sm:$0xff] %v10265_v47  ;;  %v21238_v14 = vadd.f32 %v11055_v21, %v10956_v10 }
 0x653   : > { %v10229_v28 = vpop.f32.mrf.mxu2 }
 0x654   : > { %v10250_v3 = vadd.f32 %v10229_v28, %v21177_v44  ;;  %v10754_v46 = vpop.f32.mrf.mxu3  ;;  %v11058_v58 = vpop.f32.mrf.mxu0 }
 0x655   : > { %v10768_v51 = vadd.f32 %v10754_v46, %v21172_v57  ;;  %v10942_v43 = vpop.f32.mrf.mxu1 }
 0x656   : > { %v10266_v25 = vmax.f32 %v10250_v3, 0.0  ;;  %v10957_v39 = vadd.f32 %v10942_v43, %v10767_v61 }
 0x658   : > { %10282 = vst [vmem:[%s20233_s20 + $0xe8] sm:$0xff] %v10266_v25  ;;  %v21243_v35 = vadd.f32 %v11058_v58, %v10957_v39 }
 0x65b   : > { %v10232_v54 = vpop.f32.mrf.mxu2 }
 0x65c   : > { %v10251_v63 = vadd.f32 %v10232_v54, %v21189_v34  ;;  %v10757_v24 = vpop.f32.mrf.mxu3  ;;  %v11060_v52 = vpop.f32.mrf.mxu0 }
 0x65d   : > { %v10769_v42 = vadd.f32 %v10757_v24, %v21186_v31  ;;  %v10944_v44 = vpop.f32.mrf.mxu1 }
 0x65e   : > { %v10267_v18 = vmax.f32 %v10251_v63, 0.0  ;;  %v10958_v36 = vadd.f32 %v10944_v44, %v10768_v51 }
 0x660   : > { %10283 = vst [vmem:[%s20233_s20 + $0xf0] sm:$0xff] %v10267_v18  ;;  %v21248_v9 = vadd.f32 %v11060_v52, %v10958_v36 }
 0x663   : > { %v10234_v57 = vpop.f32.mrf.mxu2 }
 0x664   : > { %v10252_v40 = vadd.f32 %v10234_v57, %v21202_v0  ;;  %v10759_v19 = vpop.f32.mrf.mxu3  ;;  %v11063_v4 = vpop.f32.mrf.mxu0 }
 0x665   : > { %v10947_v55 = vpop.f32.mrf.mxu1 }
 0x666   : > { %v10268_v23 = vmax.f32 %v10252_v40, 0.0  ;;  %v10959_v45 = vadd.f32 %v10947_v55, %v10769_v42 }
 0x668   : > { %10284 = vst [vmem:[%s20233_s20 + $0xf8] sm:$0xff] %v10268_v23  ;;  %v21252_v34 = vadd.f32 %v11063_v4, %v10959_v45 }
 0x66b   : > { %v11228_v6 = vpop.f32.mrf.mxu2 }
 0x66c   : > { %v11413_v31 = vpop.f32.mrf.mxu3  ;;  %v11065_v41 = vpop.f32.mrf.mxu0  ;;  %v11252_v16 = vadd.f32 %v11228_v6, %v21213_v8 }
 0x66d   : > { %v10949_v27 = vpop.f32.mrf.mxu1 }
 0x66e   : > { %v11437_v38 = vadd.f32 %v11413_v31, %v11252_v16 }
 0x673   : > { %v11230_v56 = vpop.f32.mrf.mxu2 }
 0x674   : > { %v11415_v11 = vpop.f32.mrf.mxu3  ;;  %v11681_v59 = vpop.f32.mrf.mxu0  ;;  %v11253_v20 = vadd.f32 %v11230_v56, %v21218_v62 }
 0x675   : > { %v11537_v0 = vpop.f32.mrf.mxu1 }
 0x676   : > { %v11561_v37 = vadd.f32 %v11537_v0, %v11437_v38  ;;  %v11438_v17 = vadd.f32 %v11415_v11, %v11253_v20 }
 0x678   : > { %v11705_v33 = vadd.f32 %v11681_v59, %v11561_v37 }
 0x67a   : > { %v11714_v2 = vmax.f32 %v11705_v33, 0.0 }
 0x67b   : > { %v11233_v50 = vpop.f32.mrf.mxu2 }
 0x67c   : > { %11723 = vst [vmem:[%s20233_s20 + $0x100] sm:$0xff] %v11714_v2  ;;  %v11418_v22 = vpop.f32.mrf.mxu3  ;;  %v11683_v30 = vpop.f32.mrf.mxu0  ;;  %v11254_v8 = vadd.f32 %v11233_v50, %v21223_v7 }
 0x67d   : > { %v11539_v12 = vpop.f32.mrf.mxu1 }
 0x67e   : > { %v11562_v49 = vadd.f32 %v11539_v12, %v11438_v17  ;;  %v11439_v53 = vadd.f32 %v11418_v22, %v11254_v8 }
 0x680   : > { %v11706_v13 = vadd.f32 %v11683_v30, %v11562_v49 }
 0x682   : > { %v11715_v60 = vmax.f32 %v11706_v13, 0.0 }
 0x683   : > { %v11235_v26 = vpop.f32.mrf.mxu2 }
 0x684   : > { %11724 = vst [vmem:[%s20233_s20 + $0x108] sm:$0xff] %v11715_v60  ;;  %v11420_v15 = vpop.f32.mrf.mxu3  ;;  %v11686_v5 = vpop.f32.mrf.mxu0  ;;  %v11255_v21 = vadd.f32 %v11235_v26, %v21228_v1 }
 0x685   : > { %v11542_v62 = vpop.f32.mrf.mxu1 }
 0x686   : > { %v11563_v29 = vadd.f32 %v11542_v62, %v11439_v53  ;;  %v11440_v10 = vadd.f32 %v11420_v15, %v11255_v21 }
 0x688   : > { %v11707_v61 = vadd.f32 %v11686_v5, %v11563_v29 }
 0x68a   : > { %v11716_v32 = vmax.f32 %v11707_v61, 0.0 }
 0x68b   : > { %v11238_v47 = vpop.f32.mrf.mxu2 }
 0x68c   : > { %11725 = vst [vmem:[%s20233_s20 + $0x110] sm:$0xff] %v11716_v32  ;;  %v11423_v28 = vpop.f32.mrf.mxu3  ;;  %v11688_v3 = vpop.f32.mrf.mxu0  ;;  %v11256_v58 = vadd.f32 %v11238_v47, %v21233_v48 }
 0x68d   : > { %v11544_v7 = vpop.f32.mrf.mxu1 }
 0x68e   : > { %v11564_v46 = vadd.f32 %v11544_v7, %v11440_v10  ;;  %v11441_v39 = vadd.f32 %v11423_v28, %v11256_v58 }
 0x690   : > { %v11708_v51 = vadd.f32 %v11688_v3, %v11564_v46 }
 0x692   : > { %v11717_v43 = vmax.f32 %v11708_v51, 0.0 }
 0x693   : > { %v11240_v25 = vpop.f32.mrf.mxu2 }
 0x694   : > { %11726 = vst [vmem:[%s20233_s20 + $0x118] sm:$0xff] %v11717_v43  ;;  %v11425_v54 = vpop.f32.mrf.mxu3  ;;  %v11691_v63 = vpop.f32.mrf.mxu0  ;;  %v11257_v52 = vadd.f32 %v11240_v25, %v21238_v14 }
 0x695   : > { %v11547_v1 = vpop.f32.mrf.mxu1 }
 0x696   : > { %v11565_v24 = vadd.f32 %v11547_v1, %v11441_v39  ;;  %v11442_v36 = vadd.f32 %v11425_v54, %v11257_v52 }
 0x698   : > { %v11709_v42 = vadd.f32 %v11691_v63, %v11565_v24 }
 0x69a   : > { %v11718_v44 = vmax.f32 %v11709_v42, 0.0 }
 0x69b   : > { %v11243_v18 = vpop.f32.mrf.mxu2 }
 0x69c   : > { %11727 = vst [vmem:[%s20233_s20 + $0x120] sm:$0xff] %v11718_v44  ;;  %v11428_v57 = vpop.f32.mrf.mxu3  ;;  %v11693_v40 = vpop.f32.mrf.mxu0  ;;  %v11258_v4 = vadd.f32 %v11243_v18, %v21243_v35 }
 0x69d   : > { %v11549_v48 = vpop.f32.mrf.mxu1 }
 0x69e   : > { %v11566_v19 = vadd.f32 %v11549_v48, %v11442_v36  ;;  %v11443_v6 = vadd.f32 %v11428_v57, %v11258_v4 }
 0x6a0   : > { %v11710_v55 = vadd.f32 %v11693_v40, %v11566_v19 }
 0x6a2   : > { %v11719_v23 = vmax.f32 %v11710_v55, 0.0 }
 0x6a3   : > { %v11245_v45 = vpop.f32.mrf.mxu2 }
 0x6a4   : > { %11728 = vst [vmem:[%s20233_s20 + $0x128] sm:$0xff] %v11719_v23  ;;  %v11430_v31 = vpop.f32.mrf.mxu3  ;;  %v11696_v14 = vpop.f32.mrf.mxu0  ;;  %v11259_v16 = vadd.f32 %v11245_v45, %v21248_v9 }
 0x6a5   : > { %v11552_v41 = vpop.f32.mrf.mxu1 }
 0x6a6   : > { %v11567_v27 = vadd.f32 %v11552_v41, %v11443_v6  ;;  %v11444_v59 = vadd.f32 %v11430_v31, %v11259_v16 }
 0x6a8   : > { %v11711_v56 = vadd.f32 %v11696_v14, %v11567_v27 }
 0x6aa   : > { %v11720_v38 = vmax.f32 %v11711_v56, 0.0 }
 0x6ab   : > { %v11248_v11 = vpop.f32.mrf.mxu2 }
 0x6ac   : > { %11729 = vst [vmem:[%s20233_s20 + $0x130] sm:$0xff] %v11720_v38  ;;  %v11433_v0 = vpop.f32.mrf.mxu3  ;;  %v11698_v35 = vpop.f32.mrf.mxu0  ;;  %v11260_v33 = vadd.f32 %v11248_v11, %v21252_v34 }
 0x6ad   : > { %v11554_v37 = vpop.f32.mrf.mxu1 }
 0x6ae   : > { %v11568_v20 = vadd.f32 %v11554_v37, %v11444_v59  ;;  %v11445_v22 = vadd.f32 %v11433_v0, %v11260_v33 }
 0x6b0   : > { %v11712_v2 = vadd.f32 %v11698_v35, %v11568_v20 }
 0x6b2   : > { %v11721_v50 = vmax.f32 %v11712_v2, 0.0 }
 0x6b3   : > { %v11250_v17 = vpop.f32.mrf.mxu2 }
 0x6b4   : > { %11730 = vst [vmem:[%s20233_s20 + $0x138] sm:$0xff] %v11721_v50  ;;  %v11435_v9 = vpop.f32.mrf.mxu3  ;;  %v11701_v30 = vpop.f32.mrf.mxu0 }
 0x6b5   : > { %v11557_v12 = vpop.f32.mrf.mxu1 }
 0x6b6   : > { %v11569_v49 = vadd.f32 %v11557_v12, %v11445_v22 }
 0x6b8   : > { %v11713_v34 = vadd.f32 %v11701_v30, %v11569_v49 }
 0x6ba   : > { %v11722_v8 = vmax.f32 %v11713_v34, 0.0 }
 0x6bc   : > { %11731 = vst [vmem:[%s20233_s20 + $0x140] sm:$0xff] %v11722_v8  ;;  %v11703_v13 = vpop.f32.mrf.mxu0 }
 0x6bd   : > { %v11559_v60 = vpop.f32.mrf.mxu1 }
 0x6be   : > { %15435 = shalt.err (!%p15432_p10)
}
 0x6bf   : > { %s15493_s6 = smov 128   ;;  %s15494_s20 = smov 8  }
 0x6c0   : > { %15214 = dma.vmem_to_hbm [thread:$0]  (%p15592_p3), %s11746_s8, 5248, %s11748_s9, %s11733_s19, %s15493_s6, %s15493_s6, %s15494_s20  }
 0x6c1 PF: > { %s11762_s29 = sand.u32 1, %s15473_s15   ;;  %p21900_p12 = scmp.ge.s32.totalorder %s15485_s18, 2 }
 0x6c2   : > { %s11763_s21 = scalar_lea.sflag [#allocation5], %s11762_s29 }
 0x6c3   : > { %p15228_p13 = pnand %p21900_p12, %p15555_p6 }
 0x6c5   : > { %p15229_p0 = pneg %p15228_p13 }
 0x6c7   : > { %15461 = dma.done.wait (%p15229_p0), %s11763_s21, 5248  }
 0x6c8   : > { %15463 = vsyncadd (%p15229_p0), %s11763_s21, 4294962048  ;;  %p18_p5 = scmp.ge.s32.totalorder %s15582_s10, 4   ;;  %s21901_s15 = smov %s15477_s16 }
 0x6c9   : > { %s21902_s16 = smov %s15481_s17  ;;  %s21903_s17 = smov %s15598_s14 }
 0x6ca   : > { %s21904_s18 = smov %s15582_s10  ;;  %20 = sbr.rel (!%p18_p5) target bundleno = 6 (0x6), region = 105 }
 0x6cf   :  { %11769 = vsyncpa [#allocation4], 1 }
 0x6d0   :  { %11771 = vsyncpa [#allocation4 + $0x1], 1 }
 0x6d1   :  { %11772 = vsyncpa [#allocation7], 1 }
 0x6d2   :  { %11773 = vsyncpa [#allocation5], 1 }
 0x6d3   :  { %11775 = vsyncpa [#allocation5 + $0x1], 1 }

</bundles_post_ra>
